<compile_context>
chip_gen: v6e
topology: v6e:2x2x1
jax: 0.10.0
libtpu: 0.0.40
codegen_flags: <defaults>
</compile_context>

<pallas_src>
import functools

import jax
import jax.numpy as jnp
from jax.experimental import pallas as pl
from jax.experimental.pallas import tpu as pltpu

F_IN = 28
H1, H2, H3, H4 = 512, 512, 512, 128
INV_TEMP = 1.0 / 0.07
EPS = 1e-12  # F.normalize eps: denom = max(||h||, eps)


def _default_bf16_epilogue():
    """bf16 bias/ReLU epilogue on chips with a bf16 VALU (v6e/v7x); f32 on v5e and older."""
    try:
        kind = jax.devices()[0].device_kind.lower()
    except Exception:
        return True
    return not any(tag in kind for tag in ("v2", "v3", "v4", "v5"))


# ---------------------------------------------------------------------------
# Pallas kernel: full forward pass for one batch tile of TB rows.
# ---------------------------------------------------------------------------
def energy_model_kernel(
    x_ref,                       # [TB, 28]   bf16 (input tile, streamed; no feature padding)
    w1_ref, b1_ref,              # [28, 512]  bf16, [1, 512]  bf16|f32   (resident)
    w2_ref, b2_ref,              # [512, 512] bf16, [1, 512]  bf16|f32   (resident)
    w3_ref, b3_ref,              # [512, 512] bf16, [1, 512]  bf16|f32   (resident)
    w4_ref, b4_ref,              # [512, 128] bf16, [1, 128]  f32        (resident)
    we_ref,                      # [1, 128]   f32  spectral-normalized energy weight row
    be_ref,                      # [1, 1]     f32  energy bias (SMEM scalar)
    out_ref,                     # [1, 1, TB] f32  lane-dense energies for this tile
    *,
    bf16_epilogue,
):
    def layer(h_in, w_ref, b_ref):
        acc = jnp.dot(h_in, w_ref[...], preferred_element_type=jnp.float32)  # MXU, f32 accum
        if bf16_epilogue:
            # v6e/v7x: cast accumulator first, then bias+ReLU on packed bf16 vregs (half VALU work).
            return jnp.maximum(acc.astype(jnp.bfloat16) + b_ref[...], 0)
        # v5e: no bf16 VPU datapath -> keep f32 bias/ReLU, cast only for the next MXU matmul.
        return jnp.maximum(acc + b_ref[...], 0.0).astype(jnp.bfloat16)

    h = layer(x_ref[...], w1_ref, b1_ref)          # fc1 + ReLU (K = 28, Mosaic pads internally)
    h = layer(h, w2_ref, b2_ref)                   # fc2 + ReLU
    h = layer(h, w3_ref, b3_ref)                   # fc3 + ReLU

    # fc4 (no activation) — keep f32 for the normalization that follows.
    h = jnp.dot(h, w4_ref[...], preferred_element_type=jnp.float32) + b4_ref[...]

    # Fused:  energy = < F.normalize(h, p=2) / 0.07 , we > + be
    #      =  sum(h * we, -1) * rsqrt(max(sum(h*h, -1), eps^2)) / 0.07 + be
    # (VPU multiplies + XLU lane reductions + one EUP rsqrt; no N=1 MXU matmul, no divide.)
    s = jnp.sum(h * we_ref[...], axis=-1)                      # [TB]
    sumsq = jnp.sum(h * h, axis=-1)                            # [TB]
    inv_norm = jax.lax.rsqrt(jnp.maximum(sumsq, EPS * EPS))    # == 1 / max(||h||, eps)
    energy = (s * inv_norm) * INV_TEMP                         # [TB]
    energy = energy.reshape(1, -1) + be_ref[0, 0]              # [1, TB], scalar bias from SMEM
    out_ref[...] = energy.reshape(1, 1, -1).astype(out_ref.dtype)


# ---------------------------------------------------------------------------
# Wrapper: tile over batch, keep weights resident, chip-gated epilogue dtype.
# ---------------------------------------------------------------------------
@functools.partial(jax.jit, static_argnames=("tb", "bf16_epilogue"))
def _energy_forward_impl(x, params, *, tb, bf16_epilogue):
    B, f_in = x.shape
    assert f_in == F_IN
    num_tiles = pl.cdiv(B, tb)
    Bp = num_tiles * tb

    # Batch pad only (ragged B) — no feature padding, no inflated HBM copy of x.
    xb = x.astype(jnp.bfloat16)
    if Bp != B:
        xb = jnp.pad(xb, ((0, Bp - B), (0, 0)))

    bias_dtype = jnp.bfloat16 if bf16_epilogue else jnp.float32
    b1 = params["b1"].astype(bias_dtype)
    b2 = params["b2"].astype(bias_dtype)
    b3 = params["b3"].astype(bias_dtype)

    def resident(shape):
        nd = len(shape)
        return pl.BlockSpec(shape, lambda i: (0,) * nd)   # DMA'd once, stays in VMEM

    in_specs = [
        pl.BlockSpec((tb, F_IN), lambda i: (i, 0)),       # x tiles stream over the grid
        resident((F_IN, H1)), resident((1, H1)),
        resident((H1, H2)), resident((1, H2)),
        resident((H2, H3)), resident((1, H3)),
        resident((H3, H4)), resident((1, H4)),
        resident((1, H4)),                                # we_sn
        pl.BlockSpec(memory_space=pltpu.SMEM),            # be: scalar in SMEM
    ]
    out_spec = pl.BlockSpec((1, 1, tb), lambda i: (i, 0, 0))

    matmul_flops = 2 * Bp * (F_IN * H1 + H1 * H2 + H2 * H3 + H3 * H4)
    vpu_flops = Bp * (4 * H4 + 4)
    weight_bytes = (F_IN * H1 + H1 * H2 + H2 * H3 + H3 * H4) * 2       # bf16 weights
    bias_bytes = (H1 + H2 + H3) * 2 + (H4 + H4 + 1) * 4
    cost = pl.CostEstimate(
        flops=matmul_flops + vpu_flops,
        transcendentals=Bp,                                            # one rsqrt per row
        bytes_accessed=Bp * F_IN * 2 + weight_bytes + bias_bytes + Bp * 4,
    )

    out = pl.pallas_call(
        functools.partial(energy_model_kernel, bf16_epilogue=bf16_epilogue),
        out_shape=jax.ShapeDtypeStruct((num_tiles, 1, tb), jnp.float32),
        grid=(num_tiles,),
        in_specs=in_specs,
        out_specs=out_spec,
        compiler_params=pltpu.CompilerParams(
            dimension_semantics=("parallel",),          # v7x: split batch grid across 2 TCs
            vmem_limit_bytes=32 * 1024 * 1024,
        ),
        cost_estimate=cost,
    )(
        xb,
        params["w1"], b1,
        params["w2"], b2,
        params["w3"], b3,
        params["w4"], params["b4"],
        params["we_sn"], params["be"],
    )
    # Lane-dense (num_tiles, 1, TB) -> (B, 1), dropping batch padding (tile-major flatten).
    return out.reshape(-1)[:B].reshape(B, 1)


def energy_model_forward(x, params, *, tb=None, bf16_epilogue=None):
    """x: [B, 28] float32 -> energies [B, 1] float32."""
    B = x.shape[0]
    if tb is None:
        # Multiple of 256 (fills the 256-wide MXU M dim and amortizes the ~600-cycle per-grid-step
        # overhead), capped at 1024, and small enough that the grid has >= 2 steps when B allows it
        # so v7x's two TensorCores both get work.
        tb = min(1024, 256 * max(1, pl.cdiv(B, 2 * 256)))
    if bf16_epilogue is None:
        bf16_epilogue = _default_bf16_epilogue()
    return _energy_forward_impl(x, params, tb=int(tb), bf16_epilogue=bool(bf16_epilogue))


# ---------------------------------------------------------------------------
# Deterministic parameter initialization (glue, plain JAX).
# ---------------------------------------------------------------------------
def init_params(key):
    def linear_init(k, fan_in, fan_out):
        kw, kb = jax.random.split(k)
        bound = 1.0 / jnp.sqrt(fan_in)
        # PyTorch Linear weight is [out, in]; stored transposed [in, out] so kernel does x @ W.
        w = jax.random.uniform(kw, (fan_in, fan_out), jnp.float32, -bound, bound)
        b = jax.random.uniform(kb, (1, fan_out), jnp.float32, -bound, bound)
        return w, b

    k1, k2, k3, k4, k5 = jax.random.split(key, 5)
    w1, b1 = linear_init(k1, F_IN, H1)
    w2, b2 = linear_init(k2, H1, H2)
    w3, b3 = linear_init(k3, H2, H3)
    w4, b4 = linear_init(k4, H3, H4)
    we, be = linear_init(k5, H4, 1)          # we: [128, 1], be: [1, 1]

    # Spectral normalization of the energy_map weight.  For an out_features=1 linear layer
    # sigma == ||W||_2 exactly, so divide by the 2-norm.
    # TODO(synk): torch.nn.utils.spectral_norm uses one randomly-seeded power iteration; here
    # the converged sigma is used, so results differ slightly from an unconverged torch u/v.
    sigma = jnp.sqrt(jnp.sum(we * we))
    we_sn = (we / sigma).reshape(1, H4)      # [1, 128] f32 row, used by the in-kernel VPU dot

    bf = lambda a: a.astype(jnp.bfloat16)
    return {
        "w1": bf(w1), "b1": b1,              # w1 kept at its true [28, 512] shape (no K padding)
        "w2": bf(w2), "b2": b2,
        "w3": bf(w3), "b3": b3,
        "w4": bf(w4), "b4": b4,
        "we_sn": we_sn, "be": be,
    }


def energy_model_reference(x, params, *, bf16_epilogue):
    """Plain-JAX mirror of the kernel math (bf16 MXU inputs, chip-gated epilogue dtype)."""
    xb = x.astype(jnp.bfloat16)

    def layer(h, w, b):
        acc = jnp.dot(h, w, preferred_element_type=jnp.float32)
        if bf16_epilogue:
            return jnp.maximum(acc.astype(jnp.bfloat16) + b.astype(jnp.bfloat16), 0)
        return jnp.maximum(acc + b, 0.0).astype(jnp.bfloat16)

    h = layer(xb, params["w1"], params["b1"])
    h = layer(h, params["w2"], params["b2"])
    h = layer(h, params["w3"], params["b3"])
    h = jnp.dot(h, params["w4"], preferred_element_type=jnp.float32) + params["b4"]
    nrm = jnp.maximum(jnp.sqrt(jnp.sum(h * h, axis=1, keepdims=True)), EPS)
    z = (h / nrm) * INV_TEMP
    return jnp.dot(z, params["we_sn"].T) + params["be"]


if __name__ == "__main__":
    key = jax.random.PRNGKey(0)
    kp, kx = jax.random.split(key)
    params = init_params(kp)

    B = 29  # deliberately ragged: exercises batch padding up to the 256-row tile
    x = jax.random.normal(kx, (B, F_IN), jnp.float32)

    energy = jax.block_until_ready(energy_model_forward(x, params))
    assert energy.shape == (B, 1) and energy.dtype == jnp.float32

    use_bf16 = _default_bf16_epilogue()
    ref = jax.block_until_ready(energy_model_reference(x, params, bf16_epilogue=use_bf16))
    max_err = float(jnp.max(jnp.abs(energy - ref)))
    assert jnp.allclose(energy, ref, rtol=2e-2, atol=2e-2), f"max_err={max_err}"

    print("KERNEL_OK")
</pallas_src>

<mosaic_0001>
module attributes {stable_mosaic.version = 11 : i64} {
  func.func @energy_model_kernel(%arg0: i32, %arg1: memref<256x28xbf16, #tpu.memory_space<vmem>>, %arg2: memref<28x512xbf16, #tpu.memory_space<vmem>>, %arg3: memref<1x512xbf16, #tpu.memory_space<vmem>>, %arg4: memref<512x512xbf16, #tpu.memory_space<vmem>>, %arg5: memref<1x512xbf16, #tpu.memory_space<vmem>>, %arg6: memref<512x512xbf16, #tpu.memory_space<vmem>>, %arg7: memref<1x512xbf16, #tpu.memory_space<vmem>>, %arg8: memref<512x128xbf16, #tpu.memory_space<vmem>>, %arg9: memref<1x128xf32, #tpu.memory_space<vmem>>, %arg10: memref<1x128xf32, #tpu.memory_space<vmem>>, %arg11: memref<1x1xf32, #tpu.memory_space<smem>>, %arg12: memref<1x1x256xf32, #tpu.memory_space<vmem>>) attributes {dimension_semantics = [#tpu.dimension_semantics<parallel>], iteration_bounds = array<i64: 1>, scalar_prefetch = 0 : i64, scratch_operands = 0 : i64, tpu.core_type = #tpu.core_type<tc>, window_params = [{transform_indices = @transform_0, window_bounds = array<i64: 256, 28>}, {pipeline_mode = #tpu.pipeline_mode<synchronous>, transform_indices = @transform_1, window_bounds = array<i64: 28, 512>}, {pipeline_mode = #tpu.pipeline_mode<synchronous>, transform_indices = @transform_2, window_bounds = array<i64: 1, 512>}, {pipeline_mode = #tpu.pipeline_mode<synchronous>, transform_indices = @transform_3, window_bounds = array<i64: 512, 512>}, {pipeline_mode = #tpu.pipeline_mode<synchronous>, transform_indices = @transform_4, window_bounds = array<i64: 1, 512>}, {pipeline_mode = #tpu.pipeline_mode<synchronous>, transform_indices = @transform_5, window_bounds = array<i64: 512, 512>}, {pipeline_mode = #tpu.pipeline_mode<synchronous>, transform_indices = @transform_6, window_bounds = array<i64: 1, 512>}, {pipeline_mode = #tpu.pipeline_mode<synchronous>, transform_indices = @transform_7, window_bounds = array<i64: 512, 128>}, {pipeline_mode = #tpu.pipeline_mode<synchronous>, transform_indices = @transform_8, window_bounds = array<i64: 1, 128>}, {pipeline_mode = #tpu.pipeline_mode<synchronous>, transform_indices = @transform_9, window_bounds = array<i64: 1, 128>}, {transform_indices = @transform_10, window_bounds = array<i64: 1, 1>}, {transform_indices = @transform_11, window_bounds = array<i64: 1, 1, 256>}]} {
    %c0 = arith.constant 0 : index
    %c0_0 = arith.constant 0 : index
    %0 = vector.load %arg1[%c0, %c0_0] : memref<256x28xbf16, #tpu.memory_space<vmem>>, vector<256x28xbf16>
    %c0_1 = arith.constant 0 : index
    %c0_2 = arith.constant 0 : index
    %1 = vector.load %arg2[%c0_1, %c0_2] : memref<28x512xbf16, #tpu.memory_space<vmem>>, vector<28x512xbf16>
    %cst = arith.constant dense<0.000000e+00> : vector<256x512xf32>
    %2 = tpu.matmul %0, %1, %cst {dimension_numbers = #tpu.dot_dimension_numbers<[1], [0], [0], [1], [0, 0, 1, 1], [], []>} : vector<256x28xbf16>, vector<28x512xbf16>, vector<256x512xf32> -> vector<256x512xf32>
    %3 = arith.truncf %2 : vector<256x512xf32> to vector<256x512xbf16>
    %c0_3 = arith.constant 0 : index
    %c0_4 = arith.constant 0 : index
    %4 = vector.load %arg3[%c0_3, %c0_4] : memref<1x512xbf16, #tpu.memory_space<vmem>>, vector<1x512xbf16>
    %5 = vector.broadcast %4 : vector<1x512xbf16> to vector<256x512xbf16>
    %6 = arith.addf %3, %5 : vector<256x512xbf16>
    %cst_5 = arith.constant 0.000000e+00 : bf16
    %7 = vector.broadcast %cst_5 : bf16 to vector<256x512xbf16>
    %8 = arith.maximumf %6, %7 : vector<256x512xbf16>
    %c0_6 = arith.constant 0 : index
    %c0_7 = arith.constant 0 : index
    %9 = vector.load %arg4[%c0_6, %c0_7] : memref<512x512xbf16, #tpu.memory_space<vmem>>, vector<512x512xbf16>
    %cst_8 = arith.constant dense<0.000000e+00> : vector<256x512xf32>
    %10 = tpu.matmul %8, %9, %cst_8 {dimension_numbers = #tpu.dot_dimension_numbers<[1], [0], [0], [1], [0, 0, 1, 1], [], []>} : vector<256x512xbf16>, vector<512x512xbf16>, vector<256x512xf32> -> vector<256x512xf32>
    %11 = arith.truncf %10 : vector<256x512xf32> to vector<256x512xbf16>
    %c0_9 = arith.constant 0 : index
    %c0_10 = arith.constant 0 : index
    %12 = vector.load %arg5[%c0_9, %c0_10] : memref<1x512xbf16, #tpu.memory_space<vmem>>, vector<1x512xbf16>
    %13 = vector.broadcast %12 : vector<1x512xbf16> to vector<256x512xbf16>
    %14 = arith.addf %11, %13 : vector<256x512xbf16>
    %cst_11 = arith.constant 0.000000e+00 : bf16
    %15 = vector.broadcast %cst_11 : bf16 to vector<256x512xbf16>
    %16 = arith.maximumf %14, %15 : vector<256x512xbf16>
    %c0_12 = arith.constant 0 : index
    %c0_13 = arith.constant 0 : index
    %17 = vector.load %arg6[%c0_12, %c0_13] : memref<512x512xbf16, #tpu.memory_space<vmem>>, vector<512x512xbf16>
    %cst_14 = arith.constant dense<0.000000e+00> : vector<256x512xf32>
    %18 = tpu.matmul %16, %17, %cst_14 {dimension_numbers = #tpu.dot_dimension_numbers<[1], [0], [0], [1], [0, 0, 1, 1], [], []>} : vector<256x512xbf16>, vector<512x512xbf16>, vector<256x512xf32> -> vector<256x512xf32>
    %19 = arith.truncf %18 : vector<256x512xf32> to vector<256x512xbf16>
    %c0_15 = arith.constant 0 : index
    %c0_16 = arith.constant 0 : index
    %20 = vector.load %arg7[%c0_15, %c0_16] : memref<1x512xbf16, #tpu.memory_space<vmem>>, vector<1x512xbf16>
    %21 = vector.broadcast %20 : vector<1x512xbf16> to vector<256x512xbf16>
    %22 = arith.addf %19, %21 : vector<256x512xbf16>
    %cst_17 = arith.constant 0.000000e+00 : bf16
    %23 = vector.broadcast %cst_17 : bf16 to vector<256x512xbf16>
    %24 = arith.maximumf %22, %23 : vector<256x512xbf16>
    %c0_18 = arith.constant 0 : index
    %c0_19 = arith.constant 0 : index
    %25 = vector.load %arg8[%c0_18, %c0_19] : memref<512x128xbf16, #tpu.memory_space<vmem>>, vector<512x128xbf16>
    %cst_20 = arith.constant dense<0.000000e+00> : vector<256x128xf32>
    %26 = tpu.matmul %24, %25, %cst_20 {dimension_numbers = #tpu.dot_dimension_numbers<[1], [0], [0], [1], [0, 0, 1, 1], [], []>} : vector<256x512xbf16>, vector<512x128xbf16>, vector<256x128xf32> -> vector<256x128xf32>
    %c0_21 = arith.constant 0 : index
    %c0_22 = arith.constant 0 : index
    %27 = vector.load %arg9[%c0_21, %c0_22] : memref<1x128xf32, #tpu.memory_space<vmem>>, vector<1x128xf32>
    %28 = vector.broadcast %27 : vector<1x128xf32> to vector<256x128xf32>
    %29 = arith.addf %26, %28 : vector<256x128xf32>
    %c0_23 = arith.constant 0 : index
    %c0_24 = arith.constant 0 : index
    %30 = vector.load %arg10[%c0_23, %c0_24] : memref<1x128xf32, #tpu.memory_space<vmem>>, vector<1x128xf32>
    %31 = vector.broadcast %30 : vector<1x128xf32> to vector<256x128xf32>
    %32 = arith.mulf %29, %31 : vector<256x128xf32>
    %cst_25 = arith.constant dense<0.000000e+00> : vector<256xf32>
    %33 = vector.multi_reduction <add>, %32, %cst_25 [1] : vector<256x128xf32> to vector<256xf32>
    %34 = arith.mulf %29, %29 : vector<256x128xf32>
    %cst_26 = arith.constant dense<0.000000e+00> : vector<256xf32>
    %35 = vector.multi_reduction <add>, %34, %cst_26 [1] : vector<256x128xf32> to vector<256xf32>
    %cst_27 = arith.constant 1.000000e-24 : f32
    %36 = vector.broadcast %cst_27 : f32 to vector<256xf32>
    %37 = arith.maximumf %35, %36 : vector<256xf32>
    %38 = math.rsqrt %37 : vector<256xf32>
    %39 = arith.mulf %33, %38 : vector<256xf32>
    %cst_28 = arith.constant 14.2857141 : f32
    %40 = vector.broadcast %cst_28 : f32 to vector<256xf32>
    %41 = arith.mulf %39, %40 : vector<256xf32>
    %42 = vector.shape_cast %41 : vector<256xf32> to vector<1x256xf32>
    %c0_29 = arith.constant 0 : index
    %c0_30 = arith.constant 0 : index
    %43 = memref.load %arg11[%c0_29, %c0_30] : memref<1x1xf32, #tpu.memory_space<smem>>
    %44 = vector.broadcast %43 : f32 to vector<1x256xf32>
    %45 = arith.addf %42, %44 : vector<1x256xf32>
    %46 = vector.shape_cast %45 : vector<1x256xf32> to vector<1x1x256xf32>
    %c0_31 = arith.constant 0 : index
    %c0_32 = arith.constant 0 : index
    %c0_33 = arith.constant 0 : index
    %47 = vector.load %arg12[%c0_31, %c0_32, %c0_33] : memref<1x1x256xf32, #tpu.memory_space<vmem>>, vector<1x1x256xf32>
    tpu.vector_store %arg12[%c0_31, %c0_32, %c0_33], %46 {strides = array<i32>} : memref<1x1x256xf32, #tpu.memory_space<vmem>>, vector<1x1x256xf32>,
    return
  }
  func.func @transform_0(%arg0: i32) -> (i32, i32) {
    %c0_i32 = arith.constant 0 : i32
    %c0_i32_0 = arith.constant 0 : i32
    return %arg0, %c0_i32 : i32, i32
  }
  func.func @transform_1(%arg0: i32) -> (i32, i32) {
    %c0_i32 = arith.constant 0 : i32
    %c0_i32_0 = arith.constant 0 : i32
    %c0_i32_1 = arith.constant 0 : i32
    return %c0_i32, %c0_i32_0 : i32, i32
  }
  func.func @transform_2(%arg0: i32) -> (i32, i32) {
    %c0_i32 = arith.constant 0 : i32
    %c0_i32_0 = arith.constant 0 : i32
    %c0_i32_1 = arith.constant 0 : i32
    return %c0_i32, %c0_i32_0 : i32, i32
  }
  func.func @transform_3(%arg0: i32) -> (i32, i32) {
    %c0_i32 = arith.constant 0 : i32
    %c0_i32_0 = arith.constant 0 : i32
    %c0_i32_1 = arith.constant 0 : i32
    return %c0_i32, %c0_i32_0 : i32, i32
  }
  func.func @transform_4(%arg0: i32) -> (i32, i32) {
    %c0_i32 = arith.constant 0 : i32
    %c0_i32_0 = arith.constant 0 : i32
    %c0_i32_1 = arith.constant 0 : i32
    return %c0_i32, %c0_i32_0 : i32, i32
  }
  func.func @transform_5(%arg0: i32) -> (i32, i32) {
    %c0_i32 = arith.constant 0 : i32
    %c0_i32_0 = arith.constant 0 : i32
    %c0_i32_1 = arith.constant 0 : i32
    return %c0_i32, %c0_i32_0 : i32, i32
  }
  func.func @transform_6(%arg0: i32) -> (i32, i32) {
    %c0_i32 = arith.constant 0 : i32
    %c0_i32_0 = arith.constant 0 : i32
    %c0_i32_1 = arith.constant 0 : i32
    return %c0_i32, %c0_i32_0 : i32, i32
  }
  func.func @transform_7(%arg0: i32) -> (i32, i32) {
    %c0_i32 = arith.constant 0 : i32
    %c0_i32_0 = arith.constant 0 : i32
    %c0_i32_1 = arith.constant 0 : i32
    return %c0_i32, %c0_i32_0 : i32, i32
  }
  func.func @transform_8(%arg0: i32) -> (i32, i32) {
    %c0_i32 = arith.constant 0 : i32
    %c0_i32_0 = arith.constant 0 : i32
    %c0_i32_1 = arith.constant 0 : i32
    return %c0_i32, %c0_i32_0 : i32, i32
  }
  func.func @transform_9(%arg0: i32) -> (i32, i32) {
    %c0_i32 = arith.constant 0 : i32
    %c0_i32_0 = arith.constant 0 : i32
    %c0_i32_1 = arith.constant 0 : i32
    return %c0_i32, %c0_i32_0 : i32, i32
  }
  func.func @transform_10(%arg0: i32) -> (i32, i32) {
    %c0_i32 = arith.constant 0 : i32
    %c0_i32_0 = arith.constant 0 : i32
    %c0_i32_1 = arith.constant 0 : i32
    return %c0_i32, %c0_i32_0 : i32, i32
  }
  func.func @transform_11(%arg0: i32) -> (i32, i32, i32) {
    %c0_i32 = arith.constant 0 : i32
    %c0_i32_0 = arith.constant 0 : i32
    %c0_i32_1 = arith.constant 0 : i32
    return %arg0, %c0_i32, %c0_i32_0 : i32, i32, i32
  }
}

</mosaic_0001>

<bundles_post_ra>
// kernel: _energy_forward_impl.1
= control target key start
LH: loop header
LB: loop body
LE: loop exit
PB: predicated region body
PF: predicated region fallthrough
CT: control target
= control target key end

     0   :  { %17 = vsyncpa [#allocation4], 0  ;;  %s12685_s0 = inlined_call_operand.vmem [shape: bf16[256,28], index: 0, kind: input, shape index: {}]   ;;  %s12686_s1 = inlined_call_operand.vmem [shape: bf16[28,512], index: 1, kind: input, shape index: {}]   ;;  %s12687_s2 = inlined_call_operand.vmem [shape: bf16[1,512], index: 2, kind: input, shape index: {}]   ;;  %s12688_s3 = inlined_call_operand.hbm [shape: bf16[512,512], index: 3, kind: input, shape index: {}]   ;;  %s12689_s4 = inlined_call_operand.vmem [shape: bf16[1,512], index: 4, kind: input, shape index: {}]   ;;  %s12690_s5 = inlined_call_operand.hbm [shape: bf16[512,512], index: 5, kind: input, shape index: {}]   ;;  %s12691_s6 = inlined_call_operand.vmem [shape: bf16[1,512], index: 6, kind: input, shape index: {}]   ;;  %s12692_s7 = inlined_call_operand.hbm [shape: bf16[512,128], index: 7, kind: input, shape index: {}]   ;;  %s12693_s8 = inlined_call_operand.vmem [shape: f32[1,128], index: 8, kind: input, shape index: {}]   ;;  %s12694_s9 = inlined_call_operand.vmem [shape: f32[1,128], index: 9, kind: input, shape index: {}]   ;;  %s12695_s10 = inlined_call_operand.<no memory space> [shape: f32[1,1], index: 10, kind: input, shape index: {}]   ;;  %s12696_s11 = inlined_call_operand.vmem [shape: f32[1,1,256], index: 11, kind: output, shape index: {}]  }
   0x1   :  { %18 = vsyncpa [#allocation6], 0  ;;  %s9544_s17 = smov [#allocation5]   ;;  %s9545_s19 = smov [#allocation3]  }
   0x2   :  { %s44_s18 = sshll.u32 %s9544_s17, 4  ;;  %s30_s20 = sshll.u32 %s9545_s19, 4  ;;  %s45_s18 = int_to_ptr.vmem [resolvable:$true] %s44_s18  ;;  %s31_s20 = int_to_ptr.vmem [resolvable:$true] %s30_s20 }
   0x3   :  { %s9488_s21 = scalar_lea.vmem %s45_s18, 16384  ;;  %p9493_p1 = scmp.lt.s32.totalorder %s45_s18, %s45_s18 }
   0x4   :  { %p9489_p0 = scmp.ne.s32.totalorder %s45_s18, %s9488_s21  ;;  %p9494_p2 = scmp.lt.s32.totalorder %s9488_s21, %s9488_s21 }
   0x6   :  { %p9495_p3 = por %p9494_p2, %p9493_p1 }
   0x8   :  { %p9496_p4 = pnand %p9495_p3, %p9489_p0 }
   0xa   :  { %9499 = shalt.err (!%p9496_p4)
}
   0xb   :  { %s9546_s22 = smov 256   ;;  %s9547_s23 = smov 16  }
   0xc   :  { %50 = dma.hbm_to_vmem [thread:$0]  %s12690_s5, 16384, %s45_s18, [#allocation6], %s9546_s22, %s9546_s22, %s9547_s23  }
   0xd   :  { %s9508_s26 = scalar_lea.vmem %s31_s20, 16384  ;;  %p9513_p6 = scmp.lt.s32.totalorder %s31_s20, %s31_s20 }
   0xe   :  { %p9509_p5 = scmp.ne.s32.totalorder %s31_s20, %s9508_s26  ;;  %p9514_p7 = scmp.lt.s32.totalorder %s9508_s26, %s9508_s26 }
  0x10   :  { %p9515_p8 = por %p9514_p7, %p9513_p6 }
  0x12   :  { %p9516_p9 = pnand %p9515_p8, %p9509_p5 }
  0x14   :  { %9519 = shalt.err (!%p9516_p9)
}
  0x15   :  { %36 = dma.hbm_to_vmem [thread:$0]  %s12688_s3, 16384, %s31_s20, [#allocation4], %s9546_s22, %s9546_s22, %s9547_s23  }
  0x16   :  { %s9548_s29 = smov [#allocation7]  }
  0x17   :  { %s58_s30 = sshll.u32 %s9548_s29, 4  ;;  %s59_s30 = int_to_ptr.vmem [resolvable:$true] %s58_s30 }
  0x18   :  { %s9528_s12 = scalar_lea.vmem %s59_s30, 4096  ;;  %p9533_p11 = scmp.lt.s32.totalorder %s59_s30, %s59_s30 }
  0x19   :  { %p9529_p10 = scmp.ne.s32.totalorder %s59_s30, %s9528_s12  ;;  %p9534_p12 = scmp.lt.s32.totalorder %s9528_s12, %s9528_s12 }
  0x1b   :  { %p9535_p13 = por %p9534_p12, %p9533_p11 }
  0x1d   :  { %p9536_p0 = pnand %p9535_p13, %p9529_p10 }
  0x1f   :  { %9539 = shalt.err (!%p9536_p0)
}
  0x20   :  { %s9549_s5 = smov 64   ;;  %s9550_s13 = smov 4  }
  0x21   :  { %64 = dma.hbm_to_vmem [thread:$0]  %s12692_s7, 4096, %s59_s30, [#allocation6], %s9549_s5, %s9549_s5, %s9550_s13  }
  0x22   :  { %9540 = dma.done.wait [#allocation4], 16384  }
  0x23   :  { %9541 = vsyncadd [#allocation4], 4294950912 }
  0x24   :  { %9542 = dma.done.wait [#allocation6], 20480  }
  0x25   :  { %9543 = vsyncadd [#allocation6], 4294946816  ;;  %v12699_v0 = vmov 0   ;;  %vm286_vm0 = vcmask 1045504   ;;  %v8978_v5 = vld [vmem:[%s12686_s1 + $0x4] ss:$16 sps:$4 sm:$0xff]  }
  0x26   :  { %331 = vmatprep.mubr.bf16.mxu0 %v12699_v0  ;;  %524 = vmatprep.mubr.bf16.mxu1 %v12699_v0  ;;  %v8972_v1 = vld [vmem:[%s12686_s1 + $0x24] ss:$16 sps:$4 sm:$0x3f]   ;;  %v8974_v2 = vld [vmem:[%s12686_s1 + $0x2c] ss:$16 sps:$4 sm:$0x3f]  }
  0x27   :  { %8971 = vset.pattern.permute.xlu1 %v12699_v0  ;;  %8970 = vset.pattern.permute.xlu0 %v12699_v0  ;;  %v8976_v3 = vld [vmem:[%s12686_s1 + $0x20] ss:$16 sps:$4 sm:$0x3f]   ;;  %v8977_v4 = vld [vmem:[%s12686_s1 + $0x28] ss:$16 sps:$4 sm:$0x3f]  }
  0x28   :  { %8410 = vmatprep.subr.msk.bf16.mxu0 %vm286_vm0, %v8972_v1  ;;  %8427 = vmatprep.subr.msk.bf16.mxu1 %vm286_vm0, %v8974_v2  ;;  %v288_v6 = vsel %vm286_vm0, %v8976_v3, 0  ;;  %v294_v7 = vsel %vm286_vm0, %v8977_v4, 0  ;;  %v8980_v8 = vld [vmem:[%s12686_s1 + $0xc] ss:$16 sps:$4 sm:$0xff]   ;;  %v8982_v9 = vld [vmem:[%s12686_s1] ss:$16 sps:$4 sm:$0xff]  }
  0x29   :  { %312 = vmatpush1.bf16.msra.mxu0 %v288_v6  ;;  %505 = vmatpush1.bf16.msra.mxu1 %v294_v7  ;;  %v8983_v10 = vld [vmem:[%s12686_s1 + $0x8] ss:$16 sps:$4 sm:$0xff]   ;;  %v8984_v11 = vld [vmem:[%s12685_s0] sm:$0xff]   ;;  %vm237_vm1 = vcmask 228352   ;;  %v8986_v20 = vld [vmem:[%s12685_s0 + $0x10] sm:$0xff]   ;;  %vm8180_vm2 = vcmask 130112  }
  0x2a   :  { %313 = vmatprep.subr.bf16.mxu0 %v8978_v5  ;;  %506 = vmatprep.subr.bf16.mxu1 %v8980_v8  ;;  %v8985_v12 = vld [vmem:[%s12685_s0 + $0x8] sm:$0xff]   ;;  %v8994_v13 = vld [vmem:[#allocation3 + $0xe0] ss:$16 sps:$4 sm:$0xff]   ;;  %v8996_v14 = vld [vmem:[#allocation3 + $0xe4] ss:$16 sps:$4 sm:$0xff]   ;;  %vm8187_vm3 = vcmask 195712  }
  0x2b   :  { %v8999_v15 = vld [vmem:[#allocation3 + $0x2e4] ss:$16 sps:$4 sm:$0xff]   ;;  %v8997_v16 = vld [vmem:[#allocation3 + $0x2e0] ss:$16 sps:$4 sm:$0xff]   ;;  %v8987_v32 = vld [vmem:[%s12685_s0 + $0x18] sm:$0xff]   ;;  %vm8194_vm4 = vcmask 261312  }
  0x2c   :  { %v9001_v17 = vld [vmem:[#allocation3 + $0xc0] ss:$16 sps:$4 sm:$0xff]   ;;  %v9003_v18 = vld [vmem:[#allocation3 + $0xc4] ss:$16 sps:$4 sm:$0xff]   ;;  %v8989_v50 = vld [vmem:[%s12685_s0 + $0x28] sm:$0xff]   ;;  %vm8201_vm5 = vcmask 326912  }
  0x2d   :  { %314 = vmatpush1.bf16.msra.mxu0 %v8982_v9  ;;  %507 = vmatpush1.bf16.msra.mxu1 %v8983_v10  ;;  %v9006_v19 = vld [vmem:[#allocation3 + $0x2c4] ss:$16 sps:$4 sm:$0xff]   ;;  %v9004_v21 = vld [vmem:[#allocation3 + $0x2c0] ss:$16 sps:$4 sm:$0xff]   ;;  %v8991_v5 = vld [vmem:[%s12685_s0 + $0x38] sm:$0xff]   ;;  %vm8208_vm6 = vcmask 392512  }
  0x2e   :  { %1699 = vmatprep.subr.bf16.mxu0 %v8996_v14  ;;  %1892 = vmatprep.subr.bf16.mxu1 %v8999_v15  ;;  %v9008_v22 = vld [vmem:[#allocation3 + $0xa0] ss:$16 sps:$4 sm:$0xff]   ;;  %v9010_v23 = vld [vmem:[#allocation3 + $0xa4] ss:$16 sps:$4 sm:$0xff]   ;;  %vm8215_vm7 = vcmask 458112   ;;  %vm8222_vm8 = vcmask 523712  }
  0x2f   :  { %v9011_v24 = vld [vmem:[#allocation3 + $0x2a0] ss:$16 sps:$4 sm:$0xff]   ;;  %v9013_v25 = vld [vmem:[#allocation3 + $0x2a4] ss:$16 sps:$4 sm:$0xff]   ;;  %vm8229_vm9 = vcmask 589312   ;;  %vm8236_vm10 = vcmask 654912  }
  0x30   :  { %8411 = vmatmul.mubr.msk.bf16.vlgmr.msra.gmra.mxu0 %vm237_vm1, %v8984_v11  ;;  %8428 = vmatmul.mubr.msk.bf16.vlgmr.msra.gmra.mxu1 %vm237_vm1, %v8984_v11  ;;  %v9015_v26 = vld [vmem:[#allocation3 + $0x80] ss:$16 sps:$4 sm:$0xff]   ;;  %v9017_v27 = vld [vmem:[#allocation3 + $0x84] ss:$16 sps:$4 sm:$0xff]   ;;  %vm8243_vm11 = vcmask 720512   ;;  %vm8250_vm12 = vcmask 786112  }
  0x31   :  { %341 = vmatprep.mubr.bf16.mxu0 %v12699_v0  ;;  %534 = vmatprep.mubr.bf16.mxu1 %v12699_v0  ;;  %v9020_v28 = vld [vmem:[#allocation3 + $0x284] ss:$16 sps:$4 sm:$0xff]   ;;  %v9018_v29 = vld [vmem:[#allocation3 + $0x280] ss:$16 sps:$4 sm:$0xff]   ;;  %vm8257_vm13 = vcmask 851712   ;;  %vm8264_vm14 = vcmask 917312  }
  0x32   :  { %1700 = vmatpush1.bf16.msra.mxu0 %v8994_v13  ;;  %1893 = vmatpush1.bf16.msra.mxu1 %v8997_v16  ;;  %v9022_v30 = vld [vmem:[#allocation3 + $0x60] ss:$16 sps:$4 sm:$0xff]   ;;  %v9024_v31 = vld [vmem:[#allocation3 + $0x64] ss:$16 sps:$4 sm:$0xff]   ;;  %vm8271_vm15 = vcmask 982912   ;;  %vm8278_vm0 = vcmask 1048512  }
  0x33   :  { %1701 = vmatprep.subr.bf16.mxu0 %v9003_v18  ;;  %1894 = vmatprep.subr.bf16.mxu1 %v9006_v19  ;;  %v9025_v33 = vld [vmem:[#allocation3 + $0x260] ss:$16 sps:$4 sm:$0xff]   ;;  %v9027_v34 = vld [vmem:[#allocation3 + $0x264] ss:$16 sps:$4 sm:$0xff]  }
  0x34   :  { %v9029_v35 = vld [vmem:[#allocation3 + $0x40] ss:$16 sps:$4 sm:$0xff]   ;;  %v9031_v36 = vld [vmem:[#allocation3 + $0x44] ss:$16 sps:$4 sm:$0xff]  }
  0x35   :  { %v9034_v37 = vld [vmem:[#allocation3 + $0x244] ss:$16 sps:$4 sm:$0xff]   ;;  %v9032_v38 = vld [vmem:[#allocation3 + $0x240] ss:$16 sps:$4 sm:$0xff]  }
  0x36   :  { %1702 = vmatpush1.bf16.msra.mxu0 %v9001_v17  ;;  %1895 = vmatpush1.bf16.msra.mxu1 %v9004_v21  ;;  %v9038_v39 = vld [vmem:[#allocation3 + $0x24] ss:$16 sps:$4 sm:$0xff]   ;;  %v9036_v40 = vld [vmem:[#allocation3 + $0x20] ss:$16 sps:$4 sm:$0xff]   ;;  %v8993_v17 = vld [vmem:[%s12685_s0 + $0x48] sm:$0xff]  }
  0x37   :  { %1703 = vmatprep.subr.bf16.mxu0 %v9010_v23  ;;  %1896 = vmatprep.subr.bf16.mxu1 %v9013_v25  ;;  %v8988_v41 = vld [vmem:[%s12685_s0 + $0x20] sm:$0xff]   ;;  %v8990_v59 = vld [vmem:[%s12685_s0 + $0x30] sm:$0xff]   ;;  %v9098_v23 = vld [vmem:[#allocation3 + $0xec] ss:$16 sps:$4 sm:$0xff]  }
  0x38   :  { %8412 = vmatmul.mubr.msk.bf16.gmra.mxu0 %vm237_vm1, %v8985_v12  ;;  %8429 = vmatmul.mubr.msk.bf16.gmra.mxu1 %vm237_vm1, %v8985_v12  ;;  %v9039_v42 = vld [vmem:[#allocation3 + $0x220] ss:$16 sps:$4 sm:$0xff]   ;;  %v9041_v43 = vld [vmem:[#allocation3 + $0x224] ss:$16 sps:$4 sm:$0xff]   ;;  %v9007_v25 = vld [vmem:[%s12685_s0 + $0x58] sm:$0xff]  }
  0x39   :  { %351 = vmatprep.mubr.bf16.mxu0 %v12699_v0  ;;  %544 = vmatprep.mubr.bf16.mxu1 %v12699_v0  ;;  %v9042_v44 = vld [vmem:[#allocation3] ss:$16 sps:$4 sm:$0xff]   ;;  %v9044_v45 = vld [vmem:[#allocation3 + $0x4] ss:$16 sps:$4 sm:$0xff]  }
  0x3a   :  { %1704 = vmatpush1.bf16.msra.mxu0 %v9008_v22  ;;  %1897 = vmatpush1.bf16.msra.mxu1 %v9011_v24  ;;  %v9047_v46 = vld [vmem:[#allocation3 + $0x204] ss:$16 sps:$4 sm:$0xff]   ;;  %v9045_v48 = vld [vmem:[#allocation3 + $0x200] ss:$16 sps:$4 sm:$0xff]   ;;  %v9101_v24 = vld [vmem:[#allocation3 + $0x2ec] ss:$16 sps:$4 sm:$0xff]  }
  0x3b   :  { %1705 = vmatprep.subr.bf16.mxu0 %v9017_v27  ;;  %1898 = vmatprep.subr.bf16.mxu1 %v9020_v28  ;;  %v9050_v47 = vld [vmem:[#allocation3 + $0x1e4] ss:$16 sps:$4 sm:$0xff]   ;;  %v9048_v49 = vld [vmem:[#allocation3 + $0x1e0] ss:$16 sps:$4 sm:$0xff]   ;;  %v9021_v27 = vld [vmem:[%s12685_s0 + $0x68] sm:$0xff]  }
  0x3c   :  { %v9051_v51 = vld [vmem:[#allocation3 + $0x3e0] ss:$16 sps:$4 sm:$0xff]   ;;  %v9053_v52 = vld [vmem:[#allocation3 + $0x3e4] ss:$16 sps:$4 sm:$0xff]  }
  0x3d   :  { %v9054_v53 = vld [vmem:[#allocation3 + $0x1c0] ss:$16 sps:$4 sm:$0xff]   ;;  %v9056_v54 = vld [vmem:[#allocation3 + $0x1c4] ss:$16 sps:$4 sm:$0xff]  }
  0x3e   :  { %1706 = vmatpush1.bf16.msra.mxu0 %v9015_v26  ;;  %1899 = vmatpush1.bf16.msra.mxu1 %v9018_v29  ;;  %v9059_v55 = vld [vmem:[#allocation3 + $0x3c4] ss:$16 sps:$4 sm:$0xff]   ;;  %v9057_v57 = vld [vmem:[#allocation3 + $0x3c0] ss:$16 sps:$4 sm:$0xff]   ;;  %v9035_v29 = vld [vmem:[%s12685_s0 + $0x78] sm:$0xff]  }
  0x3f   :  { %1707 = vmatprep.subr.bf16.mxu0 %v9024_v31  ;;  %1900 = vmatprep.subr.bf16.mxu1 %v9027_v34  ;;  %v9062_v56 = vld [vmem:[#allocation3 + $0x1a4] ss:$16 sps:$4 sm:$0xff]   ;;  %v9060_v58 = vld [vmem:[#allocation3 + $0x1a0] ss:$16 sps:$4 sm:$0xff]  }
  0x40   :  { %8413 = vmatmul.mubr.msk.bf16.gmra.mxu0 %vm237_vm1, %v8986_v20  ;;  %8430 = vmatmul.mubr.msk.bf16.gmra.mxu1 %vm237_vm1, %v8986_v20  ;;  %v9063_v60 = vld [vmem:[#allocation3 + $0x3a0] ss:$16 sps:$4 sm:$0xff]   ;;  %v9065_v61 = vld [vmem:[#allocation3 + $0x3a4] ss:$16 sps:$4 sm:$0xff]  }
  0x41   :  { %361 = vmatprep.mubr.bf16.mxu0 %v12699_v0  ;;  %554 = vmatprep.mubr.bf16.mxu1 %v12699_v0  ;;  %v9066_v62 = vld [vmem:[#allocation3 + $0x180] ss:$16 sps:$4 sm:$0xff]   ;;  %v9068_v63 = vld [vmem:[#allocation3 + $0x184] ss:$16 sps:$4 sm:$0xff]  }
  0x42   :  { %1708 = vmatpush1.bf16.msra.mxu0 %v9022_v30  ;;  %1901 = vmatpush1.bf16.msra.mxu1 %v9025_v33  ;;  %v9071_v1 = vld [vmem:[#allocation3 + $0x384] ss:$16 sps:$4 sm:$0xff]   ;;  %v9069_v3 = vld [vmem:[#allocation3 + $0x380] ss:$16 sps:$4 sm:$0xff]   ;;  %v9552_v30 = vmov 1966171168  }
  0x43   :  { %1709 = vmatprep.subr.bf16.mxu0 %v9031_v36  ;;  %1902 = vmatprep.subr.bf16.mxu1 %v9034_v37  ;;  %v9074_v2 = vld [vmem:[#allocation3 + $0x164] ss:$16 sps:$4 sm:$0xff]   ;;  %v9072_v4 = vld [vmem:[#allocation3 + $0x160] ss:$16 sps:$4 sm:$0xff]   ;;  %v760_v31 = vunpack.c.l.s4 %v9552_v30  ;;  %v9110_v30 = vld [vmem:[#allocation3 + $0xac] ss:$16 sps:$4 sm:$0xff]  }
  0x44   :  { %v9077_v6 = vld [vmem:[#allocation3 + $0x364] ss:$16 sps:$4 sm:$0xff]   ;;  %v9075_v8 = vld [vmem:[#allocation3 + $0x360] ss:$16 sps:$4 sm:$0xff]  }
  0x45   :  { %v9080_v7 = vld [vmem:[#allocation3 + $0x144] ss:$16 sps:$4 sm:$0xff]   ;;  %v9078_v9 = vld [vmem:[#allocation3 + $0x140] ss:$16 sps:$4 sm:$0xff]   ;;  %v761_v33 = vunpack.c.0.s8 %v760_v31 }
  0x46   :  { %1710 = vmatpush1.bf16.msra.mxu0 %v9029_v35  ;;  %1903 = vmatpush1.bf16.msra.mxu1 %v9032_v38  ;;  %v9083_v10 = vld [vmem:[#allocation3 + $0x344] ss:$16 sps:$4 sm:$0xff]   ;;  %v9081_v12 = vld [vmem:[#allocation3 + $0x340] ss:$16 sps:$4 sm:$0xff]  }
  0x47   :  { %1711 = vmatprep.subr.bf16.mxu0 %v9038_v39  ;;  %1904 = vmatprep.subr.bf16.mxu1 %v9041_v43  ;;  %v9086_v11 = vld [vmem:[#allocation3 + $0x124] ss:$16 sps:$4 sm:$0xff]   ;;  %v9084_v13 = vld [vmem:[#allocation3 + $0x120] ss:$16 sps:$4 sm:$0xff]  }
  0x48   :  { %8414 = vmatmul.mubr.msk.bf16.gmra.mxu0 %vm237_vm1, %v8987_v32  ;;  %8431 = vmatmul.mubr.msk.bf16.gmra.mxu1 %vm237_vm1, %v8987_v32  ;;  %v8992_v14 = vld [vmem:[%s12685_s0 + $0x40] sm:$0xff]   ;;  %v9000_v22 = vld [vmem:[%s12685_s0 + $0x50] sm:$0xff]   ;;  %v12697_v32 = vlaneseq }
  0x49   :  { %371 = vmatprep.mubr.bf16.mxu0 %v12699_v0  ;;  %564 = vmatprep.mubr.bf16.mxu1 %v12699_v0  ;;  %v9087_v15 = vld [vmem:[#allocation3 + $0x320] ss:$16 sps:$4 sm:$0xff]   ;;  %v9089_v16 = vld [vmem:[#allocation3 + $0x324] ss:$16 sps:$4 sm:$0xff]  }
  0x4a   :  { %1712 = vmatpush1.bf16.msra.mxu0 %v9036_v40  ;;  %1905 = vmatpush1.bf16.msra.mxu1 %v9039_v42  ;;  %v9092_v18 = vld [vmem:[#allocation3 + $0x104] ss:$16 sps:$4 sm:$0xff]   ;;  %v9090_v20 = vld [vmem:[#allocation3 + $0x100] ss:$16 sps:$4 sm:$0xff]   ;;  %v9761_v34 = vshrl.u32 %v12697_v32, 7 }
  0x4b   :  { %1713 = vmatprep.subr.bf16.mxu0 %v9044_v45  ;;  %1906 = vmatprep.subr.bf16.mxu1 %v9047_v46  ;;  %v9095_v19 = vld [vmem:[#allocation3 + $0x304] ss:$16 sps:$4 sm:$0xff]   ;;  %v9093_v21 = vld [vmem:[#allocation3 + $0x300] ss:$16 sps:$4 sm:$0xff]  }
  0x4c   :  { %v9014_v26 = vld [vmem:[%s12685_s0 + $0x60] sm:$0xff]   ;;  %v9028_v28 = vld [vmem:[%s12685_s0 + $0x70] sm:$0xff]   ;;  %12749 = vst [vmem:[#allocation10_spill] sm:$0xff] %v9761_v34  ;;  %v9767_v36 = vsub.s32 %v761_v33, %v9761_v34  ;;  %v9772_v45 = vsub.s32 0, %v9761_v34 }
  0x4d   :  { %v8444_v35 = vld.sshfl [vmem:[%s12687_s2] sm:$0x33 pattern:$0x75316420] }
  0x4e   :  { %1714 = vmatpush1.bf16.msra.mxu0 %v9042_v44  ;;  %1907 = vmatpush1.bf16.msra.mxu1 %v9045_v48  ;;  %12750 = vst [vmem:[#allocation11_spill] sm:$0xff] %v9767_v36  ;;  %v758_v37 = vcombine.high %v8444_v35, %v8444_v35  ;;  %v765_v38 = vrot.slane %v8444_v35, %v9767_v36  ;;  %12751 = vst [vmem:[#allocation12_spill] sm:$0xff] %v9772_v45 }
  0x4f   :  { %1715 = vmatprep.subr.bf16.mxu0 %v9050_v47  ;;  %1908 = vmatprep.subr.bf16.mxu1 %v9053_v52 }
  0x50   :  { %8415 = vmatmul.mubr.msk.bf16.gmra.mxu0 %vm237_vm1, %v8988_v41  ;;  %8432 = vmatmul.mubr.msk.bf16.gmra.mxu1 %vm237_vm1, %v8988_v41  ;;  %v772_v39 = vrot.slane %v758_v37, %v9767_v36  ;;  %v773_v40 = vcombine.high %v765_v38, %v765_v38  ;;  %v776_v44 = vpack.i.b16 %v765_v38, %v765_v38 }
  0x51   :  { %381 = vmatprep.mubr.bf16.mxu0 %v12699_v0  ;;  %574 = vmatprep.mubr.bf16.mxu1 %v12699_v0 }
  0x52   :  { %1716 = vmatpush2.bf16.msra.mxu0 %v9048_v49  ;;  %1909 = vmatpush2.bf16.msra.mxu1 %v9051_v51  ;;  %v774_v41 = vcombine.high %v772_v39, %v772_v39  ;;  %v790_v46 = vpack.i.b16 %v773_v40, %v773_v40  ;;  %v783_v47 = vpack.i.b16 %v772_v39, %v772_v39  ;;  %v9113_v40 = vld [vmem:[#allocation3 + $0x2ac] ss:$16 sps:$4 sm:$0xff]  }
  0x53   :  { %1717 = vmatprep.subr.bf16.mxu0 %v9056_v54  ;;  %1910 = vmatprep.subr.bf16.mxu1 %v9059_v55  ;;  %v9775_v52 = vrot.slane %v776_v44, %v9772_v45 }
  0x54   :  { %v797_v48 = vpack.i.b16 %v774_v41, %v774_v41  ;;  %v9778_v54 = vrot.slane %v790_v46, %v9772_v45  ;;  %v9108_v46 = vld [vmem:[#allocation3 + $0xa8] ss:$16 sps:$4 sm:$0xff]  }
  0x56   :  { %1718 = vmatpush2.bf16.msra.mxu0 %v9054_v53  ;;  %1911 = vmatpush2.bf16.msra.mxu1 %v9057_v57  ;;  %v9781_v57 = vrot.slane %v783_v47, %v9772_v45  ;;  %v9111_v47 = vld [vmem:[#allocation3 + $0x2a8] ss:$16 sps:$4 sm:$0xff]  }
  0x57   :  { %1719 = vmatprep.subr.bf16.mxu0 %v9062_v56  ;;  %1912 = vmatprep.subr.bf16.mxu1 %v9065_v61 }
  0x58   :  { %8416 = vmatmul.mubr.msk.bf16.gmra.mxu0 %vm237_vm1, %v8989_v50  ;;  %8433 = vmatmul.mubr.msk.bf16.gmra.mxu1 %vm237_vm1, %v8989_v50 }
  0x59   :  { %391 = vmatprep.mubr.bf16.mxu0 %v12699_v0  ;;  %584 = vmatprep.mubr.bf16.mxu1 %v12699_v0 }
  0x5a   :  { %1720 = vmatpush2.bf16.msra.mxu0 %v9060_v58  ;;  %1913 = vmatpush2.bf16.msra.mxu1 %v9063_v60  ;;  %v9784_v58 = vrot.slane %v797_v48, %v9772_v45 }
  0x5b   :  { %1721 = vmatprep.subr.bf16.mxu0 %v9068_v63  ;;  %1914 = vmatprep.subr.bf16.mxu1 %v9071_v1 }
  0x5e   :  { %1722 = vmatpush2.bf16.msra.mxu0 %v9066_v62  ;;  %1915 = vmatpush2.bf16.msra.mxu1 %v9069_v3 }
  0x5f   :  { %1723 = vmatprep.subr.bf16.mxu0 %v9074_v2  ;;  %1916 = vmatprep.subr.bf16.mxu1 %v9077_v6 }
  0x60   :  { %8417 = vmatmul.mubr.msk.bf16.gmra.mxu0 %vm237_vm1, %v8990_v59  ;;  %8434 = vmatmul.mubr.msk.bf16.gmra.mxu1 %vm237_vm1, %v8990_v59 }
  0x61   :  { %401 = vmatprep.mubr.bf16.mxu0 %v12699_v0  ;;  %594 = vmatprep.mubr.bf16.mxu1 %v12699_v0 }
  0x62   :  { %1724 = vmatpush2.bf16.msra.mxu0 %v9072_v4  ;;  %1917 = vmatpush2.bf16.msra.mxu1 %v9075_v8 }
  0x63   :  { %1725 = vmatprep.subr.bf16.mxu0 %v9080_v7  ;;  %1918 = vmatprep.subr.bf16.mxu1 %v9083_v10  ;;  %v9096_v10 = vld [vmem:[#allocation3 + $0xe8] ss:$16 sps:$4 sm:$0xff]  }
  0x66   :  { %1726 = vmatpush2.bf16.msra.mxu0 %v9078_v9  ;;  %1919 = vmatpush2.bf16.msra.mxu1 %v9081_v12 }
  0x67   :  { %1727 = vmatprep.subr.bf16.mxu0 %v9086_v11  ;;  %1920 = vmatprep.subr.bf16.mxu1 %v9089_v16  ;;  %v9104_v16 = vld [vmem:[#allocation3 + $0xcc] ss:$16 sps:$4 sm:$0xff]  }
  0x68   :  { %8418 = vmatmul.mubr.msk.bf16.gmra.mxu0 %vm237_vm1, %v8991_v5  ;;  %8435 = vmatmul.mubr.msk.bf16.gmra.mxu1 %vm237_vm1, %v8991_v5 }
  0x69   :  { %411 = vmatprep.mubr.bf16.mxu0 %v12699_v0  ;;  %604 = vmatprep.mubr.bf16.mxu1 %v12699_v0 }
  0x6a   :  { %1728 = vmatpush2.bf16.msra.mxu0 %v9084_v13  ;;  %1921 = vmatpush2.bf16.msra.mxu1 %v9087_v15  ;;  %v9099_v15 = vld [vmem:[#allocation3 + $0x2e8] ss:$16 sps:$4 sm:$0xff]  }
  0x6b   :  { %1729 = vmatprep.subr.bf16.mxu0 %v9092_v18  ;;  %1922 = vmatprep.subr.bf16.mxu1 %v9095_v19  ;;  %v9107_v19 = vld [vmem:[#allocation3 + $0x2cc] ss:$16 sps:$4 sm:$0xff]  }
  0x6e   :  { %1730 = vmatpush2.bf16.msra.mxu0 %v9090_v20  ;;  %1923 = vmatpush2.bf16.msra.mxu1 %v9093_v21 }
  0x6f   :  { %2085 = vmatprep.subr.bf16.mxu0 %v9098_v23  ;;  %2278 = vmatprep.subr.bf16.mxu1 %v9101_v24  ;;  %v9102_v24 = vld [vmem:[#allocation3 + $0xc8] ss:$16 sps:$4 sm:$0xff]  }
  0x70   :  { %8419 = vmatmul.mubr.msk.bf16.gmra.mxu0 %vm237_vm1, %v8992_v14  ;;  %8436 = vmatmul.mubr.msk.bf16.gmra.mxu1 %vm237_vm1, %v8992_v14 }
  0x71   :  { %421 = vmatprep.mubr.bf16.mxu0 %v12699_v0  ;;  %614 = vmatprep.mubr.bf16.mxu1 %v12699_v0 }
  0x78   :  { %8420 = vmatmul.mubr.msk.bf16.gmra.mxu0 %vm237_vm1, %v8993_v17  ;;  %8437 = vmatmul.mubr.msk.bf16.gmra.mxu1 %vm237_vm1, %v8993_v17 }
  0x79   :  { %431 = vmatprep.mubr.bf16.mxu0 %v12699_v0  ;;  %624 = vmatprep.mubr.bf16.mxu1 %v12699_v0 }
  0x80   :  { %8421 = vmatmul.mubr.msk.bf16.gmra.mxu0 %vm237_vm1, %v9000_v22  ;;  %8438 = vmatmul.mubr.msk.bf16.gmra.mxu1 %vm237_vm1, %v9000_v22 }
  0x81   :  { %441 = vmatprep.mubr.bf16.mxu0 %v12699_v0  ;;  %634 = vmatprep.mubr.bf16.mxu1 %v12699_v0 }
  0x88   :  { %8422 = vmatmul.mubr.msk.bf16.gmra.mxu0 %vm237_vm1, %v9007_v25  ;;  %8439 = vmatmul.mubr.msk.bf16.gmra.mxu1 %vm237_vm1, %v9007_v25 }
  0x89   :  { %451 = vmatprep.mubr.bf16.mxu0 %v12699_v0  ;;  %644 = vmatprep.mubr.bf16.mxu1 %v12699_v0 }
  0x90   :  { %8423 = vmatmul.mubr.msk.bf16.gmra.mxu0 %vm237_vm1, %v9014_v26  ;;  %8440 = vmatmul.mubr.msk.bf16.gmra.mxu1 %vm237_vm1, %v9014_v26 }
  0x91   :  { %461 = vmatprep.mubr.bf16.mxu0 %v12699_v0  ;;  %654 = vmatprep.mubr.bf16.mxu1 %v12699_v0 }
  0x98   :  { %8424 = vmatmul.mubr.msk.bf16.gmra.mxu0 %vm237_vm1, %v9021_v27  ;;  %8441 = vmatmul.mubr.msk.bf16.gmra.mxu1 %vm237_vm1, %v9021_v27 }
  0x99   :  { %471 = vmatprep.mubr.bf16.mxu0 %v12699_v0  ;;  %664 = vmatprep.mubr.bf16.mxu1 %v12699_v0 }
  0xa0   :  { %8425 = vmatmul.mubr.msk.bf16.gmra.mxu0 %vm237_vm1, %v9028_v28  ;;  %8442 = vmatmul.mubr.msk.bf16.gmra.mxu1 %vm237_vm1, %v9028_v28 }
  0xa1   :  { %481 = vmatprep.mubr.bf16.mxu0 %v12699_v0  ;;  %674 = vmatprep.mubr.bf16.mxu1 %v12699_v0 }
  0xa8   :  { %8426 = vmatmul.mubr.msk.bf16.gmra.mxu0 %vm237_vm1, %v9035_v29  ;;  %8443 = vmatmul.mubr.msk.bf16.gmra.mxu1 %vm237_vm1, %v9035_v29  ;;  %v9105_v29 = vld [vmem:[#allocation3 + $0x2c8] ss:$16 sps:$4 sm:$0xff]  }
  0xf0   :  { %v333_v42 = vpop.f32.mrf.mxu0  ;;  %v526_v43 = vpop.f32.mrf.mxu1 }
  0xf2   :  { %v335_v49 = vpop.f32.mrf.mxu0  ;;  %v528_v50 = vpop.f32.mrf.mxu1 }
  0xf4   :  { %v337_v51 = vpop.f32.mrf.mxu0  ;;  %v530_v53 = vpop.f32.mrf.mxu1 }
  0xf5   :  { %v685_v55 = vpack.c.bf16 %v337_v51, %v333_v42  ;;  %v687_v56 = vpack.c.bf16 %v530_v53, %v526_v43 }
  0xf6   :  { %v339_v59 = vpop.f32.mrf.mxu0  ;;  %v532_v60 = vpop.f32.mrf.mxu1 }
  0xf7   :  { %v686_v61 = vpack.c.bf16 %v339_v59, %v335_v49  ;;  %v688_v62 = vpack.c.bf16 %v532_v60, %v528_v50  ;;  %v803_v63 = vadd.bf16 %v9775_v52, %v685_v55  ;;  %v805_v1 = vadd.bf16 %v9778_v54, %v687_v56  ;;  %v9116_v50 = vld [vmem:[#allocation3 + $0x8c] ss:$16 sps:$4 sm:$0xff]  }
  0xf8   :  { %v343_v2 = vpop.f32.mrf.mxu0  ;;  %v536_v3 = vpop.f32.mrf.mxu1  ;;  %v9119_v55 = vld [vmem:[#allocation3 + $0x28c] ss:$16 sps:$4 sm:$0xff]  }
  0xf9   :  { %v804_v4 = vadd.bf16 %v9781_v57, %v686_v61  ;;  %v806_v5 = vadd.bf16 %v9784_v58, %v688_v62  ;;  %v9797_v11 = vmax.bf16 %v12699_v0, %v803_v63  ;;  %v9800_v12 = vmax.bf16 %v12699_v0, %v805_v1  ;;  %v9114_v1 = vld [vmem:[#allocation3 + $0x88] ss:$16 sps:$4 sm:$0xff]  }
  0xfa   :  { %v345_v6 = vpop.f32.mrf.mxu0  ;;  %v538_v7 = vpop.f32.mrf.mxu1 }
  0xfb   :  { %v9791_v8 = vmax.bf16 %v12699_v0, %v804_v4  ;;  %v9794_v9 = vmax.bf16 %v12699_v0, %v806_v5 }
  0xfc   :  { %v347_v13 = vpop.f32.mrf.mxu0  ;;  %v540_v14 = vpop.f32.mrf.mxu1 }
  0xfd   :  { %v689_v17 = vpack.c.bf16 %v347_v13, %v343_v2  ;;  %v691_v18 = vpack.c.bf16 %v540_v14, %v536_v3  ;;  %1731 = vmatprep.mubr.bf16.mxu0 %v9791_v8  ;;  %1924 = vmatprep.mubr.bf16.mxu1 %v9794_v9  ;;  %v9117_v2 = vld [vmem:[#allocation3 + $0x288] ss:$16 sps:$4 sm:$0xff]   ;;  %v9122_v13 = vld [vmem:[#allocation3 + $0x6c] ss:$16 sps:$4 sm:$0xff]  }
  0xfe   :  { %v349_v20 = vpop.f32.mrf.mxu0  ;;  %v542_v21 = vpop.f32.mrf.mxu1  ;;  %1732 = vmatmul.mubr.bf16.vlgmr.msra.gmra.mxu0 %v9797_v11  ;;  %1925 = vmatmul.mubr.bf16.vlgmr.msra.gmra.mxu1 %v9800_v12 }
  0xff   :  { %v690_v22 = vpack.c.bf16 %v349_v20, %v345_v6  ;;  %v692_v23 = vpack.c.bf16 %v542_v21, %v538_v7  ;;  %2086 = vmatpush1.bf16.msra.mxu0 %v9096_v10  ;;  %v807_v25 = vadd.bf16 %v9775_v52, %v689_v17  ;;  %v809_v26 = vadd.bf16 %v9778_v54, %v691_v18  ;;  %v9120_v18 = vld [vmem:[#allocation3 + $0x68] ss:$16 sps:$4 sm:$0xff]  }
 0x100   :  { %2279 = vmatpush1.bf16.msra.mxu1 %v9099_v15  ;;  %v353_v27 = vpop.f32.mrf.mxu0  ;;  %v546_v28 = vpop.f32.mrf.mxu1  ;;  %2087 = vmatprep.subr.bf16.mxu0 %v9104_v16 }
 0x101   :  { %v808_v31 = vadd.bf16 %v9781_v57, %v690_v22  ;;  %v810_v33 = vadd.bf16 %v9784_v58, %v692_v23  ;;  %2280 = vmatprep.subr.bf16.mxu1 %v9107_v19  ;;  %v9817_v43 = vmax.bf16 %v12699_v0, %v807_v25  ;;  %v9820_v44 = vmax.bf16 %v12699_v0, %v809_v26  ;;  %v9125_v19 = vld [vmem:[#allocation3 + $0x26c] ss:$16 sps:$4 sm:$0xff]   ;;  %v9123_v22 = vld [vmem:[#allocation3 + $0x268] ss:$16 sps:$4 sm:$0xff]  }
 0x102   :  { %v355_v35 = vpop.f32.mrf.mxu0  ;;  %v548_v37 = vpop.f32.mrf.mxu1  ;;  %v9128_v25 = vld [vmem:[#allocation3 + $0x4c] ss:$16 sps:$4 sm:$0xff]  }
 0x103   :  { %v9811_v38 = vmax.bf16 %v12699_v0, %v808_v31  ;;  %v9814_v39 = vmax.bf16 %v12699_v0, %v810_v33  ;;  %2088 = vmatpush1.bf16.msra.mxu0 %v9102_v24  ;;  %v9131_v26 = vld [vmem:[#allocation3 + $0x24c] ss:$16 sps:$4 sm:$0xff]  }
 0x104   :  { %v357_v41 = vpop.f32.mrf.mxu0  ;;  %v550_v42 = vpop.f32.mrf.mxu1  ;;  %2281 = vmatpush1.bf16.msra.mxu1 %v9105_v29  ;;  %2089 = vmatprep.subr.bf16.mxu0 %v9110_v30 }
 0x105   :  { %v693_v48 = vpack.c.bf16 %v357_v41, %v353_v27  ;;  %v695_v49 = vpack.c.bf16 %v550_v42, %v546_v28  ;;  %1741 = vmatprep.mubr.bf16.mxu0 %v9811_v38  ;;  %1934 = vmatprep.mubr.bf16.mxu1 %v9814_v39 }
 0x106   :  { %v359_v51 = vpop.f32.mrf.mxu0  ;;  %v552_v53 = vpop.f32.mrf.mxu1  ;;  %1742 = vmatmul.mubr.bf16.gmra.mxu0 %v9817_v43  ;;  %1935 = vmatmul.mubr.bf16.gmra.mxu1 %v9820_v44 }
 0x107   :  { %v694_v56 = vpack.c.bf16 %v359_v51, %v355_v35  ;;  %v696_v59 = vpack.c.bf16 %v552_v53, %v548_v37  ;;  %2282 = vmatprep.subr.bf16.mxu1 %v9113_v40  ;;  %v811_v60 = vadd.bf16 %v9775_v52, %v693_v48  ;;  %v813_v61 = vadd.bf16 %v9778_v54, %v695_v49  ;;  %v9126_v35 = vld [vmem:[#allocation3 + $0x48] ss:$16 sps:$4 sm:$0xff]  }
 0x108   :  { %v363_v62 = vpop.f32.mrf.mxu0  ;;  %v556_v63 = vpop.f32.mrf.mxu1  ;;  %2090 = vmatpush1.bf16.msra.mxu0 %v9108_v46  ;;  %2283 = vmatpush1.bf16.msra.mxu1 %v9111_v47  ;;  %v9129_v48 = vld [vmem:[#allocation3 + $0x248] ss:$16 sps:$4 sm:$0xff]  }
 0x109   :  { %v812_v3 = vadd.bf16 %v9781_v57, %v694_v56  ;;  %v814_v4 = vadd.bf16 %v9784_v58, %v696_v59  ;;  %2091 = vmatprep.subr.bf16.mxu0 %v9116_v50  ;;  %2284 = vmatprep.subr.bf16.mxu1 %v9119_v55  ;;  %v9837_v16 = vmax.bf16 %v12699_v0, %v811_v60  ;;  %v9134_v55 = vld [vmem:[#allocation3 + $0x2c] ss:$16 sps:$4 sm:$0xff]  }
 0x10a   :  { %v365_v5 = vpop.f32.mrf.mxu0  ;;  %v558_v6 = vpop.f32.mrf.mxu1  ;;  %v9840_v17 = vmax.bf16 %v12699_v0, %v813_v61  ;;  %v9137_v56 = vld [vmem:[#allocation3 + $0x22c] ss:$16 sps:$4 sm:$0xff]   ;;  %v9132_v61 = vld [vmem:[#allocation3 + $0x28] ss:$16 sps:$4 sm:$0xff]  }
 0x10b   :  { %v9831_v7 = vmax.bf16 %v12699_v0, %v812_v3  ;;  %v9834_v10 = vmax.bf16 %v12699_v0, %v814_v4  ;;  %v9135_v4 = vld [vmem:[#allocation3 + $0x228] ss:$16 sps:$4 sm:$0xff]  }
 0x10c   :  { %v367_v14 = vpop.f32.mrf.mxu0  ;;  %v560_v15 = vpop.f32.mrf.mxu1  ;;  %2092 = vmatpush1.bf16.msra.mxu0 %v9114_v1  ;;  %2285 = vmatpush1.bf16.msra.mxu1 %v9117_v2  ;;  %v9140_v1 = vld [vmem:[#allocation3 + $0xc] ss:$16 sps:$4 sm:$0xff]  }
 0x10d   :  { %v697_v20 = vpack.c.bf16 %v367_v14, %v363_v62  ;;  %v699_v21 = vpack.c.bf16 %v560_v15, %v556_v63  ;;  %1751 = vmatprep.mubr.bf16.mxu0 %v9831_v7  ;;  %1944 = vmatprep.mubr.bf16.mxu1 %v9834_v10  ;;  %v9143_v15 = vld [vmem:[#allocation3 + $0x20c] ss:$16 sps:$4 sm:$0xff]  }
 0x10e   :  { %v369_v23 = vpop.f32.mrf.mxu0  ;;  %v562_v24 = vpop.f32.mrf.mxu1  ;;  %1752 = vmatmul.mubr.bf16.gmra.mxu0 %v9837_v16  ;;  %1945 = vmatmul.mubr.bf16.gmra.mxu1 %v9840_v17 }
 0x10f   :  { %v698_v27 = vpack.c.bf16 %v369_v23, %v365_v5  ;;  %v700_v28 = vpack.c.bf16 %v562_v24, %v558_v6  ;;  %2093 = vmatprep.subr.bf16.mxu0 %v9122_v13  ;;  %v815_v29 = vadd.bf16 %v9775_v52, %v697_v20  ;;  %v817_v30 = vadd.bf16 %v9778_v54, %v699_v21  ;;  %v9138_v24 = vld [vmem:[#allocation3 + $0x8] ss:$16 sps:$4 sm:$0xff]  }
 0x110   :  { %v373_v31 = vpop.f32.mrf.mxu0  ;;  %v566_v33 = vpop.f32.mrf.mxu1  ;;  %2286 = vmatprep.subr.bf16.mxu1 %v9125_v19  ;;  %2094 = vmatpush1.bf16.msra.mxu0 %v9120_v18 }
 0x111   :  { %v816_v37 = vadd.bf16 %v9781_v57, %v698_v27  ;;  %v818_v40 = vadd.bf16 %v9784_v58, %v700_v28  ;;  %2287 = vmatpush1.bf16.msra.mxu1 %v9123_v22  ;;  %2095 = vmatprep.subr.bf16.mxu0 %v9128_v25  ;;  %v9857_v51 = vmax.bf16 %v12699_v0, %v815_v29  ;;  %v9141_v29 = vld [vmem:[#allocation3 + $0x208] ss:$16 sps:$4 sm:$0xff]  }
 0x112   :  { %v375_v41 = vpop.f32.mrf.mxu0  ;;  %v568_v42 = vpop.f32.mrf.mxu1  ;;  %2288 = vmatprep.subr.bf16.mxu1 %v9131_v26  ;;  %v9860_v53 = vmax.bf16 %v12699_v0, %v817_v30  ;;  %v9146_v30 = vld [vmem:[#allocation3 + $0x1ec] ss:$16 sps:$4 sm:$0xff]  }
 0x113   :  { %v9851_v46 = vmax.bf16 %v12699_v0, %v816_v37  ;;  %v9854_v47 = vmax.bf16 %v12699_v0, %v818_v40 }
 0x114   :  { %v377_v49 = vpop.f32.mrf.mxu0  ;;  %v570_v50 = vpop.f32.mrf.mxu1  ;;  %2096 = vmatpush1.bf16.msra.mxu0 %v9126_v35  ;;  %v9149_v35 = vld [vmem:[#allocation3 + $0x3ec] ss:$16 sps:$4 sm:$0xff]  }
 0x115   :  { %v701_v59 = vpack.c.bf16 %v377_v49, %v373_v31  ;;  %v703_v60 = vpack.c.bf16 %v570_v50, %v566_v33  ;;  %1761 = vmatprep.mubr.bf16.mxu0 %v9851_v46  ;;  %1954 = vmatprep.mubr.bf16.mxu1 %v9854_v47 }
 0x116   :  { %v379_v62 = vpop.f32.mrf.mxu0  ;;  %v572_v63 = vpop.f32.mrf.mxu1  ;;  %1762 = vmatmul.mubr.bf16.gmra.mxu0 %v9857_v51  ;;  %1955 = vmatmul.mubr.bf16.gmra.mxu1 %v9860_v53 }
 0x117   :  { %v702_v2 = vpack.c.bf16 %v379_v62, %v375_v41  ;;  %v704_v3 = vpack.c.bf16 %v572_v63, %v568_v42  ;;  %2289 = vmatpush1.bf16.msra.mxu1 %v9129_v48  ;;  %v819_v5 = vadd.bf16 %v9775_v52, %v701_v59  ;;  %v821_v6 = vadd.bf16 %v9778_v54, %v703_v60  ;;  %v9144_v48 = vld [vmem:[#allocation3 + $0x1e8] ss:$16 sps:$4 sm:$0xff]   ;;  %v9152_v60 = vld [vmem:[#allocation3 + $0x1cc] ss:$16 sps:$4 sm:$0xff]  }
 0x118   :  { %v383_v13 = vpop.f32.mrf.mxu0  ;;  %v576_v14 = vpop.f32.mrf.mxu1  ;;  %2097 = vmatprep.subr.bf16.mxu0 %v9134_v55  ;;  %2290 = vmatprep.subr.bf16.mxu1 %v9137_v56  ;;  %v9147_v59 = vld [vmem:[#allocation3 + $0x3e8] ss:$16 sps:$4 sm:$0xff]  }
 0x119   :  { %v820_v18 = vadd.bf16 %v9781_v57, %v702_v2  ;;  %v822_v19 = vadd.bf16 %v9784_v58, %v704_v3  ;;  %2098 = vmatpush1.bf16.msra.mxu0 %v9132_v61  ;;  %v9877_v27 = vmax.bf16 %v12699_v0, %v819_v5  ;;  %v9880_v28 = vmax.bf16 %v12699_v0, %v821_v6 }
 0x11a   :  { %v385_v20 = vpop.f32.mrf.mxu0  ;;  %v578_v21 = vpop.f32.mrf.mxu1  ;;  %2099 = vmatprep.subr.bf16.mxu0 %v9140_v1 }
 0x11b   :  { %v9871_v22 = vmax.bf16 %v12699_v0, %v820_v18  ;;  %v9874_v23 = vmax.bf16 %v12699_v0, %v822_v19  ;;  %2291 = vmatpush1.bf16.msra.mxu1 %v9135_v4  ;;  %v9155_v4 = vld [vmem:[#allocation3 + $0x3cc] ss:$16 sps:$4 sm:$0xff]   ;;  %v9153_v18 = vld [vmem:[#allocation3 + $0x3c8] ss:$16 sps:$4 sm:$0xff]  }
 0x11c   :  { %v387_v25 = vpop.f32.mrf.mxu0  ;;  %v580_v26 = vpop.f32.mrf.mxu1  ;;  %2292 = vmatprep.subr.bf16.mxu1 %v9143_v15  ;;  %v9150_v15 = vld [vmem:[#allocation3 + $0x1c8] ss:$16 sps:$4 sm:$0xff]  }
 0x11d   :  { %v705_v31 = vpack.c.bf16 %v387_v25, %v383_v13  ;;  %v707_v33 = vpack.c.bf16 %v580_v26, %v576_v14  ;;  %1771 = vmatprep.mubr.bf16.mxu0 %v9871_v22  ;;  %1964 = vmatprep.mubr.bf16.mxu1 %v9874_v23  ;;  %v9161_v26 = vld [vmem:[#allocation3 + $0x3ac] ss:$16 sps:$4 sm:$0xff]  }
 0x11e   :  { %v389_v37 = vpop.f32.mrf.mxu0  ;;  %v582_v40 = vpop.f32.mrf.mxu1  ;;  %1772 = vmatmul.mubr.bf16.gmra.mxu0 %v9877_v27  ;;  %1965 = vmatmul.mubr.bf16.gmra.mxu1 %v9880_v28 }
 0x11f   :  { %v706_v41 = vpack.c.bf16 %v389_v37, %v385_v20  ;;  %v708_v42 = vpack.c.bf16 %v582_v40, %v578_v21  ;;  %2100 = vmatpush1.bf16.msra.mxu0 %v9138_v24  ;;  %v823_v49 = vadd.bf16 %v9775_v52, %v705_v31  ;;  %v825_v50 = vadd.bf16 %v9778_v54, %v707_v33  ;;  %v9158_v21 = vld [vmem:[#allocation3 + $0x1ac] ss:$16 sps:$4 sm:$0xff]   ;;  %v9156_v40 = vld [vmem:[#allocation3 + $0x1a8] ss:$16 sps:$4 sm:$0xff]  }
 0x120   :  { %v393_v55 = vpop.f32.mrf.mxu0  ;;  %v586_v56 = vpop.f32.mrf.mxu1  ;;  %2293 = vmatpush1.bf16.msra.mxu1 %v9141_v29  ;;  %2101 = vmatprep.subr.bf16.mxu0 %v9146_v30 }
 0x121   :  { %v824_v61 = vadd.bf16 %v9781_v57, %v706_v41  ;;  %v826_v62 = vadd.bf16 %v9784_v58, %v708_v42  ;;  %2294 = vmatprep.subr.bf16.mxu1 %v9149_v35  ;;  %v9897_v13 = vmax.bf16 %v12699_v0, %v823_v49  ;;  %v9900_v14 = vmax.bf16 %v12699_v0, %v825_v50  ;;  %v9159_v41 = vld [vmem:[#allocation3 + $0x3a8] ss:$16 sps:$4 sm:$0xff]  }
 0x122   :  { %v395_v63 = vpop.f32.mrf.mxu0  ;;  %v588_v1 = vpop.f32.mrf.mxu1 }
 0x123   :  { %v9891_v2 = vmax.bf16 %v12699_v0, %v824_v61  ;;  %v9894_v3 = vmax.bf16 %v12699_v0, %v826_v62  ;;  %2102 = vmatpush2.bf16.msra.mxu0 %v9144_v48 }
 0x124   :  { %v397_v5 = vpop.f32.mrf.mxu0  ;;  %v590_v6 = vpop.f32.mrf.mxu1  ;;  %2295 = vmatpush2.bf16.msra.mxu1 %v9147_v59  ;;  %2103 = vmatprep.subr.bf16.mxu0 %v9152_v60  ;;  %v9164_v59 = vld [vmem:[#allocation3 + $0x18c] ss:$16 sps:$4 sm:$0xff]  }
 0x125   :  { %v709_v19 = vpack.c.bf16 %v397_v5, %v393_v55  ;;  %v711_v20 = vpack.c.bf16 %v590_v6, %v586_v56  ;;  %1781 = vmatprep.mubr.bf16.mxu0 %v9891_v2  ;;  %1974 = vmatprep.mubr.bf16.mxu1 %v9894_v3 }
 0x126   :  { %v399_v24 = vpop.f32.mrf.mxu0  ;;  %v592_v25 = vpop.f32.mrf.mxu1  ;;  %1782 = vmatmul.mubr.bf16.gmra.mxu0 %v9897_v13  ;;  %1975 = vmatmul.mubr.bf16.gmra.mxu1 %v9900_v14 }
 0x127   :  { %v710_v29 = vpack.c.bf16 %v399_v24, %v395_v63  ;;  %v712_v30 = vpack.c.bf16 %v592_v25, %v588_v1  ;;  %2296 = vmatprep.subr.bf16.mxu1 %v9155_v4  ;;  %v827_v31 = vadd.bf16 %v9775_v52, %v709_v19  ;;  %v829_v33 = vadd.bf16 %v9778_v54, %v711_v20  ;;  %v9162_v1 = vld [vmem:[#allocation3 + $0x188] ss:$16 sps:$4 sm:$0xff]   ;;  %v9167_v4 = vld [vmem:[#allocation3 + $0x38c] ss:$16 sps:$4 sm:$0xff]  }
 0x128   :  { %v403_v35 = vpop.f32.mrf.mxu0  ;;  %v596_v37 = vpop.f32.mrf.mxu1  ;;  %2104 = vmatpush2.bf16.msra.mxu0 %v9150_v15  ;;  %2297 = vmatpush2.bf16.msra.mxu1 %v9153_v18  ;;  %v9165_v15 = vld [vmem:[#allocation3 + $0x388] ss:$16 sps:$4 sm:$0xff]   ;;  %v9170_v20 = vld [vmem:[#allocation3 + $0x16c] ss:$16 sps:$4 sm:$0xff]  }
 0x129   :  { %v828_v42 = vadd.bf16 %v9781_v57, %v710_v29  ;;  %v830_v48 = vadd.bf16 %v9784_v58, %v712_v30  ;;  %2105 = vmatprep.subr.bf16.mxu0 %v9158_v21  ;;  %2298 = vmatprep.subr.bf16.mxu1 %v9161_v26  ;;  %v9917_v62 = vmax.bf16 %v12699_v0, %v827_v31  ;;  %v9173_v21 = vld [vmem:[#allocation3 + $0x36c] ss:$16 sps:$4 sm:$0xff]  }
 0x12a   :  { %v405_v49 = vpop.f32.mrf.mxu0  ;;  %v598_v50 = vpop.f32.mrf.mxu1  ;;  %v9920_v63 = vmax.bf16 %v12699_v0, %v829_v33  ;;  %v9168_v33 = vld [vmem:[#allocation3 + $0x168] ss:$16 sps:$4 sm:$0xff]  }
 0x12b   :  { %v9911_v55 = vmax.bf16 %v12699_v0, %v828_v42  ;;  %v9914_v56 = vmax.bf16 %v12699_v0, %v830_v48 }
 0x12c   :  { %v407_v60 = vpop.f32.mrf.mxu0  ;;  %v600_v61 = vpop.f32.mrf.mxu1  ;;  %2106 = vmatpush2.bf16.msra.mxu0 %v9156_v40  ;;  %2299 = vmatpush2.bf16.msra.mxu1 %v9159_v41 }
 0x12d   :  { %v713_v5 = vpack.c.bf16 %v407_v60, %v403_v35  ;;  %v715_v6 = vpack.c.bf16 %v600_v61, %v596_v37  ;;  %1791 = vmatprep.mubr.bf16.mxu0 %v9911_v55  ;;  %1984 = vmatprep.mubr.bf16.mxu1 %v9914_v56 }
 0x12e   :  { %v409_v18 = vpop.f32.mrf.mxu0  ;;  %v602_v19 = vpop.f32.mrf.mxu1  ;;  %1792 = vmatmul.mubr.bf16.gmra.mxu0 %v9917_v62  ;;  %1985 = vmatmul.mubr.bf16.gmra.mxu1 %v9920_v63 }
 0x12f   :  { %v714_v24 = vpack.c.bf16 %v409_v18, %v405_v49  ;;  %v716_v25 = vpack.c.bf16 %v602_v19, %v598_v50  ;;  %2107 = vmatprep.subr.bf16.mxu0 %v9164_v59  ;;  %v831_v26 = vadd.bf16 %v9775_v52, %v713_v5  ;;  %v833_v29 = vadd.bf16 %v9778_v54, %v715_v6  ;;  %v9171_v49 = vld [vmem:[#allocation3 + $0x368] ss:$16 sps:$4 sm:$0xff]  }
 0x130   :  { %v413_v30 = vpop.f32.mrf.mxu0  ;;  %v606_v31 = vpop.f32.mrf.mxu1  ;;  %2300 = vmatprep.subr.bf16.mxu1 %v9167_v4  ;;  %2108 = vmatpush2.bf16.msra.mxu0 %v9162_v1  ;;  %v9176_v1 = vld [vmem:[#allocation3 + $0x14c] ss:$16 sps:$4 sm:$0xff]  }
 0x131   :  { %v832_v35 = vadd.bf16 %v9781_v57, %v714_v24  ;;  %v834_v37 = vadd.bf16 %v9784_v58, %v716_v25  ;;  %2301 = vmatpush2.bf16.msra.mxu1 %v9165_v15  ;;  %2109 = vmatprep.subr.bf16.mxu0 %v9170_v20  ;;  %v9937_v60 = vmax.bf16 %v12699_v0, %v831_v26  ;;  %v9179_v4 = vld [vmem:[#allocation3 + $0x34c] ss:$16 sps:$4 sm:$0xff]   ;;  %v9174_v15 = vld [vmem:[#allocation3 + $0x148] ss:$16 sps:$4 sm:$0xff]  }
 0x132   :  { %v415_v40 = vpop.f32.mrf.mxu0  ;;  %v608_v41 = vpop.f32.mrf.mxu1  ;;  %2302 = vmatprep.subr.bf16.mxu1 %v9173_v21  ;;  %v9940_v61 = vmax.bf16 %v12699_v0, %v833_v29  ;;  %v9182_v20 = vld [vmem:[#allocation3 + $0x12c] ss:$16 sps:$4 sm:$0xff]   ;;  %v9177_v25 = vld [vmem:[#allocation3 + $0x348] ss:$16 sps:$4 sm:$0xff]  }
 0x133   :  { %v9931_v42 = vmax.bf16 %v12699_v0, %v832_v35  ;;  %v9934_v48 = vmax.bf16 %v12699_v0, %v834_v37 }
 0x134   :  { %v417_v50 = vpop.f32.mrf.mxu0  ;;  %v610_v59 = vpop.f32.mrf.mxu1  ;;  %2110 = vmatpush2.bf16.msra.mxu0 %v9168_v33  ;;  %v9185_v33 = vld [vmem:[#allocation3 + $0x32c] ss:$16 sps:$4 sm:$0xff]  }
 0x135   :  { %v717_v5 = vpack.c.bf16 %v417_v50, %v413_v30  ;;  %v719_v6 = vpack.c.bf16 %v610_v59, %v606_v31  ;;  %1801 = vmatprep.mubr.bf16.mxu0 %v9931_v42  ;;  %1994 = vmatprep.mubr.bf16.mxu1 %v9934_v48 }
 0x136   :  { %v419_v18 = vpop.f32.mrf.mxu0  ;;  %v612_v19 = vpop.f32.mrf.mxu1  ;;  %1802 = vmatmul.mubr.bf16.gmra.mxu0 %v9937_v60  ;;  %1995 = vmatmul.mubr.bf16.gmra.mxu1 %v9940_v61 }
 0x137   :  { %v718_v21 = vpack.c.bf16 %v419_v18, %v415_v40  ;;  %v720_v24 = vpack.c.bf16 %v612_v19, %v608_v41  ;;  %2303 = vmatpush2.bf16.msra.mxu1 %v9171_v49  ;;  %v835_v26 = vadd.bf16 %v9775_v52, %v717_v5  ;;  %v837_v29 = vadd.bf16 %v9778_v54, %v719_v6  ;;  %v9180_v49 = vld [vmem:[#allocation3 + $0x128] ss:$16 sps:$4 sm:$0xff]   ;;  %v9188_v18 = vld [vmem:[#allocation3 + $0x10c] ss:$16 sps:$4 sm:$0xff]  }
 0x138   :  { %v423_v30 = vpop.f32.mrf.mxu0  ;;  %v616_v31 = vpop.f32.mrf.mxu1  ;;  %2111 = vmatprep.subr.bf16.mxu0 %v9176_v1  ;;  %2304 = vmatprep.subr.bf16.mxu1 %v9179_v4 }
 0x139   :  { %v836_v35 = vadd.bf16 %v9781_v57, %v718_v21  ;;  %v838_v37 = vadd.bf16 %v9784_v58, %v720_v24  ;;  %2112 = vmatpush2.bf16.msra.mxu0 %v9174_v15  ;;  %v9957_v4 = vmax.bf16 %v12699_v0, %v835_v26  ;;  %v9960_v6 = vmax.bf16 %v12699_v0, %v837_v29  ;;  %v9183_v15 = vld [vmem:[#allocation3 + $0x328] ss:$16 sps:$4 sm:$0xff]   ;;  %v9191_v21 = vld [vmem:[#allocation3 + $0x30c] ss:$16 sps:$4 sm:$0xff]  }
 0x13a   :  { %v425_v50 = vpop.f32.mrf.mxu0  ;;  %v618_v59 = vpop.f32.mrf.mxu1  ;;  %2113 = vmatprep.subr.bf16.mxu0 %v9182_v20  ;;  %v9186_v29 = vld [vmem:[#allocation3 + $0x108] ss:$16 sps:$4 sm:$0xff]  }
 0x13b   :  { %v9951_v40 = vmax.bf16 %v12699_v0, %v836_v35  ;;  %v9954_v41 = vmax.bf16 %v12699_v0, %v838_v37  ;;  %2305 = vmatpush2.bf16.msra.mxu1 %v9177_v25 }
 0x13c   :  { %v427_v5 = vpop.f32.mrf.mxu0  ;;  %v620_v1 = vpop.f32.mrf.mxu1  ;;  %2306 = vmatprep.subr.bf16.mxu1 %v9185_v33 }
 0x13d   :  { %v721_v19 = vpack.c.bf16 %v427_v5, %v423_v30  ;;  %v723_v20 = vpack.c.bf16 %v620_v1, %v616_v31  ;;  %1811 = vmatprep.mubr.bf16.mxu0 %v9951_v40  ;;  %2004 = vmatprep.mubr.bf16.mxu1 %v9954_v41  ;;  %v9189_v5 = vld [vmem:[#allocation3 + $0x308] ss:$16 sps:$4 sm:$0xff]   ;;  %v9194_v1 = vld [vmem:[#allocation5 + $0xe4] ss:$16 sps:$4 sm:$0xff]  }
 0x13e   :  { %v429_v24 = vpop.f32.mrf.mxu0  ;;  %v622_v25 = vpop.f32.mrf.mxu1  ;;  %1812 = vmatmul.mubr.bf16.gmra.mxu0 %v9957_v4  ;;  %2005 = vmatmul.mubr.bf16.gmra.mxu1 %v9960_v6 }
 0x13f   :  { %v722_v26 = vpack.c.bf16 %v429_v24, %v425_v50  ;;  %v724_v35 = vpack.c.bf16 %v622_v25, %v618_v59  ;;  %2114 = vmatpush2.bf16.msra.mxu0 %v9180_v49  ;;  %v839_v33 = vadd.bf16 %v9775_v52, %v721_v19  ;;  %v841_v30 = vadd.bf16 %v9778_v54, %v723_v20 }
 0x140   :  { %v433_v31 = vpop.f32.mrf.mxu0  ;;  %v626_v37 = vpop.f32.mrf.mxu1  ;;  %2307 = vmatpush2.bf16.msra.mxu1 %v9183_v15  ;;  %2115 = vmatprep.subr.bf16.mxu0 %v9188_v18  ;;  %v12752_v59 = vmov 0  }
 0x141   :  { %v840_v32 = vadd.bf16 %v9781_v57, %v722_v26  ;;  %v842_v0 = vadd.bf16 %v9784_v58, %v724_v35  ;;  %2308 = vmatprep.subr.bf16.mxu1 %v9191_v21  ;;  %v9977_v15 = vmax.bf16 %v12752_v59, %v839_v33  ;;  %v9980_v18 = vmax.bf16 %v12752_v59, %v841_v30 }
 0x142   :  { %v435_v34 = vpop.f32.mrf.mxu0  ;;  %v628_v50 = vpop.f32.mrf.mxu1 }
 0x143   :  { %v9971_v49 = vmax.bf16 %v12752_v59, %v840_v32  ;;  %v9974_v19 = vmax.bf16 %v12752_v59, %v842_v0  ;;  %2116 = vmatpush2.bf16.msra.mxu0 %v9186_v29  ;;  %12753 = vst [vmem:[#allocation13_spill] sm:$0xff] %v9980_v18 }
 0x144   :  { %v437_v20 = vpop.f32.mrf.mxu0  ;;  %v630_v24 = vpop.f32.mrf.mxu1  ;;  %2309 = vmatpush2.bf16.msra.mxu1 %v9189_v5  ;;  %3485 = vmatprep.subr.bf16.mxu0 %v9194_v1 }
 0x145   :  { %v725_v21 = vpack.c.bf16 %v437_v20, %v433_v31  ;;  %v727_v25 = vpack.c.bf16 %v630_v24, %v626_v37  ;;  %1821 = vmatprep.mubr.bf16.mxu0 %v9971_v49  ;;  %2014 = vmatprep.mubr.bf16.mxu1 %v9974_v19 }
 0x146   :  { %v439_v32 = vpop.f32.mrf.mxu0  ;;  %v632_v0 = vpop.f32.mrf.mxu1  ;;  %1822 = vmatmul.mubr.bf16.gmra.mxu0 %v9977_v15  ;;  %2015 = vmatmul.mubr.bf16.gmra.mxu1 %v9980_v18 }
 0x147   :  { %v726_v26 = vpack.c.bf16 %v439_v32, %v435_v34  ;;  %v728_v35 = vpack.c.bf16 %v632_v0, %v628_v50  ;;  %v843_v29 = vadd.bf16 %v9775_v52, %v725_v21  ;;  %v845_v33 = vadd.bf16 %v9778_v54, %v727_v25 }
 0x148   :  { %v443_v30 = vpop.f32.mrf.mxu0  ;;  %v636_v5 = vpop.f32.mrf.mxu1 }
 0x149   :  { %v844_v31 = vadd.bf16 %v9781_v57, %v726_v26  ;;  %v846_v37 = vadd.bf16 %v9784_v58, %v728_v35  ;;  %v9997_v21 = vmax.bf16 %v12752_v59, %v843_v29  ;;  %v10000_v25 = vmax.bf16 %v12752_v59, %v845_v33 }
 0x14a   :  { %v445_v1 = vpop.f32.mrf.mxu0  ;;  %v638_v20 = vpop.f32.mrf.mxu1 }
 0x14b   :  { %v9991_v24 = vmax.bf16 %v12752_v59, %v844_v31  ;;  %v9994_v45 = vmax.bf16 %v12752_v59, %v846_v37  ;;  %12756 = vst [vmem:[#allocation16_spill] sm:$0xff] %v9997_v21  ;;  %12757 = vst [vmem:[#allocation17_spill] sm:$0xff] %v10000_v25 }
 0x14c   :  { %v447_v34 = vpop.f32.mrf.mxu0  ;;  %v640_v50 = vpop.f32.mrf.mxu1 }
 0x14d   :  { %12754 = vst [vmem:[#allocation14_spill] sm:$0xff] %v9991_v24  ;;  %12755 = vst [vmem:[#allocation15_spill] sm:$0xff] %v9994_v45  ;;  %v729_v32 = vpack.c.bf16 %v447_v34, %v443_v30  ;;  %v731_v0 = vpack.c.bf16 %v640_v50, %v636_v5  ;;  %1831 = vmatprep.mubr.bf16.mxu0 %v9991_v24  ;;  %2024 = vmatprep.mubr.bf16.mxu1 %v9994_v45  ;;  %v9206_v34 = vld [vmem:[#allocation5 + $0x2e4] ss:$16 sps:$4 sm:$0xff]  }
 0x14e   :  { %v449_v26 = vpop.f32.mrf.mxu0  ;;  %v642_v35 = vpop.f32.mrf.mxu1  ;;  %1832 = vmatmul.mubr.bf16.gmra.mxu0 %v9997_v21  ;;  %2025 = vmatmul.mubr.bf16.gmra.mxu1 %v10000_v25 }
 0x14f   :  { %v730_v31 = vpack.c.bf16 %v449_v26, %v445_v1  ;;  %v732_v37 = vpack.c.bf16 %v642_v35, %v638_v20  ;;  %v847_v29 = vadd.bf16 %v9775_v52, %v729_v32  ;;  %v849_v36 = vadd.bf16 %v9778_v54, %v731_v0  ;;  %3678 = vmatprep.subr.bf16.mxu1 %v9206_v34 }
 0x150   :  { %v453_v33 = vpop.f32.mrf.mxu0  ;;  %v646_v18 = vpop.f32.mrf.mxu1 }
 0x151   :  { %v848_v30 = vadd.bf16 %v9781_v57, %v730_v31  ;;  %v850_v5 = vadd.bf16 %v9784_v58, %v732_v37  ;;  %v10017_v32 = vmax.bf16 %v12752_v59, %v847_v29  ;;  %v10020_v0 = vmax.bf16 %v12752_v59, %v849_v36 }
 0x152   :  { %v455_v50 = vpop.f32.mrf.mxu0  ;;  %v648_v45 = vpop.f32.mrf.mxu1 }
 0x153   :  { %v10011_v24 = vmax.bf16 %v12752_v59, %v848_v30  ;;  %v10014_v25 = vmax.bf16 %v12752_v59, %v850_v5  ;;  %12760 = vst [vmem:[#allocation20_spill] sm:$0xff] %v10017_v32  ;;  %12761 = vst [vmem:[#allocation21_spill] sm:$0xff] %v10020_v0 }
 0x154   :  { %v457_v1 = vpop.f32.mrf.mxu0  ;;  %v650_v20 = vpop.f32.mrf.mxu1 }
 0x155   :  { %12758 = vst [vmem:[#allocation18_spill] sm:$0xff] %v10011_v24  ;;  %12759 = vst [vmem:[#allocation19_spill] sm:$0xff] %v10014_v25  ;;  %v733_v26 = vpack.c.bf16 %v457_v1, %v453_v33  ;;  %v735_v35 = vpack.c.bf16 %v650_v20, %v646_v18  ;;  %1841 = vmatprep.mubr.bf16.mxu0 %v10011_v24  ;;  %2034 = vmatprep.mubr.bf16.mxu1 %v10014_v25 }
 0x156   :  { %v459_v31 = vpop.f32.mrf.mxu0  ;;  %v652_v37 = vpop.f32.mrf.mxu1  ;;  %1842 = vmatmul.mubr.bf16.gmra.mxu0 %v10017_v32  ;;  %2035 = vmatmul.mubr.bf16.gmra.mxu1 %v10020_v0 }
 0x157   :  { %v734_v30 = vpack.c.bf16 %v459_v31, %v455_v50  ;;  %v736_v5 = vpack.c.bf16 %v652_v37, %v648_v45  ;;  %v851_v29 = vadd.bf16 %v9775_v52, %v733_v26  ;;  %v853_v34 = vadd.bf16 %v9778_v54, %v735_v35 }
 0x158   :  { %v463_v36 = vpop.f32.mrf.mxu0  ;;  %v656_v21 = vpop.f32.mrf.mxu1 }
 0x159   :  { %v852_v18 = vadd.bf16 %v9781_v57, %v734_v30  ;;  %v854_v33 = vadd.bf16 %v9784_v58, %v736_v5  ;;  %v10037_v45 = vmax.bf16 %v12752_v59, %v851_v29  ;;  %v10040_v50 = vmax.bf16 %v12752_v59, %v853_v34 }
 0x15a   :  { %v465_v1 = vpop.f32.mrf.mxu0  ;;  %v658_v20 = vpop.f32.mrf.mxu1 }
 0x15b   :  { %v10031_v25 = vmax.bf16 %v12752_v59, %v852_v18  ;;  %v10034_v32 = vmax.bf16 %v12752_v59, %v854_v33  ;;  %12764 = vst [vmem:[#allocation24_spill] sm:$0xff] %v10037_v45  ;;  %12765 = vst [vmem:[#allocation25_spill] sm:$0xff] %v10040_v50 }
 0x15c   :  { %v467_v26 = vpop.f32.mrf.mxu0  ;;  %v660_v35 = vpop.f32.mrf.mxu1 }
 0x15d   :  { %12762 = vst [vmem:[#allocation22_spill] sm:$0xff] %v10031_v25  ;;  %12763 = vst [vmem:[#allocation23_spill] sm:$0xff] %v10034_v32  ;;  %v737_v31 = vpack.c.bf16 %v467_v26, %v463_v36  ;;  %v739_v37 = vpack.c.bf16 %v660_v35, %v656_v21  ;;  %1851 = vmatprep.mubr.bf16.mxu0 %v10031_v25  ;;  %2044 = vmatprep.mubr.bf16.mxu1 %v10034_v32 }
 0x15e   :  { %v469_v30 = vpop.f32.mrf.mxu0  ;;  %v662_v5 = vpop.f32.mrf.mxu1  ;;  %1852 = vmatmul.mubr.bf16.gmra.mxu0 %v10037_v45  ;;  %2045 = vmatmul.mubr.bf16.gmra.mxu1 %v10040_v50 }
 0x15f   :  { %v738_v18 = vpack.c.bf16 %v469_v30, %v465_v1  ;;  %v740_v29 = vpack.c.bf16 %v662_v5, %v658_v20  ;;  %v855_v33 = vadd.bf16 %v9775_v52, %v737_v31  ;;  %v857_v34 = vadd.bf16 %v9778_v54, %v739_v37 }
 0x160   :  { %v473_v0 = vpop.f32.mrf.mxu0  ;;  %v666_v24 = vpop.f32.mrf.mxu1 }
 0x161   :  { %v856_v21 = vadd.bf16 %v9781_v57, %v738_v18  ;;  %v858_v36 = vadd.bf16 %v9784_v58, %v740_v29  ;;  %v10057_v1 = vmax.bf16 %v12752_v59, %v855_v33  ;;  %v10060_v20 = vmax.bf16 %v12752_v59, %v857_v34 }
 0x162   :  { %v475_v26 = vpop.f32.mrf.mxu0  ;;  %v668_v35 = vpop.f32.mrf.mxu1 }
 0x163   :  { %v10051_v32 = vmax.bf16 %v12752_v59, %v856_v21  ;;  %v10054_v45 = vmax.bf16 %v12752_v59, %v858_v36  ;;  %12767 = vst [vmem:[#allocation27_spill] sm:$0xff] %v10057_v1  ;;  %12768 = vst [vmem:[#allocation28_spill] sm:$0xff] %v10060_v20 }
 0x164   :  { %v477_v31 = vpop.f32.mrf.mxu0  ;;  %v670_v37 = vpop.f32.mrf.mxu1 }
 0x165   :  { %12766 = vst [vmem:[#allocation26_spill] sm:$0xff] %v10054_v45  ;;  %v741_v30 = vpack.c.bf16 %v477_v31, %v473_v0  ;;  %v743_v5 = vpack.c.bf16 %v670_v37, %v666_v24  ;;  %1861 = vmatprep.mubr.bf16.mxu0 %v10051_v32  ;;  %2054 = vmatprep.mubr.bf16.mxu1 %v10054_v45 }
 0x166   :  { %v479_v18 = vpop.f32.mrf.mxu0  ;;  %v672_v29 = vpop.f32.mrf.mxu1  ;;  %1862 = vmatmul.mubr.bf16.gmra.mxu0 %v10057_v1  ;;  %2055 = vmatmul.mubr.bf16.gmra.mxu1 %v10060_v20 }
 0x167   :  { %v742_v21 = vpack.c.bf16 %v479_v18, %v475_v26  ;;  %v744_v33 = vpack.c.bf16 %v672_v29, %v668_v35  ;;  %v859_v36 = vadd.bf16 %v9775_v52, %v741_v30  ;;  %v861_v34 = vadd.bf16 %v9778_v54, %v743_v5 }
 0x168   :  { %v483_v50 = vpop.f32.mrf.mxu0  ;;  %v676_v25 = vpop.f32.mrf.mxu1 }
 0x169   :  { %v860_v24 = vadd.bf16 %v9781_v57, %v742_v21  ;;  %v862_v0 = vadd.bf16 %v9784_v58, %v744_v33  ;;  %v10077_v26 = vmax.bf16 %v12752_v59, %v859_v36  ;;  %v10080_v35 = vmax.bf16 %v12752_v59, %v861_v34 }
 0x16a   :  { %v485_v31 = vpop.f32.mrf.mxu0  ;;  %v678_v37 = vpop.f32.mrf.mxu1 }
 0x16b   :  { %v10071_v45 = vmax.bf16 %v12752_v59, %v860_v24  ;;  %v10074_v1 = vmax.bf16 %v12752_v59, %v862_v0 }
 0x16c   :  { %v487_v30 = vpop.f32.mrf.mxu0  ;;  %v680_v5 = vpop.f32.mrf.mxu1 }
 0x16d   :  { %v745_v18 = vpack.c.bf16 %v487_v30, %v483_v50  ;;  %v747_v29 = vpack.c.bf16 %v680_v5, %v676_v25  ;;  %1871 = vmatprep.mubr.bf16.mxu0 %v10071_v45  ;;  %2064 = vmatprep.mubr.bf16.mxu1 %v10074_v1 }
 0x16e   :  { %v489_v21 = vpop.f32.mrf.mxu0  ;;  %v682_v33 = vpop.f32.mrf.mxu1  ;;  %1872 = vmatmul.mubr.bf16.gmra.mxu0 %v10077_v26  ;;  %2065 = vmatmul.mubr.bf16.gmra.mxu1 %v10080_v35 }
 0x16f   :  { %v746_v24 = vpack.c.bf16 %v489_v21, %v485_v31  ;;  %v748_v36 = vpack.c.bf16 %v682_v33, %v678_v37  ;;  %v863_v0 = vadd.bf16 %v9775_v52, %v745_v18  ;;  %v865_v34 = vadd.bf16 %v9778_v54, %v747_v29  ;;  %v9192_v52 = vld [vmem:[#allocation5 + $0xe0] ss:$16 sps:$4 sm:$0xff]   ;;  %v9209_v21 = vld [vmem:[#allocation5 + $0x64] ss:$16 sps:$4 sm:$0xff]  }
 0x170   :  { %v9204_v54 = vld [vmem:[#allocation5 + $0x2e0] ss:$16 sps:$4 sm:$0xff]   ;;  %v9242_v33 = vld [vmem:[#allocation5 + $0x264] ss:$16 sps:$4 sm:$0xff]  }
 0x171   :  { %v864_v20 = vadd.bf16 %v9781_v57, %v746_v24  ;;  %v866_v25 = vadd.bf16 %v9784_v58, %v748_v36  ;;  %v10097_v5 = vmax.bf16 %v12752_v59, %v863_v0  ;;  %v10100_v31 = vmax.bf16 %v12752_v59, %v865_v34  ;;  %v9197_v57 = vld [vmem:[#allocation5 + $0xc4] ss:$16 sps:$4 sm:$0xff]   ;;  %v9213_v37 = vld [vmem:[#allocation5 + $0x2c0] ss:$16 sps:$4 sm:$0xff]  }
 0x172   :  { %v9215_v58 = vld [vmem:[#allocation5 + $0x2c4] ss:$16 sps:$4 sm:$0xff]   ;;  %v9198_v18 = vld [vmem:[#allocation5 + $0xa0] ss:$16 sps:$4 sm:$0xff]  }
 0x173   :  { %v10091_v50 = vmax.bf16 %v12752_v59, %v864_v20  ;;  %v10094_v30 = vmax.bf16 %v12752_v59, %v866_v25  ;;  %v9195_v20 = vld [vmem:[#allocation5 + $0xc0] ss:$16 sps:$4 sm:$0xff]   ;;  %v9218_v0 = vld [vmem:[#allocation5 + $0x24] ss:$16 sps:$4 sm:$0xff]  }
 0x174   :  { %v9222_v29 = vld [vmem:[#allocation5 + $0x2a0] ss:$16 sps:$4 sm:$0xff]   ;;  %v9260_v34 = vld [vmem:[#allocation5 + $0x224] ss:$16 sps:$4 sm:$0xff]  }
 0x175   :  { %1881 = vmatprep.mubr.bf16.mxu0 %v10091_v50  ;;  %2074 = vmatprep.mubr.bf16.mxu1 %v10094_v30  ;;  %v9207_v24 = vld [vmem:[#allocation5 + $0x60] ss:$16 sps:$4 sm:$0xff]  }
 0x176   :  { %1882 = vmatmul.mubr.bf16.gmra.mxu0 %v10097_v5  ;;  %2075 = vmatmul.mubr.bf16.gmra.mxu1 %v10100_v31  ;;  %v9240_v36 = vld [vmem:[#allocation5 + $0x260] ss:$16 sps:$4 sm:$0xff]  }
 0x177   :  { %2117 = vmatprep.mubr.bf16.mxu0 %v9791_v8  ;;  %2310 = vmatprep.mubr.bf16.mxu1 %v9794_v9  ;;  %v9200_v8 = vld [vmem:[#allocation5 + $0xa4] ss:$16 sps:$4 sm:$0xff]   ;;  %v9216_v25 = vld [vmem:[#allocation5 + $0x20] ss:$16 sps:$4 sm:$0xff]  }
 0x178   :  { %v9224_v9 = vld [vmem:[#allocation5 + $0x2a4] ss:$16 sps:$4 sm:$0xff]  }
 0x17e   :  { %2118 = vmatmul.mubr.bf16.vlgmr.msra.gmra.mxu0 %v9797_v11  ;;  %2311 = vmatmul.mubr.bf16.vlgmr.msra.gmra.mxu1 %v9800_v12  ;;  %v9203_v11 = vld [vmem:[#allocation5 + $0x84] ss:$16 sps:$4 sm:$0xff]  }
 0x17f   :  { %2127 = vmatprep.mubr.bf16.mxu0 %v9811_v38  ;;  %2320 = vmatprep.mubr.bf16.mxu1 %v9814_v39  ;;  %v9233_v12 = vld [vmem:[#allocation5 + $0x284] ss:$16 sps:$4 sm:$0xff]   ;;  %v9201_v38 = vld [vmem:[#allocation5 + $0x80] ss:$16 sps:$4 sm:$0xff]  }
 0x180   :  { %3486 = vmatpush1.bf16.msra.mxu0 %v9192_v52  ;;  %3679 = vmatpush1.bf16.msra.mxu1 %v9204_v54  ;;  %v9231_v39 = vld [vmem:[#allocation5 + $0x280] ss:$16 sps:$4 sm:$0xff]   ;;  %v9227_v54 = vld [vmem:[#allocation5 + $0x1e4] ss:$16 sps:$4 sm:$0xff]  }
 0x181   :  { %3487 = vmatprep.subr.bf16.mxu0 %v9197_v57  ;;  %3680 = vmatprep.subr.bf16.mxu1 %v9215_v58  ;;  %v9258_v52 = vld [vmem:[#allocation5 + $0x220] ss:$16 sps:$4 sm:$0xff]   ;;  %v9266_v57 = vld [vmem:[#allocation5 + $0x3e4] ss:$16 sps:$4 sm:$0xff]  }
 0x182   :  { %v9225_v58 = vld [vmem:[#allocation5 + $0x1e0] ss:$16 sps:$4 sm:$0xff]  }
 0x184   :  { %3488 = vmatpush1.bf16.msra.mxu0 %v9195_v20  ;;  %3681 = vmatpush1.bf16.msra.mxu1 %v9213_v37  ;;  %v9264_v20 = vld [vmem:[#allocation5 + $0x3e0] ss:$16 sps:$4 sm:$0xff]   ;;  %v9236_v37 = vld [vmem:[#allocation5 + $0x1a4] ss:$16 sps:$4 sm:$0xff]  }
 0x185   :  { %3489 = vmatprep.subr.bf16.mxu0 %v9200_v8  ;;  %3682 = vmatprep.subr.bf16.mxu1 %v9224_v9  ;;  %v9272_v8 = vld [vmem:[#allocation5 + $0x3a4] ss:$16 sps:$4 sm:$0xff]   ;;  %v9234_v9 = vld [vmem:[#allocation5 + $0x1a0] ss:$16 sps:$4 sm:$0xff]  }
 0x186   :  { %2128 = vmatmul.mubr.bf16.gmra.mxu0 %v9817_v43  ;;  %2321 = vmatmul.mubr.bf16.gmra.mxu1 %v9820_v44  ;;  %v9212_v43 = vld [vmem:[#allocation5 + $0x44] ss:$16 sps:$4 sm:$0xff]  }
 0x187   :  { %2137 = vmatprep.mubr.bf16.mxu0 %v9831_v7  ;;  %2330 = vmatprep.mubr.bf16.mxu1 %v9834_v10  ;;  %v9251_v44 = vld [vmem:[#allocation5 + $0x244] ss:$16 sps:$4 sm:$0xff]   ;;  %v9210_v7 = vld [vmem:[#allocation5 + $0x40] ss:$16 sps:$4 sm:$0xff]  }
 0x188   :  { %3490 = vmatpush1.bf16.msra.mxu0 %v9198_v18  ;;  %3683 = vmatpush1.bf16.msra.mxu1 %v9222_v29  ;;  %v9249_v10 = vld [vmem:[#allocation5 + $0x240] ss:$16 sps:$4 sm:$0xff]   ;;  %v9275_v29 = vld [vmem:[#allocation5 + $0x384] ss:$16 sps:$4 sm:$0xff]  }
 0x189   :  { %3491 = vmatprep.subr.bf16.mxu0 %v9203_v11  ;;  %3684 = vmatprep.subr.bf16.mxu1 %v9233_v12  ;;  %v9270_v18 = vld [vmem:[#allocation5 + $0x3a0] ss:$16 sps:$4 sm:$0xff]   ;;  %v9248_v12 = vld [vmem:[#allocation5 + $0x144] ss:$16 sps:$4 sm:$0xff]  }
 0x18a   :  { %v9243_v11 = vld [vmem:[#allocation5 + $0x160] ss:$16 sps:$4 sm:$0xff]  }
 0x18c   :  { %3492 = vmatpush1.bf16.msra.mxu0 %v9201_v38  ;;  %3685 = vmatpush1.bf16.msra.mxu1 %v9231_v39  ;;  %v9252_v38 = vld [vmem:[#allocation5 + $0x120] ss:$16 sps:$4 sm:$0xff]   ;;  %v9257_v39 = vld [vmem:[#allocation5 + $0x104] ss:$16 sps:$4 sm:$0xff]  }
 0x18d   :  { %3493 = vmatprep.subr.bf16.mxu0 %v9209_v21  ;;  %3686 = vmatprep.subr.bf16.mxu1 %v9242_v33 }
 0x18e   :  { %2138 = vmatmul.mubr.bf16.gmra.mxu0 %v9837_v16  ;;  %2331 = vmatmul.mubr.bf16.gmra.mxu1 %v9840_v17  ;;  %v9221_v16 = vld [vmem:[#allocation5 + $0x4] ss:$16 sps:$4 sm:$0xff]  }
 0x18f   :  { %2147 = vmatprep.mubr.bf16.mxu0 %v9851_v46  ;;  %2340 = vmatprep.mubr.bf16.mxu1 %v9854_v47  ;;  %v9263_v17 = vld [vmem:[#allocation5 + $0x204] ss:$16 sps:$4 sm:$0xff]   ;;  %v9219_v46 = vld [vmem:[#allocation5] ss:$16 sps:$4 sm:$0xff]  }
 0x190   :  { %3494 = vmatpush1.bf16.msra.mxu0 %v9207_v24  ;;  %3687 = vmatpush1.bf16.msra.mxu1 %v9240_v36  ;;  %v9261_v47 = vld [vmem:[#allocation5 + $0x200] ss:$16 sps:$4 sm:$0xff]  }
 0x191   :  { %3495 = vmatprep.subr.bf16.mxu0 %v9212_v43  ;;  %3688 = vmatprep.subr.bf16.mxu1 %v9251_v44  ;;  %v12770_v44 = vld [vmem:[#allocation14_spill] sm:$0xff] }
 0x194   :  { %3496 = vmatpush1.bf16.msra.mxu0 %v9210_v7  ;;  %3689 = vmatpush1.bf16.msra.mxu1 %v9249_v10  ;;  %v12771_v7 = vld [vmem:[#allocation15_spill] sm:$0xff] }
 0x195   :  { %3497 = vmatprep.subr.bf16.mxu0 %v9218_v0  ;;  %3690 = vmatprep.subr.bf16.mxu1 %v9260_v34  ;;  %v9293_v34 = vld [vmem:[#allocation5 + $0x304] ss:$16 sps:$4 sm:$0xff]  }
 0x196   :  { %2148 = vmatmul.mubr.bf16.gmra.mxu0 %v9857_v51  ;;  %2341 = vmatmul.mubr.bf16.gmra.mxu1 %v9860_v53  ;;  %v9230_v51 = vld [vmem:[#allocation5 + $0x1c4] ss:$16 sps:$4 sm:$0xff]  }
 0x197   :  { %2157 = vmatprep.mubr.bf16.mxu0 %v9871_v22  ;;  %2350 = vmatprep.mubr.bf16.mxu1 %v9874_v23  ;;  %v9269_v53 = vld [vmem:[#allocation5 + $0x3c4] ss:$16 sps:$4 sm:$0xff]   ;;  %v9228_v22 = vld [vmem:[#allocation5 + $0x1c0] ss:$16 sps:$4 sm:$0xff]  }
 0x198   :  { %3498 = vmatpush1.bf16.msra.mxu0 %v9216_v25  ;;  %3691 = vmatpush1.bf16.msra.mxu1 %v9258_v52  ;;  %v9267_v23 = vld [vmem:[#allocation5 + $0x3c0] ss:$16 sps:$4 sm:$0xff]  }
 0x199   :  { %3499 = vmatprep.subr.bf16.mxu0 %v9221_v16  ;;  %3692 = vmatprep.subr.bf16.mxu1 %v9263_v17  ;;  %v9291_v25 = vld [vmem:[#allocation5 + $0x300] ss:$16 sps:$4 sm:$0xff]  }
 0x19c   :  { %3500 = vmatpush1.bf16.msra.mxu0 %v9219_v46  ;;  %3693 = vmatpush1.bf16.msra.mxu1 %v9261_v47 }
 0x19d   :  { %3501 = vmatprep.subr.bf16.mxu0 %v9227_v54  ;;  %3694 = vmatprep.subr.bf16.mxu1 %v9266_v57  ;;  %v12772_v54 = vld [vmem:[#allocation16_spill] sm:$0xff]  ;;  %v12773_v57 = vld [vmem:[#allocation17_spill] sm:$0xff] }
 0x19e   :  { %2158 = vmatmul.mubr.bf16.gmra.mxu0 %v9877_v27  ;;  %2351 = vmatmul.mubr.bf16.gmra.mxu1 %v9880_v28  ;;  %v9239_v27 = vld [vmem:[#allocation5 + $0x184] ss:$16 sps:$4 sm:$0xff]   ;;  %v9237_v28 = vld [vmem:[#allocation5 + $0x180] ss:$16 sps:$4 sm:$0xff]  }
 0x19f   :  { %2167 = vmatprep.mubr.bf16.mxu0 %v9891_v2  ;;  %2360 = vmatprep.mubr.bf16.mxu1 %v9894_v3  ;;  %v9245_v2 = vld [vmem:[#allocation5 + $0x164] ss:$16 sps:$4 sm:$0xff]   ;;  %v9273_v3 = vld [vmem:[#allocation5 + $0x380] ss:$16 sps:$4 sm:$0xff]  }
 0x1a0   :  { %3502 = vmatpush2.bf16.msra.mxu0 %v9225_v58  ;;  %3695 = vmatpush2.bf16.msra.mxu1 %v9264_v20  ;;  %v12774_v58 = vld [vmem:[#allocation18_spill] sm:$0xff]  ;;  %v12775_v20 = vld [vmem:[#allocation19_spill] sm:$0xff] }
 0x1a1   :  { %3503 = vmatprep.subr.bf16.mxu0 %v9230_v51  ;;  %3696 = vmatprep.subr.bf16.mxu1 %v9269_v53 }
 0x1a4   :  { %3504 = vmatpush2.bf16.msra.mxu0 %v9228_v22  ;;  %3697 = vmatpush2.bf16.msra.mxu1 %v9267_v23  ;;  %v9302_v22 = vld [vmem:[#allocation5 + $0x2ec] ss:$16 sps:$4 sm:$0xff]  }
 0x1a5   :  { %3505 = vmatprep.subr.bf16.mxu0 %v9236_v37  ;;  %3698 = vmatprep.subr.bf16.mxu1 %v9272_v8 }
 0x1a6   :  { %2168 = vmatmul.mubr.bf16.gmra.mxu0 %v9897_v13  ;;  %2361 = vmatmul.mubr.bf16.gmra.mxu1 %v9900_v14  ;;  %v9246_v13 = vld [vmem:[#allocation5 + $0x140] ss:$16 sps:$4 sm:$0xff]   ;;  %v9254_v14 = vld [vmem:[#allocation5 + $0x124] ss:$16 sps:$4 sm:$0xff]  }
 0x1a7   :  { %2177 = vmatprep.mubr.bf16.mxu0 %v9911_v55  ;;  %2370 = vmatprep.mubr.bf16.mxu1 %v9914_v56  ;;  %v9276_v55 = vld [vmem:[#allocation5 + $0x360] ss:$16 sps:$4 sm:$0xff]   ;;  %v9278_v56 = vld [vmem:[#allocation5 + $0x364] ss:$16 sps:$4 sm:$0xff]  }
 0x1a8   :  { %3506 = vmatpush2.bf16.msra.mxu0 %v9234_v9  ;;  %3699 = vmatpush2.bf16.msra.mxu1 %v9270_v18 }
 0x1a9   :  { %3507 = vmatprep.subr.bf16.mxu0 %v9239_v27  ;;  %3700 = vmatprep.subr.bf16.mxu1 %v9275_v29  ;;  %v12779_v29 = vld [vmem:[#allocation23_spill] sm:$0xff] }
 0x1ac   :  { %3508 = vmatpush2.bf16.msra.mxu0 %v9237_v28  ;;  %3701 = vmatpush2.bf16.msra.mxu1 %v9273_v3  ;;  %v12776_v28 = vld [vmem:[#allocation20_spill] sm:$0xff]  ;;  %v12778_v3 = vld [vmem:[#allocation22_spill] sm:$0xff] }
 0x1ad   :  { %3509 = vmatprep.subr.bf16.mxu0 %v9245_v2  ;;  %3702 = vmatprep.subr.bf16.mxu1 %v9278_v56  ;;  %v12777_v2 = vld [vmem:[#allocation21_spill] sm:$0xff] }
 0x1ae   :  { %2178 = vmatmul.mubr.bf16.gmra.mxu0 %v9917_v62  ;;  %2371 = vmatmul.mubr.bf16.gmra.mxu1 %v9920_v63  ;;  %v9255_v62 = vld [vmem:[#allocation5 + $0x100] ss:$16 sps:$4 sm:$0xff]  }
 0x1af   :  { %2187 = vmatprep.mubr.bf16.mxu0 %v9931_v42  ;;  %2380 = vmatprep.mubr.bf16.mxu1 %v9934_v48  ;;  %v9279_v63 = vld [vmem:[#allocation5 + $0x340] ss:$16 sps:$4 sm:$0xff]   ;;  %v9281_v42 = vld [vmem:[#allocation5 + $0x344] ss:$16 sps:$4 sm:$0xff]   ;;  %v9287_v48 = vld [vmem:[#allocation5 + $0xec] ss:$16 sps:$4 sm:$0xff]  }
 0x1b0   :  { %3510 = vmatpush2.bf16.msra.mxu0 %v9243_v11  ;;  %3703 = vmatpush2.bf16.msra.mxu1 %v9276_v55 }
 0x1b1   :  { %3511 = vmatprep.subr.bf16.mxu0 %v9248_v12  ;;  %3704 = vmatprep.subr.bf16.mxu1 %v9281_v42  ;;  %v12781_v42 = vld [vmem:[#allocation25_spill] sm:$0xff] }
 0x1b4   :  { %3512 = vmatpush2.bf16.msra.mxu0 %v9246_v13  ;;  %3705 = vmatpush2.bf16.msra.mxu1 %v9279_v63  ;;  %v12780_v63 = vld [vmem:[#allocation24_spill] sm:$0xff] }
 0x1b5   :  { %3513 = vmatprep.subr.bf16.mxu0 %v9254_v14 }
 0x1b6   :  { %2188 = vmatmul.mubr.bf16.gmra.mxu0 %v9937_v60  ;;  %2381 = vmatmul.mubr.bf16.gmra.mxu1 %v9940_v61 }
 0x1b7   :  { %2197 = vmatprep.mubr.bf16.mxu0 %v9951_v40  ;;  %2390 = vmatprep.mubr.bf16.mxu1 %v9954_v41  ;;  %v9282_v40 = vld [vmem:[#allocation5 + $0x320] ss:$16 sps:$4 sm:$0xff]   ;;  %v9284_v41 = vld [vmem:[#allocation5 + $0x324] ss:$16 sps:$4 sm:$0xff]  }
 0x1b8   :  { %3514 = vmatpush2.bf16.msra.mxu0 %v9252_v38  ;;  %3706 = vmatprep.subr.bf16.mxu1 %v9284_v41  ;;  %v8573_v38 = vld.sshfl [vmem:[%s12689_s4] sm:$0x33 pattern:$0x75316420] }
 0x1b9   :  { %3515 = vmatprep.subr.bf16.mxu0 %v9257_v39  ;;  %3707 = vmatpush2.bf16.msra.mxu1 %v9282_v40 }
 0x1ba   :  { %3708 = vmatprep.subr.bf16.mxu1 %v9293_v34 }
 0x1bc   :  { %3516 = vmatpush2.bf16.msra.mxu0 %v9255_v62 }
 0x1bd   :  { %3871 = vmatprep.subr.bf16.mxu0 %v9287_v48  ;;  %3709 = vmatpush2.bf16.msra.mxu1 %v9291_v25  ;;  %v12782_v48 = vld [vmem:[#allocation26_spill] sm:$0xff] }
 0x1be   :  { %v10140_v21 = vpop.f32.mrf.mxu0  ;;  %v10142_v33 = vpop.f32.mrf.mxu1  ;;  %2198 = vmatmul.mubr.bf16.gmra.mxu0 %v9957_v4  ;;  %2391 = vmatmul.mubr.bf16.gmra.mxu1 %v9960_v6 }
 0x1bf   :  { %2207 = vmatprep.mubr.bf16.mxu0 %v9971_v49  ;;  %2400 = vmatprep.mubr.bf16.mxu1 %v9974_v19  ;;  %v12769_v19 = vld [vmem:[#allocation13_spill] sm:$0xff] }
 0x1c0   :  { %v10148_v60 = vpop.f32.mrf.mxu0  ;;  %v10150_v61 = vpop.f32.mrf.mxu1  ;;  %4064 = vmatprep.subr.bf16.mxu1 %v9302_v22  ;;  %v12786_v22 = vld [vmem:[#allocation28_spill] sm:$0xff] }
 0x1c2   :  { %v10152_v24 = vpop.f32.mrf.mxu0  ;;  %v10154_v36 = vpop.f32.mrf.mxu1 }
 0x1c4   :  { %v10156_v43 = vpop.f32.mrf.mxu0  ;;  %v10158_v4 = vpop.f32.mrf.mxu1 }
 0x1c6   :  { %v10160_v6 = vpop.f32.mrf.mxu0  ;;  %v10162_v49 = vpop.f32.mrf.mxu1  ;;  %2208 = vmatmul.mubr.bf16.gmra.mxu0 %v9977_v15  ;;  %2401 = vmatmul.mubr.bf16.gmra.mxu1 %v12769_v19  ;;  %v2544_v19 = vcombine.high %v8573_v38, %v8573_v38 }
 0x1c7   :  { %2217 = vmatprep.mubr.bf16.mxu0 %v12770_v44  ;;  %2410 = vmatprep.mubr.bf16.mxu1 %v12771_v7 }
 0x1c8   :  { %v10168_v10 = vpop.f32.mrf.mxu0  ;;  %v10170_v0 = vpop.f32.mrf.mxu1 }
 0x1ca   :  { %v10172_v52 = vpop.f32.mrf.mxu0  ;;  %v10174_v16 = vpop.f32.mrf.mxu1 }
 0x1cc   :  { %v10176_v17 = vpop.f32.mrf.mxu0  ;;  %v10178_v15 = vpop.f32.mrf.mxu1 }
 0x1ce   :  { %v10180_v46 = vpop.f32.mrf.mxu0  ;;  %v10182_v47 = vpop.f32.mrf.mxu1  ;;  %2218 = vmatmul.mubr.bf16.gmra.mxu0 %v12772_v54  ;;  %2411 = vmatmul.mubr.bf16.gmra.mxu1 %v12773_v57  ;;  %v12783_v54 = vld [vmem:[#allocation11_spill] sm:$0xff] }
 0x1cf   :  { %2227 = vmatprep.mubr.bf16.mxu0 %v12774_v58  ;;  %2420 = vmatprep.mubr.bf16.mxu1 %v12775_v20  ;;  %v10244_v57 = vrot.slane %v2544_v19, %v12783_v54  ;;  %v12785_v20 = vld [vmem:[#allocation27_spill] sm:$0xff] }
 0x1d0   :  { %v10188_v51 = vpop.f32.mrf.mxu0  ;;  %v10190_v53 = vpop.f32.mrf.mxu1 }
 0x1d1   :  { %12784 = vst [vmem:[#allocation13_spill] sm:$0xff] %v10244_v57 }
 0x1d2   :  { %v10192_v23 = vpop.f32.mrf.mxu0  ;;  %v10194_v37 = vpop.f32.mrf.mxu1 }
 0x1d4   :  { %v10196_v8 = vpop.f32.mrf.mxu0  ;;  %v10198_v9 = vpop.f32.mrf.mxu1 }
 0x1d6   :  { %v10200_v18 = vpop.f32.mrf.mxu0  ;;  %v10202_v27 = vpop.f32.mrf.mxu1  ;;  %2228 = vmatmul.mubr.bf16.gmra.mxu0 %v12776_v28  ;;  %2421 = vmatmul.mubr.bf16.gmra.mxu1 %v12777_v2 }
 0x1d7   :  { %2237 = vmatprep.mubr.bf16.mxu0 %v12778_v3  ;;  %2430 = vmatprep.mubr.bf16.mxu1 %v12779_v29  ;;  %v1933_v3 = vadd.f32 %v10158_v4, %v10156_v43  ;;  %v2569_v29 = vpack.i.b16 %v10244_v57, %v10244_v57 }
 0x1d8   :  { %v10208_v11 = vpop.f32.mrf.mxu0  ;;  %v10210_v12 = vpop.f32.mrf.mxu1 }
 0x1da   :  { %v10212_v13 = vpop.f32.mrf.mxu0  ;;  %v10214_v14 = vpop.f32.mrf.mxu1 }
 0x1dc   :  { %v10216_v55 = vpop.f32.mrf.mxu0  ;;  %v10218_v56 = vpop.f32.mrf.mxu1 }
 0x1de   :  { %v10223_v39 = vpop.f32.mrf.mxu0  ;;  %v10225_v62 = vpop.f32.mrf.mxu1  ;;  %2238 = vmatmul.mubr.bf16.gmra.mxu0 %v12780_v63  ;;  %2431 = vmatmul.mubr.bf16.gmra.mxu1 %v12781_v42 }
 0x1df   :  { %2247 = vmatprep.mubr.bf16.mxu0 %v10051_v32  ;;  %2440 = vmatprep.mubr.bf16.mxu1 %v12782_v48  ;;  %v1929_v48 = vadd.f32 %v10150_v61, %v10148_v60  ;;  %v1931_v60 = vadd.f32 %v10154_v36, %v10152_v24  ;;  %v1939_v24 = vadd.f32 %v10170_v0, %v10168_v10 }
 0x1e0   :  { %v10231_v40 = vpop.f32.mrf.mxu0  ;;  %v10233_v41 = vpop.f32.mrf.mxu1  ;;  %v1941_v0 = vadd.f32 %v10174_v16, %v10172_v52  ;;  %v9285_v52 = vld [vmem:[#allocation5 + $0xe8] ss:$16 sps:$4 sm:$0xff]  }
 0x1e2   :  { %v10235_v44 = vpop.f32.mrf.mxu0  ;;  %v10237_v7 = vpop.f32.mrf.mxu1 }
 0x1e4   :  { %v10239_v34 = vpop.f32.mrf.mxu0  ;;  %v10241_v25 = vpop.f32.mrf.mxu1 }
 0x1e6   :  { %v10246_v58 = vpop.f32.mrf.mxu0  ;;  %v10248_v32 = vpop.f32.mrf.mxu1  ;;  %2248 = vmatmul.mubr.bf16.gmra.mxu0 %v12785_v20  ;;  %2441 = vmatmul.mubr.bf16.gmra.mxu1 %v12786_v22  ;;  %v2472_v20 = vpack.c.bf16 %v1933_v3, %v1929_v48  ;;  %v12788_v22 = vld [vmem:[#allocation12_spill] sm:$0xff] }
 0x1e7   :  { %2257 = vmatprep.mubr.bf16.mxu0 %v10071_v45  ;;  %2450 = vmatprep.mubr.bf16.mxu1 %v10074_v1  ;;  %v10269_v45 = vrot.slane %v8573_v38, %v12783_v54  ;;  %v10276_v43 = vrot.slane %v2569_v29, %v12788_v22 }
 0x1e8   :  { %v10254_v28 = vpop.f32.mrf.mxu0  ;;  %v10256_v2 = vpop.f32.mrf.mxu1 }
 0x1e9   :  { %12787 = vst [vmem:[#allocation14_spill] sm:$0xff] %v10269_v45  ;;  %v2562_v61 = vpack.i.b16 %v10269_v45, %v10269_v45  ;;  %v2590_v29 = vadd.bf16 %v10276_v43, %v2472_v20 }
 0x1ea   :  { %v10262_v63 = vpop.f32.mrf.mxu0  ;;  %v10264_v42 = vpop.f32.mrf.mxu1 }
 0x1eb   :  { %v10306_v48 = vrot.slane %v2562_v61, %v12788_v22 }
 0x1ec   :  { %v10271_v1 = vpop.f32.mrf.mxu0  ;;  %v10273_v19 = vpop.f32.mrf.mxu1 }
 0x1ee   :  { %v10278_v4 = vpop.f32.mrf.mxu0  ;;  %v10280_v57 = vpop.f32.mrf.mxu1  ;;  %2258 = vmatmul.mubr.bf16.gmra.mxu0 %v10077_v26  ;;  %2451 = vmatmul.mubr.bf16.gmra.mxu1 %v10080_v35  ;;  %v1943_v26 = vadd.f32 %v10178_v15, %v10176_v17  ;;  %v1927_v35 = vadd.f32 %v10142_v33, %v10140_v21  ;;  %v10313_v17 = vmax.bf16 %v12752_v59, %v2590_v29 }
 0x1ef   :  { %2267 = vmatprep.mubr.bf16.mxu0 %v10091_v50  ;;  %2460 = vmatprep.mubr.bf16.mxu1 %v10094_v30  ;;  %v1953_v29 = vadd.f32 %v10198_v9, %v10196_v8  ;;  %v9290_v8 = vld [vmem:[#allocation5 + $0xcc] ss:$16 sps:$4 sm:$0xff]  }
 0x1f0   :  { %v10290_v38 = vpop.f32.mrf.mxu0  ;;  %v10292_v3 = vpop.f32.mrf.mxu1  ;;  %v2471_v36 = vpack.c.bf16 %v1931_v60, %v1927_v35  ;;  %v2476_v45 = vpack.c.bf16 %v1943_v26, %v1939_v24  ;;  %12789 = vst [vmem:[#allocation15_spill] sm:$0xff] %v10313_v17  ;;  %v1949_v35 = vadd.f32 %v10190_v53, %v10188_v51  ;;  %v9288_v51 = vld [vmem:[#allocation5 + $0xc8] ss:$16 sps:$4 sm:$0xff]  }
 0x1f2   :  { %v10299_v50 = vpop.f32.mrf.mxu0  ;;  %v10301_v30 = vpop.f32.mrf.mxu1  ;;  %v2589_v10 = vadd.bf16 %v10306_v48, %v2471_v36  ;;  %v2594_v61 = vadd.bf16 %v10276_v43, %v2476_v45  ;;  %v2480_v9 = vpack.c.bf16 %v1953_v29, %v1949_v35  ;;  %v1963_v35 = vadd.f32 %v10218_v56, %v10216_v55  ;;  %v9299_v55 = vld [vmem:[#allocation5 + $0x8c] ss:$16 sps:$4 sm:$0xff]  }
 0x1f4   :  { %v10308_v54 = vpop.f32.mrf.mxu0  ;;  %v10310_v20 = vpop.f32.mrf.mxu1  ;;  %v10341_v16 = vmax.bf16 %v12752_v59, %v2589_v10  ;;  %v1951_v10 = vadd.f32 %v10194_v37, %v10192_v23  ;;  %v1959_v23 = vadd.f32 %v10210_v12, %v10208_v11  ;;  %v9294_v37 = vld [vmem:[#allocation5 + $0xa8] ss:$16 sps:$4 sm:$0xff]  }
 0x1f5   :  { %v9297_v11 = vld [vmem:[#allocation5 + $0x88] ss:$16 sps:$4 sm:$0xff]  }
 0x1f6   :  { %v10315_v21 = vpop.f32.mrf.mxu0  ;;  %v10317_v33 = vpop.f32.mrf.mxu1  ;;  %2268 = vmatmul.mubr.bf16.gmra.mxu0 %v10097_v5  ;;  %2461 = vmatmul.mubr.bf16.gmra.mxu1 %v10100_v31  ;;  %v1937_v5 = vadd.f32 %v10162_v49, %v10160_v6  ;;  %12790 = vst [vmem:[#allocation16_spill] sm:$0xff] %v10341_v16  ;;  %v10348_v6 = vmax.bf16 %v12752_v59, %v2594_v61  ;;  %v9296_v61 = vld [vmem:[#allocation5 + $0xac] ss:$16 sps:$4 sm:$0xff]  }
 0x1f7   :  { %3517 = vmatprep.mubr.bf16.mxu0 %v10313_v17 }
 0x1f8   :  { %v10325_v15 = vpop.f32.mrf.mxu0  ;;  %v10327_v60 = vpop.f32.mrf.mxu1  ;;  %v2475_v24 = vpack.c.bf16 %v1941_v0, %v1937_v5  ;;  %12791 = vst [vmem:[#allocation17_spill] sm:$0xff] %v10348_v6  ;;  %v2598_v5 = vadd.bf16 %v10276_v43, %v2480_v9 }
 0x1fa   :  { %v10334_v31 = vpop.f32.mrf.mxu0  ;;  %v10336_v26 = vpop.f32.mrf.mxu1  ;;  %v2593_v53 = vadd.bf16 %v10306_v48, %v2475_v24 }
 0x1fc   :  { %v10343_v36 = vpop.f32.mrf.mxu0  ;;  %v10345_v45 = vpop.f32.mrf.mxu1 }
 0x1fe   :  { %v10350_v49 = vpop.f32.mrf.mxu0  ;;  %v10352_v17 = vpop.f32.mrf.mxu1  ;;  %3518 = vmatmul.mubr.bf16.vlgmr.msra.gmra.mxu0 %v10341_v16 }
 0x1ff   :  { %12792 = vst [vmem:[#allocation18_spill] sm:$0xff] %v10352_v17  ;;  %3527 = vmatprep.mubr.bf16.mxu0 %v10348_v6  ;;  %3872 = vmatpush1.bf16.msra.mxu0 %v9285_v52  ;;  %v1947_v52 = vadd.f32 %v10182_v47, %v10180_v46  ;;  %v2484_v46 = vpack.c.bf16 %v1963_v35, %v1959_v23 }
 0x200   :  { %v10359_v0 = vpop.f32.mrf.mxu0  ;;  %v10361_v29 = vpop.f32.mrf.mxu1  ;;  %3873 = vmatprep.subr.bf16.mxu0 %v9290_v8  ;;  %v10375_v8 = vmax.bf16 %v12752_v59, %v2593_v53  ;;  %v10382_v47 = vmax.bf16 %v12752_v59, %v2598_v5  ;;  %v1973_v35 = vadd.f32 %v10241_v25, %v10239_v34  ;;  %v9308_v34 = vld [vmem:[#allocation5 + $0x4c] ss:$16 sps:$4 sm:$0xff]  }
 0x201   :  { %v2479_v16 = vpack.c.bf16 %v1951_v10, %v1947_v52  ;;  %v2602_v5 = vadd.bf16 %v10276_v43, %v2484_v46  ;;  %v1957_v52 = vadd.f32 %v10202_v27, %v10200_v18 }
 0x202   :  { %v10368_v6 = vpop.f32.mrf.mxu0  ;;  %v10370_v24 = vpop.f32.mrf.mxu1  ;;  %12793 = vst [vmem:[#allocation19_spill] sm:$0xff] %v10375_v8  ;;  %12794 = vst [vmem:[#allocation20_spill] sm:$0xff] %v10382_v47 }
 0x203   :  { %3874 = vmatpush1.bf16.msra.mxu0 %v9288_v51  ;;  %v2597_v12 = vadd.bf16 %v10306_v48, %v2479_v16  ;;  %v1961_v51 = vadd.f32 %v10214_v14, %v10212_v13  ;;  %v1969_v13 = vadd.f32 %v10233_v41, %v10231_v40  ;;  %v9303_v14 = vld [vmem:[#allocation5 + $0x68] ss:$16 sps:$4 sm:$0xff]   ;;  %v10416_v27 = vmax.bf16 %v12752_v59, %v2602_v5 }
 0x204   :  { %v10377_v9 = vpop.f32.mrf.mxu0  ;;  %v10379_v22 = vpop.f32.mrf.mxu1  ;;  %3875 = vmatprep.subr.bf16.mxu0 %v9296_v61  ;;  %v9305_v61 = vld [vmem:[#allocation5 + $0x6c] ss:$16 sps:$4 sm:$0xff]   ;;  %v9306_v40 = vld [vmem:[#allocation5 + $0x48] ss:$16 sps:$4 sm:$0xff]  }
 0x205   :  { %v2488_v18 = vpack.c.bf16 %v1973_v35, %v1969_v13  ;;  %12796 = vst [vmem:[#allocation22_spill] sm:$0xff] %v10416_v27  ;;  %v1983_v35 = vadd.f32 %v10273_v19, %v10271_v1  ;;  %v9317_v1 = vld [vmem:[#allocation5 + $0xc] ss:$16 sps:$4 sm:$0xff]  }
 0x206   :  { %v10384_v56 = vpop.f32.mrf.mxu0  ;;  %v10386_v17 = vpop.f32.mrf.mxu1  ;;  %3528 = vmatmul.mubr.bf16.gmra.mxu0 %v10375_v8 }
 0x207   :  { %3537 = vmatprep.mubr.bf16.mxu0 %v10382_v47  ;;  %3876 = vmatpush1.bf16.msra.mxu0 %v9294_v37  ;;  %v10409_v37 = vmax.bf16 %v12752_v59, %v2597_v12  ;;  %v2606_v5 = vadd.bf16 %v10276_v43, %v2488_v18 }
 0x208   :  { %v10393_v53 = vpop.f32.mrf.mxu0  ;;  %v10395_v10 = vpop.f32.mrf.mxu1  ;;  %3877 = vmatprep.subr.bf16.mxu0 %v9299_v55  ;;  %v2483_v55 = vpack.c.bf16 %v1961_v51, %v1957_v52  ;;  %v1967_v52 = vadd.f32 %v10225_v62, %v10223_v39 }
 0x209   :  { %12795 = vst [vmem:[#allocation21_spill] sm:$0xff] %v10409_v37  ;;  %v10450_v62 = vmax.bf16 %v12752_v59, %v2606_v5 }
 0x20a   :  { %v10402_v23 = vpop.f32.mrf.mxu0  ;;  %v10404_v16 = vpop.f32.mrf.mxu1  ;;  %v2601_v41 = vadd.bf16 %v10306_v48, %v2483_v55 }
 0x20b   :  { %3878 = vmatpush1.bf16.msra.mxu0 %v9297_v11  ;;  %v1971_v11 = vadd.f32 %v10237_v7, %v10235_v44  ;;  %v1979_v44 = vadd.f32 %v10256_v2, %v10254_v28  ;;  %v9312_v7 = vld [vmem:[#allocation5 + $0x28] ss:$16 sps:$4 sm:$0xff]   ;;  %12798 = vst [vmem:[#allocation24_spill] sm:$0xff] %v10450_v62 }
 0x20c   :  { %v10411_v46 = vpop.f32.mrf.mxu0  ;;  %v10413_v47 = vpop.f32.mrf.mxu1  ;;  %3879 = vmatprep.subr.bf16.mxu0 %v9305_v61  ;;  %v9314_v61 = vld [vmem:[#allocation5 + $0x2c] ss:$16 sps:$4 sm:$0xff]   ;;  %v10443_v55 = vmax.bf16 %v12752_v59, %v2601_v41  ;;  %v9315_v28 = vld [vmem:[#allocation5 + $0x8] ss:$16 sps:$4 sm:$0xff]  }
 0x20d   :  { %v2492_v39 = vpack.c.bf16 %v1983_v35, %v1979_v44  ;;  %v1993_v35 = vadd.f32 %v10310_v20, %v10308_v54  ;;  %v9326_v54 = vld [vmem:[#allocation5 + $0x1cc] ss:$16 sps:$4 sm:$0xff]  }
 0x20e   :  { %v10418_v25 = vpop.f32.mrf.mxu0  ;;  %v10420_v8 = vpop.f32.mrf.mxu1  ;;  %3538 = vmatmul.mubr.bf16.gmra.mxu0 %v10409_v37  ;;  %12797 = vst [vmem:[#allocation23_spill] sm:$0xff] %v10443_v55 }
 0x20f   :  { %3547 = vmatprep.mubr.bf16.mxu0 %v10416_v27  ;;  %3880 = vmatpush1.bf16.msra.mxu0 %v9303_v14  ;;  %v2610_v5 = vadd.bf16 %v10276_v43, %v2492_v39 }
 0x210   :  { %v10427_v12 = vpop.f32.mrf.mxu0  ;;  %v10429_v51 = vpop.f32.mrf.mxu1  ;;  %3881 = vmatprep.subr.bf16.mxu0 %v9308_v34  ;;  %v2487_v34 = vpack.c.bf16 %v1971_v11, %v1967_v52  ;;  %v1977_v52 = vadd.f32 %v10248_v32, %v10246_v58 }
 0x211   :  { %v10484_v32 = vmax.bf16 %v12752_v59, %v2610_v5 }
 0x212   :  { %v10436_v13 = vpop.f32.mrf.mxu0  ;;  %v10438_v14 = vpop.f32.mrf.mxu1  ;;  %v2605_v2 = vadd.bf16 %v10306_v48, %v2487_v34 }
 0x213   :  { %3882 = vmatpush1.bf16.msra.mxu0 %v9306_v40  ;;  %v1981_v40 = vadd.f32 %v10264_v42, %v10262_v63  ;;  %v1989_v63 = vadd.f32 %v10292_v3, %v10290_v38  ;;  %v9321_v42 = vld [vmem:[#allocation5 + $0x1e8] ss:$16 sps:$4 sm:$0xff]   ;;  %12800 = vst [vmem:[#allocation26_spill] sm:$0xff] %v10484_v32 }
 0x214   :  { %v10445_v18 = vpop.f32.mrf.mxu0  ;;  %v10447_v27 = vpop.f32.mrf.mxu1  ;;  %3883 = vmatprep.subr.bf16.mxu0 %v9314_v61  ;;  %v9323_v61 = vld [vmem:[#allocation5 + $0x1ec] ss:$16 sps:$4 sm:$0xff]   ;;  %v10477_v34 = vmax.bf16 %v12752_v59, %v2605_v2  ;;  %v9324_v38 = vld [vmem:[#allocation5 + $0x1c8] ss:$16 sps:$4 sm:$0xff]  }
 0x215   :  { %v2496_v58 = vpack.c.bf16 %v1993_v35, %v1989_v63  ;;  %v2003_v35 = vadd.f32 %v10345_v45, %v10343_v36  ;;  %v9335_v36 = vld [vmem:[#allocation5 + $0x18c] ss:$16 sps:$4 sm:$0xff]  }
 0x216   :  { %v10452_v19 = vpop.f32.mrf.mxu0  ;;  %v10454_v37 = vpop.f32.mrf.mxu1  ;;  %3548 = vmatmul.mubr.bf16.gmra.mxu0 %v10443_v55  ;;  %12799 = vst [vmem:[#allocation25_spill] sm:$0xff] %v10477_v34 }
 0x217   :  { %3557 = vmatprep.mubr.bf16.mxu0 %v10450_v62  ;;  %3884 = vmatpush1.bf16.msra.mxu0 %v9312_v7  ;;  %v2614_v5 = vadd.bf16 %v10276_v43, %v2496_v58 }
 0x218   :  { %v10461_v41 = vpop.f32.mrf.mxu0  ;;  %v10463_v11 = vpop.f32.mrf.mxu1  ;;  %3885 = vmatprep.subr.bf16.mxu0 %v9317_v1  ;;  %v2491_v1 = vpack.c.bf16 %v1981_v40, %v1977_v52  ;;  %v1987_v52 = vadd.f32 %v10280_v57, %v10278_v4 }
 0x219   :  { %v10518_v4 = vmax.bf16 %v12752_v59, %v2614_v5 }
 0x21a   :  { %v10470_v44 = vpop.f32.mrf.mxu0  ;;  %v10472_v7 = vpop.f32.mrf.mxu1  ;;  %v2609_v3 = vadd.bf16 %v10306_v48, %v2491_v1 }
 0x21b   :  { %3886 = vmatpush1.bf16.msra.mxu0 %v9315_v28  ;;  %v1991_v28 = vadd.f32 %v10301_v30, %v10299_v50  ;;  %v1999_v50 = vadd.f32 %v10327_v60, %v10325_v15  ;;  %v9330_v30 = vld [vmem:[#allocation5 + $0x1a8] ss:$16 sps:$4 sm:$0xff]   ;;  %12802 = vst [vmem:[#allocation28_spill] sm:$0xff] %v10518_v4 }
 0x21c   :  { %v10479_v39 = vpop.f32.mrf.mxu0  ;;  %v10481_v62 = vpop.f32.mrf.mxu1  ;;  %3887 = vmatprep.subr.bf16.mxu0 %v9323_v61  ;;  %v9332_v61 = vld [vmem:[#allocation5 + $0x1ac] ss:$16 sps:$4 sm:$0xff]   ;;  %v10511_v1 = vmax.bf16 %v12752_v59, %v2609_v3  ;;  %v9333_v15 = vld [vmem:[#allocation5 + $0x188] ss:$16 sps:$4 sm:$0xff]  }
 0x21d   :  { %v2500_v57 = vpack.c.bf16 %v2003_v35, %v1999_v50  ;;  %v2013_v35 = vadd.f32 %v10379_v22, %v10377_v9  ;;  %v9344_v22 = vld [vmem:[#allocation5 + $0x14c] ss:$16 sps:$4 sm:$0xff]  }
 0x21e   :  { %v10486_v20 = vpop.f32.mrf.mxu0  ;;  %v10488_v55 = vpop.f32.mrf.mxu1  ;;  %3558 = vmatmul.mubr.bf16.gmra.mxu0 %v10477_v34  ;;  %12801 = vst [vmem:[#allocation27_spill] sm:$0xff] %v10511_v1 }
 0x21f   :  { %3567 = vmatprep.mubr.bf16.mxu0 %v10484_v32  ;;  %3888 = vmatpush2.bf16.msra.mxu0 %v9321_v42  ;;  %v2618_v5 = vadd.bf16 %v10276_v43, %v2500_v57 }
 0x220   :  { %v10495_v2 = vpop.f32.mrf.mxu0  ;;  %v10497_v40 = vpop.f32.mrf.mxu1  ;;  %3889 = vmatprep.subr.bf16.mxu0 %v9326_v54  ;;  %v2495_v54 = vpack.c.bf16 %v1991_v28, %v1987_v52  ;;  %v1997_v52 = vadd.f32 %v10317_v33, %v10315_v21 }
 0x221   :  { %v10552_v33 = vmax.bf16 %v12752_v59, %v2618_v5 }
 0x222   :  { %v10504_v63 = vpop.f32.mrf.mxu0  ;;  %v10506_v42 = vpop.f32.mrf.mxu1  ;;  %v2613_v60 = vadd.bf16 %v10306_v48, %v2495_v54 }
 0x223   :  { %3890 = vmatpush2.bf16.msra.mxu0 %v9324_v38  ;;  %v2001_v38 = vadd.f32 %v10336_v26, %v10334_v31  ;;  %v2009_v31 = vadd.f32 %v10361_v29, %v10359_v0  ;;  %v9339_v26 = vld [vmem:[#allocation5 + $0x168] ss:$16 sps:$4 sm:$0xff]   ;;  %12804 = vst [vmem:[#allocation30_spill] sm:$0xff] %v10552_v33 }
 0x224   :  { %v10513_v58 = vpop.f32.mrf.mxu0  ;;  %v10515_v32 = vpop.f32.mrf.mxu1  ;;  %3891 = vmatprep.subr.bf16.mxu0 %v9332_v61  ;;  %v9341_v61 = vld [vmem:[#allocation5 + $0x16c] ss:$16 sps:$4 sm:$0xff]   ;;  %v10545_v54 = vmax.bf16 %v12752_v59, %v2613_v60  ;;  %v9342_v0 = vld [vmem:[#allocation5 + $0x148] ss:$16 sps:$4 sm:$0xff]  }
 0x225   :  { %v2504_v21 = vpack.c.bf16 %v2013_v35, %v2009_v31  ;;  %v2023_v35 = vadd.f32 %v10413_v47, %v10411_v46  ;;  %v9353_v47 = vld [vmem:[#allocation5 + $0x10c] ss:$16 sps:$4 sm:$0xff]  }
 0x226   :  { %v10520_v45 = vpop.f32.mrf.mxu0  ;;  %v10522_v34 = vpop.f32.mrf.mxu1  ;;  %3568 = vmatmul.mubr.bf16.gmra.mxu0 %v10511_v1  ;;  %12803 = vst [vmem:[#allocation29_spill] sm:$0xff] %v10545_v54 }
 0x227   :  { %3577 = vmatprep.mubr.bf16.mxu0 %v10518_v4  ;;  %3892 = vmatpush2.bf16.msra.mxu0 %v9330_v30  ;;  %v2622_v5 = vadd.bf16 %v10276_v43, %v2504_v21 }
 0x228   :  { %v10529_v3 = vpop.f32.mrf.mxu0  ;;  %v10531_v28 = vpop.f32.mrf.mxu1  ;;  %3893 = vmatprep.subr.bf16.mxu0 %v9335_v36  ;;  %v2499_v36 = vpack.c.bf16 %v2001_v38, %v1997_v52  ;;  %v12806_v52 = vld [vmem:[#allocation18_spill] sm:$0xff] }
 0x229   :  { %v2007_v31 = vadd.f32 %v12806_v52, %v10350_v49  ;;  %v10586_v46 = vmax.bf16 %v12752_v59, %v2622_v5 }
 0x22a   :  { %v10538_v50 = vpop.f32.mrf.mxu0  ;;  %v10540_v30 = vpop.f32.mrf.mxu1  ;;  %v2617_v29 = vadd.bf16 %v10306_v48, %v2499_v36 }
 0x22b   :  { %3894 = vmatpush2.bf16.msra.mxu0 %v9333_v15  ;;  %v2011_v15 = vadd.f32 %v10370_v24, %v10368_v6  ;;  %v2019_v6 = vadd.f32 %v10395_v10, %v10393_v53  ;;  %v9348_v24 = vld [vmem:[#allocation5 + $0x128] ss:$16 sps:$4 sm:$0xff]   ;;  %12808 = vst [vmem:[#allocation32_spill] sm:$0xff] %v10586_v46 }
 0x22c   :  { %v10547_v57 = vpop.f32.mrf.mxu0  ;;  %v10549_v4 = vpop.f32.mrf.mxu1  ;;  %3895 = vmatprep.subr.bf16.mxu0 %v9341_v61  ;;  %v9350_v61 = vld [vmem:[#allocation5 + $0x12c] ss:$16 sps:$4 sm:$0xff]   ;;  %v9351_v53 = vld [vmem:[#allocation5 + $0x108] ss:$16 sps:$4 sm:$0xff]  }
 0x22d   :  { %v2508_v49 = vpack.c.bf16 %v2023_v35, %v2019_v6  ;;  %v2017_v35 = vadd.f32 %v10386_v17, %v10384_v56  ;;  %v12813_v17 = vld [vmem:[#allocation13_spill] sm:$0xff] }
 0x22e   :  { %v10554_v9 = vpop.f32.mrf.mxu0  ;;  %v10556_v1 = vpop.f32.mrf.mxu1  ;;  %3578 = vmatmul.mubr.bf16.gmra.mxu0 %v10545_v54  ;;  %v2560_v56 = vcombine.high %v12813_v17, %v12813_v17  ;;  %v2027_v17 = vadd.f32 %v10420_v8, %v10418_v25 }
 0x22f   :  { %12805 = vst [vmem:[#allocation31_spill] sm:$0xff] %v10556_v1  ;;  %3587 = vmatprep.mubr.bf16.mxu0 %v10552_v33  ;;  %3896 = vmatpush2.bf16.msra.mxu0 %v9339_v26  ;;  %v2503_v33 = vpack.c.bf16 %v2011_v15, %v2007_v31  ;;  %v2626_v5 = vadd.bf16 %v10276_v43, %v2508_v49 }
 0x230   :  { %v10563_v60 = vpop.f32.mrf.mxu0  ;;  %v10565_v38 = vpop.f32.mrf.mxu1  ;;  %3897 = vmatprep.subr.bf16.mxu0 %v9344_v22  ;;  %v10579_v22 = vmax.bf16 %v12752_v59, %v2617_v29  ;;  %v2033_v29 = vadd.f32 %v10447_v27, %v10445_v18  ;;  %v2029_v31 = vadd.f32 %v10429_v51, %v10427_v12 }
 0x231   :  { %v2621_v10 = vadd.bf16 %v10306_v48, %v2503_v33  ;;  %v10624_v12 = vmax.bf16 %v12752_v59, %v2626_v5  ;;  %v2043_v5 = vadd.f32 %v10481_v62, %v10479_v39 }
 0x232   :  { %v10572_v26 = vpop.f32.mrf.mxu0  ;;  %v10574_v36 = vpop.f32.mrf.mxu1  ;;  %12807 = vst [vmem:[#allocation18_spill] sm:$0xff] %v10579_v22 }
 0x233   :  { %3898 = vmatpush2.bf16.msra.mxu0 %v9342_v0  ;;  %v2021_v0 = vadd.f32 %v10404_v16, %v10402_v23  ;;  %v12811_v23 = vld [vmem:[#allocation14_spill] sm:$0xff]  ;;  %v10615_v27 = vmax.bf16 %v12752_v59, %v2621_v10  ;;  %12814 = vst [vmem:[#allocation13_spill] sm:$0xff] %v10624_v12 }
 0x234   :  { %v10581_v21 = vpop.f32.mrf.mxu0  ;;  %v10583_v54 = vpop.f32.mrf.mxu1  ;;  %3899 = vmatprep.subr.bf16.mxu0 %v9350_v61  ;;  %v2559_v16 = vcombine.high %v12811_v23, %v12811_v23  ;;  %v2583_v23 = vpack.i.b16 %v2560_v56, %v2560_v56 }
 0x235   :  { %12812 = vst [vmem:[#allocation14_spill] sm:$0xff] %v10615_v27  ;;  %v2507_v18 = vpack.c.bf16 %v2021_v0, %v2017_v35  ;;  %v2031_v0 = vadd.f32 %v10438_v14, %v10436_v13 }
 0x236   :  { %v10588_v52 = vpop.f32.mrf.mxu0  ;;  %v10590_v1 = vpop.f32.mrf.mxu1  ;;  %3588 = vmatmul.mubr.bf16.gmra.mxu0 %v10579_v22 }
 0x237   :  { %12809 = vst [vmem:[#allocation33_spill] sm:$0xff] %v10588_v52  ;;  %12810 = vst [vmem:[#allocation34_spill] sm:$0xff] %v10590_v1  ;;  %3597 = vmatprep.mubr.bf16.mxu0 %v10586_v46  ;;  %3900 = vmatpush2.bf16.msra.mxu0 %v9348_v24  ;;  %v2512_v24 = vpack.c.bf16 %v2033_v29, %v2029_v31  ;;  %v2625_v10 = vadd.bf16 %v10306_v48, %v2507_v18  ;;  %v12815_v1 = vld [vmem:[#allocation12_spill] sm:$0xff] }
 0x238   :  { %v10599_v15 = vpop.f32.mrf.mxu0  ;;  %v10601_v61 = vpop.f32.mrf.mxu1  ;;  %3901 = vmatprep.subr.bf16.mxu0 %v9353_v47  ;;  %v10645_v62 = vrot.slane %v2583_v23, %v12815_v1  ;;  %v2049_v23 = vadd.f32 %v10497_v40, %v10495_v2 }
 0x239   :  { %v2630_v29 = vadd.bf16 %v10276_v43, %v2512_v24  ;;  %v10642_v14 = vmax.bf16 %v12752_v59, %v2625_v10  ;;  %v2511_v24 = vpack.c.bf16 %v2031_v0, %v2027_v17  ;;  %v2053_v10 = vadd.f32 %v10515_v32, %v10513_v58  ;;  %v9300_v58 = vld [vmem:[#allocation5 + $0x2e8] ss:$16 sps:$4 sm:$0xff]  }
 0x23a   :  { %v10608_v33 = vpop.f32.mrf.mxu0  ;;  %v10610_v6 = vpop.f32.mrf.mxu1 }
 0x23b   :  { %3902 = vmatpush2.bf16.msra.mxu0 %v9351_v53  ;;  %v2576_v53 = vpack.i.b16 %v2559_v16, %v2559_v16  ;;  %v2039_v16 = vadd.f32 %v10463_v11, %v10461_v41  ;;  %v10648_v8 = vmax.bf16 %v12752_v59, %v2630_v29 }
 0x23c   :  { %v10617_v47 = vpop.f32.mrf.mxu0  ;;  %v10619_v49 = vpop.f32.mrf.mxu1 }
 0x23d   :  { %v10639_v13 = vrot.slane %v2576_v53, %v12815_v1  ;;  %v2516_v25 = vpack.c.bf16 %v2043_v5, %v2039_v16  ;;  %v2041_v53 = vadd.f32 %v10472_v7, %v10470_v44 }
 0x23e   :  { %v2119_v51 = vpop.f32.mrf.mxu0  ;;  %v2312_v46 = vpop.f32.mrf.mxu1  ;;  %3598 = vmatmul.mubr.bf16.gmra.mxu0 %v10615_v27 }
 0x23f   :  { %3607 = vmatprep.mubr.bf16.mxu0 %v10624_v12  ;;  %v2313_v18 = vadd.f32 %v2312_v46, %v2119_v51  ;;  %v2629_v51 = vadd.bf16 %v10306_v48, %v2511_v24  ;;  %v2520_v24 = vpack.c.bf16 %v2053_v10, %v2049_v23  ;;  %v2047_v23 = vadd.f32 %v10488_v55, %v10486_v20 }
 0x240   :  { %v2121_v35 = vpop.f32.mrf.mxu0  ;;  %v2314_v31 = vpop.f32.mrf.mxu1 }
 0x241   :  { %v2315_v39 = vadd.f32 %v2314_v31, %v2121_v35  ;;  %v2037_v31 = vadd.f32 %v10454_v37, %v10452_v19  ;;  %v10668_v16 = vmax.bf16 %v12752_v59, %v2629_v51  ;;  %v2638_v10 = vadd.bf16 %v10276_v43, %v2520_v24 }
 0x242   :  { %v2123_v27 = vpop.f32.mrf.mxu0  ;;  %v2316_v22 = vpop.f32.mrf.mxu1 }
 0x243   :  { %v2317_v12 = vadd.f32 %v2316_v22, %v2123_v27  ;;  %v10702_v24 = vmax.bf16 %v12752_v59, %v2638_v10 }
 0x244   :  { %v2125_v56 = vpop.f32.mrf.mxu0  ;;  %v2318_v52 = vpop.f32.mrf.mxu1 }
 0x245   :  { %v2473_v41 = vpack.c.bf16 %v2317_v12, %v2313_v18  ;;  %v2319_v11 = vadd.f32 %v2318_v52, %v2125_v56  ;;  %v2634_v52 = vadd.bf16 %v10276_v43, %v2516_v25  ;;  %v2515_v18 = vpack.c.bf16 %v2041_v53, %v2037_v31  ;;  %v9311_v25 = vld [vmem:[#allocation5 + $0x2cc] ss:$16 sps:$4 sm:$0xff]  }
 0x246   :  { %v2129_v22 = vpop.f32.mrf.mxu0  ;;  %v2322_v46 = vpop.f32.mrf.mxu1  ;;  %3608 = vmatmul.mubr.bf16.gmra.mxu0 %v10642_v14  ;;  %v2051_v53 = vadd.f32 %v10506_v42, %v10504_v63  ;;  %v2059_v63 = vadd.f32 %v10531_v28, %v10529_v3  ;;  %v9329_v3 = vld [vmem:[#allocation5 + $0x28c] ss:$16 sps:$4 sm:$0xff]  }
 0x247   :  { %v2474_v27 = vpack.c.bf16 %v2319_v11, %v2315_v39  ;;  %3617 = vmatprep.mubr.bf16.mxu0 %v10648_v8  ;;  %v2591_v0 = vadd.bf16 %v10639_v13, %v2473_v41  ;;  %v2323_v44 = vadd.f32 %v2322_v46, %v2129_v22  ;;  %v10675_v41 = vmax.bf16 %v12752_v59, %v2634_v52  ;;  %v9320_v52 = vld [vmem:[#allocation5 + $0x2ac] ss:$16 sps:$4 sm:$0xff]  }
 0x248   :  { %v2131_v29 = vpop.f32.mrf.mxu0  ;;  %v2324_v12 = vpop.f32.mrf.mxu1  ;;  %v2633_v51 = vadd.bf16 %v10306_v48, %v2515_v18 }
 0x249   :  { %v2592_v35 = vadd.bf16 %v10645_v62, %v2474_v27  ;;  %v10671_v56 = vmax.bf16 %v12752_v59, %v2591_v0  ;;  %v2325_v2 = vadd.f32 %v2324_v12, %v2131_v29  ;;  %v9309_v27 = vld [vmem:[#allocation5 + $0x2c8] ss:$16 sps:$4 sm:$0xff]  }
 0x24a   :  { %v2133_v5 = vpop.f32.mrf.mxu0  ;;  %v2326_v17 = vpop.f32.mrf.mxu1  ;;  %v10696_v18 = vmax.bf16 %v12752_v59, %v2633_v51 }
 0x24b   :  { %v2327_v7 = vadd.f32 %v2326_v17, %v2133_v5  ;;  %v10665_v32 = vmax.bf16 %v12752_v59, %v2592_v35  ;;  %v2063_v35 = vadd.f32 %v10549_v4, %v10547_v57  ;;  %v2519_v4 = vpack.c.bf16 %v2051_v53, %v2047_v23  ;;  %v9336_v23 = vld [vmem:[#allocation5 + $0x268] ss:$16 sps:$4 sm:$0xff]  }
 0x24c   :  { %v2135_v37 = vpop.f32.mrf.mxu0  ;;  %v2328_v19 = vpop.f32.mrf.mxu1 }
 0x24d   :  { %v2477_v40 = vpack.c.bf16 %v2327_v7, %v2323_v44  ;;  %v2329_v39 = vadd.f32 %v2328_v19, %v2135_v37  ;;  %3710 = vmatprep.mubr.bf16.mxu1 %v10665_v32  ;;  %v2524_v28 = vpack.c.bf16 %v2063_v35, %v2059_v63  ;;  %v2069_v35 = vadd.f32 %v10565_v38, %v10563_v60  ;;  %v9347_v60 = vld [vmem:[#allocation5 + $0x24c] ss:$16 sps:$4 sm:$0xff]  }
 0x24e   :  { %v2139_v11 = vpop.f32.mrf.mxu0  ;;  %v2332_v22 = vpop.f32.mrf.mxu1  ;;  %3618 = vmatmul.mubr.bf16.gmra.mxu0 %v10668_v16  ;;  %3711 = vmatmul.mubr.bf16.vlgmr.msra.gmra.mxu1 %v10671_v56 }
 0x24f   :  { %v2478_v46 = vpack.c.bf16 %v2329_v39, %v2325_v2  ;;  %4065 = vmatpush1.bf16.msra.mxu1 %v9300_v58  ;;  %3627 = vmatprep.mubr.bf16.mxu0 %v10675_v41  ;;  %v2595_v0 = vadd.bf16 %v10639_v13, %v2477_v40  ;;  %v2333_v42 = vadd.f32 %v2332_v22, %v2139_v11  ;;  %v9318_v58 = vld [vmem:[#allocation5 + $0x2a8] ss:$16 sps:$4 sm:$0xff]  }
 0x250   :  { %v2141_v29 = vpop.f32.mrf.mxu0  ;;  %v2334_v12 = vpop.f32.mrf.mxu1  ;;  %4066 = vmatprep.subr.bf16.mxu1 %v9311_v25  ;;  %v9327_v11 = vld [vmem:[#allocation5 + $0x288] ss:$16 sps:$4 sm:$0xff]   ;;  %v2637_v22 = vadd.bf16 %v10306_v48, %v2519_v4 }
 0x251   :  { %v2596_v31 = vadd.bf16 %v10645_v62, %v2478_v46  ;;  %v10699_v57 = vmax.bf16 %v12752_v59, %v2595_v0  ;;  %v2335_v37 = vadd.f32 %v2334_v12, %v2141_v29  ;;  %v2061_v46 = vadd.f32 %v10540_v30, %v10538_v50  ;;  %v9338_v0 = vld [vmem:[#allocation5 + $0x26c] ss:$16 sps:$4 sm:$0xff]  }
 0x252   :  { %v2143_v5 = vpop.f32.mrf.mxu0  ;;  %v2336_v17 = vpop.f32.mrf.mxu1  ;;  %v2642_v29 = vadd.bf16 %v10276_v43, %v2524_v28  ;;  %v9345_v28 = vld [vmem:[#allocation5 + $0x248] ss:$16 sps:$4 sm:$0xff]  }
 0x253   :  { %v2337_v44 = vadd.f32 %v2336_v17, %v2143_v5  ;;  %v10693_v7 = vmax.bf16 %v12752_v59, %v2596_v31  ;;  %4067 = vmatpush1.bf16.msra.mxu1 %v9309_v27  ;;  %v2073_v27 = vadd.f32 %v10583_v54, %v10581_v21  ;;  %v10724_v5 = vmax.bf16 %v12752_v59, %v2637_v22 }
 0x254   :  { %v2145_v55 = vpop.f32.mrf.mxu0  ;;  %v2338_v20 = vpop.f32.mrf.mxu1  ;;  %4068 = vmatprep.subr.bf16.mxu1 %v9320_v52  ;;  %v2057_v52 = vadd.f32 %v10522_v34, %v10520_v45  ;;  %v10731_v4 = vmax.bf16 %v12752_v59, %v2642_v29  ;;  %v2083_v22 = vadd.f32 %v10619_v49, %v10617_v47 }
 0x255   :  { %v2481_v19 = vpack.c.bf16 %v2337_v44, %v2333_v42  ;;  %v2339_v25 = vadd.f32 %v2338_v20, %v2145_v55  ;;  %3720 = vmatprep.mubr.bf16.mxu1 %v10693_v7  ;;  %v2528_v63 = vpack.c.bf16 %v2073_v27, %v2069_v35  ;;  %v12816_v27 = vld [vmem:[#allocation31_spill] sm:$0xff] }
 0x256   :  { %v2149_v2 = vpop.f32.mrf.mxu0  ;;  %v2342_v40 = vpop.f32.mrf.mxu1  ;;  %3628 = vmatmul.mubr.bf16.gmra.mxu0 %v10696_v18  ;;  %3721 = vmatmul.mubr.bf16.gmra.mxu1 %v10699_v57  ;;  %v2523_v17 = vpack.c.bf16 %v2061_v46, %v2057_v52 }
 0x257   :  { %v2482_v39 = vpack.c.bf16 %v2339_v25, %v2335_v37  ;;  %3637 = vmatprep.mubr.bf16.mxu0 %v10702_v24  ;;  %4069 = vmatpush1.bf16.msra.mxu1 %v9318_v58  ;;  %v2599_v51 = vadd.bf16 %v10639_v13, %v2481_v19  ;;  %v2343_v31 = vadd.f32 %v2342_v40, %v2149_v2 }
 0x258   :  { %v2151_v53 = vpop.f32.mrf.mxu0  ;;  %v2344_v10 = vpop.f32.mrf.mxu1  ;;  %4070 = vmatprep.subr.bf16.mxu1 %v9329_v3  ;;  %v2641_v37 = vadd.bf16 %v10306_v48, %v2523_v17  ;;  %v2071_v19 = vadd.f32 %v10574_v36, %v10572_v26  ;;  %v2646_v25 = vadd.bf16 %v10276_v43, %v2528_v63  ;;  %v2079_v26 = vadd.f32 %v10601_v61, %v10599_v15  ;;  %v9359_v15 = vld [vmem:[#allocation5 + $0x20c] ss:$16 sps:$4 sm:$0xff]  }
 0x259   :  { %v2600_v12 = vadd.bf16 %v10645_v62, %v2482_v39  ;;  %v10727_v42 = vmax.bf16 %v12752_v59, %v2599_v51  ;;  %v2345_v38 = vadd.f32 %v2344_v10, %v2151_v53  ;;  %v2067_v51 = vadd.f32 %v12816_v27, %v10554_v9 }
 0x25a   :  { %v2153_v50 = vpop.f32.mrf.mxu0  ;;  %v2346_v30 = vpop.f32.mrf.mxu1  ;;  %v10752_v52 = vmax.bf16 %v12752_v59, %v2641_v37  ;;  %v2532_v61 = vpack.c.bf16 %v2083_v22, %v2079_v26  ;;  %v12818_v37 = vld [vmem:[#allocation34_spill] sm:$0xff] }
 0x25b   :  { %v2347_v54 = vadd.f32 %v2346_v30, %v2153_v50  ;;  %v10721_v21 = vmax.bf16 %v12752_v59, %v2600_v12  ;;  %4071 = vmatpush1.bf16.msra.mxu1 %v9327_v11  ;;  %v9356_v11 = vld [vmem:[#allocation5 + $0x22c] ss:$16 sps:$4 sm:$0xff]   ;;  %v9354_v12 = vld [vmem:[#allocation5 + $0x228] ss:$16 sps:$4 sm:$0xff]   ;;  %v2527_v47 = vpack.c.bf16 %v2071_v19, %v2067_v51  ;;  %v10758_v50 = vmax.bf16 %v12752_v59, %v2646_v25 }
 0x25c   :  { %v2155_v34 = vpop.f32.mrf.mxu0  ;;  %v2348_v45 = vpop.f32.mrf.mxu1  ;;  %4072 = vmatprep.subr.bf16.mxu1 %v9338_v0  ;;  %v9365_v51 = vld [vmem:[#allocation5 + $0x3cc] ss:$16 sps:$4 sm:$0xff]  }
 0x25d   :  { %v2485_v44 = vpack.c.bf16 %v2347_v54, %v2343_v31  ;;  %v2349_v58 = vadd.f32 %v2348_v45, %v2155_v34  ;;  %3730 = vmatprep.mubr.bf16.mxu1 %v10721_v21  ;;  %v9357_v34 = vld [vmem:[#allocation5 + $0x208] ss:$16 sps:$4 sm:$0xff]   ;;  %v2645_v45 = vadd.bf16 %v10306_v48, %v2527_v47 }
 0x25e   :  { %v2159_v55 = vpop.f32.mrf.mxu0  ;;  %v2352_v20 = vpop.f32.mrf.mxu1  ;;  %3638 = vmatmul.mubr.bf16.gmra.mxu0 %v10724_v5  ;;  %3731 = vmatmul.mubr.bf16.gmra.mxu1 %v10727_v42 }
 0x25f   :  { %v2486_v3 = vpack.c.bf16 %v2349_v58, %v2345_v38  ;;  %3647 = vmatprep.mubr.bf16.mxu0 %v10731_v4  ;;  %4073 = vmatpush1.bf16.msra.mxu1 %v9336_v23  ;;  %v2603_v2 = vadd.bf16 %v10639_v13, %v2485_v44  ;;  %v2353_v36 = vadd.f32 %v2352_v20, %v2159_v55  ;;  %v9362_v55 = vld [vmem:[#allocation5 + $0x3ec] ss:$16 sps:$4 sm:$0xff]  }
 0x260   :  { %v2161_v40 = vpop.f32.mrf.mxu0  ;;  %v2354_v39 = vpop.f32.mrf.mxu1  ;;  %4074 = vmatprep.subr.bf16.mxu1 %v9347_v60  ;;  %v2081_v60 = vadd.f32 %v10610_v6, %v10608_v33  ;;  %v2650_v20 = vadd.bf16 %v10276_v43, %v2532_v61  ;;  %v9360_v33 = vld [vmem:[#allocation5 + $0x3e8] ss:$16 sps:$4 sm:$0xff]   ;;  %v10776_v6 = vmax.bf16 %v12752_v59, %v2645_v45 }
 0x261   :  { %v2604_v46 = vadd.bf16 %v10645_v62, %v2486_v3  ;;  %v10755_v49 = vmax.bf16 %v12752_v59, %v2603_v2  ;;  %v2355_v30 = vadd.f32 %v2354_v39, %v2161_v40 }
 0x262   :  { %v2163_v53 = vpop.f32.mrf.mxu0  ;;  %v2356_v10 = vpop.f32.mrf.mxu1 }
 0x263   :  { %v2357_v0 = vadd.f32 %v2356_v10, %v2163_v53  ;;  %v10749_v29 = vmax.bf16 %v12752_v59, %v2604_v46  ;;  %4075 = vmatpush1.bf16.msra.mxu1 %v9345_v28  ;;  %v12817_v28 = vld [vmem:[#allocation33_spill] sm:$0xff] }
 0x264   :  { %v2165_v9 = vpop.f32.mrf.mxu0  ;;  %v2358_v35 = vpop.f32.mrf.mxu1  ;;  %4076 = vmatprep.subr.bf16.mxu1 %v9356_v11  ;;  %v2077_v19 = vadd.f32 %v12818_v37, %v12817_v28 }
 0x265   :  { %v2489_v31 = vpack.c.bf16 %v2357_v0, %v2353_v36  ;;  %v2359_v54 = vadd.f32 %v2358_v35, %v2165_v9  ;;  %3740 = vmatprep.mubr.bf16.mxu1 %v10749_v29  ;;  %v10783_v36 = vmax.bf16 %v12752_v59, %v2650_v20  ;;  %v9363_v9 = vld [vmem:[#allocation5 + $0x3c8] ss:$16 sps:$4 sm:$0xff]  }
 0x266   :  { %v2169_v23 = vpop.f32.mrf.mxu0  ;;  %v2362_v17 = vpop.f32.mrf.mxu1  ;;  %3648 = vmatmul.mubr.bf16.gmra.mxu0 %v10752_v52  ;;  %3741 = vmatmul.mubr.bf16.gmra.mxu1 %v10755_v49  ;;  %v2531_v22 = vpack.c.bf16 %v2081_v60, %v2077_v19  ;;  %v9366_v60 = vld [vmem:[#allocation5 + $0x3a8] ss:$16 sps:$4 sm:$0xff]  }
 0x267   :  { %v2490_v63 = vpack.c.bf16 %v2359_v54, %v2355_v30  ;;  %3657 = vmatprep.mubr.bf16.mxu0 %v10758_v50  ;;  %4077 = vmatpush1.bf16.msra.mxu1 %v9354_v12  ;;  %v2607_v38 = vadd.bf16 %v10639_v13, %v2489_v31  ;;  %v2363_v40 = vadd.f32 %v2362_v17, %v2169_v23  ;;  %v9368_v31 = vld [vmem:[#allocation5 + $0x3ac] ss:$16 sps:$4 sm:$0xff]  }
 0x268   :  { %v2171_v44 = vpop.f32.mrf.mxu0  ;;  %v2364_v58 = vpop.f32.mrf.mxu1  ;;  %4078 = vmatprep.subr.bf16.mxu1 %v9359_v15  ;;  %v2649_v35 = vadd.bf16 %v10306_v48, %v2531_v22 }
 0x269   :  { %v2608_v3 = vadd.bf16 %v10645_v62, %v2490_v63  ;;  %v10779_v43 = vmax.bf16 %v12752_v59, %v2607_v38  ;;  %v2365_v53 = vadd.f32 %v2364_v58, %v2171_v44 }
 0x26a   :  { %v2173_v25 = vpop.f32.mrf.mxu0  ;;  %v2366_v2 = vpop.f32.mrf.mxu1  ;;  %v10795_v38 = vmax.bf16 %v12752_v59, %v2649_v35 }
 0x26b   :  { %v2367_v39 = vadd.f32 %v2366_v2, %v2173_v25  ;;  %v10773_v11 = vmax.bf16 %v12752_v59, %v2608_v3  ;;  %4079 = vmatpush1.bf16.msra.mxu1 %v9357_v34  ;;  %v12819_v2 = vld [vmem:[#allocation15_spill] sm:$0xff] }
 0x26c   :  { %v2175_v46 = vpop.f32.mrf.mxu0  ;;  %v2368_v27 = vpop.f32.mrf.mxu1  ;;  %4080 = vmatprep.subr.bf16.mxu1 %v9362_v55  ;;  %v9371_v55 = vld [vmem:[#allocation5 + $0x38c] ss:$16 sps:$4 sm:$0xff]  }
 0x26d   :  { %v2493_v10 = vpack.c.bf16 %v2367_v39, %v2363_v40  ;;  %v2369_v26 = vadd.f32 %v2368_v27, %v2175_v46  ;;  %3750 = vmatprep.mubr.bf16.mxu1 %v10773_v11  ;;  %v9369_v40 = vld [vmem:[#allocation5 + $0x388] ss:$16 sps:$4 sm:$0xff]   ;;  %v9374_v46 = vld [vmem:[#allocation5 + $0x36c] ss:$16 sps:$4 sm:$0xff]  }
 0x26e   :  { %v2179_v0 = vpop.f32.mrf.mxu0  ;;  %v2372_v12 = vpop.f32.mrf.mxu1  ;;  %3658 = vmatmul.mubr.bf16.gmra.mxu0 %v10776_v6  ;;  %3751 = vmatmul.mubr.bf16.gmra.mxu1 %v10779_v43 }
 0x26f   :  { %v2494_v47 = vpack.c.bf16 %v2369_v26, %v2365_v53  ;;  %3667 = vmatprep.mubr.bf16.mxu0 %v10783_v36  ;;  %4081 = vmatpush2.bf16.msra.mxu1 %v9360_v33  ;;  %v2611_v15 = vadd.bf16 %v10639_v13, %v2493_v10  ;;  %v2373_v63 = vadd.f32 %v2372_v12, %v2179_v0  ;;  %v9372_v12 = vld [vmem:[#allocation5 + $0x368] ss:$16 sps:$4 sm:$0xff]  }
 0x270   :  { %v2181_v61 = vpop.f32.mrf.mxu0  ;;  %v2374_v30 = vpop.f32.mrf.mxu1  ;;  %4082 = vmatprep.subr.bf16.mxu1 %v9365_v51 }
 0x271   :  { %v2612_v54 = vadd.bf16 %v10645_v62, %v2494_v47  ;;  %v10798_v48 = vmax.bf16 %v12752_v59, %v2611_v15  ;;  %v2375_v20 = vadd.f32 %v2374_v30, %v2181_v61  ;;  %v9377_v15 = vld [vmem:[#allocation5 + $0x34c] ss:$16 sps:$4 sm:$0xff]  }
 0x272   :  { %v2183_v23 = vpop.f32.mrf.mxu0  ;;  %v2376_v17 = vpop.f32.mrf.mxu1  ;;  %v9384_v61 = vld [vmem:[#allocation7 + $0x78] sm:$0xff]  }
 0x273   :  { %v2377_v34 = vadd.f32 %v2376_v17, %v2183_v23  ;;  %v10792_v45 = vmax.bf16 %v12752_v59, %v2612_v54  ;;  %4083 = vmatpush2.bf16.msra.mxu1 %v9363_v9  ;;  %v9385_v23 = vld [vmem:[#allocation7 + $0x38] sm:$0xff]   ;;  %8737 = vmatprep.subr.bf16.mxu0 %v9384_v61 }
 0x274   :  { %v2185_v44 = vpop.f32.mrf.mxu0  ;;  %v2378_v58 = vpop.f32.mrf.mxu1  ;;  %4084 = vmatprep.subr.bf16.mxu1 %v9368_v31 }
 0x275   :  { %v2497_v3 = vpack.c.bf16 %v2377_v34, %v2373_v63  ;;  %v2379_v28 = vadd.f32 %v2378_v58, %v2185_v44  ;;  %3760 = vmatprep.mubr.bf16.mxu1 %v10792_v45  ;;  %v12820_v34 = vld [vmem:[#allocation16_spill] sm:$0xff]  ;;  %v12821_v44 = vld [vmem:[#allocation17_spill] sm:$0xff] }
 0x276   :  { %v2189_v37 = vpop.f32.mrf.mxu0  ;;  %v2382_v19 = vpop.f32.mrf.mxu1  ;;  %3668 = vmatmul.mubr.bf16.gmra.mxu0 %v10795_v38  ;;  %3761 = vmatmul.mubr.bf16.gmra.mxu1 %v10798_v48  ;;  %v9375_v58 = vld [vmem:[#allocation5 + $0x348] ss:$16 sps:$4 sm:$0xff]  }
 0x277   :  { %v2498_v25 = vpack.c.bf16 %v2379_v28, %v2375_v20  ;;  %3903 = vmatprep.mubr.bf16.mxu0 %v12819_v2  ;;  %4085 = vmatpush2.bf16.msra.mxu1 %v9366_v60  ;;  %v2615_v39 = vadd.bf16 %v10639_v13, %v2497_v3  ;;  %v2383_v10 = vadd.f32 %v2382_v19, %v2189_v37  ;;  %v9380_v28 = vld [vmem:[#allocation5 + $0x32c] ss:$16 sps:$4 sm:$0xff]   ;;  %v9386_v37 = vld [vmem:[#allocation7 + $0x70] sm:$0xff]  }
 0x278   :  { %v2191_v33 = vpop.f32.mrf.mxu0  ;;  %v2384_v22 = vpop.f32.mrf.mxu1  ;;  %4086 = vmatprep.subr.bf16.mxu1 %v9371_v55 }
 0x279   :  { %v2616_v27 = vadd.bf16 %v10645_v62, %v2498_v25  ;;  %v10810_v47 = vmax.bf16 %v12752_v59, %v2615_v39  ;;  %v2385_v30 = vadd.f32 %v2384_v22, %v2191_v33  ;;  %v9387_v25 = vld [vmem:[#allocation7 + $0x30] sm:$0xff]  }
 0x27a   :  { %v2193_v51 = vpop.f32.mrf.mxu0  ;;  %v2386_v53 = vpop.f32.mrf.mxu1 }
 0x27b   :  { %v2387_v26 = vadd.f32 %v2386_v53, %v2193_v51  ;;  %v10807_v0 = vmax.bf16 %v12752_v59, %v2616_v27  ;;  %4087 = vmatpush2.bf16.msra.mxu1 %v9369_v40 }
 0x27c   :  { %v2195_v9 = vpop.f32.mrf.mxu0  ;;  %v2388_v35 = vpop.f32.mrf.mxu1  ;;  %4088 = vmatprep.subr.bf16.mxu1 %v9374_v46  ;;  %v9378_v46 = vld [vmem:[#allocation5 + $0x328] ss:$16 sps:$4 sm:$0xff]  }
 0x27d   :  { %v2501_v31 = vpack.c.bf16 %v2387_v26, %v2383_v10  ;;  %v2389_v54 = vadd.f32 %v2388_v35, %v2195_v9  ;;  %3770 = vmatprep.mubr.bf16.mxu1 %v10807_v0  ;;  %v9383_v10 = vld [vmem:[#allocation5 + $0x30c] ss:$16 sps:$4 sm:$0xff]  }
 0x27e   :  { %v2199_v17 = vpop.f32.mrf.mxu0  ;;  %v2392_v63 = vpop.f32.mrf.mxu1  ;;  %3771 = vmatmul.mubr.bf16.gmra.mxu1 %v10810_v47  ;;  %3904 = vmatmul.mubr.bf16.vlgmr.msra.gmra.mxu0 %v12820_v34  ;;  %v9388_v26 = vld [vmem:[#allocation7 + $0x68] sm:$0xff]  }
 0x27f   :  { %v2502_v60 = vpack.c.bf16 %v2389_v54, %v2385_v30  ;;  %3913 = vmatprep.mubr.bf16.mxu0 %v12821_v44  ;;  %4089 = vmatpush2.bf16.msra.mxu1 %v9372_v12  ;;  %v2619_v55 = vadd.bf16 %v10639_v13, %v2501_v31  ;;  %v2393_v39 = vadd.f32 %v2392_v63, %v2199_v17  ;;  %v12822_v31 = vld [vmem:[#allocation19_spill] sm:$0xff]  ;;  %v9390_v44 = vld [vmem:[#allocation7 + $0x60] sm:$0xff]  }
 0x280   :  { %v2201_v20 = vpop.f32.mrf.mxu0  ;;  %v2394_v3 = vpop.f32.mrf.mxu1  ;;  %4090 = vmatprep.subr.bf16.mxu1 %v9377_v15  ;;  %8738 = vmatpush3.bf16.msra.mxu0 %v9385_v23  ;;  %v9389_v15 = vld [vmem:[#allocation7 + $0x28] sm:$0xff]   ;;  %v12823_v23 = vld [vmem:[#allocation20_spill] sm:$0xff] }
 0x281   :  { %v2620_v19 = vadd.bf16 %v10645_v62, %v2502_v60  ;;  %8739 = vmatprep.subr.bf16.mxu0 %v9386_v37  ;;  %v10822_v27 = vmax.bf16 %v12752_v59, %v2619_v55  ;;  %v2395_v12 = vadd.f32 %v2394_v3, %v2201_v20  ;;  %v9381_v17 = vld [vmem:[#allocation5 + $0x308] ss:$16 sps:$4 sm:$0xff]   ;;  %v9391_v55 = vld [vmem:[#allocation7 + $0x20] sm:$0xff]  }
 0x282   :  { %v2203_v2 = vpop.f32.mrf.mxu0  ;;  %v2396_v40 = vpop.f32.mrf.mxu1 }
 0x283   :  { %v2397_v33 = vadd.f32 %v2396_v40, %v2203_v2  ;;  %v10819_v22 = vmax.bf16 %v12752_v59, %v2620_v19  ;;  %4091 = vmatpush2.bf16.msra.mxu1 %v9375_v58 }
 0x284   :  { %v2205_v51 = vpop.f32.mrf.mxu0  ;;  %v2398_v53 = vpop.f32.mrf.mxu1  ;;  %4092 = vmatprep.subr.bf16.mxu1 %v9380_v28  ;;  %8740 = vmatpush3.bf16.msra.mxu0 %v9387_v25 }
 0x285   :  { %v2505_v9 = vpack.c.bf16 %v2397_v33, %v2393_v39  ;;  %v2399_v35 = vadd.f32 %v2398_v53, %v2205_v51  ;;  %3780 = vmatprep.mubr.bf16.mxu1 %v10819_v22  ;;  %8741 = vmatprep.subr.bf16.mxu0 %v9388_v26  ;;  %v9392_v39 = vld [vmem:[#allocation7 + $0x58] sm:$0xff]  }
 0x286   :  { %v2209_v61 = vpop.f32.mrf.mxu0  ;;  %v2402_v30 = vpop.f32.mrf.mxu1  ;;  %3781 = vmatmul.mubr.bf16.gmra.mxu1 %v10822_v27  ;;  %3914 = vmatmul.mubr.bf16.gmra.mxu0 %v12822_v31  ;;  %v9393_v53 = vld [vmem:[#allocation7 + $0x18] sm:$0xff]   ;;  %v9394_v31 = vld [vmem:[#allocation7 + $0x50] sm:$0xff]  }
 0x287   :  { %v2506_v54 = vpack.c.bf16 %v2399_v35, %v2395_v12  ;;  %3923 = vmatprep.mubr.bf16.mxu0 %v12823_v23  ;;  %4093 = vmatpush2.bf16.msra.mxu1 %v9378_v46  ;;  %v2623_v63 = vadd.bf16 %v10639_v13, %v2505_v9  ;;  %v2403_v28 = vadd.f32 %v2402_v30, %v2209_v61  ;;  %v12824_v12 = vld [vmem:[#allocation21_spill] sm:$0xff]  ;;  %v12825_v35 = vld [vmem:[#allocation22_spill] sm:$0xff]  ;;  %v9395_v23 = vld [vmem:[#allocation7 + $0x10] sm:$0xff]  }
 0x288   :  { %v2211_v34 = vpop.f32.mrf.mxu0  ;;  %v2404_v60 = vpop.f32.mrf.mxu1  ;;  %4094 = vmatprep.subr.bf16.mxu1 %v9383_v10  ;;  %8742 = vmatpush3.bf16.msra.mxu0 %v9389_v15 }
 0x289   :  { %v2624_v58 = vadd.bf16 %v10645_v62, %v2506_v54  ;;  %8743 = vmatprep.subr.bf16.mxu0 %v9390_v44  ;;  %v10834_v25 = vmax.bf16 %v12752_v59, %v2623_v63  ;;  %v2405_v33 = vadd.f32 %v2404_v60, %v2211_v34 }
 0x28a   :  { %v2213_v20 = vpop.f32.mrf.mxu0  ;;  %v2406_v3 = vpop.f32.mrf.mxu1 }
 0x28b   :  { %v2407_v37 = vadd.f32 %v2406_v3, %v2213_v20  ;;  %v10831_v19 = vmax.bf16 %v12752_v59, %v2624_v58  ;;  %4095 = vmatpush2.bf16.msra.mxu1 %v9381_v17  ;;  %v9396_v3 = vld [vmem:[#allocation7 + $0x48] sm:$0xff]  }
 0x28c   :  { %v2215_v2 = vpop.f32.mrf.mxu0  ;;  %v2408_v40 = vpop.f32.mrf.mxu1  ;;  %8744 = vmatpush3.bf16.msra.mxu0 %v9391_v55 }
 0x28d   :  { %v2509_v46 = vpack.c.bf16 %v2407_v37, %v2403_v28  ;;  %v2409_v51 = vadd.f32 %v2408_v40, %v2215_v2  ;;  %3790 = vmatprep.mubr.bf16.mxu1 %v10831_v19  ;;  %8745 = vmatprep.subr.bf16.mxu0 %v9392_v39  ;;  %v9397_v40 = vld [vmem:[#allocation7 + $0x8] sm:$0xff]  }
 0x28e   :  { %v2219_v10 = vpop.f32.mrf.mxu0  ;;  %v2412_v26 = vpop.f32.mrf.mxu1  ;;  %3791 = vmatmul.mubr.bf16.gmra.mxu1 %v10834_v25  ;;  %3924 = vmatmul.mubr.bf16.gmra.mxu0 %v12824_v12 }
 0x28f   :  { %v2510_v9 = vpack.c.bf16 %v2409_v51, %v2405_v33  ;;  %3933 = vmatprep.mubr.bf16.mxu0 %v12825_v35  ;;  %v2627_v15 = vadd.bf16 %v10639_v13, %v2509_v46  ;;  %v2413_v34 = vadd.f32 %v2412_v26, %v2219_v10  ;;  %v12826_v46 = vld [vmem:[#allocation23_spill] sm:$0xff] }
 0x290   :  { %v2221_v61 = vpop.f32.mrf.mxu0  ;;  %v2414_v30 = vpop.f32.mrf.mxu1  ;;  %8746 = vmatpush3.bf16.msra.mxu0 %v9393_v53  ;;  %v12827_v53 = vld [vmem:[#allocation24_spill] sm:$0xff] }
 0x291   :  { %v2628_v54 = vadd.bf16 %v10645_v62, %v2510_v9  ;;  %8747 = vmatprep.subr.bf16.mxu0 %v9394_v31  ;;  %v10846_v58 = vmax.bf16 %v12752_v59, %v2627_v15  ;;  %v2415_v28 = vadd.f32 %v2414_v30, %v2221_v61  ;;  %v9398_v9 = vld [vmem:[#allocation7 + $0x40] sm:$0xff]  }
 0x292   :  { %v2223_v17 = vpop.f32.mrf.mxu0  ;;  %v2416_v63 = vpop.f32.mrf.mxu1  ;;  %v9399_v15 = vld [vmem:[#allocation7] sm:$0xff]  }
 0x293   :  { %v2417_v60 = vadd.f32 %v2416_v63, %v2223_v17  ;;  %v10843_v44 = vmax.bf16 %v12752_v59, %v2628_v54 }
 0x294   :  { %v2225_v55 = vpop.f32.mrf.mxu0  ;;  %v2418_v20 = vpop.f32.mrf.mxu1  ;;  %8748 = vmatpush3.bf16.msra.mxu0 %v9395_v23 }
 0x295   :  { %v2513_v37 = vpack.c.bf16 %v2417_v60, %v2413_v34  ;;  %v2419_v2 = vadd.f32 %v2418_v20, %v2225_v55  ;;  %3800 = vmatprep.mubr.bf16.mxu1 %v10843_v44  ;;  %8749 = vmatprep.subr.bf16.mxu0 %v9396_v3 }
 0x296   :  { %v2229_v39 = vpop.f32.mrf.mxu0  ;;  %v2422_v33 = vpop.f32.mrf.mxu1  ;;  %3801 = vmatmul.mubr.bf16.gmra.mxu1 %v10846_v58  ;;  %3934 = vmatmul.mubr.bf16.gmra.mxu0 %v12826_v46 }
 0x297   :  { %v2514_v51 = vpack.c.bf16 %v2419_v2, %v2415_v28  ;;  %3943 = vmatprep.mubr.bf16.mxu0 %v12827_v53  ;;  %v2631_v10 = vadd.bf16 %v10639_v13, %v2513_v37  ;;  %v2423_v31 = vadd.f32 %v2422_v33, %v2229_v39  ;;  %v12828_v37 = vld [vmem:[#allocation25_spill] sm:$0xff] }
 0x298   :  { %v2231_v26 = vpop.f32.mrf.mxu0  ;;  %v2424_v12 = vpop.f32.mrf.mxu1  ;;  %8750 = vmatpush3.bf16.msra.mxu0 %v9397_v40  ;;  %v12829_v40 = vld [vmem:[#allocation26_spill] sm:$0xff]  ;;  %v9400_v53 = vld [vmem:[#allocation7 + $0xf8] sm:$0xff]  }
 0x299   :  { %v2632_v35 = vadd.bf16 %v10645_v62, %v2514_v51  ;;  %8751 = vmatprep.subr.bf16.mxu0 %v9398_v9  ;;  %v10858_v17 = vmax.bf16 %v12752_v59, %v2631_v10  ;;  %v2425_v60 = vadd.f32 %v2424_v12, %v2231_v26  ;;  %8849 = vmatprep.subr.bf16.mxu1 %v9400_v53 }
 0x29a   :  { %v2233_v61 = vpop.f32.mrf.mxu0  ;;  %v2426_v30 = vpop.f32.mrf.mxu1 }
 0x29b   :  { %v2427_v54 = vadd.f32 %v2426_v30, %v2233_v61  ;;  %v10855_v23 = vmax.bf16 %v12752_v59, %v2632_v35 }
 0x29c   :  { %v2235_v63 = vpop.f32.mrf.mxu0  ;;  %v2428_v34 = vpop.f32.mrf.mxu1  ;;  %8752 = vmatpush3.bf16.msra.mxu0 %v9399_v15 }
 0x29d   :  { %v2517_v55 = vpack.c.bf16 %v2427_v54, %v2423_v31  ;;  %v2429_v20 = vadd.f32 %v2428_v34, %v2235_v63  ;;  %3810 = vmatprep.mubr.bf16.mxu1 %v10855_v23 }
 0x29e   :  { %v2239_v3 = vpop.f32.mrf.mxu0  ;;  %v2432_v28 = vpop.f32.mrf.mxu1  ;;  %3811 = vmatmul.mubr.bf16.gmra.mxu1 %v10858_v17  ;;  %3944 = vmatmul.mubr.bf16.gmra.mxu0 %v12828_v37 }
 0x29f   :  { %v2518_v2 = vpack.c.bf16 %v2429_v20, %v2425_v60  ;;  %3953 = vmatprep.mubr.bf16.mxu0 %v12829_v40  ;;  %v2635_v39 = vadd.bf16 %v10639_v13, %v2517_v55  ;;  %v2433_v12 = vadd.f32 %v2432_v28, %v2239_v3  ;;  %v12830_v55 = vld [vmem:[#allocation27_spill] sm:$0xff]  ;;  %v12831_v3 = vld [vmem:[#allocation28_spill] sm:$0xff] }
 0x2a0   :  { %v2241_v33 = vpop.f32.mrf.mxu0  ;;  %v2434_v46 = vpop.f32.mrf.mxu1 }
 0x2a1   :  { %v2636_v51 = vadd.bf16 %v10645_v62, %v2518_v2  ;;  %v10870_v15 = vmax.bf16 %v12752_v59, %v2635_v39  ;;  %v2435_v31 = vadd.f32 %v2434_v46, %v2241_v33 }
 0x2a2   :  { %v2243_v10 = vpop.f32.mrf.mxu0  ;;  %v2436_v26 = vpop.f32.mrf.mxu1 }
 0x2a3   :  { %v2437_v9 = vadd.f32 %v2436_v26, %v2243_v10  ;;  %v10867_v35 = vmax.bf16 %v12752_v59, %v2636_v51 }
 0x2a4   :  { %v2245_v61 = vpop.f32.mrf.mxu0  ;;  %v2438_v30 = vpop.f32.mrf.mxu1 }
 0x2a5   :  { %v2521_v54 = vpack.c.bf16 %v2437_v9, %v2433_v12  ;;  %v2439_v63 = vadd.f32 %v2438_v30, %v2245_v61  ;;  %3820 = vmatprep.mubr.bf16.mxu1 %v10867_v35 }
 0x2a6   :  { %v2249_v34 = vpop.f32.mrf.mxu0  ;;  %v2442_v60 = vpop.f32.mrf.mxu1  ;;  %3821 = vmatmul.mubr.bf16.gmra.mxu1 %v10870_v15  ;;  %3954 = vmatmul.mubr.bf16.gmra.mxu0 %v12830_v55 }
 0x2a7   :  { %v2522_v20 = vpack.c.bf16 %v2439_v63, %v2435_v31  ;;  %3963 = vmatprep.mubr.bf16.mxu0 %v12831_v3  ;;  %v2639_v28 = vadd.bf16 %v10639_v13, %v2521_v54  ;;  %v2443_v46 = vadd.f32 %v2442_v60, %v2249_v34  ;;  %v12832_v63 = vld [vmem:[#allocation29_spill] sm:$0xff]  ;;  %v12833_v60 = vld [vmem:[#allocation30_spill] sm:$0xff] }
 0x2a8   :  { %v2251_v37 = vpop.f32.mrf.mxu0  ;;  %v2444_v2 = vpop.f32.mrf.mxu1 }
 0x2a9   :  { %v2640_v40 = vadd.bf16 %v10645_v62, %v2522_v20  ;;  %v10882_v10 = vmax.bf16 %v12752_v59, %v2639_v28  ;;  %v2445_v9 = vadd.f32 %v2444_v2, %v2251_v37 }
 0x2aa   :  { %v2253_v39 = vpop.f32.mrf.mxu0  ;;  %v2446_v33 = vpop.f32.mrf.mxu1 }
 0x2ab   :  { %v2447_v51 = vadd.f32 %v2446_v33, %v2253_v39  ;;  %v10879_v53 = vmax.bf16 %v12752_v59, %v2640_v40 }
 0x2ac   :  { %v2255_v26 = vpop.f32.mrf.mxu0  ;;  %v2448_v12 = vpop.f32.mrf.mxu1 }
 0x2ad   :  { %v2525_v61 = vpack.c.bf16 %v2447_v51, %v2443_v46  ;;  %v2449_v30 = vadd.f32 %v2448_v12, %v2255_v26  ;;  %3830 = vmatprep.mubr.bf16.mxu1 %v10879_v53 }
 0x2ae   :  { %v2259_v31 = vpop.f32.mrf.mxu0  ;;  %v2452_v54 = vpop.f32.mrf.mxu1  ;;  %3831 = vmatmul.mubr.bf16.gmra.mxu1 %v10882_v10  ;;  %3964 = vmatmul.mubr.bf16.gmra.mxu0 %v12832_v63 }
 0x2af   :  { %v2526_v34 = vpack.c.bf16 %v2449_v30, %v2445_v9  ;;  %3973 = vmatprep.mubr.bf16.mxu0 %v12833_v60  ;;  %v2643_v55 = vadd.bf16 %v10639_v13, %v2525_v61  ;;  %v2453_v40 = vadd.f32 %v2452_v54, %v2259_v31  ;;  %v12835_v54 = vld [vmem:[#allocation32_spill] sm:$0xff] }
 0x2b0   :  { %v2261_v20 = vpop.f32.mrf.mxu0  ;;  %v2454_v3 = vpop.f32.mrf.mxu1 }
 0x2b1   :  { %v2644_v28 = vadd.bf16 %v10645_v62, %v2526_v34  ;;  %v10894_v46 = vmax.bf16 %v12752_v59, %v2643_v55  ;;  %v2455_v12 = vadd.f32 %v2454_v3, %v2261_v20  ;;  %v12834_v34 = vld [vmem:[#allocation18_spill] sm:$0xff] }
 0x2b2   :  { %v2263_v37 = vpop.f32.mrf.mxu0  ;;  %v2456_v2 = vpop.f32.mrf.mxu1 }
 0x2b3   :  { %v2457_v39 = vadd.f32 %v2456_v2, %v2263_v37  ;;  %v10891_v33 = vmax.bf16 %v12752_v59, %v2644_v28 }
 0x2b4   :  { %v2265_v51 = vpop.f32.mrf.mxu0  ;;  %v2458_v26 = vpop.f32.mrf.mxu1 }
 0x2b5   :  { %v2529_v9 = vpack.c.bf16 %v2457_v39, %v2453_v40  ;;  %v2459_v30 = vadd.f32 %v2458_v26, %v2265_v51  ;;  %3840 = vmatprep.mubr.bf16.mxu1 %v10891_v33 }
 0x2b6   :  { %v2269_v61 = vpop.f32.mrf.mxu0  ;;  %v2462_v63 = vpop.f32.mrf.mxu1  ;;  %3841 = vmatmul.mubr.bf16.gmra.mxu1 %v10894_v46  ;;  %3974 = vmatmul.mubr.bf16.gmra.mxu0 %v12834_v34 }
 0x2b7   :  { %v2530_v31 = vpack.c.bf16 %v2459_v30, %v2455_v12  ;;  %3983 = vmatprep.mubr.bf16.mxu0 %v12835_v54  ;;  %v2647_v60 = vadd.bf16 %v10639_v13, %v2529_v9  ;;  %v2463_v2 = vadd.f32 %v2462_v63, %v2269_v61  ;;  %v12837_v63 = vld [vmem:[#allocation13_spill] sm:$0xff] }
 0x2b8   :  { %v2271_v55 = vpop.f32.mrf.mxu0  ;;  %v2464_v28 = vpop.f32.mrf.mxu1 }
 0x2b9   :  { %v2648_v37 = vadd.bf16 %v10645_v62, %v2530_v31  ;;  %v10906_v51 = vmax.bf16 %v12752_v59, %v2647_v60  ;;  %v2465_v30 = vadd.f32 %v2464_v28, %v2271_v55  ;;  %v12836_v31 = vld [vmem:[#allocation14_spill] sm:$0xff] }
 0x2ba   :  { %v2273_v20 = vpop.f32.mrf.mxu0  ;;  %v2466_v3 = vpop.f32.mrf.mxu1 }
 0x2bb   :  { %v2467_v40 = vadd.f32 %v2466_v3, %v2273_v20  ;;  %v10903_v39 = vmax.bf16 %v12752_v59, %v2648_v37 }
 0x2bc   :  { %v2275_v26 = vpop.f32.mrf.mxu0  ;;  %v2468_v12 = vpop.f32.mrf.mxu1 }
 0x2bd   :  { %v2533_v34 = vpack.c.bf16 %v2467_v40, %v2463_v2  ;;  %v2469_v54 = vadd.f32 %v2468_v12, %v2275_v26  ;;  %3850 = vmatprep.mubr.bf16.mxu1 %v10903_v39  ;;  %v9401_v12 = vld [vmem:[#allocation7 + $0xb8] sm:$0xff]  }
 0x2be   :  { %v10909_v9 = vpop.f32.mrf.mxu0  ;;  %3851 = vmatmul.mubr.bf16.gmra.mxu1 %v10906_v51  ;;  %3984 = vmatmul.mubr.bf16.gmra.mxu0 %v12836_v31 }
 0x2bf   :  { %v2534_v61 = vpack.c.bf16 %v2469_v54, %v2465_v30  ;;  %3993 = vmatprep.mubr.bf16.mxu0 %v12837_v63  ;;  %v2651_v37 = vadd.bf16 %v10639_v13, %v2533_v34  ;;  %v9402_v30 = vld [vmem:[#allocation7 + $0xf0] sm:$0xff]  }
 0x2c0   :  { %v10915_v60 = vpop.f32.mrf.mxu0 }
 0x2c1   :  { %v2652_v20 = vadd.bf16 %v10645_v62, %v2534_v61  ;;  %v10924_v3 = vmax.bf16 %v12752_v59, %v2651_v37  ;;  %v9405_v61 = vld [vmem:[#allocation7 + $0xa8] sm:$0xff]  }
 0x2c2   :  { %v10918_v55 = vpop.f32.mrf.mxu0 }
 0x2c3   :  { %v10921_v28 = vmax.bf16 %v12752_v59, %v2652_v20 }
 0x2c4   :  { %v10926_v2 = vpop.f32.mrf.mxu0 }
 0x2c5   :  { %3860 = vmatprep.mubr.bf16.mxu1 %v10921_v28 }
 0x2c6   :  { %v10929_v40 = vpop.f32.mrf.mxu0  ;;  %3861 = vmatmul.mubr.bf16.gmra.mxu1 %v10924_v3  ;;  %3994 = vmatmul.mubr.bf16.gmra.mxu0 %v10642_v14 }
 0x2c7   :  { %4003 = vmatprep.mubr.bf16.mxu0 %v10648_v8  ;;  %4096 = vmatprep.mubr.bf16.mxu1 %v10665_v32  ;;  %v9403_v8 = vld [vmem:[#allocation7 + $0xb0] sm:$0xff]   ;;  %v9404_v32 = vld [vmem:[#allocation7 + $0xe8] sm:$0xff]  }
 0x2c8   :  { %v10935_v13 = vpop.f32.mrf.mxu0 }
 0x2ca   :  { %v10937_v62 = vpop.f32.mrf.mxu0 }
 0x2cc   :  { %v10939_v26 = vpop.f32.mrf.mxu0 }
 0x2ce   :  { %v10941_v34 = vpop.f32.mrf.mxu0  ;;  %4004 = vmatmul.mubr.bf16.gmra.mxu0 %v10668_v16  ;;  %4097 = vmatmul.mubr.bf16.vlgmr.msra.gmra.mxu1 %v10671_v56  ;;  %v9406_v16 = vld [vmem:[#allocation7 + $0xe0] sm:$0xff]  }
 0x2cf   :  { %4013 = vmatprep.mubr.bf16.mxu0 %v10675_v41  ;;  %4106 = vmatprep.mubr.bf16.mxu1 %v10693_v7  ;;  %v9407_v41 = vld [vmem:[#allocation7 + $0xa0] sm:$0xff]  }
 0x2d0   :  { %v10947_v14 = vpop.f32.mrf.mxu0  ;;  %8850 = vmatpush3.bf16.msra.mxu1 %v9401_v12 }
 0x2d1   :  { %8851 = vmatprep.subr.bf16.mxu1 %v9402_v30 }
 0x2d2   :  { %v10949_v54 = vpop.f32.mrf.mxu0 }
 0x2d4   :  { %v10951_v31 = vpop.f32.mrf.mxu0  ;;  %8852 = vmatpush3.bf16.msra.mxu1 %v9403_v8 }
 0x2d5   :  { %8853 = vmatprep.subr.bf16.mxu1 %v9404_v32 }
 0x2d6   :  { %v10953_v63 = vpop.f32.mrf.mxu0  ;;  %4014 = vmatmul.mubr.bf16.gmra.mxu0 %v10696_v18  ;;  %4107 = vmatmul.mubr.bf16.gmra.mxu1 %v10699_v57  ;;  %v9408_v57 = vld [vmem:[#allocation7 + $0xd8] sm:$0xff]  }
 0x2d7   :  { %4023 = vmatprep.mubr.bf16.mxu0 %v10702_v24  ;;  %4116 = vmatprep.mubr.bf16.mxu1 %v10721_v21  ;;  %v9409_v24 = vld [vmem:[#allocation7 + $0x98] sm:$0xff]  }
 0x2d8   :  { %v10959_v56 = vpop.f32.mrf.mxu0  ;;  %8854 = vmatpush3.bf16.msra.mxu1 %v9405_v61 }
 0x2d9   :  { %8855 = vmatprep.subr.bf16.mxu1 %v9406_v16  ;;  %v9412_v16 = vld [vmem:[#allocation7 + $0xc8] sm:$0xff]  }
 0x2da   :  { %v10961_v7 = vpop.f32.mrf.mxu0 }
 0x2dc   :  { %v10963_v37 = vpop.f32.mrf.mxu0  ;;  %8856 = vmatpush3.bf16.msra.mxu1 %v9407_v41 }
 0x2dd   :  { %8857 = vmatprep.subr.bf16.mxu1 %v9408_v57 }
 0x2de   :  { %v10965_v20 = vpop.f32.mrf.mxu0  ;;  %4024 = vmatmul.mubr.bf16.gmra.mxu0 %v10724_v5  ;;  %4117 = vmatmul.mubr.bf16.gmra.mxu1 %v10727_v42 }
 0x2df   :  { %4033 = vmatprep.mubr.bf16.mxu0 %v10731_v4  ;;  %4126 = vmatprep.mubr.bf16.mxu1 %v10749_v29 }
 0x2e0   :  { %v10971_v18 = vpop.f32.mrf.mxu0  ;;  %8858 = vmatpush3.bf16.msra.mxu1 %v9409_v24 }
 0x2e2   :  { %v10973_v21 = vpop.f32.mrf.mxu0 }
 0x2e4   :  { %v10975_v12 = vpop.f32.mrf.mxu0 }
 0x2e6   :  { %v10977_v30 = vpop.f32.mrf.mxu0  ;;  %4034 = vmatmul.mubr.bf16.gmra.mxu0 %v10752_v52  ;;  %4127 = vmatmul.mubr.bf16.gmra.mxu1 %v10755_v49  ;;  %v9410_v49 = vld [vmem:[#allocation7 + $0xd0] sm:$0xff]  }
 0x2e7   :  { %4043 = vmatprep.mubr.bf16.mxu0 %v10758_v50  ;;  %4136 = vmatprep.mubr.bf16.mxu1 %v10773_v11  ;;  %v9411_v50 = vld [vmem:[#allocation7 + $0x90] sm:$0xff]  }
 0x2e8   :  { %v10983_v5 = vpop.f32.mrf.mxu0  ;;  %8859 = vmatprep.subr.bf16.mxu1 %v9410_v49 }
 0x2e9   :  { %8860 = vmatpush3.bf16.msra.mxu1 %v9411_v50  ;;  %v12846_v50 = vld [vmem:[#allocation11_spill] sm:$0xff] }
 0x2ea   :  { %v10985_v42 = vpop.f32.mrf.mxu0  ;;  %8861 = vmatprep.subr.bf16.mxu1 %v9412_v16 }
 0x2ec   :  { %v10987_v4 = vpop.f32.mrf.mxu0 }
 0x2ee   :  { %v10989_v29 = vpop.f32.mrf.mxu0  ;;  %4044 = vmatmul.mubr.bf16.gmra.mxu0 %v10776_v6  ;;  %4137 = vmatmul.mubr.bf16.gmra.mxu1 %v10779_v43 }
 0x2ef   :  { %4053 = vmatprep.mubr.bf16.mxu0 %v10783_v36  ;;  %4146 = vmatprep.mubr.bf16.mxu1 %v10792_v45 }
 0x2f0   :  { %v10995_v52 = vpop.f32.mrf.mxu0 }
 0x2f2   :  { %v10997_v11 = vpop.f32.mrf.mxu0 }
 0x2f4   :  { %v10999_v8 = vpop.f32.mrf.mxu0 }
 0x2f6   :  { %v11001_v32 = vpop.f32.mrf.mxu0  ;;  %4054 = vmatmul.mubr.bf16.gmra.mxu0 %v10795_v38  ;;  %4147 = vmatmul.mubr.bf16.gmra.mxu1 %v10798_v48  ;;  %v9413_v38 = vld [vmem:[#allocation7 + $0x88] sm:$0xff]  }
 0x2f7   :  { %4156 = vmatprep.mubr.bf16.mxu1 %v10807_v0  ;;  %8862 = vmatpush3.bf16.msra.mxu1 %v9413_v38 }
 0x2f8   :  { %v11006_v6 = vpop.f32.mrf.mxu0 }
 0x2fa   :  { %v11008_v43 = vpop.f32.mrf.mxu0 }
 0x2fc   :  { %v11010_v36 = vpop.f32.mrf.mxu0 }
 0x2fe   :  { %v11012_v45 = vpop.f32.mrf.mxu0  ;;  %4157 = vmatmul.mubr.bf16.gmra.mxu1 %v10810_v47  ;;  %v8702_v47 = vld.sshfl [vmem:[%s12691_s6] sm:$0x33 pattern:$0x75316420] }
 0x2ff   :  { %12838 = vst [vmem:[#allocation12_spill] sm:$0xff] %v11012_v45  ;;  %4166 = vmatprep.mubr.bf16.mxu1 %v10819_v22  ;;  %v4330_v57 = vcombine.high %v8702_v47, %v8702_v47  ;;  %v11036_v16 = vrot.slane %v8702_v47, %v12846_v50 }
 0x300   :  { %v11016_v61 = vpop.f32.mrf.mxu0 }
 0x301   :  { %12839 = vst [vmem:[#allocation31_spill] sm:$0xff] %v11016_v61  ;;  %12847 = vst [vmem:[#allocation20_spill] sm:$0xff] %v11036_v16  ;;  %v11039_v38 = vrot.slane %v4330_v57, %v12846_v50 }
 0x302   :  { %v11018_v41 = vpop.f32.mrf.mxu0 }
 0x303   :  { %12840 = vst [vmem:[#allocation33_spill] sm:$0xff] %v11018_v41  ;;  %12848 = vst [vmem:[#allocation21_spill] sm:$0xff] %v11039_v38  ;;  %v4355_v47 = vpack.i.b16 %v11039_v38, %v11039_v38 }
 0x304   :  { %v11020_v48 = vpop.f32.mrf.mxu0 }
 0x305   :  { %12841 = vst [vmem:[#allocation34_spill] sm:$0xff] %v11020_v48  ;;  %v9415_v48 = vld [vmem:[#allocation7 + $0x80] sm:$0xff]  }
 0x306   :  { %v11022_v0 = vpop.f32.mrf.mxu0  ;;  %4167 = vmatmul.mubr.bf16.gmra.mxu1 %v10822_v27 }
 0x307   :  { %12842 = vst [vmem:[#allocation15_spill] sm:$0xff] %v11022_v0  ;;  %4176 = vmatprep.mubr.bf16.mxu1 %v10831_v19 }
 0x308   :  { %v11029_v22 = vpop.f32.mrf.mxu0 }
 0x309   :  { %12843 = vst [vmem:[#allocation16_spill] sm:$0xff] %v11029_v22 }
 0x30a   :  { %v11031_v24 = vpop.f32.mrf.mxu0 }
 0x30b   :  { %12844 = vst [vmem:[#allocation17_spill] sm:$0xff] %v11031_v24  ;;  %v4348_v24 = vpack.i.b16 %v11036_v16, %v11036_v16 }
 0x30c   :  { %v11033_v49 = vpop.f32.mrf.mxu0 }
 0x30d   :  { %12845 = vst [vmem:[#allocation19_spill] sm:$0xff] %v11033_v49  ;;  %v9414_v49 = vld [vmem:[#allocation7 + $0xc0] sm:$0xff]  }
 0x30e   :  { %v11041_v27 = vpop.f32.mrf.mxu0  ;;  %v3712_v0 = vpop.f32.mrf.mxu1  ;;  %4177 = vmatmul.mubr.bf16.gmra.mxu1 %v10834_v25  ;;  %8863 = vmatprep.subr.bf16.mxu1 %v9414_v49 }
 0x30f   :  { %12849 = vst [vmem:[#allocation22_spill] sm:$0xff] %v11041_v27  ;;  %4186 = vmatprep.mubr.bf16.mxu1 %v10843_v44  ;;  %v3713_v27 = vadd.f32 %v3712_v0, %v10909_v9  ;;  %v11056_v44 = vrot.slane %v4348_v24, %v12815_v1  ;;  %8864 = vmatpush3.bf16.msra.mxu1 %v9415_v48 }
 0x310   :  { %v11045_v19 = vpop.f32.mrf.mxu0  ;;  %v3714_v22 = vpop.f32.mrf.mxu1 }
 0x311   :  { %12850 = vst [vmem:[#allocation23_spill] sm:$0xff] %v11045_v19  ;;  %v3715_v16 = vadd.f32 %v3714_v22, %v10915_v60 }
 0x312   :  { %v11051_v57 = vpop.f32.mrf.mxu0  ;;  %v3716_v50 = vpop.f32.mrf.mxu1 }
 0x313   :  { %12851 = vst [vmem:[#allocation24_spill] sm:$0xff] %v11051_v57  ;;  %v3717_v25 = vadd.f32 %v3716_v50, %v10918_v55  ;;  %v11063_v57 = vrot.slane %v4355_v47, %v12815_v1 }
 0x314   :  { %v11058_v19 = vpop.f32.mrf.mxu0  ;;  %v3718_v61 = vpop.f32.mrf.mxu1 }
 0x315   :  { %v4257_v38 = vpack.c.bf16 %v3717_v25, %v3713_v27  ;;  %v3719_v41 = vadd.f32 %v3718_v61, %v10926_v2 }
 0x316   :  { %v11065_v45 = vpop.f32.mrf.mxu0  ;;  %v3722_v9 = vpop.f32.mrf.mxu1  ;;  %4187 = vmatmul.mubr.bf16.gmra.mxu1 %v10846_v58 }
 0x317   :  { %v4258_v55 = vpack.c.bf16 %v3719_v41, %v3715_v16  ;;  %4196 = vmatprep.mubr.bf16.mxu1 %v10855_v23  ;;  %v4375_v0 = vadd.bf16 %v11056_v44, %v4257_v38  ;;  %v3723_v61 = vadd.f32 %v3722_v9, %v10929_v40 }
 0x318   :  { %v11070_v24 = vpop.f32.mrf.mxu0  ;;  %v3724_v48 = vpop.f32.mrf.mxu1 }
 0x319   :  { %v4376_v60 = vadd.bf16 %v11063_v57, %v4258_v55  ;;  %v4439_v58 = vmax.bf16 %v12752_v59, %v4375_v0  ;;  %v3725_v16 = vadd.f32 %v3724_v48, %v10935_v13 }
 0x31a   :  { %v11073_v22 = vpop.f32.mrf.mxu0  ;;  %v3726_v2 = vpop.f32.mrf.mxu1 }
 0x31b   :  { %v3727_v49 = vadd.f32 %v3726_v2, %v10937_v62  ;;  %v4440_v50 = vmax.bf16 %v12752_v59, %v4376_v60 }
 0x31c   :  { %v11079_v41 = vpop.f32.mrf.mxu0  ;;  %v3728_v23 = vpop.f32.mrf.mxu1 }
 0x31d   :  { %v4261_v38 = vpack.c.bf16 %v3727_v49, %v3723_v61  ;;  %v3729_v27 = vadd.f32 %v3728_v23, %v10939_v26  ;;  %4798 = vmatprep.mubr.bf16.mxu0 %v4440_v50 }
 0x31e   :  { %v11083_v47 = vpop.f32.mrf.mxu0  ;;  %v3732_v25 = vpop.f32.mrf.mxu1  ;;  %4197 = vmatmul.mubr.bf16.gmra.mxu1 %v10858_v17  ;;  %4799 = vmatmul.mubr.bf16.vlgmr.msra.gmra.mxu0 %v4439_v58 }
 0x31f   :  { %v4262_v40 = vpack.c.bf16 %v3729_v27, %v3725_v16  ;;  %4206 = vmatprep.mubr.bf16.mxu1 %v10867_v35  ;;  %v4379_v62 = vadd.bf16 %v11056_v44, %v4261_v38  ;;  %v3733_v48 = vadd.f32 %v3732_v25, %v10941_v34 }
 0x320   :  { %v11088_v9 = vpop.f32.mrf.mxu0  ;;  %v3734_v55 = vpop.f32.mrf.mxu1 }
 0x321   :  { %v4380_v13 = vadd.bf16 %v11063_v57, %v4262_v40  ;;  %v4443_v2 = vmax.bf16 %v12752_v59, %v4379_v62  ;;  %v3735_v49 = vadd.f32 %v3734_v55, %v10947_v14 }
 0x322   :  { %v11091_v0 = vpop.f32.mrf.mxu0  ;;  %v3736_v26 = vpop.f32.mrf.mxu1 }
 0x323   :  { %v3737_v60 = vadd.f32 %v3736_v26, %v10949_v54  ;;  %v4444_v17 = vmax.bf16 %v12752_v59, %v4380_v13 }
 0x324   :  { %v11097_v61 = vpop.f32.mrf.mxu0  ;;  %v3738_v35 = vpop.f32.mrf.mxu1 }
 0x325   :  { %v4265_v50 = vpack.c.bf16 %v3737_v60, %v3733_v48  ;;  %v3739_v58 = vadd.f32 %v3738_v35, %v10951_v31  ;;  %4806 = vmatprep.mubr.bf16.mxu0 %v4444_v17 }
 0x326   :  { %v11101_v23 = vpop.f32.mrf.mxu0  ;;  %v3742_v16 = vpop.f32.mrf.mxu1  ;;  %4207 = vmatmul.mubr.bf16.gmra.mxu1 %v10870_v15  ;;  %4807 = vmatmul.mubr.bf16.gmra.mxu0 %v4443_v2 }
 0x327   :  { %v4266_v34 = vpack.c.bf16 %v3739_v58, %v3735_v49  ;;  %4216 = vmatprep.mubr.bf16.mxu1 %v10879_v53  ;;  %v4383_v54 = vadd.bf16 %v11056_v44, %v4265_v50  ;;  %v3743_v40 = vadd.f32 %v3742_v16, %v10953_v63 }
 0x328   :  { %v11106_v38 = vpop.f32.mrf.mxu0  ;;  %v3744_v27 = vpop.f32.mrf.mxu1 }
 0x329   :  { %v4384_v14 = vadd.bf16 %v11063_v57, %v4266_v34  ;;  %v4447_v55 = vmax.bf16 %v12752_v59, %v4383_v54  ;;  %v3745_v26 = vadd.f32 %v3744_v27, %v10959_v56 }
 0x32a   :  { %v11109_v25 = vpop.f32.mrf.mxu0  ;;  %v3746_v31 = vpop.f32.mrf.mxu1 }
 0x32b   :  { %v3747_v62 = vadd.f32 %v3746_v31, %v10961_v7  ;;  %v4448_v15 = vmax.bf16 %v12752_v59, %v4384_v14 }
 0x32c   :  { %v11115_v13 = vpop.f32.mrf.mxu0  ;;  %v3748_v53 = vpop.f32.mrf.mxu1 }
 0x32d   :  { %v4269_v48 = vpack.c.bf16 %v3747_v62, %v3743_v40  ;;  %v3749_v60 = vadd.f32 %v3748_v53, %v10963_v37  ;;  %4814 = vmatprep.mubr.bf16.mxu0 %v4448_v15 }
 0x32e   :  { %v11119_v17 = vpop.f32.mrf.mxu0  ;;  %v3752_v2 = vpop.f32.mrf.mxu1  ;;  %4217 = vmatmul.mubr.bf16.gmra.mxu1 %v10882_v10  ;;  %4815 = vmatmul.mubr.bf16.gmra.mxu0 %v4447_v55 }
 0x32f   :  { %v4270_v63 = vpack.c.bf16 %v3749_v60, %v3745_v26  ;;  %4226 = vmatprep.mubr.bf16.mxu1 %v10891_v33  ;;  %v4387_v7 = vadd.bf16 %v11056_v44, %v4269_v48  ;;  %v3753_v58 = vadd.f32 %v3752_v2, %v10965_v20 }
 0x330   :  { %v11124_v35 = vpop.f32.mrf.mxu0  ;;  %v3754_v49 = vpop.f32.mrf.mxu1 }
 0x331   :  { %v4388_v56 = vadd.bf16 %v11063_v57, %v4270_v63  ;;  %v4451_v34 = vmax.bf16 %v12752_v59, %v4387_v7  ;;  %v3755_v27 = vadd.f32 %v3754_v49, %v10971_v18 }
 0x332   :  { %v11127_v50 = vpop.f32.mrf.mxu0  ;;  %v3756_v37 = vpop.f32.mrf.mxu1 }
 0x333   :  { %v3757_v16 = vadd.f32 %v3756_v37, %v10973_v21  ;;  %v4452_v10 = vmax.bf16 %v12752_v59, %v4388_v56 }
 0x334   :  { %v11133_v54 = vpop.f32.mrf.mxu0  ;;  %v3758_v33 = vpop.f32.mrf.mxu1 }
 0x335   :  { %v4273_v14 = vpack.c.bf16 %v3757_v16, %v3753_v58  ;;  %v3759_v31 = vadd.f32 %v3758_v33, %v10975_v12  ;;  %4822 = vmatprep.mubr.bf16.mxu0 %v4452_v10 }
 0x336   :  { %v11137_v40 = vpop.f32.mrf.mxu0  ;;  %v3762_v62 = vpop.f32.mrf.mxu1  ;;  %4227 = vmatmul.mubr.bf16.gmra.mxu1 %v10894_v46  ;;  %4823 = vmatmul.mubr.bf16.gmra.mxu0 %v4451_v34 }
 0x337   :  { %v4274_v20 = vpack.c.bf16 %v3759_v31, %v3755_v27  ;;  %4236 = vmatprep.mubr.bf16.mxu1 %v10903_v39  ;;  %v4391_v21 = vadd.bf16 %v11056_v44, %v4273_v14  ;;  %v3763_v26 = vadd.f32 %v3762_v62, %v10977_v30 }
 0x338   :  { %v11142_v15 = vpop.f32.mrf.mxu0  ;;  %v3764_v55 = vpop.f32.mrf.mxu1 }
 0x339   :  { %v4392_v18 = vadd.bf16 %v11063_v57, %v4274_v20  ;;  %v4455_v60 = vmax.bf16 %v12752_v59, %v4391_v21  ;;  %v3765_v63 = vadd.f32 %v3764_v55, %v10983_v5 }
 0x33a   :  { %v11145_v53 = vpop.f32.mrf.mxu0  ;;  %v3766_v12 = vpop.f32.mrf.mxu1 }
 0x33b   :  { %v3767_v48 = vadd.f32 %v3766_v12, %v10985_v42  ;;  %v4456_v46 = vmax.bf16 %v12752_v59, %v4392_v18 }
 0x33c   :  { %v11151_v2 = vpop.f32.mrf.mxu0  ;;  %v3768_v39 = vpop.f32.mrf.mxu1 }
 0x33d   :  { %v4277_v7 = vpack.c.bf16 %v3767_v48, %v3763_v26  ;;  %v3769_v49 = vadd.f32 %v3768_v39, %v10987_v4  ;;  %4830 = vmatprep.mubr.bf16.mxu0 %v4456_v46 }
 0x33e   :  { %v3772_v56 = vpop.f32.mrf.mxu1  ;;  %v11155_v37 = vpop.f32.mrf.mxu0  ;;  %4237 = vmatmul.mubr.bf16.gmra.mxu1 %v10906_v51  ;;  %4831 = vmatmul.mubr.bf16.gmra.mxu0 %v4455_v60 }
 0x33f   :  { %v4278_v30 = vpack.c.bf16 %v3769_v49, %v3765_v63  ;;  %4246 = vmatprep.mubr.bf16.mxu1 %v10921_v28  ;;  %v4395_v42 = vadd.bf16 %v11056_v44, %v4277_v7  ;;  %v3773_v4 = vadd.f32 %v3772_v56, %v10989_v29 }
 0x340   :  { %v3774_v58 = vpop.f32.mrf.mxu1  ;;  %v11160_v16 = vpop.f32.mrf.mxu0 }
 0x341   :  { %v4396_v5 = vadd.bf16 %v11063_v57, %v4278_v30  ;;  %v4459_v27 = vmax.bf16 %v12752_v59, %v4395_v42  ;;  %v3775_v31 = vadd.f32 %v3774_v58, %v10995_v52 }
 0x342   :  { %v3776_v10 = vpop.f32.mrf.mxu1  ;;  %v11163_v34 = vpop.f32.mrf.mxu0 }
 0x343   :  { %v3777_v33 = vadd.f32 %v3776_v10, %v10997_v11  ;;  %v4460_v51 = vmax.bf16 %v12752_v59, %v4396_v5 }
 0x344   :  { %v3778_v14 = vpop.f32.mrf.mxu1  ;;  %v11169_v28 = vpop.f32.mrf.mxu0 }
 0x345   :  { %v4281_v62 = vpack.c.bf16 %v3777_v33, %v3773_v4  ;;  %v3779_v20 = vadd.f32 %v3778_v14, %v10999_v8  ;;  %4838 = vmatprep.mubr.bf16.mxu0 %v4460_v51 }
 0x346   :  { %v3782_v21 = vpop.f32.mrf.mxu1  ;;  %v11173_v55 = vpop.f32.mrf.mxu0  ;;  %4247 = vmatmul.mubr.bf16.gmra.mxu1 %v10924_v3  ;;  %4839 = vmatmul.mubr.bf16.gmra.mxu0 %v4459_v27  ;;  %v12853_v27 = vld [vmem:[#allocation33_spill] sm:$0xff] }
 0x347   :  { %v4282_v29 = vpack.c.bf16 %v3779_v20, %v3775_v31  ;;  %v4399_v11 = vadd.bf16 %v11056_v44, %v4281_v62  ;;  %v3783_v8 = vadd.f32 %v3782_v21, %v11001_v32  ;;  %v12854_v21 = vld [vmem:[#allocation31_spill] sm:$0xff] }
 0x348   :  { %v3784_v18 = vpop.f32.mrf.mxu1  ;;  %v11177_v12 = vpop.f32.mrf.mxu0 }
 0x349   :  { %v4400_v26 = vadd.bf16 %v11063_v57, %v4282_v29  ;;  %v4463_v3 = vmax.bf16 %v12752_v59, %v4399_v11  ;;  %v3785_v7 = vadd.f32 %v3784_v18, %v11006_v6  ;;  %v12852_v6 = vld [vmem:[#allocation12_spill] sm:$0xff]  ;;  %v12855_v18 = vld [vmem:[#allocation34_spill] sm:$0xff] }
 0x34a   :  { %v3786_v48 = vpop.f32.mrf.mxu1  ;;  %v11180_v52 = vpop.f32.mrf.mxu0 }
 0x34b   :  { %v3787_v46 = vadd.f32 %v3786_v48, %v11008_v43  ;;  %v4464_v60 = vmax.bf16 %v12752_v59, %v4400_v26 }
 0x34c   :  { %v3788_v39 = vpop.f32.mrf.mxu1  ;;  %v11186_v63 = vpop.f32.mrf.mxu0 }
 0x34d   :  { %v4285_v49 = vpack.c.bf16 %v3787_v46, %v3783_v8  ;;  %v3789_v56 = vadd.f32 %v3788_v39, %v11010_v36  ;;  %4846 = vmatprep.mubr.bf16.mxu0 %v4464_v60 }
 0x34e   :  { %v3792_v30 = vpop.f32.mrf.mxu1  ;;  %v11190_v42 = vpop.f32.mrf.mxu0  ;;  %4847 = vmatmul.mubr.bf16.gmra.mxu0 %v4463_v3 }
 0x34f   :  { %v4286_v32 = vpack.c.bf16 %v3789_v56, %v3785_v7  ;;  %v4403_v43 = vadd.bf16 %v11056_v44, %v4285_v49  ;;  %v3793_v51 = vadd.f32 %v3792_v30, %v12852_v6  ;;  %v12856_v30 = vld [vmem:[#allocation15_spill] sm:$0xff] }
 0x350   :  { %v3794_v58 = vpop.f32.mrf.mxu1  ;;  %v11193_v5 = vpop.f32.mrf.mxu0 }
 0x351   :  { %v4404_v10 = vadd.bf16 %v11063_v57, %v4286_v32  ;;  %v4467_v31 = vmax.bf16 %v12752_v59, %v4403_v43  ;;  %v3795_v29 = vadd.f32 %v3794_v58, %v12854_v21  ;;  %v12857_v43 = vld [vmem:[#allocation17_spill] sm:$0xff] }
 0x352   :  { %v3796_v4 = vpop.f32.mrf.mxu1  ;;  %v11196_v33 = vpop.f32.mrf.mxu0 }
 0x353   :  { %v3797_v36 = vadd.f32 %v3796_v4, %v12853_v27  ;;  %v4468_v14 = vmax.bf16 %v12752_v59, %v4404_v10  ;;  %v12858_v27 = vld [vmem:[#allocation16_spill] sm:$0xff] }
 0x354   :  { %v3798_v62 = vpop.f32.mrf.mxu1  ;;  %v11202_v20 = vpop.f32.mrf.mxu0 }
 0x355   :  { %v4289_v11 = vpack.c.bf16 %v3797_v36, %v3793_v51  ;;  %v3799_v26 = vadd.f32 %v3798_v62, %v12855_v18  ;;  %4854 = vmatprep.mubr.bf16.mxu0 %v4468_v14 }
 0x356   :  { %v3802_v48 = vpop.f32.mrf.mxu1  ;;  %v11206_v8 = vpop.f32.mrf.mxu0  ;;  %4855 = vmatmul.mubr.bf16.gmra.mxu0 %v4467_v31  ;;  %v12859_v31 = vld [vmem:[#allocation19_spill] sm:$0xff] }
 0x357   :  { %v4290_v46 = vpack.c.bf16 %v3799_v26, %v3795_v29  ;;  %v4407_v60 = vadd.bf16 %v11056_v44, %v4289_v11  ;;  %v3803_v32 = vadd.f32 %v3802_v48, %v12856_v30  ;;  %v12861_v30 = vld [vmem:[#allocation24_spill] sm:$0xff] }
 0x358   :  { %v3804_v3 = vpop.f32.mrf.mxu1  ;;  %v11209_v39 = vpop.f32.mrf.mxu0 }
 0x359   :  { %v4408_v7 = vadd.bf16 %v11063_v57, %v4290_v46  ;;  %v4471_v4 = vmax.bf16 %v12752_v59, %v4407_v60  ;;  %v3805_v36 = vadd.f32 %v3804_v3, %v12858_v27  ;;  %v12860_v3 = vld [vmem:[#allocation22_spill] sm:$0xff] }
 0x35a   :  { %v3806_v49 = vpop.f32.mrf.mxu1  ;;  %v11212_v56 = vpop.f32.mrf.mxu0 }
 0x35b   :  { %v3807_v58 = vadd.f32 %v3806_v49, %v12857_v43  ;;  %v4472_v10 = vmax.bf16 %v12752_v59, %v4408_v7 }
 0x35c   :  { %v3808_v6 = vpop.f32.mrf.mxu1  ;;  %v11218_v51 = vpop.f32.mrf.mxu0 }
 0x35d   :  { %v4293_v14 = vpack.c.bf16 %v3807_v58, %v3803_v32  ;;  %v3809_v62 = vadd.f32 %v3808_v6, %v12859_v31  ;;  %4862 = vmatprep.mubr.bf16.mxu0 %v4472_v10  ;;  %v12862_v6 = vld [vmem:[#allocation23_spill] sm:$0xff] }
 0x35e   :  { %v3812_v21 = vpop.f32.mrf.mxu1  ;;  %v11222_v29 = vpop.f32.mrf.mxu0  ;;  %4863 = vmatmul.mubr.bf16.gmra.mxu0 %v4471_v4 }
 0x35f   :  { %v4294_v11 = vpack.c.bf16 %v3809_v62, %v3805_v36  ;;  %v4411_v18 = vadd.bf16 %v11056_v44, %v4293_v14  ;;  %v3813_v49 = vadd.f32 %v3812_v21, %v12860_v3 }
 0x360   :  { %v3814_v26 = vpop.f32.mrf.mxu1  ;;  %v11225_v48 = vpop.f32.mrf.mxu0 }
 0x361   :  { %v4412_v46 = vadd.bf16 %v11063_v57, %v4294_v11  ;;  %v4475_v58 = vmax.bf16 %v12752_v59, %v4411_v18  ;;  %v3815_v27 = vadd.f32 %v3814_v26, %v12862_v6 }
 0x362   :  { %v3816_v60 = vpop.f32.mrf.mxu1  ;;  %v11228_v7 = vpop.f32.mrf.mxu0 }
 0x363   :  { %v3817_v32 = vadd.f32 %v3816_v60, %v12861_v30  ;;  %v4476_v43 = vmax.bf16 %v12752_v59, %v4412_v46 }
 0x364   :  { %v3818_v10 = vpop.f32.mrf.mxu1  ;;  %v11234_v4 = vpop.f32.mrf.mxu0 }
 0x365   :  { %v4297_v36 = vpack.c.bf16 %v3817_v32, %v3813_v49  ;;  %v3819_v14 = vadd.f32 %v3818_v10, %v11058_v19  ;;  %4870 = vmatprep.mubr.bf16.mxu0 %v4476_v43 }
 0x366   :  { %v3822_v31 = vpop.f32.mrf.mxu1  ;;  %v11238_v62 = vpop.f32.mrf.mxu0  ;;  %4871 = vmatmul.mubr.bf16.gmra.mxu0 %v4475_v58 }
 0x367   :  { %v4298_v21 = vpack.c.bf16 %v3819_v14, %v3815_v27  ;;  %v4415_v11 = vadd.bf16 %v11056_v44, %v4297_v36  ;;  %v3823_v26 = vadd.f32 %v3822_v31, %v11065_v45 }
 0x368   :  { %v3824_v60 = vpop.f32.mrf.mxu1  ;;  %v11241_v46 = vpop.f32.mrf.mxu0 }
 0x369   :  { %v4416_v18 = vadd.bf16 %v11063_v57, %v4298_v21  ;;  %v4479_v32 = vmax.bf16 %v12752_v59, %v4415_v11  ;;  %v3825_v10 = vadd.f32 %v3824_v60, %v11070_v24 }
 0x36a   :  { %v3826_v3 = vpop.f32.mrf.mxu1  ;;  %v11244_v30 = vpop.f32.mrf.mxu0 }
 0x36b   :  { %v3827_v19 = vadd.f32 %v3826_v3, %v11073_v22  ;;  %v4480_v49 = vmax.bf16 %v12752_v59, %v4416_v18 }
 0x36c   :  { %v3828_v43 = vpop.f32.mrf.mxu1  ;;  %v11250_v58 = vpop.f32.mrf.mxu0 }
 0x36d   :  { %v4301_v6 = vpack.c.bf16 %v3827_v19, %v3823_v26  ;;  %v3829_v27 = vadd.f32 %v3828_v43, %v11079_v41  ;;  %4878 = vmatprep.mubr.bf16.mxu0 %v4480_v49 }
 0x36e   :  { %v3832_v36 = vpop.f32.mrf.mxu1  ;;  %v11254_v14 = vpop.f32.mrf.mxu0  ;;  %4879 = vmatmul.mubr.bf16.gmra.mxu0 %v4479_v32 }
 0x36f   :  { %v4302_v45 = vpack.c.bf16 %v3829_v27, %v3825_v10  ;;  %v4419_v22 = vadd.bf16 %v11056_v44, %v4301_v6  ;;  %v3833_v24 = vadd.f32 %v3832_v36, %v11083_v47 }
 0x370   :  { %v3834_v31 = vpop.f32.mrf.mxu1  ;;  %v11257_v21 = vpop.f32.mrf.mxu0 }
 0x371   :  { %v4420_v11 = vadd.bf16 %v11063_v57, %v4302_v45  ;;  %v4483_v26 = vmax.bf16 %v12752_v59, %v4419_v22  ;;  %v3835_v32 = vadd.f32 %v3834_v31, %v11088_v9 }
 0x372   :  { %v3836_v18 = vpop.f32.mrf.mxu1  ;;  %v11260_v3 = vpop.f32.mrf.mxu0 }
 0x373   :  { %v3837_v41 = vadd.f32 %v3836_v18, %v11091_v0  ;;  %v4484_v60 = vmax.bf16 %v12752_v59, %v4420_v11 }
 0x374   :  { %v3838_v19 = vpop.f32.mrf.mxu1  ;;  %v11266_v49 = vpop.f32.mrf.mxu0 }
 0x375   :  { %v4305_v43 = vpack.c.bf16 %v3837_v41, %v3833_v24  ;;  %v3839_v10 = vadd.f32 %v3838_v19, %v11097_v61  ;;  %4886 = vmatprep.mubr.bf16.mxu0 %v4484_v60 }
 0x376   :  { %v3842_v6 = vpop.f32.mrf.mxu1  ;;  %v11270_v27 = vpop.f32.mrf.mxu0  ;;  %4887 = vmatmul.mubr.bf16.gmra.mxu0 %v4483_v26 }
 0x377   :  { %v4306_v47 = vpack.c.bf16 %v3839_v10, %v3835_v32  ;;  %v4423_v0 = vadd.bf16 %v11056_v44, %v4305_v43  ;;  %v3843_v9 = vadd.f32 %v3842_v6, %v11101_v23 }
 0x378   :  { %v3844_v36 = vpop.f32.mrf.mxu1  ;;  %v11273_v45 = vpop.f32.mrf.mxu0 }
 0x379   :  { %v4424_v22 = vadd.bf16 %v11063_v57, %v4306_v47  ;;  %v4487_v24 = vmax.bf16 %v12752_v59, %v4423_v0  ;;  %v3845_v26 = vadd.f32 %v3844_v36, %v11106_v38 }
 0x37a   :  { %v3846_v11 = vpop.f32.mrf.mxu1  ;;  %v11276_v18 = vpop.f32.mrf.mxu0 }
 0x37b   :  { %v3847_v61 = vadd.f32 %v3846_v11, %v11109_v25  ;;  %v4488_v31 = vmax.bf16 %v12752_v59, %v4424_v22 }
 0x37c   :  { %v3848_v41 = vpop.f32.mrf.mxu1  ;;  %v11282_v60 = vpop.f32.mrf.mxu0 }
 0x37d   :  { %v4309_v19 = vpack.c.bf16 %v3847_v61, %v3843_v9  ;;  %v3849_v32 = vadd.f32 %v3848_v41, %v11115_v13  ;;  %4894 = vmatprep.mubr.bf16.mxu0 %v4488_v31 }
 0x37e   :  { %v3852_v43 = vpop.f32.mrf.mxu1  ;;  %v11286_v10 = vpop.f32.mrf.mxu0  ;;  %4895 = vmatmul.mubr.bf16.gmra.mxu0 %v4487_v24 }
 0x37f   :  { %v4310_v23 = vpack.c.bf16 %v3849_v32, %v3845_v26  ;;  %v4427_v25 = vadd.bf16 %v11056_v44, %v4309_v19  ;;  %v3853_v38 = vadd.f32 %v3852_v43, %v11119_v17 }
 0x380   :  { %v3854_v6 = vpop.f32.mrf.mxu1  ;;  %v11289_v47 = vpop.f32.mrf.mxu0 }
 0x381   :  { %v4428_v0 = vadd.bf16 %v11063_v57, %v4310_v23  ;;  %v4491_v9 = vmax.bf16 %v12752_v59, %v4427_v25  ;;  %v3855_v24 = vadd.f32 %v3854_v6, %v11124_v35 }
 0x382   :  { %v3856_v22 = vpop.f32.mrf.mxu1  ;;  %v11292_v11 = vpop.f32.mrf.mxu0 }
 0x383   :  { %v3857_v13 = vadd.f32 %v3856_v22, %v11127_v50  ;;  %v4492_v36 = vmax.bf16 %v12752_v59, %v4428_v0 }
 0x384   :  { %v3858_v61 = vpop.f32.mrf.mxu1  ;;  %v11298_v31 = vpop.f32.mrf.mxu0 }
 0x385   :  { %v4313_v41 = vpack.c.bf16 %v3857_v13, %v3853_v38  ;;  %v3859_v26 = vadd.f32 %v3858_v61, %v11133_v54  ;;  %4902 = vmatprep.mubr.bf16.mxu0 %v4492_v36 }
 0x386   :  { %v3862_v19 = vpop.f32.mrf.mxu1  ;;  %v11302_v32 = vpop.f32.mrf.mxu0  ;;  %4903 = vmatmul.mubr.bf16.gmra.mxu0 %v4491_v9  ;;  %v12864_v9 = vld [vmem:[#allocation20_spill] sm:$0xff] }
 0x387   :  { %v4314_v17 = vpack.c.bf16 %v3859_v26, %v3855_v24  ;;  %v4431_v50 = vadd.bf16 %v11056_v44, %v4313_v41  ;;  %v3863_v35 = vadd.f32 %v3862_v19, %v11137_v40  ;;  %v4345_v61 = vcombine.high %v12864_v9, %v12864_v9 }
 0x388   :  { %v3864_v43 = vpop.f32.mrf.mxu1  ;;  %v11305_v23 = vpop.f32.mrf.mxu0 }
 0x389   :  { %v4432_v25 = vadd.bf16 %v11063_v57, %v4314_v17  ;;  %v4495_v38 = vmax.bf16 %v12752_v59, %v4431_v50  ;;  %v3865_v24 = vadd.f32 %v3864_v43, %v11142_v15  ;;  %v12865_v17 = vld [vmem:[#allocation21_spill] sm:$0xff]  ;;  %v4362_v9 = vpack.i.b16 %v4345_v61, %v4345_v61 }
 0x38a   :  { %v3866_v0 = vpop.f32.mrf.mxu1  ;;  %v11308_v22 = vpop.f32.mrf.mxu0  ;;  %v4346_v40 = vcombine.high %v12865_v17, %v12865_v17 }
 0x38b   :  { %v3867_v54 = vadd.f32 %v3866_v0, %v11145_v53  ;;  %v4496_v6 = vmax.bf16 %v12752_v59, %v4432_v25 }
 0x38c   :  { %v3868_v13 = vpop.f32.mrf.mxu1  ;;  %v11314_v36 = vpop.f32.mrf.mxu0  ;;  %v4369_v43 = vpack.i.b16 %v4346_v40, %v4346_v40 }
 0x38d   :  { %12863 = vst [vmem:[#allocation25_spill] sm:$0xff] %v11314_v36  ;;  %v4317_v41 = vpack.c.bf16 %v3867_v54, %v3863_v35  ;;  %v3869_v26 = vadd.f32 %v3868_v13, %v11151_v2  ;;  %4910 = vmatprep.mubr.bf16.mxu0 %v4496_v6 }
 0x38e   :  { %v11322_v53 = vpop.f32.mrf.mxu0  ;;  %v4098_v19 = vpop.f32.mrf.mxu1  ;;  %4911 = vmatmul.mubr.bf16.gmra.mxu0 %v4495_v38  ;;  %v11342_v17 = vrot.slane %v4369_v43, %v12815_v1 }
 0x38f   :  { %v4318_v50 = vpack.c.bf16 %v3869_v26, %v3865_v24  ;;  %v4435_v25 = vadd.bf16 %v11056_v44, %v4317_v41  ;;  %v4099_v54 = vadd.f32 %v4098_v19, %v11155_v37  ;;  %v11335_v44 = vrot.slane %v4362_v9, %v12815_v1 }
 0x390   :  { %v11325_v0 = vpop.f32.mrf.mxu0  ;;  %v4100_v36 = vpop.f32.mrf.mxu1 }
 0x391   :  { %v4436_v15 = vadd.bf16 %v11063_v57, %v4318_v50  ;;  %v4499_v38 = vmax.bf16 %v12752_v59, %v4435_v25  ;;  %v4101_v57 = vadd.f32 %v4100_v36, %v11160_v16 }
 0x392   :  { %v11328_v35 = vpop.f32.mrf.mxu0  ;;  %v4102_v2 = vpop.f32.mrf.mxu1 }
 0x393   :  { %v4103_v6 = vadd.f32 %v4102_v2, %v11163_v34  ;;  %v4500_v13 = vmax.bf16 %v12752_v59, %v4436_v15 }
 0x394   :  { %v11337_v24 = vpop.f32.mrf.mxu0  ;;  %v4104_v61 = vpop.f32.mrf.mxu1 }
 0x395   :  { %v4259_v41 = vpack.c.bf16 %v4103_v6, %v4099_v54  ;;  %v4105_v26 = vadd.f32 %v4104_v61, %v11169_v28  ;;  %4918 = vmatprep.mubr.bf16.mxu0 %v4500_v13 }
 0x396   :  { %v11344_v37 = vpop.f32.mrf.mxu0  ;;  %v4108_v34 = vpop.f32.mrf.mxu1  ;;  %4919 = vmatmul.mubr.bf16.gmra.mxu0 %v4499_v38 }
 0x397   :  { %v4260_v40 = vpack.c.bf16 %v4105_v26, %v4101_v57  ;;  %v4377_v19 = vadd.bf16 %v11335_v44, %v4259_v41  ;;  %v4109_v28 = vadd.f32 %v4108_v34, %v11173_v55 }
 0x398   :  { %v11347_v50 = vpop.f32.mrf.mxu0  ;;  %v4110_v25 = vpop.f32.mrf.mxu1 }
 0x399   :  { %v4378_v9 = vadd.bf16 %v11342_v17, %v4260_v40  ;;  %v4441_v2 = vmax.bf16 %v12752_v59, %v4377_v19  ;;  %v4111_v13 = vadd.f32 %v4110_v25, %v11177_v12 }
 0x39a   :  { %v11350_v16 = vpop.f32.mrf.mxu0  ;;  %v4112_v36 = vpop.f32.mrf.mxu1 }
 0x39b   :  { %v4113_v15 = vadd.f32 %v4112_v36, %v11180_v52  ;;  %v4442_v43 = vmax.bf16 %v12752_v59, %v4378_v9 }
 0x39c   :  { %v11356_v54 = vpop.f32.mrf.mxu0  ;;  %v4114_v6 = vpop.f32.mrf.mxu1 }
 0x39d   :  { %v4263_v38 = vpack.c.bf16 %v4113_v15, %v4109_v28  ;;  %v4115_v61 = vadd.f32 %v4114_v6, %v11186_v63  ;;  %4959 = vmatprep.mubr.bf16.mxu1 %v4442_v43 }
 0x39e   :  { %v4118_v57 = vpop.f32.mrf.mxu1  ;;  %4960 = vmatmul.mubr.bf16.vlgmr.msra.gmra.mxu1 %v4441_v2  ;;  %v11361_v26 = vpop.f32.mrf.mxu0 }
 0x39f   :  { %v4264_v41 = vpack.c.bf16 %v4115_v61, %v4111_v13  ;;  %v4381_v55 = vadd.bf16 %v11335_v44, %v4263_v38  ;;  %v4119_v19 = vadd.f32 %v4118_v57, %v11190_v42 }
 0x3a0   :  { %v4120_v52 = vpop.f32.mrf.mxu1  ;;  %v11368_v25 = vpop.f32.mrf.mxu0 }
 0x3a1   :  { %v4382_v34 = vadd.bf16 %v11342_v17, %v4264_v41  ;;  %v4445_v63 = vmax.bf16 %v12752_v59, %v4381_v55  ;;  %v4121_v28 = vadd.f32 %v4120_v52, %v11193_v5 }
 0x3a2   :  { %v4122_v40 = vpop.f32.mrf.mxu1  ;;  %v11372_v13 = vpop.f32.mrf.mxu0 }
 0x3a3   :  { %v4123_v9 = vadd.f32 %v4122_v40, %v11196_v33  ;;  %v4446_v12 = vmax.bf16 %v12752_v59, %v4382_v34 }
 0x3a4   :  { %v4124_v36 = vpop.f32.mrf.mxu1  ;;  %v11380_v55 = vpop.f32.mrf.mxu0 }
 0x3a5   :  { %v4267_v15 = vpack.c.bf16 %v4123_v9, %v4119_v19  ;;  %v4125_v43 = vadd.f32 %v4124_v36, %v11202_v20  ;;  %4967 = vmatprep.mubr.bf16.mxu1 %v4446_v12 }
 0x3a6   :  { %v4128_v2 = vpop.f32.mrf.mxu1  ;;  %4968 = vmatmul.mubr.bf16.gmra.mxu1 %v4445_v63  ;;  %v11384_v63 = vpop.f32.mrf.mxu0 }
 0x3a7   :  { %v4268_v6 = vpack.c.bf16 %v4125_v43, %v4121_v28  ;;  %v4385_v42 = vadd.bf16 %v11335_v44, %v4267_v15  ;;  %v4129_v57 = vadd.f32 %v4128_v2, %v11206_v8 }
 0x3a8   :  { %v4130_v33 = vpop.f32.mrf.mxu1  ;;  %v11391_v2 = vpop.f32.mrf.mxu0 }
 0x3a9   :  { %v4386_v38 = vadd.bf16 %v11342_v17, %v4268_v6  ;;  %v4449_v20 = vmax.bf16 %v12752_v59, %v4385_v42  ;;  %v4131_v34 = vadd.f32 %v4130_v33, %v11209_v39 }
 0x3aa   :  { %v4132_v61 = vpop.f32.mrf.mxu1 }
 0x3ab   :  { %v4133_v41 = vadd.f32 %v4132_v61, %v11212_v56  ;;  %v4450_v5 = vmax.bf16 %v12752_v59, %v4386_v38 }
 0x3ac   :  { %v4134_v52 = vpop.f32.mrf.mxu1 }
 0x3ad   :  { %v4271_v40 = vpack.c.bf16 %v4133_v41, %v4129_v57  ;;  %v4135_v19 = vadd.f32 %v4134_v52, %v11218_v51  ;;  %4975 = vmatprep.mubr.bf16.mxu1 %v4450_v5  ;;  %v11396_v41 = vpop.f32.mrf.mxu0 }
 0x3ae   :  { %v4138_v9 = vpop.f32.mrf.mxu1  ;;  %4976 = vmatmul.mubr.bf16.gmra.mxu1 %v4449_v20 }
 0x3af   :  { %v4272_v12 = vpack.c.bf16 %v4135_v19, %v4131_v34  ;;  %v4389_v8 = vadd.bf16 %v11335_v44, %v4271_v40  ;;  %v4139_v15 = vadd.f32 %v4138_v9, %v11222_v29  ;;  %v11403_v40 = vpop.f32.mrf.mxu0 }
 0x3b0   :  { %v4140_v56 = vpop.f32.mrf.mxu1 }
 0x3b1   :  { %v4390_v36 = vadd.bf16 %v11342_v17, %v4272_v12  ;;  %v4453_v51 = vmax.bf16 %v12752_v59, %v4389_v8  ;;  %v4141_v42 = vadd.f32 %v4140_v56, %v11225_v48 }
 0x3b2   :  { %v4142_v28 = vpop.f32.mrf.mxu1 }
 0x3b3   :  { %v4143_v43 = vadd.f32 %v4142_v28, %v11228_v7  ;;  %v4454_v39 = vmax.bf16 %v12752_v59, %v4390_v36  ;;  %v11408_v28 = vpop.f32.mrf.mxu0 }
 0x3b4   :  { %v4144_v6 = vpop.f32.mrf.mxu1 }
 0x3b5   :  { %v4275_v33 = vpack.c.bf16 %v4143_v43, %v4139_v15  ;;  %v4145_v38 = vadd.f32 %v4144_v6, %v11234_v4  ;;  %4983 = vmatprep.mubr.bf16.mxu1 %v4454_v39  ;;  %v11415_v6 = vpop.f32.mrf.mxu0 }
 0x3b6   :  { %v4148_v61 = vpop.f32.mrf.mxu1  ;;  %4984 = vmatmul.mubr.bf16.gmra.mxu1 %v4453_v51 }
 0x3b7   :  { %v4276_v57 = vpack.c.bf16 %v4145_v38, %v4141_v42  ;;  %v4393_v29 = vadd.bf16 %v11335_v44, %v4275_v33  ;;  %v4149_v52 = vadd.f32 %v4148_v61, %v11238_v62 }
 0x3b8   :  { %v4150_v7 = vpop.f32.mrf.mxu1 }
 0x3b9   :  { %v4394_v5 = vadd.bf16 %v11342_v17, %v4276_v57  ;;  %v4457_v4 = vmax.bf16 %v12752_v59, %v4393_v29  ;;  %v4151_v9 = vadd.f32 %v4150_v7, %v11241_v46  ;;  %v11420_v7 = vpop.f32.mrf.mxu0 }
 0x3ba   :  { %v4152_v20 = vpop.f32.mrf.mxu1 }
 0x3bb   :  { %v4153_v34 = vadd.f32 %v4152_v20, %v11244_v30  ;;  %v4458_v48 = vmax.bf16 %v12752_v59, %v4394_v5 }
 0x3bc   :  { %v4154_v19 = vpop.f32.mrf.mxu1 }
 0x3bd   :  { %v4279_v12 = vpack.c.bf16 %v4153_v34, %v4149_v52  ;;  %v4155_v8 = vadd.f32 %v4154_v19, %v11250_v58  ;;  %4991 = vmatprep.mubr.bf16.mxu1 %v4458_v48  ;;  %v11427_v48 = vpop.f32.mrf.mxu0 }
 0x3be   :  { %v4158_v56 = vpop.f32.mrf.mxu1  ;;  %4992 = vmatmul.mubr.bf16.gmra.mxu1 %v4457_v4 }
 0x3bf   :  { %v4280_v36 = vpack.c.bf16 %v4155_v8, %v4151_v9  ;;  %v4397_v62 = vadd.bf16 %v11335_v44, %v4279_v12  ;;  %v4159_v39 = vadd.f32 %v4158_v56, %v11254_v14 }
 0x3c0   :  { %v4160_v30 = vpop.f32.mrf.mxu1 }
 0x3c1   :  { %v4398_v15 = vadd.bf16 %v11342_v17, %v4280_v36  ;;  %v4461_v58 = vmax.bf16 %v12752_v59, %v4397_v62  ;;  %v4161_v33 = vadd.f32 %v4160_v30, %v11257_v21  ;;  %v11432_v36 = vpop.f32.mrf.mxu0 }
 0x3c2   :  { %v4162_v43 = vpop.f32.mrf.mxu1 }
 0x3c3   :  { %v4163_v51 = vadd.f32 %v4162_v43, %v11260_v3  ;;  %v4462_v46 = vmax.bf16 %v12752_v59, %v4398_v15 }
 0x3c4   :  { %v4164_v42 = vpop.f32.mrf.mxu1 }
 0x3c5   :  { %v4283_v38 = vpack.c.bf16 %v4163_v51, %v4159_v39  ;;  %v4165_v61 = vadd.f32 %v4164_v42, %v11266_v49  ;;  %4999 = vmatprep.mubr.bf16.mxu1 %v4462_v46  ;;  %v11439_v39 = vpop.f32.mrf.mxu0 }
 0x3c6   :  { %v4168_v57 = vpop.f32.mrf.mxu1  ;;  %5000 = vmatmul.mubr.bf16.gmra.mxu1 %v4461_v58 }
 0x3c7   :  { %v4284_v29 = vpack.c.bf16 %v4165_v61, %v4161_v33  ;;  %v4401_v14 = vadd.bf16 %v11335_v44, %v4283_v38  ;;  %v4169_v52 = vadd.f32 %v4168_v57, %v11270_v27  ;;  %v11444_v61 = vpop.f32.mrf.mxu0 }
 0x3c8   :  { %v4170_v3 = vpop.f32.mrf.mxu1 }
 0x3c9   :  { %v4402_v5 = vadd.bf16 %v11342_v17, %v4284_v29  ;;  %v4465_v49 = vmax.bf16 %v12752_v59, %v4401_v14  ;;  %v4171_v19 = vadd.f32 %v4170_v3, %v11273_v45 }
 0x3ca   :  { %v4172_v20 = vpop.f32.mrf.mxu1 }
 0x3cb   :  { %v4173_v34 = vadd.f32 %v4172_v20, %v11276_v18  ;;  %v4466_v21 = vmax.bf16 %v12752_v59, %v4402_v5  ;;  %v11451_v5 = vpop.f32.mrf.mxu0 }
 0x3cc   :  { %v4174_v4 = vpop.f32.mrf.mxu1 }
 0x3cd   :  { %v4287_v9 = vpack.c.bf16 %v4173_v34, %v4169_v52  ;;  %v4175_v12 = vadd.f32 %v4174_v4, %v11282_v60  ;;  %5007 = vmatprep.mubr.bf16.mxu1 %v4466_v21  ;;  %v12866_v21 = vld [vmem:[#allocation25_spill] sm:$0xff] }
 0x3ce   :  { %v4178_v8 = vpop.f32.mrf.mxu1  ;;  %5008 = vmatmul.mubr.bf16.gmra.mxu1 %v4465_v49 }
 0x3cf   :  { %v4288_v56 = vpack.c.bf16 %v4175_v12, %v4171_v19  ;;  %v4405_v27 = vadd.bf16 %v11335_v44, %v4287_v9  ;;  %v4179_v15 = vadd.f32 %v4178_v8, %v11286_v10 }
 0x3d0   :  { %v4180_v18 = vpop.f32.mrf.mxu1 }
 0x3d1   :  { %v4406_v62 = vadd.bf16 %v11342_v17, %v4288_v56  ;;  %v4469_v60 = vmax.bf16 %v12752_v59, %v4405_v27  ;;  %v4181_v46 = vadd.f32 %v4180_v18, %v11289_v47 }
 0x3d2   :  { %v4182_v30 = vpop.f32.mrf.mxu1 }
 0x3d3   :  { %v4183_v43 = vadd.f32 %v4182_v30, %v11292_v11  ;;  %v4470_v45 = vmax.bf16 %v12752_v59, %v4406_v62 }
 0x3d4   :  { %v4184_v51 = vpop.f32.mrf.mxu1 }
 0x3d5   :  { %v4291_v58 = vpack.c.bf16 %v4183_v43, %v4179_v15  ;;  %v4185_v42 = vadd.f32 %v4184_v51, %v11298_v31  ;;  %5015 = vmatprep.mubr.bf16.mxu1 %v4470_v45 }
 0x3d6   :  { %v4188_v33 = vpop.f32.mrf.mxu1  ;;  %5016 = vmatmul.mubr.bf16.gmra.mxu1 %v4469_v60 }
 0x3d7   :  { %v4292_v38 = vpack.c.bf16 %v4185_v42, %v4181_v46  ;;  %v4409_v10 = vadd.bf16 %v11335_v44, %v4291_v58  ;;  %v4189_v14 = vadd.f32 %v4188_v33, %v11302_v32 }
 0x3d8   :  { %v4190_v11 = vpop.f32.mrf.mxu1 }
 0x3d9   :  { %v4410_v57 = vadd.bf16 %v11342_v17, %v4292_v38  ;;  %v4473_v31 = vmax.bf16 %v12752_v59, %v4409_v10  ;;  %v4191_v52 = vadd.f32 %v4190_v11, %v11305_v23 }
 0x3da   :  { %v4192_v29 = vpop.f32.mrf.mxu1 }
 0x3db   :  { %v4193_v3 = vadd.f32 %v4192_v29, %v11308_v22  ;;  %v4474_v47 = vmax.bf16 %v12752_v59, %v4410_v57 }
 0x3dc   :  { %v4194_v20 = vpop.f32.mrf.mxu1 }
 0x3dd   :  { %v4295_v34 = vpack.c.bf16 %v4193_v3, %v4189_v14  ;;  %v4195_v49 = vadd.f32 %v4194_v20, %v12866_v21  ;;  %5023 = vmatprep.mubr.bf16.mxu1 %v4474_v47 }
 0x3de   :  { %v4198_v4 = vpop.f32.mrf.mxu1  ;;  %v11456_v19 = vpop.f32.mrf.mxu0  ;;  %5024 = vmatmul.mubr.bf16.gmra.mxu1 %v4473_v31 }
 0x3df   :  { %v4296_v32 = vpack.c.bf16 %v4195_v49, %v4191_v52  ;;  %v4413_v22 = vadd.bf16 %v11335_v44, %v4295_v34  ;;  %v4199_v27 = vadd.f32 %v4198_v4, %v11322_v53 }
 0x3e0   :  { %v4200_v9 = vpop.f32.mrf.mxu1  ;;  %v11460_v8 = vpop.f32.mrf.mxu0 }
 0x3e1   :  { %v4414_v12 = vadd.bf16 %v11342_v17, %v4296_v32  ;;  %v4477_v62 = vmax.bf16 %v12752_v59, %v4413_v22  ;;  %v4201_v15 = vadd.f32 %v4200_v9, %v11325_v0 }
 0x3e2   :  { %v4202_v56 = vpop.f32.mrf.mxu1  ;;  %v11467_v45 = vpop.f32.mrf.mxu0 }
 0x3e3   :  { %v4203_v23 = vadd.f32 %v4202_v56, %v11328_v35  ;;  %v4478_v18 = vmax.bf16 %v12752_v59, %v4414_v12 }
 0x3e4   :  { %v4204_v30 = vpop.f32.mrf.mxu1  ;;  %v11472_v42 = vpop.f32.mrf.mxu0 }
 0x3e5   :  { %v4299_v43 = vpack.c.bf16 %v4203_v23, %v4199_v27  ;;  %v4205_v60 = vadd.f32 %v4204_v30, %v11337_v24  ;;  %5031 = vmatprep.mubr.bf16.mxu1 %v4478_v18 }
 0x3e6   :  { %v4208_v51 = vpop.f32.mrf.mxu1  ;;  %5032 = vmatmul.mubr.bf16.gmra.mxu1 %v4477_v62  ;;  %v11478_v57 = vpop.f32.mrf.mxu0 }
 0x3e7   :  { %v4300_v46 = vpack.c.bf16 %v4205_v60, %v4201_v15  ;;  %v4417_v53 = vadd.bf16 %v11335_v44, %v4299_v43  ;;  %v4209_v38 = vadd.f32 %v4208_v51, %v11344_v37 }
 0x3e8   :  { %v4210_v58 = vpop.f32.mrf.mxu1 }
 0x3e9   :  { %v4418_v35 = vadd.bf16 %v11342_v17, %v4300_v46  ;;  %v4481_v24 = vmax.bf16 %v12752_v59, %v4417_v53  ;;  %v4211_v29 = vadd.f32 %v4210_v58, %v11347_v50 }
 0x3ea   :  { %v4212_v33 = vpop.f32.mrf.mxu1 }
 0x3eb   :  { %v4213_v0 = vadd.f32 %v4212_v33, %v11350_v16  ;;  %v4482_v10 = vmax.bf16 %v12752_v59, %v4418_v35  ;;  %v11483_v16 = vpop.f32.mrf.mxu0 }
 0x3ec   :  { %v4214_v11 = vpop.f32.mrf.mxu1 }
 0x3ed   :  { %v4303_v14 = vpack.c.bf16 %v4213_v0, %v4209_v38  ;;  %v4215_v3 = vadd.f32 %v4214_v11, %v11356_v54  ;;  %5039 = vmatprep.mubr.bf16.mxu1 %v4482_v10  ;;  %v11490_v32 = vpop.f32.mrf.mxu0 }
 0x3ee   :  { %v4218_v47 = vpop.f32.mrf.mxu1  ;;  %5040 = vmatmul.mubr.bf16.gmra.mxu1 %v4481_v24 }
 0x3ef   :  { %v4304_v31 = vpack.c.bf16 %v4215_v3, %v4211_v29  ;;  %v4421_v37 = vadd.bf16 %v11335_v44, %v4303_v14  ;;  %v4219_v21 = vadd.f32 %v4218_v47, %v11361_v26 }
 0x3f0   :  { %v4220_v20 = vpop.f32.mrf.mxu1 }
 0x3f1   :  { %v4422_v52 = vadd.bf16 %v11342_v17, %v4304_v31  ;;  %v4485_v54 = vmax.bf16 %v12752_v59, %v4421_v37  ;;  %v4221_v22 = vadd.f32 %v4220_v20, %v11368_v25 }
 0x3f2   :  { %v4222_v34 = vpop.f32.mrf.mxu1 }
 0x3f3   :  { %v4223_v49 = vadd.f32 %v4222_v34, %v11372_v13  ;;  %v4486_v50 = vmax.bf16 %v12752_v59, %v4422_v52  ;;  %v11495_v13 = vpop.f32.mrf.mxu0 }
 0x3f4   :  { %v4224_v4 = vpop.f32.mrf.mxu1 }
 0x3f5   :  { %v4307_v9 = vpack.c.bf16 %v4223_v49, %v4219_v21  ;;  %v4225_v12 = vadd.f32 %v4224_v4, %v11380_v55  ;;  %5047 = vmatprep.mubr.bf16.mxu1 %v4486_v50  ;;  %v11502_v60 = vpop.f32.mrf.mxu0 }
 0x3f6   :  { %v4228_v56 = vpop.f32.mrf.mxu1  ;;  %5048 = vmatmul.mubr.bf16.gmra.mxu1 %v4485_v54 }
 0x3f7   :  { %v4308_v27 = vpack.c.bf16 %v4225_v12, %v4221_v22  ;;  %v4425_v26 = vadd.bf16 %v11335_v44, %v4307_v9  ;;  %v4229_v30 = vadd.f32 %v4228_v56, %v11384_v63 }
 0x3f8   :  { %v4230_v23 = vpop.f32.mrf.mxu1 }
 0x3f9   :  { %v4426_v18 = vadd.bf16 %v11342_v17, %v4308_v27  ;;  %v4489_v55 = vmax.bf16 %v12752_v59, %v4425_v26  ;;  %v4231_v51 = vadd.f32 %v4230_v23, %v11391_v2 }
 0x3fa   :  { %v4232_v62 = vpop.f32.mrf.mxu1 }
 0x3fb   :  { %v4233_v15 = vadd.f32 %v4232_v62, %v11396_v41  ;;  %v4490_v25 = vmax.bf16 %v12752_v59, %v4426_v18  ;;  %v11507_v41 = vpop.f32.mrf.mxu0 }
 0x3fc   :  { %v4234_v43 = vpop.f32.mrf.mxu1 }
 0x3fd   :  { %v4311_v46 = vpack.c.bf16 %v4233_v15, %v4229_v30  ;;  %v4235_v53 = vadd.f32 %v4234_v43, %v11403_v40  ;;  %5055 = vmatprep.mubr.bf16.mxu1 %v4490_v25  ;;  %v11514_v29 = vpop.f32.mrf.mxu0 }
 0x3fe   :  { %v4238_v58 = vpop.f32.mrf.mxu1  ;;  %5056 = vmatmul.mubr.bf16.gmra.mxu1 %v4489_v55 }
 0x3ff   :  { %v4312_v35 = vpack.c.bf16 %v4235_v53, %v4231_v51  ;;  %v4429_v63 = vadd.bf16 %v11335_v44, %v4311_v46  ;;  %v4239_v10 = vadd.f32 %v4238_v58, %v11408_v28 }
 0x400   :  { %v4240_v33 = vpop.f32.mrf.mxu1 }
 0x401   :  { %v4430_v38 = vadd.bf16 %v11342_v17, %v4312_v35  ;;  %v4493_v40 = vmax.bf16 %v12752_v59, %v4429_v63  ;;  %v4241_v14 = vadd.f32 %v4240_v33, %v11415_v6  ;;  %v8755_v63 = vadd.f32 %v11460_v8, %v11456_v19  ;;  %v11589_v19 = vld [vmem:[%s12694_s9] ss:$0 sm:$0xff] }
 0x402   :  { %v4242_v0 = vpop.f32.mrf.mxu1 }
 0x403   :  { %v4243_v24 = vadd.f32 %v4242_v0, %v11420_v7  ;;  %v4494_v2 = vmax.bf16 %v12752_v59, %v4430_v38  ;;  %v11519_v7 = vpop.f32.mrf.mxu0  ;;  %v11579_v38 = vld [vmem:[%s12693_s8] ss:$0 sm:$0xff] }
 0x404   :  { %v4244_v11 = vpop.f32.mrf.mxu1 }
 0x405   :  { %v4315_v3 = vpack.c.bf16 %v4243_v24, %v4239_v10  ;;  %v4245_v47 = vadd.f32 %v4244_v11, %v11427_v48  ;;  %5063 = vmatprep.mubr.bf16.mxu1 %v4494_v2  ;;  %v11526_v54 = vpop.f32.mrf.mxu0  ;;  %v4801_v24 = vadd.f32 %v8755_v63, %v11579_v38  ;;  %v8758_v2 = vadd.f32 %v11472_v42, %v11467_v45 }
 0x406   :  { %v4248_v31 = vpop.f32.mrf.mxu1  ;;  %5064 = vmatmul.mubr.bf16.gmra.mxu1 %v4493_v40 }
 0x407   :  { %v4316_v37 = vpack.c.bf16 %v4245_v47, %v4241_v14  ;;  %v4433_v28 = vadd.bf16 %v11335_v44, %v4315_v3  ;;  %v4249_v21 = vadd.f32 %v4248_v31, %v11432_v36  ;;  %v11531_v36 = vpop.f32.mrf.mxu0  ;;  %v8761_v3 = vadd.f32 %v11483_v16, %v11478_v57 }
 0x408   :  { %v4250_v20 = vpop.f32.mrf.mxu1  ;;  %v4804_v31 = vadd.f32 %v8758_v2, %v11579_v38 }
 0x409   :  { %v4434_v52 = vadd.bf16 %v11342_v17, %v4316_v37  ;;  %v4497_v48 = vmax.bf16 %v12752_v59, %v4433_v28  ;;  %v4251_v4 = vadd.f32 %v4250_v20, %v11439_v39  ;;  %v11536_v23 = vpop.f32.mrf.mxu0 }
 0x40a   :  { %v4252_v34 = vpop.f32.mrf.mxu1 }
 0x40b   :  { %v4253_v49 = vadd.f32 %v4252_v34, %v11444_v61  ;;  %v4498_v6 = vmax.bf16 %v12752_v59, %v4434_v52  ;;  %v11538_v39 = vpop.f32.mrf.mxu0  ;;  %v4809_v52 = vadd.f32 %v8761_v3, %v11579_v38 }
 0x40c   :  { %v4254_v50 = vpop.f32.mrf.mxu1 }
 0x40d   :  { %v4319_v22 = vpack.c.bf16 %v4253_v49, %v4249_v21  ;;  %v4255_v9 = vadd.f32 %v4254_v50, %v11451_v5  ;;  %5071 = vmatprep.mubr.bf16.mxu1 %v4498_v6  ;;  %v11540_v5 = vpop.f32.mrf.mxu0  ;;  %v8764_v21 = vadd.f32 %v11495_v13, %v11490_v32 }
 0x40e   :  { %5072 = vmatmul.mubr.bf16.gmra.mxu1 %v4497_v48 }
 0x40f   :  { %v4320_v12 = vpack.c.bf16 %v4255_v9, %v4251_v4  ;;  %v4437_v56 = vadd.bf16 %v11335_v44, %v4319_v22  ;;  %v11542_v18 = vpop.f32.mrf.mxu0  ;;  %v8767_v4 = vadd.f32 %v11507_v41, %v11502_v60  ;;  %v4812_v9 = vadd.f32 %v8764_v21, %v11579_v38 }
 0x410   :  { %v8770_v60 = vadd.f32 %v11519_v7, %v11514_v29 }
 0x411   :  { %v4438_v61 = vadd.bf16 %v11342_v17, %v4320_v12  ;;  %v4501_v26 = vmax.bf16 %v12752_v59, %v4437_v56  ;;  %v11544_v62 = vpop.f32.mrf.mxu0 }
 0x412   :  { %v4820_v3 = vadd.f32 %v8770_v60, %v11579_v38 }
 0x413   :  { %v4502_v27 = vmax.bf16 %v12752_v59, %v4438_v61  ;;  %v11546_v44 = vpop.f32.mrf.mxu0 }
 0x415   :  { %5079 = vmatprep.mubr.bf16.mxu1 %v4502_v27  ;;  %v11548_v30 = vpop.f32.mrf.mxu0 }
 0x416   :  { %5080 = vmatmul.mubr.bf16.gmra.mxu1 %v4501_v26  ;;  %v4817_v26 = vadd.f32 %v8767_v4, %v11579_v38 }
 0x417   :  { %v11550_v17 = vpop.f32.mrf.mxu0 }
 0x419   :  { %v11552_v15 = vpop.f32.mrf.mxu0 }
 0x41b   :  { %v11554_v59 = vpop.f32.mrf.mxu0 }
 0x41d   :  { %v11556_v25 = vpop.f32.mrf.mxu0 }
 0x41f   :  { %v11558_v55 = vpop.f32.mrf.mxu0 }
 0x421   :  { %v11560_v43 = vpop.f32.mrf.mxu0 }
 0x423   :  { %v11562_v51 = vpop.f32.mrf.mxu0 }
 0x425   :  { %v11564_v46 = vpop.f32.mrf.mxu0 }
 0x427   :  { %v11566_v53 = vpop.f32.mrf.mxu0 }
 0x429   :  { %v11568_v58 = vpop.f32.mrf.mxu0 }
 0x42b   :  { %v11570_v35 = vpop.f32.mrf.mxu0 }
 0x42d   :  { %v11574_v33 = vpop.f32.mrf.mxu0 }
 0x42f   :  { %v11584_v40 = vpop.f32.mrf.mxu0 }
 0x431   :  { %v11594_v37 = vpop.f32.mrf.mxu0 }
 0x433   :  { %v11600_v49 = vpop.f32.mrf.mxu0 }
 0x435   :  { %v11605_v12 = vpop.f32.mrf.mxu0 }
 0x437   :  { %v11612_v41 = vpop.f32.mrf.mxu0 }
 0x45e   :  { %v8865_v0 = vpop.f32.mrf.mxu1 }
 0x460   :  { %v8866_v10 = vpop.f32.mrf.mxu1 }
 0x461   :  { %v8867_v11 = vadd.f32 %v8866_v10, %v8865_v0 }
 0x462   :  { %v8868_v14 = vpop.f32.mrf.mxu1 }
 0x463   :  { %v4962_v8 = vadd.f32 %v8867_v11, %v4801_v24 }
 0x464   :  { %v8869_v47 = vpop.f32.mrf.mxu1 }
 0x465   :  { %v8870_v28 = vadd.f32 %v8869_v47, %v8868_v14  ;;  %v5095_v45 = vmul.f32 %v11589_v19, %v4962_v8  ;;  %v5191_v6 = vmul.f32 %v4962_v8, %v4962_v8  ;;  %v8773_v14 = vadd.f32 %v11531_v36, %v11526_v54  ;;  %v11618_v47 = vpop.f32.mrf.mxu0 }
 0x466   :  { %v8871_v42 = vpop.f32.mrf.mxu1 }
 0x467   :  { %5127 = vadd.xlane.f32.xlu0 %v5095_v45  ;;  %v4965_v20 = vadd.f32 %v8870_v28, %v4804_v31  ;;  %v11624_v54 = vpop.f32.mrf.mxu0 }
 0x468   :  { %v8872_v34 = vpop.f32.mrf.mxu1 }
 0x469   :  { %v8873_v57 = vadd.f32 %v8872_v34, %v8871_v42  ;;  %v5192_v16 = vmul.f32 %v4965_v20, %v4965_v20  ;;  %v5096_v13 = vmul.f32 %v11589_v19, %v4965_v20  ;;  %v4825_v42 = vadd.f32 %v8773_v14, %v11579_v38  ;;  %v11630_v4 = vpop.f32.mrf.mxu0 }
 0x46a   :  { %v8874_v48 = vpop.f32.mrf.mxu1 }
 0x46b   :  { %v4970_v50 = vadd.f32 %v8873_v57, %v4809_v52  ;;  %5225 = vadd.xlane.f32.xlu1 %v5192_v16  ;;  %5223 = vadd.xlane.f32.xlu0 %v5191_v6  ;;  %v8776_v52 = vadd.f32 %v11538_v39, %v11536_v23  ;;  %v8779_v6 = vadd.f32 %v11542_v18, %v11540_v5  ;;  %v11636_v5 = vpop.f32.mrf.mxu0 }
 0x46c   :  { %v8875_v22 = vpop.f32.mrf.mxu1 }
 0x46d   :  { %v8876_v56 = vadd.f32 %v8875_v22, %v8874_v48  ;;  %v5097_v32 = vmul.f32 %v11589_v19, %v4970_v50  ;;  %v5193_v24 = vmul.f32 %v4970_v50, %v4970_v50  ;;  %v4828_v50 = vadd.f32 %v8776_v52, %v11579_v38 }
 0x46e   :  { %v8877_v61 = vpop.f32.mrf.mxu1 }
 0x46f   :  { %v4973_v27 = vadd.f32 %v8876_v56, %v4812_v9  ;;  %5131 = vadd.xlane.f32.xlu1 %v5097_v32  ;;  %5129 = vadd.xlane.f32.xlu0 %v5096_v13  ;;  %v4833_v32 = vadd.f32 %v8779_v6, %v11579_v38 }
 0x470   :  { %v8878_v63 = vpop.f32.mrf.mxu1 }
 0x471   :  { %v8879_v0 = vadd.f32 %v8878_v63, %v8877_v61  ;;  %v5098_v10 = vmul.f32 %v11589_v19, %v4973_v27  ;;  %v5194_v29 = vmul.f32 %v4973_v27, %v4973_v27  ;;  %v8782_v61 = vadd.f32 %v11546_v44, %v11544_v62 }
 0x472   :  { %v8880_v2 = vpop.f32.mrf.mxu1 }
 0x473   :  { %v4978_v11 = vadd.f32 %v8879_v0, %v4817_v26  ;;  %5133 = vadd.xlane.f32.xlu1 %v5098_v10  ;;  %5227 = vadd.xlane.f32.xlu0 %v5193_v24  ;;  %v8785_v0 = vadd.f32 %v11550_v17, %v11548_v30  ;;  %v4836_v24 = vadd.f32 %v8782_v61, %v11579_v38 }
 0x474   :  { %v8881_v8 = vpop.f32.mrf.mxu1 }
 0x475   :  { %v8882_v31 = vadd.f32 %v8881_v8, %v8880_v2  ;;  %v5099_v7 = vmul.f32 %v11589_v19, %v4978_v11  ;;  %v5195_v21 = vmul.f32 %v4978_v11, %v4978_v11  ;;  %v11642_v2 = vpop.f32.mrf.mxu0 }
 0x476   :  { %v8883_v28 = vpop.f32.mrf.mxu1 }
 0x477   :  { %v4981_v45 = vadd.f32 %v8882_v31, %v4820_v3  ;;  %5229 = vadd.xlane.f32.xlu1 %v5194_v29  ;;  %5135 = vadd.xlane.f32.xlu0 %v5099_v7  ;;  %v4841_v3 = vadd.f32 %v8785_v0, %v11579_v38  ;;  %v8788_v29 = vadd.f32 %v11554_v59, %v11552_v15  ;;  %v11648_v30 = vpop.f32.mrf.mxu0 }
 0x478   :  { %v8884_v20 = vpop.f32.mrf.mxu1  ;;  %v8791_v59 = vadd.f32 %v11558_v55, %v11556_v25 }
 0x479   :  { %v8885_v36 = vadd.f32 %v8884_v20, %v8883_v28  ;;  %v5100_v34 = vmul.f32 %v11589_v19, %v4981_v45  ;;  %v5196_v23 = vmul.f32 %v4981_v45, %v4981_v45  ;;  %v4844_v52 = vadd.f32 %v8788_v29, %v11579_v38 }
 0x47a   :  { %v8886_v57 = vpop.f32.mrf.mxu1 }
 0x47b   :  { %v4986_v16 = vadd.f32 %v8885_v36, %v4825_v42  ;;  %5137 = vadd.xlane.f32.xlu1 %v5100_v34  ;;  %5231 = vadd.xlane.f32.xlu0 %v5195_v21  ;;  %v11652_v36 = vpop.f32.mrf.mxu0 }
 0x47c   :  { %v8887_v48 = vpop.f32.mrf.mxu1 }
 0x47d   :  { %v8888_v22 = vadd.f32 %v8887_v48, %v8886_v57  ;;  %v5101_v39 = vmul.f32 %v11589_v19, %v4986_v16  ;;  %v5197_v26 = vmul.f32 %v4986_v16, %v4986_v16  ;;  %v8794_v48 = vadd.f32 %v11562_v51, %v11560_v43 }
 0x47e   :  { %v8889_v9 = vpop.f32.mrf.mxu1 }
 0x47f   :  { %v4989_v56 = vadd.f32 %v8888_v22, %v4828_v50  ;;  %5233 = vadd.xlane.f32.xlu1 %v5196_v23  ;;  %5139 = vadd.xlane.f32.xlu0 %v5101_v39  ;;  %v11659_v50 = vpop.f32.mrf.mxu0  ;;  %v4852_v25 = vadd.f32 %v8794_v48, %v11579_v38 }
 0x480   :  { %v8890_v13 = vpop.f32.mrf.mxu1 }
 0x481   :  { %v8891_v18 = vadd.f32 %v8890_v13, %v8889_v9  ;;  %v5102_v27 = vmul.f32 %v11589_v19, %v4989_v56  ;;  %v5198_v62 = vmul.f32 %v4989_v56, %v4989_v56  ;;  %v4849_v56 = vadd.f32 %v8791_v59, %v11579_v38  ;;  %v11664_v55 = vpop.f32.mrf.mxu0 }
 0x482   :  { %v8892_v63 = vpop.f32.mrf.mxu1 }
 0x483   :  { %v4994_v60 = vadd.f32 %v8891_v18, %v4833_v32  ;;  %5141 = vadd.xlane.f32.xlu1 %v5102_v27  ;;  %5235 = vadd.xlane.f32.xlu0 %v5197_v26  ;;  %v8800_v26 = vadd.f32 %v11570_v35, %v11568_v58 }
 0x484   :  { %v8893_v10 = vpop.f32.mrf.mxu1 }
 0x485   :  { %v8894_v11 = vadd.f32 %v8893_v10, %v8892_v63  ;;  %v5103_v44 = vmul.f32 %v11589_v19, %v4994_v60  ;;  %v5199_v28 = vmul.f32 %v4994_v60, %v4994_v60  ;;  %v11668_v63 = vpop.f32.mrf.mxu0 }
 0x486   :  { %v8895_v14 = vpop.f32.mrf.mxu1 }
 0x487   :  { %v4997_v8 = vadd.f32 %v8894_v11, %v4836_v24  ;;  %5237 = vadd.xlane.f32.xlu1 %v5198_v62  ;;  %5143 = vadd.xlane.f32.xlu0 %v5103_v44  ;;  %v8797_v24 = vadd.f32 %v11566_v53, %v11564_v46  ;;  %v4860_v62 = vadd.f32 %v8800_v26, %v11579_v38  ;;  %v11675_v44 = vpop.f32.mrf.mxu0 }
 0x488   :  { %v8896_v31 = vpop.f32.mrf.mxu1  ;;  %v8806_v46 = vadd.f32 %v11600_v49, %v11594_v37 }
 0x489   :  { %v8897_v17 = vadd.f32 %v8896_v31, %v8895_v14  ;;  %v5104_v7 = vmul.f32 %v11589_v19, %v4997_v8  ;;  %v5200_v21 = vmul.f32 %v4997_v8, %v4997_v8  ;;  %v11682_v53 = vpop.f32.mrf.mxu0 }
 0x48a   :  { %v8898_v45 = vpop.f32.mrf.mxu1 }
 0x48b   :  { %v5002_v42 = vadd.f32 %v8897_v17, %v4841_v3  ;;  %5145 = vadd.xlane.f32.xlu1 %v5104_v7  ;;  %5239 = vadd.xlane.f32.xlu0 %v5199_v28  ;;  %v4857_v3 = vadd.f32 %v8797_v24, %v11579_v38 }
 0x48c   :  { %v8899_v20 = vpop.f32.mrf.mxu1 }
 0x48d   :  { %v8900_v34 = vadd.f32 %v8899_v20, %v8898_v45  ;;  %v5105_v57 = vmul.f32 %v11589_v19, %v5002_v42  ;;  %v5201_v39 = vmul.f32 %v5002_v42, %v5002_v42  ;;  %v8803_v42 = vadd.f32 %v11584_v40, %v11574_v33 }
 0x48e   :  { %v8901_v15 = vpop.f32.mrf.mxu1 }
 0x48f   :  { %v5005_v16 = vadd.f32 %v8900_v34, %v4844_v52  ;;  %5241 = vadd.xlane.f32.xlu1 %v5200_v21  ;;  %5147 = vadd.xlane.f32.xlu0 %v5105_v57  ;;  %v4868_v52 = vadd.f32 %v8806_v46, %v11579_v38  ;;  %v11689_v34 = vpop.f32.mrf.mxu0 }
 0x490   :  { %v8902_v6 = vpop.f32.mrf.mxu1 }
 0x491   :  { %v8903_v22 = vadd.f32 %v8902_v6, %v8901_v15  ;;  %v5106_v23 = vmul.f32 %v11589_v19, %v5005_v16  ;;  %v5202_v18 = vmul.f32 %v5005_v16, %v5005_v16  ;;  %v4865_v15 = vadd.f32 %v8803_v42, %v11579_v38  ;;  %v11695_v40 = vpop.f32.mrf.mxu0 }
 0x492   :  { %v8904_v9 = vpop.f32.mrf.mxu1  ;;  %v8812_v16 = vadd.f32 %v11624_v54, %v11618_v47 }
 0x493   :  { %5149 = vadd.xlane.f32.xlu1 %v5106_v23  ;;  %5243 = vadd.xlane.f32.xlu0 %v5201_v39  ;;  %v5010_v13 = vadd.f32 %v8903_v22, %v4849_v56  ;;  %v8809_v39 = vadd.f32 %v11612_v41, %v11605_v12  ;;  %v8818_v12 = vadd.f32 %v11648_v30, %v11642_v2 }
 0x494   :  { %v8905_v32 = vpop.f32.mrf.mxu1 }
 0x495   :  { %v8906_v61 = vadd.f32 %v8905_v32, %v8904_v9  ;;  %v5107_v0 = vmul.f32 %v11589_v19, %v5010_v13  ;;  %v5203_v58 = vmul.f32 %v5010_v13, %v5010_v13  ;;  %v4876_v9 = vadd.f32 %v8812_v16, %v11579_v38  ;;  %v11701_v32 = vpop.f32.mrf.mxu0 }
 0x496   :  { %v8907_v43 = vpop.f32.mrf.mxu1  ;;  %v4884_v24 = vadd.f32 %v8818_v12, %v11579_v38 }
 0x497   :  { %v5013_v51 = vadd.f32 %v8906_v61, %v4852_v25  ;;  %5245 = vadd.xlane.f32.xlu0 %v5202_v18  ;;  %v4873_v18 = vadd.f32 %v8809_v39, %v11579_v38 }
 0x498   :  { %v8908_v27 = vpop.f32.mrf.mxu1 }
 0x499   :  { %v5108_v60 = vmul.f32 %v11589_v19, %v5013_v51  ;;  %v8909_v14 = vadd.f32 %v8908_v27, %v8907_v43  ;;  %v5204_v28 = vmul.f32 %v5013_v51, %v5013_v51  ;;  %v8832_v51 = vpop.f32.mrf.mxu0 }
 0x49a   :  { %v8910_v10 = vpop.f32.mrf.mxu1 }
 0x49b   :  { %5153 = vadd.xlane.f32.xlu1 %v5108_v60  ;;  %5151 = vadd.xlane.f32.xlu0 %v5107_v0  ;;  %v5018_v17 = vadd.f32 %v8909_v14, %v4857_v3 }
 0x49c   :  { %v8911_v11 = vpop.f32.mrf.mxu1 }
 0x49d   :  { %v8912_v8 = vadd.f32 %v8911_v11, %v8910_v10  ;;  %v5109_v49 = vmul.f32 %v11589_v19, %v5018_v17  ;;  %v5205_v22 = vmul.f32 %v5018_v17, %v5018_v17  ;;  %v8815_v10 = vadd.f32 %v11636_v5, %v11630_v4 }
 0x49e   :  { %v8913_v35 = vpop.f32.mrf.mxu1  ;;  %v8824_v4 = vadd.f32 %v11668_v63, %v11664_v55 }
 0x49f   :  { %v11678_v31 = vadd.f32 %v8912_v8, %v4860_v62  ;;  %5247 = vadd.xlane.f32.xlu0 %v5203_v58  ;;  %v11711_v62 = vpop.f32.mrf.mxu0 }
 0x4a0   :  { %v8914_v29 = vpop.f32.mrf.mxu1  ;;  %v4892_v42 = vadd.f32 %v8824_v4, %v11579_v38 }
 0x4a1   :  { %v5110_v7 = vmul.f32 %v11589_v19, %v11678_v31  ;;  %v8915_v21 = vadd.f32 %v8914_v29, %v8913_v35  ;;  %v4881_v35 = vadd.f32 %v8815_v10, %v11579_v38  ;;  %v8835_v29 = vpop.f32.mrf.mxu0 }
 0x4a2   :  { %v8916_v45 = vpop.f32.mrf.mxu1 }
 0x4a3   :  { %5157 = vadd.xlane.f32.xlu1 %v5110_v7  ;;  %5249 = vadd.xlane.f32.xlu0 %v5204_v28  ;;  %v5026_v6 = vadd.f32 %v8915_v21, %v4865_v15 }
 0x4a4   :  { %v8917_v20 = vpop.f32.mrf.mxu1 }
 0x4a5   :  { %v8918_v37 = vadd.f32 %v8917_v20, %v8916_v45  ;;  %v5111_v13 = vmul.f32 %v11589_v19, %v5026_v6  ;;  %v5207_v60 = vmul.f32 %v5026_v6, %v5026_v6  ;;  %v8821_v45 = vadd.f32 %v11659_v50, %v11652_v36 }
 0x4a6   :  { %v8919_v57 = vpop.f32.mrf.mxu1  ;;  %v8830_v36 = vadd.f32 %v11695_v40, %v11689_v34 }
 0x4a7   :  { %v5029_v59 = vadd.f32 %v8918_v37, %v4868_v52  ;;  %5155 = vadd.xlane.f32.xlu0 %v5109_v49  ;;  %v8837_v52 = vpop.f32.mrf.mxu0 }
 0x4a8   :  { %v8920_v33 = vpop.f32.mrf.mxu1 }
 0x4a9   :  { %v5112_v48 = vmul.f32 %v11589_v19, %v5029_v59  ;;  %v8921_v25 = vadd.f32 %v8920_v33, %v8919_v57  ;;  %v5208_v54 = vmul.f32 %v5029_v59, %v5029_v59  ;;  %v4889_v57 = vadd.f32 %v8821_v45, %v11579_v38  ;;  %v8838_v59 = vpop.f32.mrf.mxu0 }
 0x4aa   :  { %v8922_v23 = vpop.f32.mrf.mxu1 }
 0x4ab   :  { %5161 = vadd.xlane.f32.xlu1 %v5112_v48  ;;  %5251 = vadd.xlane.f32.xlu0 %v5205_v22  ;;  %v5034_v27 = vadd.f32 %v8921_v25, %v4873_v18  ;;  %v8827_v22 = vadd.f32 %v11682_v53, %v11675_v44 }
 0x4ac   :  { %v8923_v56 = vpop.f32.mrf.mxu1 }
 0x4ad   :  { %v8924_v47 = vadd.f32 %v8923_v56, %v8922_v23  ;;  %v5113_v30 = vmul.f32 %v11589_v19, %v5034_v27  ;;  %v5209_v7 = vmul.f32 %v5034_v27, %v5034_v27  ;;  %v4900_v23 = vadd.f32 %v8830_v36, %v11579_v38 }
 0x4ae   :  { %v8925_v61 = vpop.f32.mrf.mxu1 }
 0x4af   :  { %v5037_v43 = vadd.f32 %v8924_v47, %v4876_v9  ;;  %5257 = vadd.xlane.f32.xlu1 %v5208_v54  ;;  %5159 = vadd.xlane.f32.xlu0 %v5111_v13  ;;  %v8840_v9 = vpop.f32.mrf.mxu0  ;;  %v4897_v54 = vadd.f32 %v8827_v22, %v11579_v38  ;;  %v8833_v13 = vadd.f32 %v8832_v51, %v11701_v32 }
 0x4b0   :  { %v8926_v41 = vpop.f32.mrf.mxu1  ;;  %v5206_v22 = vmul.f32 %v11678_v31, %v11678_v31 }
 0x4b1   :  { %v5114_v26 = vmul.f32 %v11589_v19, %v5037_v43  ;;  %v8927_v14 = vadd.f32 %v8926_v41, %v8925_v61  ;;  %v5210_v2 = vmul.f32 %v5037_v43, %v5037_v43  ;;  %v8841_v53 = vpop.f32.mrf.mxu0 }
 0x4b2   :  { %v8928_v0 = vpop.f32.mrf.mxu1 }
 0x4b3   :  { %5165 = vadd.xlane.f32.xlu1 %v5114_v26  ;;  %5255 = vadd.xlane.f32.xlu0 %v5207_v60  ;;  %v5042_v46 = vadd.f32 %v8927_v14, %v4881_v35  ;;  %v4905_v26 = vadd.f32 %v8833_v13, %v11579_v38  ;;  %v8836_v60 = vadd.f32 %v8835_v29, %v11711_v62  ;;  %v8843_v10 = vpop.f32.mrf.mxu0 }
 0x4b4   :  { %v8929_v11 = vpop.f32.mrf.mxu1 }
 0x4b5   :  { %v8930_v8 = vadd.f32 %v8929_v11, %v8928_v0  ;;  %v5115_v55 = vmul.f32 %v11589_v19, %v5042_v46  ;;  %v5211_v6 = vmul.f32 %v5042_v46, %v5042_v46 }
 0x4b6   :  { %v8931_v58 = vpop.f32.mrf.mxu1 }
 0x4b7   :  { %v5045_v3 = vadd.f32 %v8930_v8, %v4884_v24  ;;  %5261 = vadd.xlane.f32.xlu1 %v5210_v2  ;;  %5163 = vadd.xlane.f32.xlu0 %v5113_v30  ;;  %v4908_v8 = vadd.f32 %v8836_v60, %v11579_v38  ;;  %v8839_v2 = vadd.f32 %v8838_v59, %v8837_v52 }
 0x4b8   :  { %v8932_v5 = vpop.f32.mrf.mxu1 }
 0x4b9   :  { %v5116_v17 = vmul.f32 %v11589_v19, %v5045_v3  ;;  %v8933_v21 = vadd.f32 %v8932_v5, %v8931_v58  ;;  %v5212_v49 = vmul.f32 %v5045_v3, %v5045_v3  ;;  %v8844_v58 = vpop.f32.mrf.mxu0  ;;  %v4913_v29 = vadd.f32 %v8839_v2, %v11579_v38  ;;  %v12867_v2 = vld [vmem:[#allocation10_spill] sm:$0xff] }
 0x4ba   :  { %v8934_v28 = vpop.f32.mrf.mxu1  ;;  %v8845_v46 = vadd.f32 %v8844_v58, %v8843_v10  ;;  %v11764_v58 = vsub.s32 2, %v12867_v2 }
 0x4bb   :  { %5169 = vadd.xlane.f32.xlu1 %v5116_v17  ;;  %5259 = vadd.xlane.f32.xlu0 %v5209_v7  ;;  %v5050_v16 = vadd.f32 %v8933_v21, %v4889_v57  ;;  %v8846_v36 = vpop.f32.mrf.mxu0 }
 0x4bc   :  { %v8935_v20 = vpop.f32.mrf.mxu1  ;;  %v4921_v52 = vadd.f32 %v8845_v46, %v11579_v38  ;;  %v11778_v46 = vsub.s32 6, %v12867_v2 }
 0x4bd   :  { %v8936_v37 = vadd.f32 %v8935_v20, %v8934_v28  ;;  %v5117_v34 = vmul.f32 %v11589_v19, %v5050_v16  ;;  %v5213_v41 = vmul.f32 %v5050_v16, %v5050_v16  ;;  %v8842_v20 = vadd.f32 %v8841_v53, %v8840_v9 }
 0x4be   :  { %v8937_v63 = vpop.f32.mrf.mxu1 }
 0x4bf   :  { %v5053_v15 = vadd.f32 %v8936_v37, %v4892_v42  ;;  %5265 = vadd.xlane.f32.xlu1 %v5212_v49  ;;  %5167 = vadd.xlane.f32.xlu0 %v5115_v55  ;;  %v4916_v57 = vadd.f32 %v8842_v20, %v11579_v38 }
 0x4c0   :  { %v8938_v50 = vpop.f32.mrf.mxu1 }
 0x4c1   :  { %v5118_v33 = vmul.f32 %v11589_v19, %v5053_v15  ;;  %v8939_v56 = vadd.f32 %v8938_v50, %v8937_v63  ;;  %v5214_v47 = vmul.f32 %v5053_v15, %v5053_v15 }
 0x4c2   :  { %v8940_v48 = vpop.f32.mrf.mxu1 }
 0x4c3   :  { %5173 = vadd.xlane.f32.xlu1 %v5118_v33  ;;  %5263 = vadd.xlane.f32.xlu0 %v5211_v6  ;;  %v5058_v18 = vadd.f32 %v8939_v56, %v4897_v54  ;;  %v8847_v6 = vpop.f32.mrf.mxu0 }
 0x4c4   :  { %v8941_v39 = vpop.f32.mrf.mxu1 }
 0x4c5   :  { %v8942_v25 = vadd.f32 %v8941_v39, %v8940_v48  ;;  %v5119_v11 = vmul.f32 %v11589_v19, %v5058_v18  ;;  %v5215_v4 = vmul.f32 %v5058_v18, %v5058_v18  ;;  %v8848_v39 = vadd.f32 %v8847_v6, %v8846_v36 }
 0x4c6   :  { %v8943_v40 = vpop.f32.mrf.mxu1 }
 0x4c7   :  { %v5061_v61 = vadd.f32 %v8942_v25, %v4900_v23  ;;  %5269 = vadd.xlane.f32.xlu1 %v5214_v47  ;;  %5171 = vadd.xlane.f32.xlu0 %v5117_v34  ;;  %v4924_v25 = vadd.f32 %v8848_v39, %v11579_v38 }
 0x4c8   :  { %v8944_v44 = vpop.f32.mrf.mxu1 }
 0x4c9   :  { %v8945_v43 = vadd.f32 %v8944_v44, %v8943_v40  ;;  %v5120_v12 = vmul.f32 %v11589_v19, %v5061_v61  ;;  %v5216_v24 = vmul.f32 %v5061_v61, %v5061_v61 }
 0x4ca   :  { %v8946_v27 = vpop.f32.mrf.mxu1 }
 0x4cb   :  { %5177 = vadd.xlane.f32.xlu1 %v5120_v12  ;;  %5267 = vadd.xlane.f32.xlu0 %v5213_v41  ;;  %v5066_v32 = vadd.f32 %v8945_v43, %v4905_v26 }
 0x4cc   :  { %v8947_v0 = vpop.f32.mrf.mxu1 }
 0x4cd   :  { %v8948_v51 = vadd.f32 %v8947_v0, %v8946_v27  ;;  %v5217_v62 = vmul.f32 %v5066_v32, %v5066_v32  ;;  %v5121_v45 = vmul.f32 %v11589_v19, %v5066_v32 }
 0x4ce   :  { %v8949_v14 = vpop.f32.mrf.mxu1 }
 0x4cf   :  { %5273 = vadd.xlane.f32.xlu1 %v5216_v24  ;;  %5175 = vadd.xlane.f32.xlu0 %v5119_v11  ;;  %v5069_v35 = vadd.f32 %v8948_v51, %v4908_v8  ;;  %v11758_v11 = vstv %s12695_s10 }
 0x4d0   :  { %v8950_v30 = vpop.f32.mrf.mxu1 }
 0x4d1   :  { %v8951_v3 = vadd.f32 %v8950_v30, %v8949_v14  ;;  %v5122_v28 = vmul.f32 %v11589_v19, %v5069_v35  ;;  %v5218_v55 = vmul.f32 %v5069_v35, %v5069_v35  ;;  %v11761_v30 = vsub.s32 1, %v12867_v2 }
 0x4d2   :  { %v8952_v5 = vpop.f32.mrf.mxu1  ;;  %v11767_v35 = vsub.s32 3, %v12867_v2 }
 0x4d3   :  { %5275 = vadd.xlane.f32.xlu1 %v5217_v62  ;;  %5271 = vadd.xlane.f32.xlu0 %v5215_v4  ;;  %v5074_v7 = vadd.f32 %v8951_v3, %v4913_v29  ;;  %v11775_v29 = vsub.s32 5, %v12867_v2 }
 0x4d4   :  { %v8953_v17 = vpop.f32.mrf.mxu1 }
 0x4d5   :  { %v8954_v37 = vadd.f32 %v8953_v17, %v8952_v5  ;;  %v5123_v63 = vmul.f32 %v11589_v19, %v5074_v7  ;;  %v5219_v59 = vmul.f32 %v5074_v7, %v5074_v7  ;;  %v11772_v5 = vsub.s32 4, %v12867_v2 }
 0x4d6   :  { %v8955_v42 = vpop.f32.mrf.mxu1 }
 0x4d7   :  { %5181 = vadd.xlane.f32.xlu1 %v5122_v28  ;;  %5179 = vadd.xlane.f32.xlu0 %v5121_v45  ;;  %v5077_v50 = vadd.f32 %v8954_v37, %v4916_v57  ;;  %v11782_v28 = vsub.s32 7, %v12867_v2 }
 0x4d8   :  { %v8956_v21 = vpop.f32.mrf.mxu1 }
 0x4d9   :  { %v8957_v49 = vadd.f32 %v8956_v21, %v8955_v42  ;;  %v5124_v48 = vmul.f32 %v11589_v19, %v5077_v50  ;;  %v5220_v56 = vmul.f32 %v5077_v50, %v5077_v50 }
 0x4da   :  { %v8958_v33 = vpop.f32.mrf.mxu1 }
 0x4db   :  { %v5082_v15 = vadd.f32 %v8957_v49, %v4921_v52  ;;  %5277 = vadd.xlane.f32.xlu1 %v5218_v55  ;;  %5183 = vadd.xlane.f32.xlu0 %v5123_v63 }
 0x4dc   :  { %v8959_v23 = vpop.f32.mrf.mxu1 }
 0x4dd   :  { %v5125_v16 = vmul.f32 %v11589_v19, %v5082_v15  ;;  %v8960_v9 = vadd.f32 %v8959_v23, %v8958_v33  ;;  %v5221_v34 = vmul.f32 %v5082_v15, %v5082_v15 }
 0x4df   :  { %5279 = vadd.xlane.f32.xlu1 %v5219_v59  ;;  %5187 = vadd.xlane.f32.xlu0 %v5125_v16  ;;  %v5085_v47 = vadd.f32 %v8960_v9, %v4924_v25  ;;  %v12868_v9 = vld [vmem:[#allocation11_spill] sm:$0xff] }
 0x4e1   :  { %v5126_v40 = vmul.f32 %v11589_v19, %v5085_v47  ;;  %v5222_v13 = vmul.f32 %v5085_v47, %v5085_v47 }
 0x4e3   :  { %5185 = vadd.xlane.f32.xlu1 %v5124_v48  ;;  %5253 = vadd.xlane.f32.xlu0 %v5206_v22 }
 0x4e7   :  { %5281 = vadd.xlane.f32.xlu1 %v5220_v56 }
 0x4eb   :  { %5283 = vadd.xlane.f32.xlu1 %v5221_v34 }
 0x4ef   :  { %5189 = vadd.xlane.f32.xlu1 %v5126_v40 }
 0x4f0   :  { %v5128_v54 = vpop.xlane.xlu0 %5127 }
 0x4f3   :  { %5285 = vadd.xlane.f32.xlu1 %v5222_v13 }
 0x4f4   :  { %v5226_v61 = vpop.xlane.xlu1 %5225  ;;  %v5224_v31 = vpop.xlane.xlu0 %5223 }
 0x4f5   :  { %v5288_v44 = vmax.f32 %v5226_v61, 1e-24  ;;  %v5287_v53 = vmax.f32 %v5224_v31, 1e-24 }
 0x4f7   :  { %9416 = vrsqrt.f32 %v5288_v44 }
 0x4f8   :  { %9418 = vrsqrt.f32 %v5287_v53  ;;  %v5132_v18 = vpop.xlane.xlu1 %5131  ;;  %v5130_v43 = vpop.xlane.xlu0 %5129 }
 0x4fc   :  { %v11749_v12 = vpop.xlane.xlu1 %5133  ;;  %v5228_v38 = vpop.xlane.xlu0 %5227 }
 0x4fd   :  { %v5289_v41 = vmax.f32 %v5228_v38, 1e-24 }
 0x4ff   :  { %9420 = vrsqrt.f32 %v5289_v41 }
 0x500   :  { %v5230_v27 = vpop.xlane.xlu1 %5229  ;;  %v11751_v26 = vpop.xlane.xlu0 %5135 }
 0x501   :  { %v5290_v19 = vmax.f32 %v5230_v27, 1e-24 }
 0x503   :  { %9422 = vrsqrt.f32 %v5290_v19 }
 0x504   :  { %v9417_v60 = vpop.eup %9416  ;;  %v11753_v0 = vpop.xlane.xlu1 %5137 }
 0x505   :  { %v5232_v10 = vpop.xlane.xlu0 %5231  ;;  %v9419_v32 = vpop.eup %9418  ;;  %v5352_v51 = vmul.f32 %v9417_v60, %v5130_v43 }
 0x506   :  { %v5291_v24 = vmax.f32 %v5232_v10, 1e-24  ;;  %v5351_v14 = vmul.f32 %v9419_v32, %v5128_v54 }
 0x507   :  { %v5384_v8 = vmul.f32 14.285714, %v5352_v51 }
 0x508   :  { %v5383_v3 = vmul.f32 14.285714, %v5351_v14  ;;  %v5234_v62 = vpop.xlane.xlu1 %5233  ;;  %9424 = vrsqrt.f32 %v5291_v24 }
 0x509   :  { %v11769_v4 = vpop.xlane.xlu0 %5139  ;;  %v5418_v17 = vadd.f32 %v11758_v11, %v5384_v8  ;;  %v5292_v7 = vmax.f32 %v5234_v62, 1e-24 }
 0x50a   :  { %v5417_v45 = vadd.f32 %v11758_v11, %v5383_v3 }
 0x50b   :  { %9426 = vrsqrt.f32 %v5292_v7  ;;  %v5516_v42 = vrot.slane %v5418_v17, %v12815_v1  ;;  %v5520_v20 = vrot.slane %v5418_v17, %v11761_v30  ;;  %v5524_v52 = vrot.slane %v5418_v17, %v11764_v58 }
 0x50c   :  { %v9421_v21 = vpop.eup %9420  ;;  %v11788_v37 = vpop.xlane.xlu1 %5141  ;;  %v5528_v55 = vrot.slane %v5418_v17, %v11767_v35  ;;  %v5532_v63 = vrot.slane %v5418_v17, %v11772_v5  ;;  %v5536_v57 = vrot.slane %v5418_v17, %v11775_v29  ;;  %v5540_v15 = vrot.slane %v5418_v17, %v11778_v46 }
 0x50d   :  { %v5236_v49 = vpop.xlane.xlu0 %5235  ;;  %v5353_v36 = vmul.f32 %v9421_v21, %v5132_v18  ;;  %v5544_v59 = vrot.slane %v5418_v17, %v11782_v28  ;;  %v6554_v16 = vcombine.low %v5516_v42, %v5520_v20  ;;  %v5484_v48 = vrot.slane %v5417_v45, %v12815_v1 }
 0x50e   :  { %v5293_v50 = vmax.f32 %v5236_v49, 1e-24  ;;  %v6555_v33 = vcombine.low %v5524_v52, %v5528_v55  ;;  %v6556_v6 = vcombine.low %v5532_v63, %v5536_v57  ;;  %v5488_v22 = vrot.slane %v5417_v45, %v11761_v30 }
 0x50f   :  { %v5385_v23 = vmul.f32 14.285714, %v5353_v36  ;;  %v6557_v39 = vcombine.low %v5540_v15, %v5544_v59  ;;  %v6564_v56 = vrot.slane %v6554_v16, %v12868_v9  ;;  %v5492_v13 = vrot.slane %v5417_v45, %v11764_v58 }
 0x510   :  { %9428 = vrsqrt.f32 %v5293_v50  ;;  %v9423_v25 = vpop.eup %9422  ;;  %v5238_v47 = vpop.xlane.xlu1 %5237  ;;  %v6571_v40 = vrot.slane %v6555_v33, %v12868_v9  ;;  %v6578_v54 = vrot.slane %v6556_v6, %v12868_v9  ;;  %v5496_v61 = vrot.slane %v5417_v45, %v11767_v35 }
 0x511   :  { %v11798_v34 = vpop.xlane.xlu0 %5143  ;;  %v5419_v31 = vadd.f32 %v11758_v11, %v5385_v23  ;;  %v5294_v44 = vmax.f32 %v5238_v47, 1e-24  ;;  %v6585_v53 = vrot.slane %v6557_v39, %v12868_v9  ;;  %v5500_v43 = vrot.slane %v5417_v45, %v11772_v5 }
 0x512   :  { %v6586_v18 = vcombine.low %v6564_v56, %v6571_v40  ;;  %v5504_v38 = vrot.slane %v5417_v45, %v11775_v29  ;;  %v5508_v41 = vrot.slane %v5417_v45, %v11778_v46  ;;  %v5354_v27 = vmul.f32 %v9423_v25, %v11749_v12 }
 0x513   :  { %9430 = vrsqrt.f32 %v5294_v44  ;;  %v6587_v19 = vcombine.low %v6578_v54, %v6585_v53  ;;  %v5512_v60 = vrot.slane %v5417_v45, %v11782_v28  ;;  %v6505_v24 = vcombine.low %v5484_v48, %v5488_v22 }
 0x514   :  { %v11811_v10 = vpop.xlane.xlu1 %5145  ;;  %v6594_v51 = vrot.slane %v6586_v18, %v12868_v9  ;;  %v6506_v14 = vcombine.low %v5492_v13, %v5496_v61  ;;  %v6507_v8 = vcombine.low %v5500_v43, %v5504_v38  ;;  %v5386_v45 = vmul.f32 14.285714, %v5354_v27 }
 0x515   :  { %v5240_v32 = vpop.xlane.xlu0 %5239  ;;  %v6601_v62 = vrot.slane %v6587_v19, %v12868_v9  ;;  %v9425_v17 = vpop.eup %9424  ;;  %v6508_v7 = vcombine.low %v5508_v41, %v5512_v60  ;;  %v6515_v42 = vrot.slane %v6505_v24, %v12868_v9  ;;  %v5548_v21 = vrot.slane %v5419_v31, %v12815_v1 }
 0x516   :  { %v5295_v3 = vmax.f32 %v5240_v32, 1e-24  ;;  %v6522_v12 = vrot.slane %v6506_v14, %v12868_v9  ;;  %v6529_v20 = vrot.slane %v6507_v8, %v12868_v9  ;;  %v5552_v36 = vrot.slane %v5419_v31, %v11761_v30 }
 0x517   :  { %v6602_v52 = vcombine.low %v6594_v51, %v6601_v62  ;;  %v6536_v55 = vrot.slane %v6508_v7, %v12868_v9  ;;  %v5556_v50 = vrot.slane %v5419_v31, %v11764_v58  ;;  %v5355_v59 = vmul.f32 %v9425_v17, %v11751_v26 }
 0x518   :  { %9432 = vrsqrt.f32 %v5295_v3  ;;  %v9427_v49 = vpop.eup %9426  ;;  %v6537_v63 = vcombine.low %v6515_v42, %v6522_v12  ;;  %v5242_v57 = vpop.xlane.xlu1 %5241  ;;  %v5560_v6 = vrot.slane %v5419_v31, %v11767_v35  ;;  %v5564_v23 = vrot.slane %v5419_v31, %v11772_v5 }
 0x519   :  { %v11820_v15 = vpop.xlane.xlu0 %5147  ;;  %v5356_v16 = vmul.f32 %v9427_v49, %v11753_v0  ;;  %8077 = vperm.xlu1 %8971, %v6602_v52   ;;  %v5296_v33 = vmax.f32 %v5242_v57, 1e-24  ;;  %v6538_v48 = vcombine.low %v6529_v20, %v6536_v55  ;;  %v5568_v39 = vrot.slane %v5419_v31, %v11775_v29 }
 0x51a   :  { %v6545_v22 = vrot.slane %v6537_v63, %v12868_v9  ;;  %v5420_v56 = vadd.f32 %v11758_v11, %v5386_v45  ;;  %v5572_v25 = vrot.slane %v5419_v31, %v11778_v46  ;;  %v5576_v26 = vrot.slane %v5419_v31, %v11782_v28 }
 0x51b   :  { %9434 = vrsqrt.f32 %v5296_v33  ;;  %v6552_v0 = vrot.slane %v6538_v48, %v12868_v9  ;;  %v6603_v54 = vcombine.low %v5548_v21, %v5552_v36  ;;  %v6604_v13 = vcombine.low %v5556_v50, %v5560_v6 }
 0x51c   :  { %v6605_v61 = vcombine.low %v5564_v23, %v5568_v39  ;;  %v5387_v44 = vmul.f32 14.285714, %v5355_v59  ;;  %v5388_v53 = vmul.f32 14.285714, %v5356_v16  ;;  %v6606_v43 = vcombine.low %v5572_v25, %v5576_v26 }
 0x51d   :  { %v9429_v47 = vpop.eup %9428  ;;  %v5244_v40 = vpop.xlane.xlu0 %5243  ;;  %v6553_v38 = vcombine.low %v6545_v22, %v6552_v0  ;;  %v6613_v41 = vrot.slane %v6603_v54, %v12868_v9  ;;  %v6620_v27 = vrot.slane %v6604_v13, %v12868_v9  ;;  %v5580_v32 = vrot.slane %v5420_v56, %v12815_v1 }
 0x51e   :  { %v5297_v18 = vmax.f32 %v5244_v40, 1e-24  ;;  %v6627_v19 = vrot.slane %v6605_v61, %v12868_v9  ;;  %v5357_v31 = vmul.f32 %v9429_v47, %v11769_v4  ;;  %v6634_v60 = vrot.slane %v6606_v43, %v12868_v9  ;;  %v5150_v54 = vpop.xlane.xlu1 %5149 }
 0x51f   :  { %8074 = vperm.xlu0 %8970, %v6553_v38   ;;  %v6635_v24 = vcombine.low %v6613_v41, %v6620_v27  ;;  %v5584_v8 = vrot.slane %v5420_v56, %v11761_v30  ;;  %v5588_v3 = vrot.slane %v5420_v56, %v11764_v58  ;;  %v5592_v62 = vrot.slane %v5420_v56, %v11767_v35 }
 0x520   :  { %9436 = vrsqrt.f32 %v5297_v18  ;;  %v9431_v51 = vpop.eup %9430  ;;  %v5421_v17 = vadd.f32 %v11758_v11, %v5387_v44  ;;  %v6636_v4 = vcombine.low %v6627_v19, %v6634_v60  ;;  %v5596_v20 = vrot.slane %v5420_v56, %v11772_v5 }
 0x521   :  { %v5246_v14 = vpop.xlane.xlu0 %5245  ;;  %v5358_v7 = vmul.f32 %v9431_v51, %v11788_v37  ;;  %v6643_v12 = vrot.slane %v6635_v24, %v12868_v9  ;;  %v5600_v45 = vrot.slane %v5420_v56, %v11775_v29  ;;  %v5604_v52 = vrot.slane %v5420_v56, %v11778_v46 }
 0x522   :  { %v5298_v42 = vmax.f32 %v5246_v14, 1e-24  ;;  %v11850_v21 = vadd.f32 %v11758_v11, %v5388_v53  ;;  %v5389_v49 = vmul.f32 14.285714, %v5357_v31  ;;  %v6650_v55 = vrot.slane %v6636_v4, %v12868_v9 }
 0x523   :  { %v5608_v63 = vrot.slane %v5420_v56, %v11782_v28  ;;  %v6652_v37 = vcombine.low %v5580_v32, %v5584_v8  ;;  %v6653_v36 = vcombine.low %v5588_v3, %v5592_v62  ;;  %v6654_v50 = vcombine.low %v5596_v20, %v5600_v45 }
 0x524   :  { %9438 = vrsqrt.f32 %v5298_v42  ;;  %v5390_v16 = vmul.f32 14.285714, %v5358_v7  ;;  %v6651_v33 = vcombine.low %v6643_v12, %v6650_v55  ;;  %v5612_v48 = vrot.slane %v5421_v17, %v12815_v1  ;;  %v11878_v62 = vpop.xlane.xlu1 %5153 }
 0x525   :  { %v9433_v57 = vpop.eup %9432  ;;  %v11854_v59 = vpop.xlane.xlu0 %5151  ;;  %v6655_v6 = vcombine.low %v5604_v52, %v5608_v63  ;;  %v6662_v22 = vrot.slane %v6652_v37, %v12868_v9  ;;  %v6669_v23 = vrot.slane %v6653_v36, %v12868_v9  ;;  %v6676_v39 = vrot.slane %v6654_v50, %v12868_v9 }
 0x526   :  { %v5616_v56 = vrot.slane %v5421_v17, %v11761_v30  ;;  %v5359_v25 = vmul.f32 %v9433_v57, %v11798_v34  ;;  %8080 = vperm.xlu1 %8971, %v6651_v33   ;;  %v5620_v47 = vrot.slane %v5421_v17, %v11764_v58  ;;  %v5624_v0 = vrot.slane %v5421_v17, %v11767_v35 }
 0x527   :  { %v6683_v26 = vrot.slane %v6655_v6, %v12868_v9  ;;  %v6684_v13 = vcombine.low %v6662_v22, %v6669_v23  ;;  %v5628_v61 = vrot.slane %v5421_v17, %v11772_v5  ;;  %v5632_v44 = vrot.slane %v5421_v17, %v11775_v29 }
 0x528   :  { %v9435_v40 = vpop.eup %9434  ;;  %v5636_v53 = vrot.slane %v5421_v17, %v11778_v46  ;;  %v11869_v43 = vadd.f32 %v11758_v11, %v5389_v49  ;;  %v5640_v41 = vrot.slane %v5421_v17, %v11782_v28  ;;  %v6701_v19 = vcombine.low %v5612_v48, %v5616_v56 }
 0x529   :  { %v5248_v18 = vpop.xlane.xlu0 %5247  ;;  %v5360_v34 = vmul.f32 %v9435_v40, %v11811_v10  ;;  %v6685_v38 = vcombine.low %v6676_v39, %v6683_v26  ;;  %v6692_v27 = vrot.slane %v6684_v13, %v12868_v9  ;;  %v6702_v31 = vcombine.low %v5620_v47, %v5624_v0 }
 0x52a   :  { %v6703_v60 = vcombine.low %v5628_v61, %v5632_v44  ;;  %v11875_v32 = vadd.f32 %v11758_v11, %v5390_v16  ;;  %v6704_v24 = vcombine.low %v5636_v53, %v5640_v41  ;;  %v5299_v14 = vmax.f32 %v5248_v18, 1e-24 }
 0x52b   :  { %v6699_v51 = vrot.slane %v6685_v38, %v12868_v9  ;;  %v5391_v3 = vmul.f32 14.285714, %v5359_v25  ;;  %v6711_v10 = vrot.slane %v6701_v19, %v12868_v9  ;;  %v6718_v17 = vrot.slane %v6702_v31, %v12868_v9 }
 0x52c   :  { %v6725_v7 = vrot.slane %v6703_v60, %v12868_v9  ;;  %v5392_v42 = vmul.f32 14.285714, %v5360_v34  ;;  %v6732_v20 = vrot.slane %v6704_v24, %v12868_v9  ;;  %v5644_v45 = vrot.slane %v11850_v21, %v12815_v1 }
 0x52d   :  { %v9437_v8 = vpop.eup %9436  ;;  %v5250_v4 = vpop.xlane.xlu0 %5249  ;;  %v6700_v12 = vcombine.low %v6692_v27, %v6699_v51  ;;  %v6733_v52 = vcombine.low %v6711_v10, %v6718_v17  ;;  %9440 = vrsqrt.f32 %v5299_v14  ;;  %v5648_v49 = vrot.slane %v11850_v21, %v11761_v30 }
 0x52e   :  { %v5652_v55 = vrot.slane %v11850_v21, %v11764_v58  ;;  %v5361_v63 = vmul.f32 %v9437_v8, %v11820_v15  ;;  %v6734_v57 = vcombine.low %v6725_v7, %v6732_v20  ;;  %v5656_v37 = vrot.slane %v11850_v21, %v11767_v35  ;;  %v11902_v15 = vpop.xlane.xlu1 %5157 }
 0x52f   :  { %8083 = vperm.xlu1 %8971, %v6700_v12   ;;  %v5660_v36 = vrot.slane %v11850_v21, %v11772_v5  ;;  %v6741_v50 = vrot.slane %v6733_v52, %v12868_v9  ;;  %v5664_v16 = vrot.slane %v11850_v21, %v11775_v29  ;;  %v5668_v33 = vrot.slane %v11850_v21, %v11778_v46 }
 0x530   :  { %v5672_v6 = vrot.slane %v11850_v21, %v11782_v28  ;;  %v11907_v23 = vadd.f32 %v11758_v11, %v5391_v3  ;;  %v11910_v39 = vadd.f32 %v11758_v11, %v5392_v42  ;;  %v6748_v56 = vrot.slane %v6734_v57, %v12868_v9 }
 0x531   :  { %v11904_v48 = vpop.xlane.xlu0 %5155  ;;  %v9439_v22 = vpop.eup %9438  ;;  %v6750_v25 = vcombine.low %v5644_v45, %v5648_v49  ;;  %v6751_v26 = vcombine.low %v5652_v55, %v5656_v37  ;;  %v6752_v47 = vcombine.low %v5660_v36, %v5664_v16  ;;  %v5300_v40 = vmax.f32 %v5250_v4, 1e-24 }
 0x532   :  { %v6753_v0 = vcombine.low %v5668_v33, %v5672_v6  ;;  %v5393_v13 = vmul.f32 14.285714, %v5361_v63  ;;  %v6749_v21 = vcombine.low %v6741_v50, %v6748_v56  ;;  %v5676_v44 = vrot.slane %v11869_v43, %v12815_v1 }
 0x533   :  { %v6760_v61 = vrot.slane %v6750_v25, %v12868_v9  ;;  %v5362_v53 = vmul.f32 %v9439_v22, %v5150_v54  ;;  %v6767_v18 = vrot.slane %v6751_v26, %v12868_v9  ;;  %v6774_v34 = vrot.slane %v6752_v47, %v12868_v9 }
 0x534   :  { %v6781_v38 = vrot.slane %v6753_v0, %v12868_v9  ;;  %v11919_v41 = vpop.xlane.xlu1 %5161  ;;  %8086 = vperm.xlu1 %8971, %v6749_v21   ;;  %9442 = vrsqrt.f32 %v5300_v40  ;;  %v5680_v19 = vrot.slane %v11869_v43, %v11761_v30  ;;  %v5684_v31 = vrot.slane %v11869_v43, %v11764_v58 }
 0x535   :  { %v11921_v27 = vpop.xlane.xlu0 %5251  ;;  %v5688_v54 = vrot.slane %v11869_v43, %v11767_v35  ;;  %v6782_v60 = vcombine.low %v6760_v61, %v6767_v18  ;;  %v5692_v24 = vrot.slane %v11869_v43, %v11772_v5  ;;  %v5696_v14 = vrot.slane %v11869_v43, %v11775_v29 }
 0x536   :  { %v6783_v51 = vcombine.low %v6774_v34, %v6781_v38  ;;  %v5700_v8 = vrot.slane %v11869_v43, %v11778_v46  ;;  %v5704_v3 = vrot.slane %v11869_v43, %v11782_v28  ;;  %v6799_v10 = vcombine.low %v5676_v44, %v5680_v19 }
 0x537   :  { %v6800_v17 = vcombine.low %v5684_v31, %v5688_v54  ;;  %v6790_v7 = vrot.slane %v6782_v60, %v12868_v9  ;;  %v6801_v42 = vcombine.low %v5692_v24, %v5696_v14  ;;  %v5708_v12 = vrot.slane %v11875_v32, %v12815_v1 }
 0x538   :  { %v6797_v4 = vrot.slane %v6783_v51, %v12868_v9  ;;  %v11941_v20 = vpop.xlane.xlu1 %5257  ;;  %v6802_v52 = vcombine.low %v5700_v8, %v5704_v3  ;;  %v6809_v49 = vrot.slane %v6799_v10, %v12868_v9  ;;  %v5712_v43 = vrot.slane %v11875_v32, %v11761_v30 }
 0x539   :  { %v11943_v45 = vpop.xlane.xlu0 %5159  ;;  %v6816_v55 = vrot.slane %v6800_v17, %v12868_v9  ;;  %v6823_v57 = vrot.slane %v6801_v42, %v12868_v9  ;;  %v5716_v37 = vrot.slane %v11875_v32, %v11764_v58  ;;  %v5720_v36 = vrot.slane %v11875_v32, %v11767_v35 }
 0x53a   :  { %v6798_v63 = vcombine.low %v6790_v7, %v6797_v4  ;;  %v9441_v50 = vpop.eup %9440  ;;  %v6830_v16 = vrot.slane %v6802_v52, %v12868_v9  ;;  %v5724_v6 = vrot.slane %v11875_v32, %v11772_v5  ;;  %v5728_v22 = vrot.slane %v11875_v32, %v11775_v29 }
 0x53b   :  { %v6831_v33 = vcombine.low %v6809_v49, %v6816_v55  ;;  %v5363_v56 = vmul.f32 %v9441_v50, %v11854_v59  ;;  %v5732_v25 = vrot.slane %v11875_v32, %v11778_v46  ;;  %v5736_v26 = vrot.slane %v11875_v32, %v11782_v28 }
 0x53c   :  { %8089 = vperm.xlu1 %8971, %v6798_v63   ;;  %v6848_v47 = vcombine.low %v5708_v12, %v5712_v43  ;;  %v11964_v0 = vpop.xlane.xlu1 %5165  ;;  %v6832_v21 = vcombine.low %v6823_v57, %v6830_v16  ;;  %v6849_v44 = vcombine.low %v5716_v37, %v5720_v36  ;;  %v6850_v18 = vcombine.low %v5724_v6, %v5728_v22 }
 0x53d   :  { %v11966_v40 = vpop.xlane.xlu0 %5255  ;;  %v6839_v61 = vrot.slane %v6831_v33, %v12868_v9  ;;  %v11970_v34 = vadd.f32 %v11758_v11, %v5393_v13  ;;  %v6851_v59 = vcombine.low %v5732_v25, %v5736_v26  ;;  %v5301_v19 = vmax.f32 %v11921_v27, 1e-24 }
 0x53e   :  { %v6858_v38 = vrot.slane %v6848_v47, %v12868_v9  ;;  %v6846_v32 = vrot.slane %v6832_v21, %v12868_v9  ;;  %v6865_v31 = vrot.slane %v6849_v44, %v12868_v9  ;;  %v6872_v54 = vrot.slane %v6850_v18, %v12868_v9 }
 0x53f   :  { %v5740_v60 = vrot.slane %v11907_v23, %v12815_v1  ;;  %v5394_v51 = vmul.f32 14.285714, %v5362_v53  ;;  %v5395_v24 = vmul.f32 14.285714, %v5363_v56  ;;  %v6879_v14 = vrot.slane %v6851_v59, %v12868_v9 }
 0x540   :  { %v5744_v13 = vrot.slane %v11907_v23, %v11761_v30  ;;  %v11982_v8 = vpop.xlane.xlu1 %5261  ;;  %v6847_v3 = vcombine.low %v6839_v61, %v6846_v32  ;;  %v6880_v27 = vcombine.low %v6858_v38, %v6865_v31  ;;  %v5748_v10 = vrot.slane %v11907_v23, %v11764_v58 }
 0x541   :  { %v5752_v17 = vrot.slane %v11907_v23, %v11767_v35  ;;  %v11988_v7 = vpop.xlane.xlu0 %5163  ;;  %v9443_v4 = vpop.eup %9442  ;;  %v6881_v53 = vcombine.low %v6872_v54, %v6879_v14  ;;  %9444 = vrsqrt.f32 %v5301_v19  ;;  %v5756_v42 = vrot.slane %v11907_v23, %v11772_v5 }
 0x542   :  { %v5760_v12 = vrot.slane %v11907_v23, %v11775_v29  ;;  %8092 = vperm.xlu1 %8971, %v6847_v3   ;;  %v6888_v52 = vrot.slane %v6880_v27, %v12868_v9  ;;  %v5764_v49 = vrot.slane %v11907_v23, %v11778_v46  ;;  %v5768_v55 = vrot.slane %v11907_v23, %v11782_v28 }
 0x543   :  { %v6897_v43 = vcombine.low %v5740_v60, %v5744_v13  ;;  %v12000_v63 = vadd.f32 %v11758_v11, %v5394_v51  ;;  %v6895_v57 = vrot.slane %v6881_v53, %v12868_v9  ;;  %v6898_v37 = vcombine.low %v5748_v10, %v5752_v17 }
 0x544   :  { %v6899_v36 = vcombine.low %v5756_v42, %v5760_v12  ;;  %v6900_v50 = vcombine.low %v5764_v49, %v5768_v55  ;;  %v5304_v33 = vmax.f32 %v11941_v20, 1e-24  ;;  %v5772_v6 = vrot.slane %v11910_v39, %v12815_v1  ;;  %v12012_v26 = vpop.xlane.xlu1 %5169 }
 0x545   :  { %v6907_v16 = vrot.slane %v6897_v43, %v12868_v9  ;;  %v12008_v22 = vadd.f32 %v11758_v11, %v5395_v24  ;;  %v6896_v23 = vcombine.low %v6888_v52, %v6895_v57  ;;  %v6914_v56 = vrot.slane %v6898_v37, %v12868_v9  ;;  %v12019_v61 = vpop.xlane.xlu0 %5259 }
 0x546   :  { %v6921_v25 = vrot.slane %v6899_v36, %v12868_v9  ;;  %v6928_v47 = vrot.slane %v6900_v50, %v12868_v9  ;;  %9446 = vrsqrt.f32 %v5304_v33  ;;  %v5776_v21 = vrot.slane %v11910_v39, %v11761_v30 }
 0x547   :  { %v5780_v20 = vrot.slane %v11910_v39, %v11764_v58  ;;  %8095 = vperm.xlu1 %8971, %v6896_v23   ;;  %v6929_v44 = vcombine.low %v6907_v16, %v6914_v56  ;;  %v5784_v18 = vrot.slane %v11910_v39, %v11767_v35  ;;  %v5788_v59 = vrot.slane %v11910_v39, %v11772_v5 }
 0x548   :  { %v5792_v38 = vrot.slane %v11910_v39, %v11775_v29  ;;  %v6930_v19 = vcombine.low %v6921_v25, %v6928_v47  ;;  %v5796_v32 = vrot.slane %v11910_v39, %v11778_v46  ;;  %v5800_v31 = vrot.slane %v11910_v39, %v11782_v28  ;;  %v12042_v12 = vpop.xlane.xlu1 %5265 }
 0x549   :  { %v6946_v54 = vcombine.low %v5772_v6, %v5776_v21  ;;  %v6937_v60 = vrot.slane %v6929_v44, %v12868_v9  ;;  %v6947_v51 = vcombine.low %v5780_v20, %v5784_v18  ;;  %v5303_v14 = vmax.f32 %v11966_v40, 1e-24  ;;  %v12049_v43 = vpop.xlane.xlu0 %5167 }
 0x54a   :  { %v6948_v24 = vcombine.low %v5788_v59, %v5792_v38  ;;  %v6944_v13 = vrot.slane %v6930_v19, %v12868_v9  ;;  %v6949_v3 = vcombine.low %v5796_v32, %v5800_v31  ;;  %v5804_v10 = vrot.slane %v11970_v34, %v12815_v1 }
 0x54b   :  { %v6956_v27 = vrot.slane %v6946_v54, %v12868_v9  ;;  %v5364_v17 = vmul.f32 %v9443_v4, %v11878_v62  ;;  %v6963_v53 = vrot.slane %v6947_v51, %v12868_v9  ;;  %v5808_v42 = vrot.slane %v11970_v34, %v11761_v30 }
 0x54c   :  { %v6970_v39 = vrot.slane %v6948_v24, %v12868_v9  ;;  %v6945_v40 = vcombine.low %v6937_v60, %v6944_v13  ;;  %v6977_v52 = vrot.slane %v6949_v3, %v12868_v9  ;;  %v5812_v49 = vrot.slane %v11970_v34, %v11764_v58  ;;  %v12068_v19 = vpop.xlane.xlu1 %5173 }
 0x54d   :  { %v5816_v55 = vrot.slane %v11970_v34, %v11767_v35  ;;  %v6978_v62 = vcombine.low %v6956_v27, %v6963_v53  ;;  %9448 = vrsqrt.f32 %v5303_v14  ;;  %v5820_v4 = vrot.slane %v11970_v34, %v11772_v5  ;;  %v5264_v60 = vpop.xlane.xlu0 %5263 }
 0x54e   :  { %v5824_v57 = vrot.slane %v11970_v34, %v11775_v29  ;;  %v9445_v37 = vpop.eup %9444  ;;  %8098 = vperm.xlu1 %8971, %v6945_v40   ;;  %v6979_v36 = vcombine.low %v6970_v39, %v6977_v52  ;;  %v5828_v50 = vrot.slane %v11970_v34, %v11778_v46  ;;  %v5832_v16 = vrot.slane %v11970_v34, %v11782_v28 }
 0x54f   :  { %v6995_v33 = vcombine.low %v5804_v10, %v5808_v42  ;;  %v5396_v6 = vmul.f32 14.285714, %v5364_v17  ;;  %v6986_v23 = vrot.slane %v6978_v62, %v12868_v9  ;;  %v6996_v56 = vcombine.low %v5812_v49, %v5816_v55 }
 0x550   :  { %v6997_v25 = vcombine.low %v5820_v4, %v5824_v57  ;;  %v6993_v47 = vrot.slane %v6979_v36, %v12868_v9  ;;  %v6998_v21 = vcombine.low %v5828_v50, %v5832_v16  ;;  %v5306_v44 = vmax.f32 %v11982_v8, 1e-24 }
 0x551   :  { %v7005_v20 = vrot.slane %v6995_v33, %v12868_v9  ;;  %v5365_v18 = vmul.f32 %v9445_v37, %v11904_v48  ;;  %v7012_v59 = vrot.slane %v6996_v56, %v12868_v9  ;;  %v5836_v34 = vrot.slane %v12000_v63, %v12815_v1  ;;  %v12092_v37 = vpop.xlane.xlu1 %5269  ;;  %v12096_v16 = vpop.xlane.xlu0 %5171 }
 0x552   :  { %v7019_v38 = vrot.slane %v6997_v25, %v12868_v9  ;;  %v6994_v32 = vcombine.low %v6986_v23, %v6993_v47  ;;  %v7026_v31 = vrot.slane %v6998_v21, %v12868_v9  ;;  %9450 = vrsqrt.f32 %v5306_v44 }
 0x553   :  { %v5840_v54 = vrot.slane %v12000_v63, %v11761_v30  ;;  %v9447_v8 = vpop.eup %9446  ;;  %v7027_v51 = vcombine.low %v7005_v20, %v7012_v59  ;;  %v5844_v48 = vrot.slane %v12000_v63, %v11764_v58  ;;  %v5848_v24 = vrot.slane %v12000_v63, %v11767_v35 }
 0x554   :  { %v5852_v14 = vrot.slane %v12000_v63, %v11772_v5  ;;  %v5368_v13 = vmul.f32 %v9447_v8, %v11919_v41  ;;  %8101 = vperm.xlu0 %8970, %v6994_v32   ;;  %v7028_v3 = vcombine.low %v7019_v38, %v7026_v31  ;;  %v5856_v27 = vrot.slane %v12000_v63, %v11775_v29 }
 0x555   :  { %v5860_v10 = vrot.slane %v12000_v63, %v11778_v46  ;;  %v7035_v17 = vrot.slane %v7027_v51, %v12868_v9  ;;  %v5864_v53 = vrot.slane %v12000_v63, %v11782_v28  ;;  %v7044_v39 = vcombine.low %v5836_v34, %v5840_v54 }
 0x556   :  { %v7045_v42 = vcombine.low %v5844_v48, %v5848_v24  ;;  %v5400_v40 = vmul.f32 14.285714, %v5368_v13  ;;  %v7042_v52 = vrot.slane %v7028_v3, %v12868_v9  ;;  %v7046_v49 = vcombine.low %v5852_v14, %v5856_v27  ;;  %v12123_v48 = vpop.xlane.xlu1 %5177  ;;  %v5268_v27 = vpop.xlane.xlu0 %5267 }
 0x557   :  { %v5305_v41 = vmax.f32 %v12019_v61, 1e-24  ;;  %v7047_v55 = vcombine.low %v5860_v10, %v5864_v53  ;;  %v7054_v62 = vrot.slane %v7044_v39, %v12868_v9  ;;  %v5308_v57 = vmax.f32 %v12042_v12, 1e-24 }
 0x558   :  { %v7061_v4 = vrot.slane %v7045_v42, %v12868_v9  ;;  %v5430_v36 = vadd.f32 %v11758_v11, %v5396_v6  ;;  %v7043_v63 = vcombine.low %v7035_v17, %v7042_v52  ;;  %v7068_v50 = vrot.slane %v7046_v49, %v12868_v9 }
 0x559   :  { %9452 = vrsqrt.f32 %v5305_v41  ;;  %v12098_v33 = vmul.f32 14.285714, %v5365_v18  ;;  %v7075_v61 = vrot.slane %v7047_v55, %v12868_v9  ;;  %v5868_v12 = vrot.slane %v12008_v22, %v12815_v1 }
 0x55a   :  { %v7076_v23 = vcombine.low %v7054_v62, %v7061_v4  ;;  %9454 = vrsqrt.f32 %v5308_v57  ;;  %v9449_v56 = vpop.eup %9448  ;;  %8104 = vperm.xlu1 %8971, %v7043_v63   ;;  %v5872_v6 = vrot.slane %v12008_v22, %v11761_v30  ;;  %v5876_v25 = vrot.slane %v12008_v22, %v11764_v58 }
 0x55b   :  { %v5880_v47 = vrot.slane %v12008_v22, %v11767_v35  ;;  %v12110_v21 = vadd.f32 %v11758_v11, %v5400_v40  ;;  %v7077_v20 = vcombine.low %v7068_v50, %v7075_v61  ;;  %v5884_v18 = vrot.slane %v12008_v22, %v11772_v5 }
 0x55c   :  { %v7084_v44 = vrot.slane %v7076_v23, %v12868_v9  ;;  %v5888_v59 = vrot.slane %v12008_v22, %v11775_v29  ;;  %v5892_v38 = vrot.slane %v12008_v22, %v11778_v46  ;;  %v5896_v34 = vrot.slane %v12008_v22, %v11782_v28  ;;  %v5274_v23 = vpop.xlane.xlu1 %5273 }
 0x55d   :  { %v7093_v32 = vcombine.low %v5868_v12, %v5872_v6  ;;  %v5367_v31 = vmul.f32 %v9449_v56, %v11943_v45  ;;  %v7091_v54 = vrot.slane %v7077_v20, %v12868_v9  ;;  %v7094_v8 = vcombine.low %v5876_v25, %v5880_v47  ;;  %v12141_v47 = vpop.xlane.xlu0 %5175 }
 0x55e   :  { %v5307_v51 = vmax.f32 %v5264_v60, 1e-24  ;;  %v7095_v24 = vcombine.low %v5884_v18, %v5888_v59  ;;  %v7096_v14 = vcombine.low %v5892_v38, %v5896_v34  ;;  %v5900_v3 = vrot.slane %v5430_v36, %v12815_v1 }
 0x55f   :  { %v7103_v13 = vrot.slane %v7093_v32, %v12868_v9  ;;  %v9451_v10 = vpop.eup %9450  ;;  %v7092_v17 = vcombine.low %v7084_v44, %v7091_v54  ;;  %v7110_v22 = vrot.slane %v7094_v8, %v12868_v9  ;;  %v5904_v45 = vrot.slane %v5430_v36, %v11761_v30 }
 0x560   :  { %9456 = vrsqrt.f32 %v5307_v51  ;;  %v5370_v53 = vmul.f32 %v9451_v10, %v11964_v0  ;;  %v7117_v60 = vrot.slane %v7095_v24, %v12868_v9  ;;  %v7124_v39 = vrot.slane %v7096_v14, %v12868_v9  ;;  %v5276_v10 = vpop.xlane.xlu1 %5275 }
 0x561   :  { %v5908_v42 = vrot.slane %v5430_v36, %v11764_v58  ;;  %8107 = vperm.xlu1 %8971, %v7092_v17   ;;  %v7125_v40 = vcombine.low %v7103_v13, %v7110_v22  ;;  %v5912_v52 = vrot.slane %v5430_v36, %v11767_v35  ;;  %v5916_v49 = vrot.slane %v5430_v36, %v11772_v5 }
 0x562   :  { %v5920_v41 = vrot.slane %v5430_v36, %v11775_v29  ;;  %v5399_v55 = vmul.f32 14.285714, %v5367_v31  ;;  %v7126_v62 = vcombine.low %v7117_v60, %v7124_v39  ;;  %v5924_v4 = vrot.slane %v5430_v36, %v11778_v46  ;;  %v5272_v60 = vpop.xlane.xlu0 %5271 }
 0x563   :  { %v5928_v0 = vrot.slane %v5430_v36, %v11782_v28  ;;  %v7133_v57 = vrot.slane %v7125_v40, %v12868_v9  ;;  %v7142_v63 = vcombine.low %v5900_v3, %v5904_v45  ;;  %v7143_v50 = vcombine.low %v5908_v42, %v5912_v52 }
 0x564   :  { %v7144_v61 = vcombine.low %v5916_v49, %v5920_v41  ;;  %v5402_v56 = vmul.f32 14.285714, %v5370_v53  ;;  %v7140_v12 = vrot.slane %v7126_v62, %v12868_v9  ;;  %v5310_v25 = vmax.f32 %v12092_v37, 1e-24 }
 0x565   :  { %v7145_v6 = vcombine.low %v5924_v4, %v5928_v0  ;;  %v7152_v44 = vrot.slane %v7142_v63, %v12868_v9  ;;  %v7159_v18 = vrot.slane %v7143_v50, %v12868_v9  ;;  %v5309_v59 = vmax.f32 %v5268_v27, 1e-24 }
 0x566   :  { %v9453_v20 = vpop.eup %9452  ;;  %v7166_v36 = vrot.slane %v7144_v61, %v12868_v9  ;;  %v7141_v34 = vcombine.low %v7133_v57, %v7140_v12  ;;  %9458 = vrsqrt.f32 %v5310_v25  ;;  %v12149_v31 = vadd.f32 %v11758_v11, %v12098_v33 }
 0x567   :  { %v9455_v38 = vpop.eup %9454  ;;  %v7173_v32 = vrot.slane %v7145_v6, %v12868_v9  ;;  %v7174_v37 = vcombine.low %v7152_v44, %v7159_v18  ;;  %9460 = vrsqrt.f32 %v5309_v59  ;;  %v5312_v54 = vmax.f32 %v5274_v23, 1e-24 }
 0x568   :  { %v5433_v8 = vadd.f32 %v11758_v11, %v5399_v55  ;;  %8110 = vperm.xlu1 %8971, %v7141_v34   ;;  %v6028_v24 = vrot.slane %v12110_v21, %v12815_v1  ;;  %v6032_v14 = vrot.slane %v12110_v21, %v11761_v30  ;;  %v12157_v13 = vadd.f32 %v11758_v11, %v5402_v56 }
 0x569   :  { %v7175_v51 = vcombine.low %v7166_v36, %v7173_v32  ;;  %v5369_v3 = vmul.f32 %v9453_v20, %v11988_v7  ;;  %v7182_v33 = vrot.slane %v7174_v37, %v12868_v9  ;;  %v6036_v27 = vrot.slane %v12110_v21, %v11764_v58  ;;  %v12189_v32 = vpop.xlane.xlu1 %5181  ;;  %v5180_v37 = vpop.xlane.xlu0 %5179 }
 0x56a   :  { %v5372_v17 = vmul.f32 %v9455_v38, %v12012_v26  ;;  %v6040_v45 = vrot.slane %v12110_v21, %v11767_v35  ;;  %v6044_v53 = vrot.slane %v12110_v21, %v11772_v5  ;;  %9462 = vrsqrt.f32 %v5312_v54 }
 0x56b   :  { %v7189_v22 = vrot.slane %v7175_v51, %v12868_v9  ;;  %v6048_v7 = vrot.slane %v12110_v21, %v11775_v29  ;;  %v6052_v39 = vrot.slane %v12110_v21, %v11778_v46  ;;  %v6056_v42 = vrot.slane %v12110_v21, %v11782_v28 }
 0x56c   :  { %v7338_v52 = vcombine.low %v6028_v24, %v6032_v14  ;;  %v7339_v49 = vcombine.low %v6036_v27, %v6040_v45  ;;  %v5313_v41 = vmax.f32 %v5276_v10, 1e-24  ;;  %v5401_v55 = vmul.f32 14.285714, %v5369_v3 }
 0x56d   :  { %v9457_v26 = vpop.eup %9456  ;;  %v7190_v40 = vcombine.low %v7182_v33, %v7189_v22  ;;  %v7340_v62 = vcombine.low %v6044_v53, %v6048_v7  ;;  %v7341_v4 = vcombine.low %v6052_v39, %v6056_v42  ;;  %v5311_v0 = vmax.f32 %v5272_v60, 1e-24 }
 0x56e   :  { %v7348_v57 = vrot.slane %v7338_v52, %v12868_v9  ;;  %v7355_v63 = vrot.slane %v7339_v49, %v12868_v9  ;;  %9464 = vrsqrt.f32 %v5313_v41  ;;  %v5996_v50 = vrot.slane %v5433_v8, %v12815_v1 }
 0x56f   :  { %8113 = vperm.xlu1 %8971, %v7190_v40   ;;  %v5371_v61 = vmul.f32 %v9457_v26, %v12049_v43  ;;  %v7362_v21 = vrot.slane %v7340_v62, %v12868_v9  ;;  %v7369_v23 = vrot.slane %v7341_v4, %v12868_v9  ;;  %9466 = vrsqrt.f32 %v5311_v0 }
 0x570   :  { %v7370_v56 = vcombine.low %v7348_v57, %v7355_v63  ;;  %v6000_v12 = vrot.slane %v5433_v8, %v11761_v30  ;;  %v6004_v6 = vrot.slane %v5433_v8, %v11764_v58  ;;  %v6008_v25 = vrot.slane %v5433_v8, %v11767_v35  ;;  %v5278_v57 = vpop.xlane.xlu1 %5277  ;;  %v12216_v63 = vpop.xlane.xlu0 %5183 }
 0x571   :  { %v5404_v20 = vmul.f32 14.285714, %v5372_v17  ;;  %v7371_v44 = vcombine.low %v7362_v21, %v7369_v23  ;;  %v6012_v18 = vrot.slane %v5433_v8, %v11772_v5  ;;  %v6016_v36 = vrot.slane %v5433_v8, %v11775_v29 }
 0x572   :  { %v7378_v43 = vrot.slane %v7370_v56, %v12868_v9  ;;  %v6020_v59 = vrot.slane %v5433_v8, %v11778_v46  ;;  %v6024_v38 = vrot.slane %v5433_v8, %v11782_v28  ;;  %v7289_v34 = vcombine.low %v5996_v50, %v6000_v12 }
 0x573   :  { %v9459_v54 = vpop.eup %9458  ;;  %v5403_v51 = vmul.f32 14.285714, %v5371_v61  ;;  %v7385_v24 = vrot.slane %v7371_v44, %v12868_v9  ;;  %v7290_v14 = vcombine.low %v6004_v6, %v6008_v25  ;;  %v7291_v3 = vcombine.low %v6012_v18, %v6016_v36 }
 0x574   :  { %v9461_v33 = vpop.eup %9460  ;;  %v5374_v27 = vmul.f32 %v9459_v54, %v12068_v19  ;;  %v7292_v10 = vcombine.low %v6020_v59, %v6024_v38  ;;  %v7299_v17 = vrot.slane %v7289_v34, %v12868_v9  ;;  %v6092_v22 = vrot.slane %v12157_v13, %v12815_v1 }
 0x575   :  { %v5373_v8 = vmul.f32 %v9461_v33, %v12096_v16  ;;  %v7386_v45 = vcombine.low %v7378_v43, %v7385_v24  ;;  %v7306_v53 = vrot.slane %v7290_v14, %v12868_v9  ;;  %v7313_v60 = vrot.slane %v7291_v3, %v12868_v9 }
 0x576   :  { %v7320_v7 = vrot.slane %v7292_v10, %v12868_v9  ;;  %v6096_v39 = vrot.slane %v12157_v13, %v11761_v30  ;;  %v6100_v19 = vrot.slane %v12157_v13, %v11764_v58  ;;  %v6104_v42 = vrot.slane %v12157_v13, %v11767_v35 }
 0x577   :  { %v5435_v26 = vadd.f32 %v11758_v11, %v5401_v55  ;;  %v5406_v40 = vmul.f32 14.285714, %v5374_v27  ;;  %8125 = vperm.xlu1 %8971, %v7386_v45   ;;  %v7321_v16 = vcombine.low %v7299_v17, %v7306_v53  ;;  %v6108_v52 = vrot.slane %v12157_v13, %v11772_v5  ;;  %v9463_v49 = vpop.eup %9462  ;;  %v12239_v27 = vpop.xlane.xlu0 %5187 }
 0x578   :  { %v12210_v41 = vadd.f32 %v11758_v11, %v5404_v20  ;;  %v7322_v62 = vcombine.low %v7313_v60, %v7320_v7  ;;  %v6112_v4 = vrot.slane %v12157_v13, %v11775_v29  ;;  %v6116_v0 = vrot.slane %v12157_v13, %v11778_v46 }
 0x579   :  { %v12219_v55 = vadd.f32 %v11758_v11, %v5403_v51  ;;  %v5405_v50 = vmul.f32 14.285714, %v5373_v8  ;;  %v7329_v61 = vrot.slane %v7321_v16, %v12868_v9  ;;  %v6120_v21 = vrot.slane %v12157_v13, %v11782_v28  ;;  %v5280_v8 = vpop.xlane.xlu1 %5279 }
 0x57a   :  { %v7336_v23 = vrot.slane %v7322_v62, %v12868_v9  ;;  %v7436_v56 = vcombine.low %v6092_v22, %v6096_v39  ;;  %v7437_v12 = vcombine.low %v6100_v19, %v6104_v42  ;;  %v7438_v6 = vcombine.low %v6108_v52, %v6112_v4 }
 0x57b   :  { %v9465_v25 = vpop.eup %9464  ;;  %v12226_v20 = vadd.f32 %v11758_v11, %v5406_v40  ;;  %v5376_v44 = vmul.f32 %v9463_v49, %v12123_v48  ;;  %v7439_v18 = vcombine.low %v6116_v0, %v6120_v21  ;;  %v5314_v36 = vmax.f32 %v5278_v57, 1e-24  ;;  %v5254_v21 = vpop.xlane.xlu0 %5253 }
 0x57c   :  { %v9467_v43 = vpop.eup %9466  ;;  %v7337_v59 = vcombine.low %v7329_v61, %v7336_v23  ;;  %v7446_v38 = vrot.slane %v7436_v56, %v12868_v9  ;;  %v7453_v34 = vrot.slane %v7437_v12, %v12868_v9  ;;  %v6060_v13 = vrot.slane %v5435_v26, %v12815_v1 }
 0x57d   :  { %v5377_v54 = vmul.f32 %v9465_v25, %v5180_v37  ;;  %v7460_v51 = vrot.slane %v7438_v6, %v12868_v9  ;;  %v7467_v24 = vrot.slane %v7439_v18, %v12868_v9  ;;  %9468 = vrsqrt.f32 %v5314_v36  ;;  %v12269_v25 = vpop.xlane.xlu1 %5185 }
 0x57e   :  { %v12235_v14 = vadd.f32 %v11758_v11, %v5405_v50  ;;  %8122 = vperm.xlu0 %8970, %v7337_v59   ;;  %v7468_v48 = vcombine.low %v7446_v38, %v7453_v34  ;;  %v6064_v3 = vrot.slane %v5435_v26, %v11761_v30  ;;  %v6068_v33 = vrot.slane %v5435_v26, %v11764_v58 }
 0x57f   :  { %v12241_v10 = vmul.f32 14.285714, %v5376_v44  ;;  %v7469_v17 = vcombine.low %v7460_v51, %v7467_v24  ;;  %v6072_v37 = vrot.slane %v5435_v26, %v11767_v35  ;;  %v6076_v22 = vrot.slane %v5435_v26, %v11772_v5 }
 0x580   :  { %v5375_v45 = vmul.f32 %v9467_v43, %v12141_v47  ;;  %v7476_v53 = vrot.slane %v7468_v48, %v12868_v9  ;;  %v6080_v60 = vrot.slane %v5435_v26, %v11775_v29  ;;  %v6084_v7 = vrot.slane %v5435_v26, %v11778_v46 }
 0x581   :  { %v12249_v39 = vmul.f32 14.285714, %v5377_v54  ;;  %v7483_v19 = vrot.slane %v7469_v17, %v12868_v9  ;;  %v6088_v42 = vrot.slane %v5435_v26, %v11782_v28  ;;  %v7387_v40 = vcombine.low %v6060_v13, %v6064_v3 }
 0x582   :  { %v7388_v16 = vcombine.low %v6068_v33, %v6072_v37  ;;  %v7389_v52 = vcombine.low %v6076_v22, %v6080_v60  ;;  %v5315_v49 = vmax.f32 %v5280_v8, 1e-24  ;;  %v6156_v62 = vrot.slane %v12210_v41, %v12815_v1 }
 0x583   :  { %v7484_v47 = vcombine.low %v7476_v53, %v7483_v19  ;;  %v7390_v4 = vcombine.low %v6084_v7, %v6088_v42  ;;  %v7397_v0 = vrot.slane %v7387_v40, %v12868_v9  ;;  %v6160_v57 = vrot.slane %v12210_v41, %v11761_v30  ;;  %v5282_v40 = vpop.xlane.xlu1 %5281 }
 0x584   :  { %v7404_v50 = vrot.slane %v7388_v16, %v12868_v9  ;;  %v7411_v61 = vrot.slane %v7389_v52, %v12868_v9  ;;  %9470 = vrsqrt.f32 %v5315_v49  ;;  %v6164_v26 = vrot.slane %v12210_v41, %v11764_v58 }
 0x585   :  { %8131 = vperm.xlu1 %8971, %v7484_v47   ;;  %v7418_v23 = vrot.slane %v7390_v4, %v12868_v9  ;;  %v6168_v56 = vrot.slane %v12210_v41, %v11767_v35  ;;  %v6172_v12 = vrot.slane %v12210_v41, %v11772_v5  ;;  %v6176_v6 = vrot.slane %v12210_v41, %v11775_v29 }
 0x586   :  { %v7419_v44 = vcombine.low %v7397_v0, %v7404_v50  ;;  %v6180_v18 = vrot.slane %v12210_v41, %v11778_v46  ;;  %v6184_v36 = vrot.slane %v12210_v41, %v11782_v28  ;;  %v7534_v43 = vcombine.low %v6156_v62, %v6160_v57 }
 0x587   :  { %v7420_v59 = vcombine.low %v7411_v61, %v7418_v23  ;;  %v7535_v38 = vcombine.low %v6164_v26, %v6168_v56  ;;  %v7536_v34 = vcombine.low %v6172_v12, %v6176_v6  ;;  %v5302_v13 = vmax.f32 %v5254_v21, 1e-24 }
 0x588   :  { %v7427_v54 = vrot.slane %v7419_v44, %v12868_v9  ;;  %v7537_v51 = vcombine.low %v6180_v18, %v6184_v36  ;;  %v7544_v24 = vrot.slane %v7534_v43, %v12868_v9  ;;  %v6124_v48 = vrot.slane %v12219_v55, %v12815_v1 }
 0x589   :  { %v7434_v3 = vrot.slane %v7420_v59, %v12868_v9  ;;  %v7551_v33 = vrot.slane %v7535_v38, %v12868_v9  ;;  %v7558_v17 = vrot.slane %v7536_v34, %v12868_v9  ;;  %9472 = vrsqrt.f32 %v5302_v13 }
 0x58a   :  { %v9469_v41 = vpop.eup %9468  ;;  %v7565_v37 = vrot.slane %v7537_v51, %v12868_v9  ;;  %v6128_v22 = vrot.slane %v12219_v55, %v11761_v30  ;;  %v6132_v8 = vrot.slane %v12219_v55, %v11764_v58  ;;  %v6136_v53 = vrot.slane %v12219_v55, %v11767_v35 }
 0x58b   :  { %v5378_v60 = vmul.f32 %v9469_v41, %v12189_v32  ;;  %v7435_v7 = vcombine.low %v7427_v54, %v7434_v3  ;;  %v7566_v19 = vcombine.low %v7544_v24, %v7551_v33  ;;  %v6140_v42 = vrot.slane %v12219_v55, %v11772_v5 }
 0x58c   :  { %v7567_v16 = vcombine.low %v7558_v17, %v7565_v37  ;;  %v6144_v52 = vrot.slane %v12219_v55, %v11775_v29  ;;  %v6148_v49 = vrot.slane %v12219_v55, %v11778_v46  ;;  %v6152_v62 = vrot.slane %v12219_v55, %v11782_v28 }
 0x58d   :  { %v5407_v47 = vmul.f32 14.285714, %v5375_v45  ;;  %8128 = vperm.xlu0 %8970, %v7435_v7   ;;  %v7574_v32 = vrot.slane %v7566_v19, %v12868_v9  ;;  %v7485_v4 = vcombine.low %v6124_v48, %v6128_v22  ;;  %v7486_v0 = vcombine.low %v6132_v8, %v6136_v53 }
 0x58e   :  { %v7581_v57 = vrot.slane %v7567_v16, %v12868_v9  ;;  %v7487_v50 = vcombine.low %v6140_v42, %v6144_v52  ;;  %v7488_v61 = vcombine.low %v6148_v49, %v6152_v62  ;;  %v5316_v26 = vmax.f32 %v5282_v40, 1e-24  ;;  %v5284_v49 = vpop.xlane.xlu1 %5283 }
 0x58f   :  { %v5410_v21 = vmul.f32 14.285714, %v5378_v60  ;;  %v7495_v23 = vrot.slane %v7485_v4, %v12868_v9  ;;  %v7502_v56 = vrot.slane %v7486_v0, %v12868_v9  ;;  %v6220_v12 = vrot.slane %v12226_v20, %v12815_v1 }
 0x590   :  { %v7582_v55 = vcombine.low %v7574_v32, %v7581_v57  ;;  %v7509_v45 = vrot.slane %v7487_v50, %v12868_v9  ;;  %v7516_v6 = vrot.slane %v7488_v61, %v12868_v9  ;;  %9474 = vrsqrt.f32 %v5316_v26 }
 0x591   :  { %v9471_v44 = vpop.eup %9470  ;;  %v7517_v18 = vcombine.low %v7495_v23, %v7502_v56  ;;  %v6224_v36 = vrot.slane %v12226_v20, %v11761_v30  ;;  %v6228_v43 = vrot.slane %v12226_v20, %v11764_v58  ;;  %v6232_v59 = vrot.slane %v12226_v20, %v11767_v35 }
 0x592   :  { %v5379_v38 = vmul.f32 %v9471_v44, %v12216_v63  ;;  %8137 = vperm.xlu1 %8971, %v7582_v55   ;;  %v7518_v34 = vcombine.low %v7509_v45, %v7516_v6  ;;  %v6236_v13 = vrot.slane %v12226_v20, %v11772_v5  ;;  %v6240_v54 = vrot.slane %v12226_v20, %v11775_v29 }
 0x593   :  { %v7525_v51 = vrot.slane %v7517_v18, %v12868_v9  ;;  %v6244_v24 = vrot.slane %v12226_v20, %v11778_v46  ;;  %v6248_v48 = vrot.slane %v12226_v20, %v11782_v28  ;;  %v7632_v3 = vcombine.low %v6220_v12, %v6224_v36 }
 0x594   :  { %v5442_v63 = vadd.f32 %v11758_v11, %v12241_v10  ;;  %v7532_v33 = vrot.slane %v7518_v34, %v12868_v9  ;;  %v7633_v17 = vcombine.low %v6228_v43, %v6232_v59  ;;  %v7634_v41 = vcombine.low %v6236_v13, %v6240_v54 }
 0x595   :  { %v12326_v37 = vadd.f32 %v11758_v11, %v5407_v47  ;;  %v12330_v22 = vadd.f32 %v11758_v11, %v12249_v39  ;;  %v7635_v8 = vcombine.low %v6244_v24, %v6248_v48  ;;  %v7642_v53 = vrot.slane %v7632_v3, %v12868_v9 }
 0x596   :  { %v9473_v60 = vpop.eup %9472  ;;  %v7533_v20 = vcombine.low %v7525_v51, %v7532_v33  ;;  %v7649_v7 = vrot.slane %v7633_v17, %v12868_v9  ;;  %v7656_v10 = vrot.slane %v7634_v41, %v12868_v9  ;;  %v6188_v19 = vrot.slane %v12235_v14, %v12815_v1  ;;  %v12366_v51 = vpop.xlane.xlu1 %5189 }
 0x597   :  { %v12338_v42 = vadd.f32 %v11758_v11, %v5410_v21  ;;  %v5411_v40 = vmul.f32 14.285714, %v5379_v38  ;;  %v7663_v16 = vrot.slane %v7635_v8, %v12868_v9  ;;  %v6192_v39 = vrot.slane %v12235_v14, %v11761_v30 }
 0x598   :  { %8134 = vperm.xlu0 %8970, %v7533_v20   ;;  %v7664_v52 = vcombine.low %v7642_v53, %v7649_v7  ;;  %v6196_v62 = vrot.slane %v12235_v14, %v11764_v58  ;;  %v6200_v47 = vrot.slane %v12235_v14, %v11767_v35  ;;  %v6204_v32 = vrot.slane %v12235_v14, %v11772_v5 }
 0x599   :  { %v5366_v4 = vmul.f32 %v9473_v60, %v11902_v15  ;;  %v7665_v0 = vcombine.low %v7656_v10, %v7663_v16  ;;  %v6208_v57 = vrot.slane %v12235_v14, %v11775_v29  ;;  %v6212_v50 = vrot.slane %v12235_v14, %v11778_v46 }
 0x59a   :  { %v7672_v61 = vrot.slane %v7664_v52, %v12868_v9  ;;  %v6216_v26 = vrot.slane %v12235_v14, %v11782_v28  ;;  %v7583_v21 = vcombine.low %v6188_v19, %v6192_v39  ;;  %v7584_v23 = vcombine.low %v6196_v62, %v6200_v47 }
 0x59b   :  { %v7679_v56 = vrot.slane %v7665_v0, %v12868_v9  ;;  %v5317_v12 = vmax.f32 %v5284_v49, 1e-24  ;;  %v7585_v55 = vcombine.low %v6204_v32, %v6208_v57  ;;  %v6284_v15 = vrot.slane %v5442_v63, %v12815_v1  ;;  %v5286_v32 = vpop.xlane.xlu1 %5285 }
 0x59c   :  { %v7586_v45 = vcombine.low %v6212_v50, %v6216_v26  ;;  %v7593_v6 = vrot.slane %v7583_v21, %v12868_v9  ;;  %v7600_v44 = vrot.slane %v7584_v23, %v12868_v9  ;;  %v6288_v18 = vrot.slane %v5442_v63, %v11761_v30 }
 0x59d   :  { %v9475_v36 = vpop.eup %9474  ;;  %v7680_v43 = vcombine.low %v7672_v61, %v7679_v56  ;;  %v7607_v59 = vrot.slane %v7585_v55, %v12868_v9  ;;  %v6292_v14 = vrot.slane %v5442_v63, %v11764_v58  ;;  %v6296_v38 = vrot.slane %v5442_v63, %v11767_v35 }
 0x59e   :  { %v5398_v34 = vmul.f32 14.285714, %v5366_v4  ;;  %v7614_v13 = vrot.slane %v7586_v45, %v12868_v9  ;;  %v7615_v54 = vcombine.low %v7593_v6, %v7600_v44  ;;  %v6300_v24 = vrot.slane %v5442_v63, %v11772_v5 }
 0x59f   :  { %8143 = vperm.xlu1 %8971, %v7680_v43   ;;  %v6304_v48 = vrot.slane %v5442_v63, %v11775_v29  ;;  %v6308_v3 = vrot.slane %v5442_v63, %v11778_v46  ;;  %v6312_v33 = vrot.slane %v5442_v63, %v11782_v28  ;;  %v7730_v17 = vcombine.low %v6284_v15, %v6288_v18 }
 0x5a0   :  { %9476 = vrsqrt.f32 %v5317_v12  ;;  %v7616_v41 = vcombine.low %v7607_v59, %v7614_v13  ;;  %v7623_v8 = vrot.slane %v7615_v54, %v12868_v9  ;;  %v7731_v53 = vcombine.low %v6292_v14, %v6296_v38 }
 0x5a1   :  { %v5380_v60 = vmul.f32 %v9475_v36, %v12269_v25  ;;  %v7732_v20 = vcombine.low %v6300_v24, %v6304_v48  ;;  %v7733_v7 = vcombine.low %v6308_v3, %v6312_v33  ;;  %v7740_v10 = vrot.slane %v7730_v17, %v12868_v9 }
 0x5a2   :  { %v12376_v19 = vadd.f32 %v11758_v11, %v5411_v40  ;;  %v7630_v16 = vrot.slane %v7616_v41, %v12868_v9  ;;  %v7747_v39 = vrot.slane %v7731_v53, %v12868_v9  ;;  %v5932_v63 = vrot.slane %v12149_v31, %v12815_v1 }
 0x5a3   :  { %v12383_v52 = vadd.f32 %v11758_v11, %v5398_v34  ;;  %v7754_v49 = vrot.slane %v7732_v20, %v12868_v9  ;;  %v7761_v25 = vrot.slane %v7733_v7, %v12868_v9  ;;  %v5936_v62 = vrot.slane %v12149_v31, %v11761_v30 }
 0x5a4   :  { %v7631_v47 = vcombine.low %v7623_v8, %v7630_v16  ;;  %v7762_v40 = vcombine.low %v7740_v10, %v7747_v39  ;;  %v5940_v4 = vrot.slane %v12149_v31, %v11764_v58  ;;  %v5944_v0 = vrot.slane %v12149_v31, %v11767_v35 }
 0x5a5   :  { %v5412_v57 = vmul.f32 14.285714, %v5380_v60  ;;  %v7763_v50 = vcombine.low %v7754_v49, %v7761_v25  ;;  %v5948_v61 = vrot.slane %v12149_v31, %v11772_v5  ;;  %v5952_v26 = vrot.slane %v12149_v31, %v11775_v29 }
 0x5a6   :  { %8140 = vperm.xlu0 %8970, %v7631_v47   ;;  %v7770_v21 = vrot.slane %v7762_v40, %v12868_v9  ;;  %v5956_v23 = vrot.slane %v12149_v31, %v11778_v46  ;;  %v5960_v56 = vrot.slane %v12149_v31, %v11782_v28  ;;  %v7191_v12 = vcombine.low %v5932_v63, %v5936_v62 }
 0x5a7   :  { %v7777_v55 = vrot.slane %v7763_v50, %v12868_v9  ;;  %v5318_v15 = vmax.f32 %v5286_v32, 1e-24  ;;  %v7192_v45 = vcombine.low %v5940_v4, %v5944_v0  ;;  %v7193_v6 = vcombine.low %v5948_v61, %v5952_v26 }
 0x5a8   :  { %v7194_v44 = vcombine.low %v5956_v23, %v5960_v56  ;;  %v7201_v18 = vrot.slane %v7191_v12, %v12868_v9  ;;  %v6252_v36 = vrot.slane %v12326_v37, %v12815_v1  ;;  %v6256_v43 = vrot.slane %v12326_v37, %v11761_v30 }
 0x5a9   :  { %v12409_v59 = vadd.f32 %v11758_v11, %v5412_v57  ;;  %v7778_v14 = vcombine.low %v7770_v21, %v7777_v55  ;;  %v7208_v31 = vrot.slane %v7192_v45, %v12868_v9  ;;  %v7215_v38 = vrot.slane %v7193_v6, %v12868_v9 }
 0x5aa   :  { %v7222_v34 = vrot.slane %v7194_v44, %v12868_v9  ;;  %v6260_v13 = vrot.slane %v12326_v37, %v11764_v58  ;;  %v6264_v54 = vrot.slane %v12326_v37, %v11767_v35  ;;  %v6268_v24 = vrot.slane %v12326_v37, %v11772_v5 }
 0x5ab   :  { %8149 = vperm.xlu1 %8971, %v7778_v14   ;;  %v7223_v48 = vcombine.low %v7201_v18, %v7208_v31  ;;  %v6272_v3 = vrot.slane %v12326_v37, %v11775_v29  ;;  %v6276_v33 = vrot.slane %v12326_v37, %v11778_v46  ;;  %v6280_v17 = vrot.slane %v12326_v37, %v11782_v28 }
 0x5ac   :  { %v7224_v41 = vcombine.low %v7215_v38, %v7222_v34  ;;  %v7681_v8 = vcombine.low %v6252_v36, %v6256_v43  ;;  %v7682_v53 = vcombine.low %v6260_v13, %v6264_v54  ;;  %v6316_v60 = vrot.slane %v12330_v22, %v12815_v1 }
 0x5ad   :  { %v9477_v20 = vpop.eup %9476  ;;  %v7231_v7 = vrot.slane %v7223_v48, %v12868_v9  ;;  %v7683_v10 = vcombine.low %v6268_v24, %v6272_v3  ;;  %v7684_v16 = vcombine.low %v6276_v33, %v6280_v17  ;;  %v6320_v39 = vrot.slane %v12330_v22, %v11761_v30 }
 0x5ae   :  { %v7238_v63 = vrot.slane %v7224_v41, %v12868_v9  ;;  %v7691_v49 = vrot.slane %v7681_v8, %v12868_v9  ;;  %v7698_v37 = vrot.slane %v7682_v53, %v12868_v9  ;;  %v6324_v25 = vrot.slane %v12330_v22, %v11764_v58 }
 0x5af   :  { %v7705_v62 = vrot.slane %v7683_v10, %v12868_v9  ;;  %v7712_v47 = vrot.slane %v7684_v16, %v12868_v9  ;;  %v6328_v40 = vrot.slane %v12330_v22, %v11767_v35  ;;  %v6332_v32 = vrot.slane %v12330_v22, %v11772_v5 }
 0x5b0   :  { %v7239_v4 = vcombine.low %v7231_v7, %v7238_v63  ;;  %v7713_v0 = vcombine.low %v7691_v49, %v7698_v37  ;;  %v6336_v57 = vrot.slane %v12330_v22, %v11775_v29  ;;  %v6340_v50 = vrot.slane %v12330_v22, %v11778_v46 }
 0x5b1   :  { %v5381_v61 = vmul.f32 %v9477_v20, %v12239_v27  ;;  %v7714_v26 = vcombine.low %v7705_v62, %v7712_v47  ;;  %v6344_v21 = vrot.slane %v12330_v22, %v11782_v28  ;;  %v7779_v23 = vcombine.low %v6316_v60, %v6320_v39 }
 0x5b2   :  { %9478 = vrsqrt.f32 %v5318_v15  ;;  %8116 = vperm.xlu1 %8971, %v7239_v4   ;;  %v7721_v56 = vrot.slane %v7713_v0, %v12868_v9  ;;  %v7780_v12 = vcombine.low %v6324_v25, %v6328_v40  ;;  %v7781_v55 = vcombine.low %v6332_v32, %v6336_v57 }
 0x5b3   :  { %v7728_v45 = vrot.slane %v7714_v26, %v12868_v9  ;;  %v7782_v6 = vcombine.low %v6340_v50, %v6344_v21  ;;  %v7789_v44 = vrot.slane %v7779_v23, %v12868_v9  ;;  %v6348_v18 = vrot.slane %v12338_v42, %v12815_v1 }
 0x5b4   :  { %v7796_v27 = vrot.slane %v7780_v12, %v12868_v9  ;;  %v7803_v36 = vrot.slane %v7781_v55, %v12868_v9  ;;  %v6352_v22 = vrot.slane %v12338_v42, %v11761_v30  ;;  %v6356_v15 = vrot.slane %v12338_v42, %v11764_v58 }
 0x5b5   :  { %v12460_v43 = vmul.f32 14.285714, %v5381_v61  ;;  %v7729_v14 = vcombine.low %v7721_v56, %v7728_v45  ;;  %v7810_v31 = vrot.slane %v7782_v6, %v12868_v9  ;;  %v6360_v38 = vrot.slane %v12338_v42, %v11767_v35 }
 0x5b6   :  { %v7811_v34 = vcombine.low %v7789_v44, %v7796_v27  ;;  %v6364_v13 = vrot.slane %v12338_v42, %v11772_v5  ;;  %v6368_v54 = vrot.slane %v12338_v42, %v11775_v29  ;;  %v6372_v24 = vrot.slane %v12338_v42, %v11778_v46 }
 0x5b7   :  { %8146 = vperm.xlu0 %8970, %v7729_v14   ;;  %v7812_v48 = vcombine.low %v7803_v36, %v7810_v31  ;;  %v6376_v3 = vrot.slane %v12338_v42, %v11782_v28  ;;  %v7828_v33 = vcombine.low %v6348_v18, %v6352_v22  ;;  %v7829_v17 = vcombine.low %v6356_v15, %v6360_v38 }
 0x5b8   :  { %v7819_v41 = vrot.slane %v7811_v34, %v12868_v9  ;;  %v7830_v8 = vcombine.low %v6364_v13, %v6368_v54  ;;  %v6380_v53 = vrot.slane %v12376_v19, %v12815_v1  ;;  %v6384_v60 = vrot.slane %v12376_v19, %v11761_v30 }
 0x5b9   :  { %v7826_v20 = vrot.slane %v7812_v48, %v12868_v9  ;;  %v7831_v7 = vcombine.low %v6372_v24, %v6376_v3  ;;  %v7838_v10 = vrot.slane %v7828_v33, %v12868_v9  ;;  %v7845_v16 = vrot.slane %v7829_v17, %v12868_v9 }
 0x5ba   :  { %v7852_v42 = vrot.slane %v7830_v8, %v12868_v9  ;;  %v6388_v39 = vrot.slane %v12376_v19, %v11764_v58  ;;  %v6392_v63 = vrot.slane %v12376_v19, %v11767_v35  ;;  %v6396_v49 = vrot.slane %v12376_v19, %v11772_v5 }
 0x5bb   :  { %v7827_v37 = vcombine.low %v7819_v41, %v7826_v20  ;;  %v7859_v25 = vrot.slane %v7831_v7, %v12868_v9  ;;  %v7860_v62 = vcombine.low %v7838_v10, %v7845_v16  ;;  %v6400_v47 = vrot.slane %v12376_v19, %v11775_v29 }
 0x5bc   :  { %v6404_v40 = vrot.slane %v12376_v19, %v11778_v46  ;;  %v6408_v32 = vrot.slane %v12376_v19, %v11782_v28  ;;  %v7877_v4 = vcombine.low %v6380_v53, %v6384_v60  ;;  %v7878_v0 = vcombine.low %v6388_v39, %v6392_v63 }
 0x5bd   :  { %8152 = vperm.xlu0 %8970, %v7827_v37   ;;  %v7861_v57 = vcombine.low %v7852_v42, %v7859_v25  ;;  %v7868_v50 = vrot.slane %v7860_v62, %v12868_v9  ;;  %v7879_v61 = vcombine.low %v6396_v49, %v6400_v47  ;;  %v5964_v26 = vrot.slane %v12383_v52, %v12815_v1 }
 0x5be   :  { %v7880_v21 = vcombine.low %v6404_v40, %v6408_v32  ;;  %v7887_v23 = vrot.slane %v7877_v4, %v12868_v9  ;;  %v7894_v56 = vrot.slane %v7878_v0, %v12868_v9  ;;  %v5968_v12 = vrot.slane %v12383_v52, %v11761_v30 }
 0x5bf   :  { %v9479_v55 = vpop.eup %9478  ;;  %v7875_v19 = vrot.slane %v7861_v57, %v12868_v9  ;;  %v7901_v45 = vrot.slane %v7879_v61, %v12868_v9  ;;  %v5972_v6 = vrot.slane %v12383_v52, %v11764_v58  ;;  %v5976_v44 = vrot.slane %v12383_v52, %v11767_v35 }
 0x5c0   :  { %v7908_v18 = vrot.slane %v7880_v21, %v12868_v9  ;;  %v7909_v27 = vcombine.low %v7887_v23, %v7894_v56  ;;  %v5980_v36 = vrot.slane %v12383_v52, %v11772_v5  ;;  %v5984_v22 = vrot.slane %v12383_v52, %v11775_v29 }
 0x5c1   :  { %v7876_v15 = vcombine.low %v7868_v50, %v7875_v19  ;;  %v5988_v14 = vrot.slane %v12383_v52, %v11778_v46  ;;  %v5992_v31 = vrot.slane %v12383_v52, %v11782_v28  ;;  %v7240_v38 = vcombine.low %v5964_v26, %v5968_v12 }
 0x5c2   :  { %v7910_v34 = vcombine.low %v7901_v45, %v7908_v18  ;;  %v7917_v13 = vrot.slane %v7909_v27, %v12868_v9  ;;  %v7241_v54 = vcombine.low %v5972_v6, %v5976_v44  ;;  %v7242_v24 = vcombine.low %v5980_v36, %v5984_v22 }
 0x5c3   :  { %v5382_v48 = vmul.f32 %v9479_v55, %v12366_v51  ;;  %8155 = vperm.xlu0 %8970, %v7876_v15   ;;  %v7243_v3 = vcombine.low %v5988_v14, %v5992_v31  ;;  %v7250_v33 = vrot.slane %v7240_v38, %v12868_v9  ;;  %v5447_v52 = vadd.f32 %v11758_v11, %v12460_v43 }
 0x5c4   :  { %v7924_v17 = vrot.slane %v7910_v34, %v12868_v9  ;;  %v7257_v41 = vrot.slane %v7241_v54, %v12868_v9  ;;  %v7264_v8 = vrot.slane %v7242_v24, %v12868_v9  ;;  %v6412_v60 = vrot.slane %v12409_v59, %v12815_v1 }
 0x5c5   :  { %v7271_v53 = vrot.slane %v7243_v3, %v12868_v9  ;;  %v6416_v51 = vrot.slane %v12409_v59, %v11761_v30  ;;  %v6420_v10 = vrot.slane %v12409_v59, %v11764_v58  ;;  %v6424_v16 = vrot.slane %v12409_v59, %v11767_v35 }
 0x5c6   :  { %v7925_v20 = vcombine.low %v7917_v13, %v7924_v17  ;;  %v7272_v7 = vcombine.low %v7250_v33, %v7257_v41  ;;  %v5414_v42 = vmul.f32 14.285714, %v5382_v48  ;;  %v6428_v43 = vrot.slane %v12409_v59, %v11772_v5 }
 0x5c7   :  { %v7273_v39 = vcombine.low %v7264_v8, %v7271_v53  ;;  %v6432_v49 = vrot.slane %v12409_v59, %v11775_v29  ;;  %v6436_v37 = vrot.slane %v12409_v59, %v11778_v46  ;;  %v6440_v25 = vrot.slane %v12409_v59, %v11782_v28 }
 0x5c8   :  { %8158 = vperm.xlu0 %8970, %v7925_v20   ;;  %v7280_v63 = vrot.slane %v7272_v7, %v12868_v9  ;;  %v7926_v47 = vcombine.low %v6412_v60, %v6416_v51  ;;  %v7927_v40 = vcombine.low %v6420_v10, %v6424_v16  ;;  %v6444_v0 = vrot.slane %v5447_v52, %v12815_v1 }
 0x5c9   :  { %v7287_v62 = vrot.slane %v7273_v39, %v12868_v9  ;;  %v7928_v32 = vcombine.low %v6428_v43, %v6432_v49  ;;  %v7929_v4 = vcombine.low %v6436_v37, %v6440_v25  ;;  %v6448_v57 = vrot.slane %v5447_v52, %v11761_v30 }
 0x5ca   :  { %v5448_v50 = vadd.f32 %v11758_v11, %v5414_v42  ;;  %v7936_v26 = vrot.slane %v7926_v47, %v12868_v9  ;;  %v7943_v21 = vrot.slane %v7927_v40, %v12868_v9  ;;  %v6452_v56 = vrot.slane %v5447_v52, %v11764_v58 }
 0x5cb   :  { %v7288_v61 = vcombine.low %v7280_v63, %v7287_v62  ;;  %v7950_v23 = vrot.slane %v7928_v32, %v12868_v9  ;;  %v7957_v59 = vrot.slane %v7929_v4, %v12868_v9  ;;  %v6456_v12 = vrot.slane %v5447_v52, %v11767_v35  ;;  %v8078_v63 = vpop.permute.xlu1 %8077  ;;  %v8075_v32 = vpop.permute.xlu0 %8074 }
 0x5cc   :  { %v7958_v55 = vcombine.low %v7936_v26, %v7943_v21  ;;  %v6460_v19 = vrot.slane %v5447_v52, %v11772_v5  ;;  %v6464_v45 = vrot.slane %v5447_v52, %v11775_v29  ;;  %v6468_v11 = vrot.slane %v5447_v52, %v11778_v46 }
 0x5cd   :  { %8119 = vperm.xlu1 %8971, %v7288_v61   ;;  %v7959_v6 = vcombine.low %v7950_v23, %v7957_v59  ;;  %v6472_v44 = vrot.slane %v5447_v52, %v11782_v28  ;;  %v7975_v18 = vcombine.low %v6444_v0, %v6448_v57  ;;  %v7976_v27 = vcombine.low %v6452_v56, %v6456_v12 }
 0x5ce   :  { %v7966_v36 = vrot.slane %v7958_v55, %v12868_v9  ;;  %v7977_v22 = vcombine.low %v6460_v19, %v6464_v45  ;;  %v6476_v48 = vrot.slane %v5448_v50, %v12815_v1  ;;  %v6480_v3 = vrot.slane %v5448_v50, %v11761_v30 }
 0x5cf   :  { %v7973_v15 = vrot.slane %v7959_v6, %v12868_v9  ;;  %v7978_v14 = vcombine.low %v6468_v11, %v6472_v44  ;;  %v7985_v31 = vrot.slane %v7975_v18, %v12868_v9  ;;  %v7992_v38 = vrot.slane %v7976_v27, %v12868_v9  ;;  %v8081_v49 = vpop.permute.xlu1 %8080  ;;  %v12589_v0 = vpop.permute.xlu0 %8101 }
 0x5d0   :  { %v7999_v34 = vrot.slane %v7977_v22, %v12868_v9  ;;  %v6484_v33 = vrot.slane %v5448_v50, %v11764_v58  ;;  %v6488_v8 = vrot.slane %v5448_v50, %v11767_v35  ;;  %v6492_v52 = vrot.slane %v5448_v50, %v11772_v5 }
 0x5d1   :  { %v7974_v13 = vcombine.low %v7966_v36, %v7973_v15  ;;  %v8006_v54 = vrot.slane %v7978_v14, %v12868_v9  ;;  %v8007_v24 = vcombine.low %v7985_v31, %v7992_v38  ;;  %v6496_v53 = vrot.slane %v5448_v50, %v11775_v29 }
 0x5d2   :  { %v6500_v60 = vrot.slane %v5448_v50, %v11778_v46  ;;  %v6504_v1 = vrot.slane %v5448_v50, %v11782_v28  ;;  %v8024_v20 = vcombine.low %v6476_v48, %v6480_v3  ;;  %v8025_v30 = vcombine.low %v6484_v33, %v6488_v8 }
 0x5d3   :  { %8161 = vperm.xlu0 %8970, %v7974_v13   ;;  %v8008_v17 = vcombine.low %v7999_v34, %v8006_v54  ;;  %v8015_v41 = vrot.slane %v8007_v24, %v12868_v9  ;;  %v8026_v7 = vcombine.low %v6492_v52, %v6496_v53  ;;  %v8084_v37 = vpop.permute.xlu1 %8083  ;;  %v12869_v56 = vlaneseq }
 0x5d4   :  { %v8027_v10 = vcombine.low %v6500_v60, %v6504_v1  ;;  %v8034_v16 = vrot.slane %v8024_v20, %v12868_v9  ;;  %v8041_v42 = vrot.slane %v8025_v30, %v12868_v9 }
 0x5d5   :  { %v8022_v51 = vrot.slane %v8008_v17, %v12868_v9  ;;  %v8048_v35 = vrot.slane %v8026_v7, %v12868_v9  ;;  %v12600_v12 = vand.u32 127, %v12869_v56  ;;  %vm8377_vm1 = vcmp.lt.s32.totalorder %v12869_v56, 256 }
 0x5d6   :  { %v8055_v5 = vrot.slane %v8027_v10, %v12868_v9  ;;  %v8056_v29 = vcombine.low %v8034_v16, %v8041_v42 }
 0x5d7   :  { %v8023_v58 = vcombine.low %v8015_v41, %v8022_v51  ;;  %v12579_v25 = vpop.permute.xlu1 %8086  ;;  %v8175_v45 = vadd.s32 4294967288, %v12600_v12  ;;  %v8182_v11 = vadd.s32 4294967280, %v12600_v12  ;;  %v8189_v44 = vadd.s32 4294967272, %v12600_v12 }
 0x5d8   :  { %v8057_v46 = vcombine.low %v8048_v35, %v8055_v5  ;;  %v8064_v39 = vrot.slane %v8056_v29, %v12868_v9  ;;  %v8173_v27 = vsub.s32 %v12600_v12, %v12867_v2  ;;  %v8196_v15 = vadd.s32 4294967264, %v12600_v12 }
 0x5d9   :  { %8164 = vperm.xlu0 %8970, %v8023_v58   ;;  %v8178_v18 = vsub.s32 %v8175_v45, %v12867_v2  ;;  %v8185_v22 = vsub.s32 %v8182_v11, %v12867_v2  ;;  %v8192_v31 = vsub.s32 %v8189_v44, %v12867_v2  ;;  %v8203_v38 = vadd.s32 4294967256, %v12600_v12 }
 0x5da   :  { %v8071_v28 = vrot.slane %v8057_v46, %v12868_v9  ;;  %v8174_v13 = vrot.slane %v8075_v32, %v8173_v27  ;;  %v8199_v48 = vsub.s32 %v8196_v15, %v12867_v2  ;;  %v8210_v41 = vadd.s32 4294967248, %v12600_v12 }
 0x5db   :  { %v12581_v62 = vpop.permute.xlu1 %8089  ;;  %v8179_v34 = vrot.slane %v8078_v63, %v8178_v18  ;;  %v8186_v24 = vrot.slane %v8081_v49, %v8185_v22  ;;  %v8193_v17 = vrot.slane %v8084_v37, %v8192_v31  ;;  %v8206_v53 = vsub.s32 %v8203_v38, %v12867_v2 }
 0x5dc   :  { %v8072_v43 = vcombine.low %v8064_v39, %v8071_v28  ;;  %v8217_v60 = vadd.s32 4294967240, %v12600_v12  ;;  %v8224_v1 = vadd.s32 4294967232, %v12600_v12  ;;  %v8200_v7 = vrot.slane %v12579_v25, %v8199_v48 }
 0x5dd   :  { %v8181_v51 = vsel %vm8180_vm2, %v8179_v34, %v8174_v13  ;;  %v8213_v35 = vsub.s32 %v8210_v41, %v12867_v2  ;;  %v8207_v29 = vrot.slane %v12581_v62, %v8206_v53  ;;  %v8231_v39 = vadd.s32 4294967224, %v12600_v12 }
 0x5de   :  { %8167 = vperm.xlu0 %8970, %v8072_v43   ;;  %v8188_v30 = vsel %vm8187_vm3, %v8186_v24, %v8181_v51  ;;  %v8220_v46 = vsub.s32 %v8217_v60, %v12867_v2  ;;  %v8227_v28 = vsub.s32 %v8224_v1, %v12867_v2  ;;  %v8238_v37 = vadd.s32 4294967216, %v12600_v12 }
 0x5df   :  { %v12583_v47 = vpop.permute.xlu1 %8092  ;;  %v8195_v42 = vsel %vm8194_vm4, %v8193_v17, %v8188_v30  ;;  %v8252_v44 = vadd.s32 4294967200, %v12600_v12 }
 0x5e0   :  { %v8202_v49 = vsel %vm8201_vm5, %v8200_v7, %v8195_v42  ;;  %v8214_v62 = vrot.slane %v12583_v47, %v8213_v35 }
 0x5e1   :  { %v8209_v45 = vsel %vm8208_vm6, %v8207_v29, %v8202_v49  ;;  %v8255_v24 = vsub.s32 %v8252_v44, %v12867_v2 }
 0x5e3   :  { %v12585_v40 = vpop.permute.xlu1 %8095 }
 0x5e4   :  { %v8221_v11 = vrot.slane %v12585_v40, %v8220_v46 }
 0x5e7   :  { %v12587_v4 = vpop.permute.xlu1 %8098 }
 0x5eb   :  { %v12591_v57 = vpop.permute.xlu1 %8104 }
 0x5ef   :  { %v12593_v26 = vpop.permute.xlu1 %8107 }
 0x5f3   :  { %v12595_v23 = vpop.permute.xlu1 %8110 }
 0x5f4   :  { %v8256_v30 = vrot.slane %v12595_v23, %v8255_v24 }
 0x5f7   :  { %v12602_v55 = vpop.permute.xlu1 %8113 }
 0x5f9   :  { %v8123_v50 = vpop.permute.xlu0 %8122 }
 0x5fa   :  { %v8283_v54 = vrot.slane %v8123_v50, %v8173_v27 }
 0x5fb   :  { %v8126_v6 = vpop.permute.xlu1 %8125 }
 0x5fc   :  { %v8287_v8 = vrot.slane %v8126_v6, %v8178_v18  ;;  %v8234_v6 = vsub.s32 %v8231_v39, %v12867_v2  ;;  %v8228_v18 = vrot.slane %v12587_v4, %v8227_v28  ;;  %v8273_v4 = vadd.s32 4294967176, %v12600_v12 }
 0x5fe   :  { %v8288_v20 = vsel %vm8180_vm2, %v8287_v8, %v8283_v54  ;;  %v8235_v54 = vrot.slane %v12589_v0, %v8234_v6  ;;  %v8276_v51 = vsub.s32 %v8273_v4, %v12867_v2 }
 0x600   :  { %v8132_v14 = vpop.permute.xlu1 %8131 }
 0x601   :  { %v8297_v5 = vrot.slane %v8132_v14, %v8192_v31  ;;  %v8266_v14 = vadd.s32 4294967184, %v12600_v12  ;;  %v8216_v31 = vsel %vm8215_vm7, %v8214_v62, %v8209_v45 }
 0x602   :  { %v8223_v13 = vsel %vm8222_vm8, %v8221_v11, %v8216_v31 }
 0x603   :  { %v8269_v41 = vsub.s32 %v8266_v14, %v12867_v2 }
 0x608   :  { %v8129_v61 = vpop.permute.xlu0 %8128 }
 0x609   :  { %v8292_v3 = vrot.slane %v8129_v61, %v8185_v22  ;;  %v8245_v61 = vadd.s32 4294967208, %v12600_v12  ;;  %v8241_v22 = vsub.s32 %v8238_v37, %v12867_v2 }
 0x60b   :  { %v8293_v58 = vsel %vm8187_vm3, %v8292_v3, %v8288_v20  ;;  %v8248_v38 = vsub.s32 %v8245_v61, %v12867_v2  ;;  %v8230_v3 = vsel %vm8229_vm9, %v8228_v18, %v8223_v13  ;;  %v8242_v17 = vrot.slane %v12591_v57, %v8241_v22 }
 0x60c   :  { %v8298_v43 = vsel %vm8194_vm4, %v8297_v5, %v8293_v58  ;;  %v8237_v20 = vsel %vm8236_vm10, %v8235_v54, %v8230_v3 }
 0x60d   :  { %v8138_v33 = vpop.permute.xlu1 %8137  ;;  %v8249_v0 = vrot.slane %v12593_v26, %v8248_v38 }
 0x613   :  { %v8135_v21 = vpop.permute.xlu0 %8134 }
 0x614   :  { %v8302_v10 = vrot.slane %v8135_v21, %v8199_v48  ;;  %v8307_v21 = vrot.slane %v8138_v33, %v8206_v53 }
 0x616   :  { %v8303_v25 = vsel %vm8201_vm5, %v8302_v10, %v8298_v43  ;;  %v8244_v10 = vsel %vm8243_vm11, %v8242_v17, %v8237_v20 }
 0x617   :  { %v8308_v27 = vsel %vm8208_vm6, %v8307_v21, %v8303_v25  ;;  %v8251_v42 = vsel %vm8250_vm12, %v8249_v0, %v8244_v10 }
 0x618   :  { %v8258_v5 = vsel %vm8257_vm13, %v8256_v30, %v8251_v42 }
 0x61a   :  { %v8144_v16 = vpop.permute.xlu1 %8143 }
 0x61b   :  { %v8317_v34 = vrot.slane %v8144_v16, %v8220_v46 }
 0x621   :  { %v12597_v59 = vpop.permute.xlu0 %8140 }
 0x622   :  { %v8312_v32 = vrot.slane %v12597_v59, %v8213_v35  ;;  %v8259_v59 = vadd.s32 4294967192, %v12600_v12 }
 0x624   :  { %v8313_v15 = vsel %vm8215_vm7, %v8312_v32, %v8308_v27 }
 0x625   :  { %v8318_v33 = vsel %vm8222_vm8, %v8317_v34, %v8313_v15 }
 0x626   :  { %v8150_v50 = vpop.permute.xlu1 %8149 }
 0x627   :  { %v8327_v53 = vrot.slane %v8150_v50, %v8234_v6 }
 0x62d   :  { %v8117_v48 = vpop.permute.xlu1 %8116 }
 0x632   :  { %v12604_v19 = vpop.permute.xlu0 %8146 }
 0x633   :  { %v8322_v40 = vrot.slane %v12604_v19, %v8227_v28  ;;  %v8262_v19 = vsub.s32 %v8259_v59, %v12867_v2 }
 0x635   :  { %v8323_v12 = vsel %vm8229_vm9, %v8322_v40, %v8318_v33  ;;  %v8263_v58 = vrot.slane %v12602_v55, %v8262_v19 }
 0x637   :  { %v8265_v46 = vsel %vm8264_vm14, %v8263_v58, %v8258_v5 }
 0x638   :  { %v12612_v36 = vpop.permute.xlu0 %8152 }
 0x639   :  { %v8332_v8 = vrot.slane %v12612_v36, %v8241_v22  ;;  %v8328_v36 = vsel %vm8236_vm10, %v8327_v53, %v8323_v12 }
 0x63b   :  { %v8333_v2 = vsel %vm8243_vm11, %v8332_v8, %v8328_v36 }
 0x63e   :  { %v12620_v52 = vpop.permute.xlu0 %8155 }
 0x63f   :  { %v8337_v60 = vrot.slane %v12620_v52, %v8248_v38  ;;  %v8270_v52 = vrot.slane %v8117_v48, %v8269_v41 }
 0x641   :  { %v8338_v23 = vsel %vm8250_vm12, %v8337_v60, %v8333_v2  ;;  %v8272_v43 = vsel %vm8271_vm15, %v8270_v52, %v8265_v46 }
 0x643   :  { %v12633_v63 = vpop.permute.xlu0 %8158 }
 0x644   :  { %v8342_v57 = vrot.slane %v12633_v63, %v8255_v24 }
 0x646   :  { %v8343_v29 = vsel %vm8257_vm13, %v8342_v57, %v8338_v23 }
 0x648   :  { %v8120_v7 = vpop.permute.xlu1 %8119 }
 0x649   :  { %v8277_v35 = vrot.slane %v8120_v7, %v8276_v51 }
 0x64b   :  { %v8279_v49 = vsel %vm8278_vm0, %v8277_v35, %v8272_v43 }
 0x64e   :  { %v8162_v47 = vpop.permute.xlu0 %8161 }
 0x64f   :  { %v8347_v26 = vrot.slane %v8162_v47, %v8262_v19 }
 0x651   :  { %v8348_v39 = vsel %vm8264_vm14, %v8347_v26, %v8343_v29 }
 0x654   :  { %v8165_v1 = vpop.permute.xlu0 %8164 }
 0x655   :  { %v8352_v16 = vrot.slane %v8165_v1, %v8269_v41 }
 0x657   :  { %v8353_v63 = vsel %vm8271_vm15, %v8352_v16, %v8348_v39 }
 0x659   :  { %v8168_v55 = vpop.permute.xlu0 %8167 }
 0x65a   :  { %v8357_v28 = vrot.slane %v8168_v55, %v8276_v51 }
 0x65c   :  { %v8358_v37 = vsel %vm8278_vm0, %v8357_v28, %v8353_v63 }
 0x65d   :  { %v8359_v25 = vcombine.low %v8279_v49, %v8358_v37 }
 0x65f   :  { %v8366_v32 = vrot.slane %v8359_v25, %v12868_v9 }
 0x661   :  { %v8373_v50 = vrot.slane %v8366_v32, %v12868_v9 }
 0x663   :  { %8379 = vst.msk [vmem:[%s12696_s11] sm:$0x3] %vm8377_vm1, %v8373_v50 }
 0x664   :  { %8384 = vsyncpa [#allocation4], 1 }
 0x665   :  { %8385 = vsyncpa [#allocation6], 1 }

</bundles_post_ra>
